<compile_context>
chip_gen: v7x
topology: tpu7x:2x2x1
jax: 0.10.0
libtpu: 0.0.40
codegen_flags: <defaults>
</compile_context>

<pallas_src>
import functools

import numpy as np
import jax
import jax.numpy as jnp
from jax import lax
from jax.experimental import pallas as pl
from jax.experimental.pallas import tpu as pltpu


# ----------------------------- Pallas kernels ------------------------------


def _head_kernel(z_ref, wl_ref, bl_ref, w1_ref, b1_ref, o_ref):
    """Fused Linear(L,256)+ReLU and ConvT(256,64,k4,s1,p0)+ReLU on a 1x1 input.

    The ConvT of a 1x1 spatial input is a plain matmul; its packed weight
    already contains zero columns for the 6x6 spatial border, so the output is
    the layer-2 input in padded-NHWC form, flattened as (h, w, co).
    """
    z = z_ref[:, 0, :]                                          # (BB, L)
    h = jnp.dot(z, wl_ref[...], preferred_element_type=jnp.float32)
    h = jnp.maximum(h + bl_ref[...], 0.0)
    o = jnp.dot(h.astype(w1_ref.dtype), w1_ref[...],
                preferred_element_type=jnp.float32)
    o = jnp.maximum(o + b1_ref[...], 0.0)                       # (BB, 6*6*64)
    o_ref[:, 0, :] = o.astype(o_ref.dtype)


def _convt_s2_kernel(x_ref, w_ref, b_ref, o_ref, *, relu):
    """Batch-tile of a k4/s2/p1 ConvTranspose2d, sub-pixel decomposed.

    x_ref: (BB, H+2, W+2, Cin)   zero-padded interleaved NHWC (bf16)
    w_ref: (9*Cin, 4*Cout)       im2col weight; rows=(dh,dw,ci), cols=(ph,pw,co)
    b_ref: (1, 4*Cout)           f32 bias (tiled over the 4 parities)
    o_ref: (BB, H*W, 4*Cout)     parity-blocked output (lane-dense last dim)
    """
    bb, hp, wp, cin = x_ref.shape
    H, W = hp - 2, wp - 2
    co4 = o_ref.shape[-1]
    M = bb * H * W

    x = x_ref[...]                                              # one full load
    acc = None
    for dh in range(3):                                         # 3 accumulating dots
        taps = [x[:, dh:dh + H, dw:dw + W, :].reshape(M, cin)
                for dw in range(3)]
        patch = jnp.concatenate(taps, axis=-1)                  # (M, 3*Cin)
        part = jnp.dot(patch, w_ref[dh * 3 * cin:(dh + 1) * 3 * cin, :],
                       preferred_element_type=jnp.float32)
        acc = part if acc is None else acc + part
    acc = acc + b_ref[...]
    if relu:
        acc = jnp.maximum(acc, 0.0)
    o_ref[...] = acc.reshape(bb, H * W, co4).astype(o_ref.dtype)


# --------------------------- Weight packing (init-time) ---------------------

# S[p, d, k] = 1 iff output parity p, at padded-input offset d, uses ConvT tap k
# (from oh = 2*ih - 1 + kh for ConvTranspose2d(k=4, s=2, p=1)).
_SUBPIXEL_SELECT = np.zeros((2, 3, 4), np.float32)
_SUBPIXEL_SELECT[0, 0, 3] = 1.0
_SUBPIXEL_SELECT[0, 1, 1] = 1.0
_SUBPIXEL_SELECT[1, 1, 2] = 1.0
_SUBPIXEL_SELECT[1, 2, 0] = 1.0


def _pack_subpixel(w_pt, b, cout_pad=None):
    """(Cin,Cout,4,4) ConvT weight -> (9*Cin, 4*cp) im2col matrix + tiled bias."""
    w_pt = np.asarray(w_pt, np.float32)
    b = np.asarray(b, np.float32)
    cin, cout = w_pt.shape[0], w_pt.shape[1]
    cp = cout if cout_pad is None else cout_pad
    s = _SUBPIXEL_SELECT
    m = np.einsum('phk,qwl,cokl->hwcpqo', s, s, w_pt)      # (dh,dw,ci,ph,pw,co)
    if cp > cout:
        m = np.pad(m, ((0, 0),) * 5 + ((0, cp - cout),))
        b = np.pad(b, (0, cp - cout))
    w_mat = m.reshape(9 * cin, 4 * cp)
    b_mat = np.tile(b, 4).reshape(1, 4 * cp)
    return jnp.asarray(w_mat, jnp.bfloat16), jnp.asarray(b_mat, jnp.float32)


def pack_params(params, nc):
    """One-time packing of PyTorch-layout weights into kernel matrices."""
    cp = ((nc + 31) // 32) * 32
    # ConvT1 (1x1 input): matmul weight with zero columns for the 6x6 border,
    # so the head kernel emits the layer-2 input already padded.
    w1 = np.asarray(params["w1"], np.float32)               # (256, 64, 4, 4)
    b1 = np.asarray(params["b1"], np.float32)
    w1p = np.zeros((256, 6, 6, 64), np.float32)
    w1p[:, 1:5, 1:5, :] = np.transpose(w1, (0, 2, 3, 1))
    b1p = np.zeros((6, 6, 64), np.float32)
    b1p[1:5, 1:5, :] = b1[None, None, :]

    packed = {
        "lin_w": jnp.asarray(params["lin_w"], jnp.bfloat16),
        "lin_b": jnp.asarray(np.asarray(params["lin_b"], np.float32)
                             .reshape(1, -1), jnp.float32),
        "w1p": jnp.asarray(w1p.reshape(256, 6 * 6 * 64), jnp.bfloat16),
        "b1p": jnp.asarray(b1p.reshape(1, 6 * 6 * 64), jnp.float32),
    }
    for i, cpad in ((2, None), (3, None), (4, None), (5, cp)):
        wm, bm = _pack_subpixel(params[f"w{i}"], params[f"b{i}"], cpad)
        packed[f"w{i}m"] = wm
        packed[f"b{i}m"] = bm
    return packed


# ------------------------------- Wrappers -----------------------------------

_VMEM_LIMIT = 32 * 1024 * 1024  # safe on v5e/v6e (128 MiB) and v7x (64 MiB)


def _pick_bb(B, cap):
    """Largest divisor of B <= cap, keeping grid >= 2 when B >= 2 (v7x 2 TCs)."""
    bb = min(cap, B)
    if B >= 2:
        bb = min(bb, max(B // 2, 1))
    while B % bb:
        bb -= 1
    return bb


def fused_head(z, lin_w, lin_b, w1p, b1p, *, bb):
    """Linear+ReLU fused with ConvT(256,64,4,s1,p0)+ReLU -> (B, 6*6*64) bf16."""
    B, L = z.shape
    N = w1p.shape[1]
    z3 = z.astype(jnp.bfloat16).reshape(B, 1, L)
    out = pl.pallas_call(
        _head_kernel,
        grid=(B // bb,),
        in_specs=[
            pl.BlockSpec((bb, 1, L), lambda i: (i, 0, 0)),
            pl.BlockSpec(lin_w.shape, lambda i: (0, 0)),
            pl.BlockSpec(lin_b.shape, lambda i: (0, 0)),
            pl.BlockSpec(w1p.shape, lambda i: (0, 0)),
            pl.BlockSpec(b1p.shape, lambda i: (0, 0)),
        ],
        out_specs=pl.BlockSpec((bb, 1, N), lambda i: (i, 0, 0)),
        out_shape=jax.ShapeDtypeStruct((B, 1, N), jnp.bfloat16),
        compiler_params=pltpu.CompilerParams(
            dimension_semantics=("parallel",),
            vmem_limit_bytes=_VMEM_LIMIT),
    )(z3, lin_w, lin_b, w1p, b1p)
    return out.reshape(B, 6, 6, 64)          # padded layer-2 input, NHWC


def subpixel_convt(x_pad, w_mat, b_mat, *, relu, bb, out_dtype=jnp.bfloat16):
    """ConvTranspose2d(Cin,Cout,4,stride=2,padding=1) on padded NHWC input.

    Returns parity-blocked result (B, H, W, 4*Cout); last dim = (ph, pw, co).
    """
    B, hp, wp, cin = x_pad.shape
    H, W = hp - 2, wp - 2
    co4 = w_mat.shape[1]
    y = pl.pallas_call(
        functools.partial(_convt_s2_kernel, relu=relu),
        grid=(B // bb,),
        in_specs=[
            pl.BlockSpec((bb, hp, wp, cin), lambda i: (i, 0, 0, 0)),
            pl.BlockSpec(w_mat.shape, lambda i: (0, 0)),
            pl.BlockSpec(b_mat.shape, lambda i: (0, 0)),
        ],
        out_specs=pl.BlockSpec((bb, H * W, co4), lambda i: (i, 0, 0)),
        out_shape=jax.ShapeDtypeStruct((B, H * W, co4), out_dtype),
        compiler_params=pltpu.CompilerParams(
            dimension_semantics=("parallel",),
            vmem_limit_bytes=_VMEM_LIMIT),
    )(x_pad, w_mat, b_mat)
    return y.reshape(B, H, W, co4)


def _deparity_pad(y, cout):
    """(B,H,W,4*cout) parity-blocked -> (B,2H+2,2W+2,cout) padded interleaved.

    # TODO(synk): in-kernel parity interleave needs a lane<->sublane relayout
    # that Mosaic does not lower reliably; kept as one fused XLA op per boundary.
    """
    B, H, W, _ = y.shape
    y = y.reshape(B, H, W, 2, 2, cout)
    y = jnp.transpose(y, (0, 1, 3, 2, 4, 5)).reshape(B, 2 * H, 2 * W, cout)
    return jnp.pad(y, ((0, 0), (1, 1), (1, 1), (0, 0)))


# --------------------------- Parameter creation -----------------------------


def _uniform(key, shape, bound):
    return jax.random.uniform(key, shape, jnp.float32, -bound, bound)


def init_params(key, latent_dim, nc):
    ks = jax.random.split(key, 12)
    p = {}
    b0 = 1.0 / (latent_dim ** 0.5)
    p["lin_w"] = _uniform(ks[0], (latent_dim, 256), b0)   # stored (in, out)
    p["lin_b"] = _uniform(ks[1], (256,), b0)
    convs = [(256, 64), (64, 64), (64, 32), (32, 32), (32, nc)]
    for i, (cin, cout) in enumerate(convs, start=1):
        bnd = 1.0 / ((cout * 16) ** 0.5)                  # fan_in = Cout*K*K
        p[f"w{i}"] = _uniform(ks[2 * i], (cin, cout, 4, 4), bnd)
        p[f"b{i}"] = _uniform(ks[2 * i + 1], (cout,), bnd)
    return p


# ------------------------------- Forward ------------------------------------


@functools.partial(jax.jit, static_argnames=("nc",))
def base_decoder_forward(z, packed, *, nc):
    B = z.shape[0]

    # Linear -> View(-1,256,1,1) -> ReLU -> ConvT1 -> ReLU (fused, pre-padded)
    x = fused_head(z, packed["lin_w"], packed["lin_b"],
                   packed["w1p"], packed["b1p"],
                   bb=_pick_bb(B, 16))                           # (B,6,6,64)

    y = subpixel_convt(x, packed["w2m"], packed["b2m"], relu=True,
                       bb=_pick_bb(B, 16))                       # (B,4,4,256)
    x = _deparity_pad(y, 64)                                     # (B,10,10,64)

    y = subpixel_convt(x, packed["w3m"], packed["b3m"], relu=True,
                       bb=_pick_bb(B, 8))                        # (B,8,8,128)
    x = _deparity_pad(y, 32)                                     # (B,18,18,32)

    y = subpixel_convt(x, packed["w4m"], packed["b4m"], relu=True,
                       bb=_pick_bb(B, 4))                        # (B,16,16,128)
    x = _deparity_pad(y, 32)                                     # (B,34,34,32)

    y = subpixel_convt(x, packed["w5m"], packed["b5m"], relu=False,
                       bb=_pick_bb(B, 2))                        # (B,32,32,4*cp) bf16
    cp = packed["w5m"].shape[1] // 4

    # Epilogue: slice real channels BEFORE the big transpose, upcast to f32.
    H, W = y.shape[1], y.shape[2]
    y = y.reshape(B, H, W, 2, 2, cp)[..., :nc].astype(jnp.float32)
    y = jnp.transpose(y, (0, 5, 1, 3, 2, 4)).reshape(B, nc, 2 * H, 2 * W)
    return y                                                     # NCHW f32


# ------------------------- Pure-XLA reference (check) ------------------------


@jax.jit
def reference_forward(z, params):
    h = jnp.maximum(z @ params["lin_w"] + params["lin_b"], 0.0)
    x = h.reshape(h.shape[0], 256, 1, 1)

    def convt(x, w, b, stride, pad, relu):
        k = w.shape[2]
        wf = jnp.transpose(w, (1, 0, 2, 3))[:, :, ::-1, ::-1]
        y = lax.conv_general_dilated(
            x, wf, window_strides=(1, 1),
            padding=[(k - 1 - pad, k - 1 - pad)] * 2,
            lhs_dilation=(stride, stride),
            dimension_numbers=("NCHW", "OIHW", "NCHW"))
        y = y + b.reshape(1, -1, 1, 1)
        return jnp.maximum(y, 0.0) if relu else y

    x = convt(x, params["w1"], params["b1"], 1, 0, True)
    x = convt(x, params["w2"], params["b2"], 2, 1, True)
    x = convt(x, params["w3"], params["b3"], 2, 1, True)
    x = convt(x, params["w4"], params["b4"], 2, 1, True)
    x = convt(x, params["w5"], params["b5"], 2, 1, False)
    return x


# --------------------------------- Main --------------------------------------


if __name__ == "__main__":
    latent_dim = 32
    nc = 3
    batch = 2

    key = jax.random.PRNGKey(0)
    k_z, k_p = jax.random.split(key)
    z = jax.random.normal(k_z, (batch, latent_dim), jnp.float32)
    params = init_params(k_p, latent_dim, nc)
    packed = pack_params(params, nc)          # one-time weight packing

    out = jax.block_until_ready(base_decoder_forward(z, packed, nc=nc))

    assert out.shape == (batch, nc, 64, 64), out.shape
    assert out.dtype == jnp.float32
    assert bool(jnp.all(jnp.isfinite(out)))

    # Numerical sanity check vs f32 XLA reference (kernels run bf16 -> loose tol)
    ref = jax.block_until_ready(reference_forward(z, params))
    rel_err = float(jnp.max(jnp.abs(out - ref)) / (jnp.max(jnp.abs(ref)) + 1e-12))
    assert rel_err < 5e-2, rel_err

    print("KERNEL_OK")
</pallas_src>

<mosaic_0001>
module attributes {stable_mosaic.version = 11 : i64} {
  func.func @_head_kernel(%arg0: i32, %arg1: memref<1x1x32xbf16, #tpu.memory_space<vmem>>, %arg2: memref<32x256xbf16, #tpu.memory_space<vmem>>, %arg3: memref<1x256xf32, #tpu.memory_space<vmem>>, %arg4: memref<256x2304xbf16, #tpu.memory_space<vmem>>, %arg5: memref<1x2304xf32, #tpu.memory_space<vmem>>, %arg6: memref<1x1x2304xbf16, #tpu.memory_space<vmem>>) attributes {dimension_semantics = [#tpu.dimension_semantics<parallel>], iteration_bounds = array<i64: 2>, scalar_prefetch = 0 : i64, scratch_operands = 0 : i64, tpu.core_type = #tpu.core_type<tc>, window_params = [{transform_indices = @transform_0, window_bounds = array<i64: 1, 1, 32>}, {pipeline_mode = #tpu.pipeline_mode<synchronous>, transform_indices = @transform_1, window_bounds = array<i64: 32, 256>}, {pipeline_mode = #tpu.pipeline_mode<synchronous>, transform_indices = @transform_2, window_bounds = array<i64: 1, 256>}, {pipeline_mode = #tpu.pipeline_mode<synchronous>, transform_indices = @transform_3, window_bounds = array<i64: 256, 2304>}, {pipeline_mode = #tpu.pipeline_mode<synchronous>, transform_indices = @transform_4, window_bounds = array<i64: 1, 2304>}, {transform_indices = @transform_5, window_bounds = array<i64: 1, 1, 2304>}]} {
    %c0 = arith.constant 0 : index
    %c0_0 = arith.constant 0 : index
    %c0_1 = arith.constant 0 : index
    %0 = vector.load %arg1[%c0, %c0_0, %c0_1] : memref<1x1x32xbf16, #tpu.memory_space<vmem>>, vector<1x1x32xbf16>
    %1 = vector.shape_cast %0 : vector<1x1x32xbf16> to vector<1x32xbf16>
    %c0_2 = arith.constant 0 : index
    %c0_3 = arith.constant 0 : index
    %2 = vector.load %arg2[%c0_2, %c0_3] : memref<32x256xbf16, #tpu.memory_space<vmem>>, vector<32x256xbf16>
    %cst = arith.constant dense<0.000000e+00> : vector<1x256xf32>
    %3 = tpu.matmul %1, %2, %cst {dimension_numbers = #tpu.dot_dimension_numbers<[1], [0], [0], [1], [0, 0, 1, 1], [], []>} : vector<1x32xbf16>, vector<32x256xbf16>, vector<1x256xf32> -> vector<1x256xf32>
    %c0_4 = arith.constant 0 : index
    %c0_5 = arith.constant 0 : index
    %4 = vector.load %arg3[%c0_4, %c0_5] : memref<1x256xf32, #tpu.memory_space<vmem>>, vector<1x256xf32>
    %5 = arith.addf %3, %4 : vector<1x256xf32>
    %cst_6 = arith.constant 0.000000e+00 : f32
    %6 = vector.broadcast %cst_6 : f32 to vector<1x256xf32>
    %7 = arith.maximumf %5, %6 : vector<1x256xf32>
    %8 = arith.truncf %7 : vector<1x256xf32> to vector<1x256xbf16>
    %c0_7 = arith.constant 0 : index
    %c0_8 = arith.constant 0 : index
    %9 = vector.load %arg4[%c0_7, %c0_8] : memref<256x2304xbf16, #tpu.memory_space<vmem>>, vector<256x2304xbf16>
    %cst_9 = arith.constant dense<0.000000e+00> : vector<1x2304xf32>
    %10 = tpu.matmul %8, %9, %cst_9 {dimension_numbers = #tpu.dot_dimension_numbers<[1], [0], [0], [1], [0, 0, 1, 1], [], []>} : vector<1x256xbf16>, vector<256x2304xbf16>, vector<1x2304xf32> -> vector<1x2304xf32>
    %c0_10 = arith.constant 0 : index
    %c0_11 = arith.constant 0 : index
    %11 = vector.load %arg5[%c0_10, %c0_11] : memref<1x2304xf32, #tpu.memory_space<vmem>>, vector<1x2304xf32>
    %12 = arith.addf %10, %11 : vector<1x2304xf32>
    %cst_12 = arith.constant 0.000000e+00 : f32
    %13 = vector.broadcast %cst_12 : f32 to vector<1x2304xf32>
    %14 = arith.maximumf %12, %13 : vector<1x2304xf32>
    %15 = arith.truncf %14 : vector<1x2304xf32> to vector<1x2304xbf16>
    %c0_13 = arith.constant 0 : index
    %c0_14 = arith.constant 0 : index
    %c0_15 = arith.constant 0 : index
    %16 = vector.load %arg6[%c0_13, %c0_14, %c0_15] : memref<1x1x2304xbf16, #tpu.memory_space<vmem>>, vector<1x1x2304xbf16>
    %17 = vector.shape_cast %16 : vector<1x1x2304xbf16> to vector<1x2304xbf16>
    %18 = vector.shape_cast %15 : vector<1x2304xbf16> to vector<1x1x2304xbf16>
    tpu.vector_store %arg6[%c0_13, %c0_14, %c0_15], %18 {strides = array<i32>} : memref<1x1x2304xbf16, #tpu.memory_space<vmem>>, vector<1x1x2304xbf16>,
    return
  }
  func.func @transform_0(%arg0: i32) -> (i32, i32, i32) {
    %c0_i32 = arith.constant 0 : i32
    %c0_i32_0 = arith.constant 0 : i32
    %c0_i32_1 = arith.constant 0 : i32
    return %arg0, %c0_i32, %c0_i32_0 : i32, i32, i32
  }
  func.func @transform_1(%arg0: i32) -> (i32, i32) {
    %c0_i32 = arith.constant 0 : i32
    %c0_i32_0 = arith.constant 0 : i32
    %c0_i32_1 = arith.constant 0 : i32
    return %c0_i32, %c0_i32_0 : i32, i32
  }
  func.func @transform_2(%arg0: i32) -> (i32, i32) {
    %c0_i32 = arith.constant 0 : i32
    %c0_i32_0 = arith.constant 0 : i32
    %c0_i32_1 = arith.constant 0 : i32
    return %c0_i32, %c0_i32_0 : i32, i32
  }
  func.func @transform_3(%arg0: i32) -> (i32, i32) {
    %c0_i32 = arith.constant 0 : i32
    %c0_i32_0 = arith.constant 0 : i32
    %c0_i32_1 = arith.constant 0 : i32
    return %c0_i32, %c0_i32_0 : i32, i32
  }
  func.func @transform_4(%arg0: i32) -> (i32, i32) {
    %c0_i32 = arith.constant 0 : i32
    %c0_i32_0 = arith.constant 0 : i32
    %c0_i32_1 = arith.constant 0 : i32
    return %c0_i32, %c0_i32_0 : i32, i32
  }
  func.func @transform_5(%arg0: i32) -> (i32, i32, i32) {
    %c0_i32 = arith.constant 0 : i32
    %c0_i32_0 = arith.constant 0 : i32
    %c0_i32_1 = arith.constant 0 : i32
    return %arg0, %c0_i32, %c0_i32_0 : i32, i32, i32
  }
}

module attributes {stable_mosaic.version = 11 : i64} {
  func.func @_convt_s2_kernel(%arg0: i32, %arg1: memref<1x6x6x64xbf16, #tpu.memory_space<vmem>>, %arg2: memref<576x256xbf16, #tpu.memory_space<vmem>>, %arg3: memref<1x256xf32, #tpu.memory_space<vmem>>, %arg4: memref<1x16x256xbf16, #tpu.memory_space<vmem>>) attributes {dimension_semantics = [#tpu.dimension_semantics<parallel>], iteration_bounds = array<i64: 2>, scalar_prefetch = 0 : i64, scratch_operands = 0 : i64, tpu.core_type = #tpu.core_type<tc>, window_params = [{transform_indices = @transform_0, window_bounds = array<i64: 1, 6, 6, 64>}, {pipeline_mode = #tpu.pipeline_mode<synchronous>, transform_indices = @transform_1, window_bounds = array<i64: 576, 256>}, {pipeline_mode = #tpu.pipeline_mode<synchronous>, transform_indices = @transform_2, window_bounds = array<i64: 1, 256>}, {transform_indices = @transform_3, window_bounds = array<i64: 1, 16, 256>}]} {
    %c0 = arith.constant 0 : index
    %c0_0 = arith.constant 0 : index
    %c0_1 = arith.constant 0 : index
    %c0_2 = arith.constant 0 : index
    %0 = vector.load %arg1[%c0, %c0_0, %c0_1, %c0_2] : memref<1x6x6x64xbf16, #tpu.memory_space<vmem>>, vector<1x6x6x64xbf16>
    %1 = vector.extract_strided_slice %0 {offsets = [0, 0, 0, 0], sizes = [1, 4, 4, 64], strides = [1, 1, 1, 1]} : vector<1x6x6x64xbf16> to vector<1x4x4x64xbf16>
    %2 = vector.shape_cast %1 : vector<1x4x4x64xbf16> to vector<16x64xbf16>
    %3 = vector.extract_strided_slice %0 {offsets = [0, 0, 1, 0], sizes = [1, 4, 4, 64], strides = [1, 1, 1, 1]} : vector<1x6x6x64xbf16> to vector<1x4x4x64xbf16>
    %4 = vector.shape_cast %3 : vector<1x4x4x64xbf16> to vector<16x64xbf16>
    %5 = vector.extract_strided_slice %0 {offsets = [0, 0, 2, 0], sizes = [1, 4, 4, 64], strides = [1, 1, 1, 1]} : vector<1x6x6x64xbf16> to vector<1x4x4x64xbf16>
    %6 = vector.shape_cast %5 : vector<1x4x4x64xbf16> to vector<16x64xbf16>
    %7 = tpu.concatenate %2, %4, %6 in 1 : vector<16x64xbf16>, vector<16x64xbf16>, vector<16x64xbf16> -> vector<16x192xbf16>
    %c0_3 = arith.constant 0 : index
    %c0_4 = arith.constant 0 : index
    %8 = vector.load %arg2[%c0_3, %c0_4] : memref<576x256xbf16, #tpu.memory_space<vmem>>, vector<192x256xbf16>
    %cst = arith.constant dense<0.000000e+00> : vector<16x256xf32>
    %9 = tpu.matmul %7, %8, %cst {dimension_numbers = #tpu.dot_dimension_numbers<[1], [0], [0], [1], [0, 0, 1, 1], [], []>} : vector<16x192xbf16>, vector<192x256xbf16>, vector<16x256xf32> -> vector<16x256xf32>
    %10 = vector.extract_strided_slice %0 {offsets = [0, 1, 0, 0], sizes = [1, 4, 4, 64], strides = [1, 1, 1, 1]} : vector<1x6x6x64xbf16> to vector<1x4x4x64xbf16>
    %11 = vector.shape_cast %10 : vector<1x4x4x64xbf16> to vector<16x64xbf16>
    %12 = vector.extract_strided_slice %0 {offsets = [0, 1, 1, 0], sizes = [1, 4, 4, 64], strides = [1, 1, 1, 1]} : vector<1x6x6x64xbf16> to vector<1x4x4x64xbf16>
    %13 = vector.shape_cast %12 : vector<1x4x4x64xbf16> to vector<16x64xbf16>
    %14 = vector.extract_strided_slice %0 {offsets = [0, 1, 2, 0], sizes = [1, 4, 4, 64], strides = [1, 1, 1, 1]} : vector<1x6x6x64xbf16> to vector<1x4x4x64xbf16>
    %15 = vector.shape_cast %14 : vector<1x4x4x64xbf16> to vector<16x64xbf16>
    %16 = tpu.concatenate %11, %13, %15 in 1 : vector<16x64xbf16>, vector<16x64xbf16>, vector<16x64xbf16> -> vector<16x192xbf16>
    %c192 = arith.constant 192 : index
    %c0_5 = arith.constant 0 : index
    %17 = vector.load %arg2[%c192, %c0_5] : memref<576x256xbf16, #tpu.memory_space<vmem>>, vector<192x256xbf16>
    %cst_6 = arith.constant dense<0.000000e+00> : vector<16x256xf32>
    %18 = tpu.matmul %16, %17, %cst_6 {dimension_numbers = #tpu.dot_dimension_numbers<[1], [0], [0], [1], [0, 0, 1, 1], [], []>} : vector<16x192xbf16>, vector<192x256xbf16>, vector<16x256xf32> -> vector<16x256xf32>
    %19 = arith.addf %9, %18 : vector<16x256xf32>
    %20 = vector.extract_strided_slice %0 {offsets = [0, 2, 0, 0], sizes = [1, 4, 4, 64], strides = [1, 1, 1, 1]} : vector<1x6x6x64xbf16> to vector<1x4x4x64xbf16>
    %21 = vector.shape_cast %20 : vector<1x4x4x64xbf16> to vector<16x64xbf16>
    %22 = vector.extract_strided_slice %0 {offsets = [0, 2, 1, 0], sizes = [1, 4, 4, 64], strides = [1, 1, 1, 1]} : vector<1x6x6x64xbf16> to vector<1x4x4x64xbf16>
    %23 = vector.shape_cast %22 : vector<1x4x4x64xbf16> to vector<16x64xbf16>
    %24 = vector.extract_strided_slice %0 {offsets = [0, 2, 2, 0], sizes = [1, 4, 4, 64], strides = [1, 1, 1, 1]} : vector<1x6x6x64xbf16> to vector<1x4x4x64xbf16>
    %25 = vector.shape_cast %24 : vector<1x4x4x64xbf16> to vector<16x64xbf16>
    %26 = tpu.concatenate %21, %23, %25 in 1 : vector<16x64xbf16>, vector<16x64xbf16>, vector<16x64xbf16> -> vector<16x192xbf16>
    %c384 = arith.constant 384 : index
    %c0_7 = arith.constant 0 : index
    %27 = vector.load %arg2[%c384, %c0_7] : memref<576x256xbf16, #tpu.memory_space<vmem>>, vector<192x256xbf16>
    %cst_8 = arith.constant dense<0.000000e+00> : vector<16x256xf32>
    %28 = tpu.matmul %26, %27, %cst_8 {dimension_numbers = #tpu.dot_dimension_numbers<[1], [0], [0], [1], [0, 0, 1, 1], [], []>} : vector<16x192xbf16>, vector<192x256xbf16>, vector<16x256xf32> -> vector<16x256xf32>
    %29 = arith.addf %19, %28 : vector<16x256xf32>
    %c0_9 = arith.constant 0 : index
    %c0_10 = arith.constant 0 : index
    %30 = vector.load %arg3[%c0_9, %c0_10] : memref<1x256xf32, #tpu.memory_space<vmem>>, vector<1x256xf32>
    %31 = vector.broadcast %30 : vector<1x256xf32> to vector<16x256xf32>
    %32 = arith.addf %29, %31 : vector<16x256xf32>
    %cst_11 = arith.constant 0.000000e+00 : f32
    %33 = vector.broadcast %cst_11 : f32 to vector<16x256xf32>
    %34 = arith.maximumf %32, %33 : vector<16x256xf32>
    %35 = vector.shape_cast %34 : vector<16x256xf32> to vector<1x16x256xf32>
    %36 = arith.truncf %35 : vector<1x16x256xf32> to vector<1x16x256xbf16>
    %c0_12 = arith.constant 0 : index
    %c0_13 = arith.constant 0 : index
    %c0_14 = arith.constant 0 : index
    %37 = vector.load %arg4[%c0_12, %c0_13, %c0_14] : memref<1x16x256xbf16, #tpu.memory_space<vmem>>, vector<1x16x256xbf16>
    tpu.vector_store %arg4[%c0_12, %c0_13, %c0_14], %36 {strides = array<i32>} : memref<1x16x256xbf16, #tpu.memory_space<vmem>>, vector<1x16x256xbf16>,
    return
  }
  func.func @transform_0(%arg0: i32) -> (i32, i32, i32, i32) {
    %c0_i32 = arith.constant 0 : i32
    %c0_i32_0 = arith.constant 0 : i32
    %c0_i32_1 = arith.constant 0 : i32
    %c0_i32_2 = arith.constant 0 : i32
    return %arg0, %c0_i32, %c0_i32_0, %c0_i32_1 : i32, i32, i32, i32
  }
  func.func @transform_1(%arg0: i32) -> (i32, i32) {
    %c0_i32 = arith.constant 0 : i32
    %c0_i32_0 = arith.constant 0 : i32
    %c0_i32_1 = arith.constant 0 : i32
    return %c0_i32, %c0_i32_0 : i32, i32
  }
  func.func @transform_2(%arg0: i32) -> (i32, i32) {
    %c0_i32 = arith.constant 0 : i32
    %c0_i32_0 = arith.constant 0 : i32
    %c0_i32_1 = arith.constant 0 : i32
    return %c0_i32, %c0_i32_0 : i32, i32
  }
  func.func @transform_3(%arg0: i32) -> (i32, i32, i32) {
    %c0_i32 = arith.constant 0 : i32
    %c0_i32_0 = arith.constant 0 : i32
    %c0_i32_1 = arith.constant 0 : i32
    return %arg0, %c0_i32, %c0_i32_0 : i32, i32, i32
  }
}

module attributes {stable_mosaic.version = 11 : i64} {
  func.func @_convt_s2_kernel(%arg0: i32, %arg1: memref<1x10x10x64xbf16, #tpu.memory_space<vmem>>, %arg2: memref<576x128xbf16, #tpu.memory_space<vmem>>, %arg3: memref<1x128xf32, #tpu.memory_space<vmem>>, %arg4: memref<1x64x128xbf16, #tpu.memory_space<vmem>>) attributes {dimension_semantics = [#tpu.dimension_semantics<parallel>], iteration_bounds = array<i64: 2>, scalar_prefetch = 0 : i64, scratch_operands = 0 : i64, tpu.core_type = #tpu.core_type<tc>, window_params = [{transform_indices = @transform_0, window_bounds = array<i64: 1, 10, 10, 64>}, {pipeline_mode = #tpu.pipeline_mode<synchronous>, transform_indices = @transform_1, window_bounds = array<i64: 576, 128>}, {pipeline_mode = #tpu.pipeline_mode<synchronous>, transform_indices = @transform_2, window_bounds = array<i64: 1, 128>}, {transform_indices = @transform_3, window_bounds = array<i64: 1, 64, 128>}]} {
    %c0 = arith.constant 0 : index
    %c0_0 = arith.constant 0 : index
    %c0_1 = arith.constant 0 : index
    %c0_2 = arith.constant 0 : index
    %0 = vector.load %arg1[%c0, %c0_0, %c0_1, %c0_2] : memref<1x10x10x64xbf16, #tpu.memory_space<vmem>>, vector<1x10x10x64xbf16>
    %1 = vector.extract_strided_slice %0 {offsets = [0, 0, 0, 0], sizes = [1, 8, 8, 64], strides = [1, 1, 1, 1]} : vector<1x10x10x64xbf16> to vector<1x8x8x64xbf16>
    %2 = vector.shape_cast %1 : vector<1x8x8x64xbf16> to vector<64x64xbf16>
    %3 = vector.extract_strided_slice %0 {offsets = [0, 0, 1, 0], sizes = [1, 8, 8, 64], strides = [1, 1, 1, 1]} : vector<1x10x10x64xbf16> to vector<1x8x8x64xbf16>
    %4 = vector.shape_cast %3 : vector<1x8x8x64xbf16> to vector<64x64xbf16>
    %5 = vector.extract_strided_slice %0 {offsets = [0, 0, 2, 0], sizes = [1, 8, 8, 64], strides = [1, 1, 1, 1]} : vector<1x10x10x64xbf16> to vector<1x8x8x64xbf16>
    %6 = vector.shape_cast %5 : vector<1x8x8x64xbf16> to vector<64x64xbf16>
    %7 = tpu.concatenate %2, %4, %6 in 1 : vector<64x64xbf16>, vector<64x64xbf16>, vector<64x64xbf16> -> vector<64x192xbf16>
    %c0_3 = arith.constant 0 : index
    %c0_4 = arith.constant 0 : index
    %8 = vector.load %arg2[%c0_3, %c0_4] : memref<576x128xbf16, #tpu.memory_space<vmem>>, vector<192x128xbf16>
    %cst = arith.constant dense<0.000000e+00> : vector<64x128xf32>
    %9 = tpu.matmul %7, %8, %cst {dimension_numbers = #tpu.dot_dimension_numbers<[1], [0], [0], [1], [0, 0, 1, 1], [], []>} : vector<64x192xbf16>, vector<192x128xbf16>, vector<64x128xf32> -> vector<64x128xf32>
    %10 = vector.extract_strided_slice %0 {offsets = [0, 1, 0, 0], sizes = [1, 8, 8, 64], strides = [1, 1, 1, 1]} : vector<1x10x10x64xbf16> to vector<1x8x8x64xbf16>
    %11 = vector.shape_cast %10 : vector<1x8x8x64xbf16> to vector<64x64xbf16>
    %12 = vector.extract_strided_slice %0 {offsets = [0, 1, 1, 0], sizes = [1, 8, 8, 64], strides = [1, 1, 1, 1]} : vector<1x10x10x64xbf16> to vector<1x8x8x64xbf16>
    %13 = vector.shape_cast %12 : vector<1x8x8x64xbf16> to vector<64x64xbf16>
    %14 = vector.extract_strided_slice %0 {offsets = [0, 1, 2, 0], sizes = [1, 8, 8, 64], strides = [1, 1, 1, 1]} : vector<1x10x10x64xbf16> to vector<1x8x8x64xbf16>
    %15 = vector.shape_cast %14 : vector<1x8x8x64xbf16> to vector<64x64xbf16>
    %16 = tpu.concatenate %11, %13, %15 in 1 : vector<64x64xbf16>, vector<64x64xbf16>, vector<64x64xbf16> -> vector<64x192xbf16>
    %c192 = arith.constant 192 : index
    %c0_5 = arith.constant 0 : index
    %17 = vector.load %arg2[%c192, %c0_5] : memref<576x128xbf16, #tpu.memory_space<vmem>>, vector<192x128xbf16>
    %cst_6 = arith.constant dense<0.000000e+00> : vector<64x128xf32>
    %18 = tpu.matmul %16, %17, %cst_6 {dimension_numbers = #tpu.dot_dimension_numbers<[1], [0], [0], [1], [0, 0, 1, 1], [], []>} : vector<64x192xbf16>, vector<192x128xbf16>, vector<64x128xf32> -> vector<64x128xf32>
    %19 = arith.addf %9, %18 : vector<64x128xf32>
    %20 = vector.extract_strided_slice %0 {offsets = [0, 2, 0, 0], sizes = [1, 8, 8, 64], strides = [1, 1, 1, 1]} : vector<1x10x10x64xbf16> to vector<1x8x8x64xbf16>
    %21 = vector.shape_cast %20 : vector<1x8x8x64xbf16> to vector<64x64xbf16>
    %22 = vector.extract_strided_slice %0 {offsets = [0, 2, 1, 0], sizes = [1, 8, 8, 64], strides = [1, 1, 1, 1]} : vector<1x10x10x64xbf16> to vector<1x8x8x64xbf16>
    %23 = vector.shape_cast %22 : vector<1x8x8x64xbf16> to vector<64x64xbf16>
    %24 = vector.extract_strided_slice %0 {offsets = [0, 2, 2, 0], sizes = [1, 8, 8, 64], strides = [1, 1, 1, 1]} : vector<1x10x10x64xbf16> to vector<1x8x8x64xbf16>
    %25 = vector.shape_cast %24 : vector<1x8x8x64xbf16> to vector<64x64xbf16>
    %26 = tpu.concatenate %21, %23, %25 in 1 : vector<64x64xbf16>, vector<64x64xbf16>, vector<64x64xbf16> -> vector<64x192xbf16>
    %c384 = arith.constant 384 : index
    %c0_7 = arith.constant 0 : index
    %27 = vector.load %arg2[%c384, %c0_7] : memref<576x128xbf16, #tpu.memory_space<vmem>>, vector<192x128xbf16>
    %cst_8 = arith.constant dense<0.000000e+00> : vector<64x128xf32>
    %28 = tpu.matmul %26, %27, %cst_8 {dimension_numbers = #tpu.dot_dimension_numbers<[1], [0], [0], [1], [0, 0, 1, 1], [], []>} : vector<64x192xbf16>, vector<192x128xbf16>, vector<64x128xf32> -> vector<64x128xf32>
    %29 = arith.addf %19, %28 : vector<64x128xf32>
    %c0_9 = arith.constant 0 : index
    %c0_10 = arith.constant 0 : index
    %30 = vector.load %arg3[%c0_9, %c0_10] : memref<1x128xf32, #tpu.memory_space<vmem>>, vector<1x128xf32>
    %31 = vector.broadcast %30 : vector<1x128xf32> to vector<64x128xf32>
    %32 = arith.addf %29, %31 : vector<64x128xf32>
    %cst_11 = arith.constant 0.000000e+00 : f32
    %33 = vector.broadcast %cst_11 : f32 to vector<64x128xf32>
    %34 = arith.maximumf %32, %33 : vector<64x128xf32>
    %35 = vector.shape_cast %34 : vector<64x128xf32> to vector<1x64x128xf32>
    %36 = arith.truncf %35 : vector<1x64x128xf32> to vector<1x64x128xbf16>
    %c0_12 = arith.constant 0 : index
    %c0_13 = arith.constant 0 : index
    %c0_14 = arith.constant 0 : index
    %37 = vector.load %arg4[%c0_12, %c0_13, %c0_14] : memref<1x64x128xbf16, #tpu.memory_space<vmem>>, vector<1x64x128xbf16>
    tpu.vector_store %arg4[%c0_12, %c0_13, %c0_14], %36 {strides = array<i32>} : memref<1x64x128xbf16, #tpu.memory_space<vmem>>, vector<1x64x128xbf16>,
    return
  }
  func.func @transform_0(%arg0: i32) -> (i32, i32, i32, i32) {
    %c0_i32 = arith.constant 0 : i32
    %c0_i32_0 = arith.constant 0 : i32
    %c0_i32_1 = arith.constant 0 : i32
    %c0_i32_2 = arith.constant 0 : i32
    return %arg0, %c0_i32, %c0_i32_0, %c0_i32_1 : i32, i32, i32, i32
  }
  func.func @transform_1(%arg0: i32) -> (i32, i32) {
    %c0_i32 = arith.constant 0 : i32
    %c0_i32_0 = arith.constant 0 : i32
    %c0_i32_1 = arith.constant 0 : i32
    return %c0_i32, %c0_i32_0 : i32, i32
  }
  func.func @transform_2(%arg0: i32) -> (i32, i32) {
    %c0_i32 = arith.constant 0 : i32
    %c0_i32_0 = arith.constant 0 : i32
    %c0_i32_1 = arith.constant 0 : i32
    return %c0_i32, %c0_i32_0 : i32, i32
  }
  func.func @transform_3(%arg0: i32) -> (i32, i32, i32) {
    %c0_i32 = arith.constant 0 : i32
    %c0_i32_0 = arith.constant 0 : i32
    %c0_i32_1 = arith.constant 0 : i32
    return %arg0, %c0_i32, %c0_i32_0 : i32, i32, i32
  }
}

module attributes {stable_mosaic.version = 11 : i64} {
  func.func @_convt_s2_kernel(%arg0: i32, %arg1: memref<1x18x18x32xbf16, #tpu.memory_space<vmem>>, %arg2: memref<288x128xbf16, #tpu.memory_space<vmem>>, %arg3: memref<1x128xf32, #tpu.memory_space<vmem>>, %arg4: memref<1x256x128xbf16, #tpu.memory_space<vmem>>) attributes {dimension_semantics = [#tpu.dimension_semantics<parallel>], iteration_bounds = array<i64: 2>, scalar_prefetch = 0 : i64, scratch_operands = 0 : i64, tpu.core_type = #tpu.core_type<tc>, window_params = [{transform_indices = @transform_0, window_bounds = array<i64: 1, 18, 18, 32>}, {pipeline_mode = #tpu.pipeline_mode<synchronous>, transform_indices = @transform_1, window_bounds = array<i64: 288, 128>}, {pipeline_mode = #tpu.pipeline_mode<synchronous>, transform_indices = @transform_2, window_bounds = array<i64: 1, 128>}, {transform_indices = @transform_3, window_bounds = array<i64: 1, 256, 128>}]} {
    %c0 = arith.constant 0 : index
    %c0_0 = arith.constant 0 : index
    %c0_1 = arith.constant 0 : index
    %c0_2 = arith.constant 0 : index
    %0 = vector.load %arg1[%c0, %c0_0, %c0_1, %c0_2] : memref<1x18x18x32xbf16, #tpu.memory_space<vmem>>, vector<1x18x18x32xbf16>
    %1 = vector.extract_strided_slice %0 {offsets = [0, 0, 0, 0], sizes = [1, 16, 16, 32], strides = [1, 1, 1, 1]} : vector<1x18x18x32xbf16> to vector<1x16x16x32xbf16>
    %2 = vector.shape_cast %1 : vector<1x16x16x32xbf16> to vector<256x32xbf16>
    %3 = vector.extract_strided_slice %0 {offsets = [0, 0, 1, 0], sizes = [1, 16, 16, 32], strides = [1, 1, 1, 1]} : vector<1x18x18x32xbf16> to vector<1x16x16x32xbf16>
    %4 = vector.shape_cast %3 : vector<1x16x16x32xbf16> to vector<256x32xbf16>
    %5 = vector.extract_strided_slice %0 {offsets = [0, 0, 2, 0], sizes = [1, 16, 16, 32], strides = [1, 1, 1, 1]} : vector<1x18x18x32xbf16> to vector<1x16x16x32xbf16>
    %6 = vector.shape_cast %5 : vector<1x16x16x32xbf16> to vector<256x32xbf16>
    %7 = tpu.concatenate %2, %4, %6 in 1 : vector<256x32xbf16>, vector<256x32xbf16>, vector<256x32xbf16> -> vector<256x96xbf16>
    %c0_3 = arith.constant 0 : index
    %c0_4 = arith.constant 0 : index
    %8 = vector.load %arg2[%c0_3, %c0_4] : memref<288x128xbf16, #tpu.memory_space<vmem>>, vector<96x128xbf16>
    %cst = arith.constant dense<0.000000e+00> : vector<256x128xf32>
    %9 = tpu.matmul %7, %8, %cst {dimension_numbers = #tpu.dot_dimension_numbers<[1], [0], [0], [1], [0, 0, 1, 1], [], []>} : vector<256x96xbf16>, vector<96x128xbf16>, vector<256x128xf32> -> vector<256x128xf32>
    %10 = vector.extract_strided_slice %0 {offsets = [0, 1, 0, 0], sizes = [1, 16, 16, 32], strides = [1, 1, 1, 1]} : vector<1x18x18x32xbf16> to vector<1x16x16x32xbf16>
    %11 = vector.shape_cast %10 : vector<1x16x16x32xbf16> to vector<256x32xbf16>
    %12 = vector.extract_strided_slice %0 {offsets = [0, 1, 1, 0], sizes = [1, 16, 16, 32], strides = [1, 1, 1, 1]} : vector<1x18x18x32xbf16> to vector<1x16x16x32xbf16>
    %13 = vector.shape_cast %12 : vector<1x16x16x32xbf16> to vector<256x32xbf16>
    %14 = vector.extract_strided_slice %0 {offsets = [0, 1, 2, 0], sizes = [1, 16, 16, 32], strides = [1, 1, 1, 1]} : vector<1x18x18x32xbf16> to vector<1x16x16x32xbf16>
    %15 = vector.shape_cast %14 : vector<1x16x16x32xbf16> to vector<256x32xbf16>
    %16 = tpu.concatenate %11, %13, %15 in 1 : vector<256x32xbf16>, vector<256x32xbf16>, vector<256x32xbf16> -> vector<256x96xbf16>
    %c96 = arith.constant 96 : index
    %c0_5 = arith.constant 0 : index
    %17 = vector.load %arg2[%c96, %c0_5] : memref<288x128xbf16, #tpu.memory_space<vmem>>, vector<96x128xbf16>
    %cst_6 = arith.constant dense<0.000000e+00> : vector<256x128xf32>
    %18 = tpu.matmul %16, %17, %cst_6 {dimension_numbers = #tpu.dot_dimension_numbers<[1], [0], [0], [1], [0, 0, 1, 1], [], []>} : vector<256x96xbf16>, vector<96x128xbf16>, vector<256x128xf32> -> vector<256x128xf32>
    %19 = arith.addf %9, %18 : vector<256x128xf32>
    %20 = vector.extract_strided_slice %0 {offsets = [0, 2, 0, 0], sizes = [1, 16, 16, 32], strides = [1, 1, 1, 1]} : vector<1x18x18x32xbf16> to vector<1x16x16x32xbf16>
    %21 = vector.shape_cast %20 : vector<1x16x16x32xbf16> to vector<256x32xbf16>
    %22 = vector.extract_strided_slice %0 {offsets = [0, 2, 1, 0], sizes = [1, 16, 16, 32], strides = [1, 1, 1, 1]} : vector<1x18x18x32xbf16> to vector<1x16x16x32xbf16>
    %23 = vector.shape_cast %22 : vector<1x16x16x32xbf16> to vector<256x32xbf16>
    %24 = vector.extract_strided_slice %0 {offsets = [0, 2, 2, 0], sizes = [1, 16, 16, 32], strides = [1, 1, 1, 1]} : vector<1x18x18x32xbf16> to vector<1x16x16x32xbf16>
    %25 = vector.shape_cast %24 : vector<1x16x16x32xbf16> to vector<256x32xbf16>
    %26 = tpu.concatenate %21, %23, %25 in 1 : vector<256x32xbf16>, vector<256x32xbf16>, vector<256x32xbf16> -> vector<256x96xbf16>
    %c192 = arith.constant 192 : index
    %c0_7 = arith.constant 0 : index
    %27 = vector.load %arg2[%c192, %c0_7] : memref<288x128xbf16, #tpu.memory_space<vmem>>, vector<96x128xbf16>
    %cst_8 = arith.constant dense<0.000000e+00> : vector<256x128xf32>
    %28 = tpu.matmul %26, %27, %cst_8 {dimension_numbers = #tpu.dot_dimension_numbers<[1], [0], [0], [1], [0, 0, 1, 1], [], []>} : vector<256x96xbf16>, vector<96x128xbf16>, vector<256x128xf32> -> vector<256x128xf32>
    %29 = arith.addf %19, %28 : vector<256x128xf32>
    %c0_9 = arith.constant 0 : index
    %c0_10 = arith.constant 0 : index
    %30 = vector.load %arg3[%c0_9, %c0_10] : memref<1x128xf32, #tpu.memory_space<vmem>>, vector<1x128xf32>
    %31 = vector.broadcast %30 : vector<1x128xf32> to vector<256x128xf32>
    %32 = arith.addf %29, %31 : vector<256x128xf32>
    %cst_11 = arith.constant 0.000000e+00 : f32
    %33 = vector.broadcast %cst_11 : f32 to vector<256x128xf32>
    %34 = arith.maximumf %32, %33 : vector<256x128xf32>
    %35 = vector.shape_cast %34 : vector<256x128xf32> to vector<1x256x128xf32>
    %36 = arith.truncf %35 : vector<1x256x128xf32> to vector<1x256x128xbf16>
    %c0_12 = arith.constant 0 : index
    %c0_13 = arith.constant 0 : index
    %c0_14 = arith.constant 0 : index
    %37 = vector.load %arg4[%c0_12, %c0_13, %c0_14] : memref<1x256x128xbf16, #tpu.memory_space<vmem>>, vector<1x256x128xbf16>
    tpu.vector_store %arg4[%c0_12, %c0_13, %c0_14], %36 {strides = array<i32>} : memref<1x256x128xbf16, #tpu.memory_space<vmem>>, vector<1x256x128xbf16>,
    return
  }
  func.func @transform_0(%arg0: i32) -> (i32, i32, i32, i32) {
    %c0_i32 = arith.constant 0 : i32
    %c0_i32_0 = arith.constant 0 : i32
    %c0_i32_1 = arith.constant 0 : i32
    %c0_i32_2 = arith.constant 0 : i32
    return %arg0, %c0_i32, %c0_i32_0, %c0_i32_1 : i32, i32, i32, i32
  }
  func.func @transform_1(%arg0: i32) -> (i32, i32) {
    %c0_i32 = arith.constant 0 : i32
    %c0_i32_0 = arith.constant 0 : i32
    %c0_i32_1 = arith.constant 0 : i32
    return %c0_i32, %c0_i32_0 : i32, i32
  }
  func.func @transform_2(%arg0: i32) -> (i32, i32) {
    %c0_i32 = arith.constant 0 : i32
    %c0_i32_0 = arith.constant 0 : i32
    %c0_i32_1 = arith.constant 0 : i32
    return %c0_i32, %c0_i32_0 : i32, i32
  }
  func.func @transform_3(%arg0: i32) -> (i32, i32, i32) {
    %c0_i32 = arith.constant 0 : i32
    %c0_i32_0 = arith.constant 0 : i32
    %c0_i32_1 = arith.constant 0 : i32
    return %arg0, %c0_i32, %c0_i32_0 : i32, i32, i32
  }
}

module attributes {stable_mosaic.version = 11 : i64} {
  func.func @_convt_s2_kernel(%arg0: i32, %arg1: memref<1x34x34x32xbf16, #tpu.memory_space<vmem>>, %arg2: memref<288x128xbf16, #tpu.memory_space<vmem>>, %arg3: memref<1x128xf32, #tpu.memory_space<vmem>>, %arg4: memref<1x1024x128xbf16, #tpu.memory_space<vmem>>) attributes {dimension_semantics = [#tpu.dimension_semantics<parallel>], iteration_bounds = array<i64: 2>, scalar_prefetch = 0 : i64, scratch_operands = 0 : i64, tpu.core_type = #tpu.core_type<tc>, window_params = [{transform_indices = @transform_0, window_bounds = array<i64: 1, 34, 34, 32>}, {pipeline_mode = #tpu.pipeline_mode<synchronous>, transform_indices = @transform_1, window_bounds = array<i64: 288, 128>}, {pipeline_mode = #tpu.pipeline_mode<synchronous>, transform_indices = @transform_2, window_bounds = array<i64: 1, 128>}, {transform_indices = @transform_3, window_bounds = array<i64: 1, 1024, 128>}]} {
    %c0 = arith.constant 0 : index
    %c0_0 = arith.constant 0 : index
    %c0_1 = arith.constant 0 : index
    %c0_2 = arith.constant 0 : index
    %0 = vector.load %arg1[%c0, %c0_0, %c0_1, %c0_2] : memref<1x34x34x32xbf16, #tpu.memory_space<vmem>>, vector<1x34x34x32xbf16>
    %1 = vector.extract_strided_slice %0 {offsets = [0, 0, 0, 0], sizes = [1, 32, 32, 32], strides = [1, 1, 1, 1]} : vector<1x34x34x32xbf16> to vector<1x32x32x32xbf16>
    %2 = vector.shape_cast %1 : vector<1x32x32x32xbf16> to vector<1024x32xbf16>
    %3 = vector.extract_strided_slice %0 {offsets = [0, 0, 1, 0], sizes = [1, 32, 32, 32], strides = [1, 1, 1, 1]} : vector<1x34x34x32xbf16> to vector<1x32x32x32xbf16>
    %4 = vector.shape_cast %3 : vector<1x32x32x32xbf16> to vector<1024x32xbf16>
    %5 = vector.extract_strided_slice %0 {offsets = [0, 0, 2, 0], sizes = [1, 32, 32, 32], strides = [1, 1, 1, 1]} : vector<1x34x34x32xbf16> to vector<1x32x32x32xbf16>
    %6 = vector.shape_cast %5 : vector<1x32x32x32xbf16> to vector<1024x32xbf16>
    %7 = tpu.concatenate %2, %4, %6 in 1 : vector<1024x32xbf16>, vector<1024x32xbf16>, vector<1024x32xbf16> -> vector<1024x96xbf16>
    %c0_3 = arith.constant 0 : index
    %c0_4 = arith.constant 0 : index
    %8 = vector.load %arg2[%c0_3, %c0_4] : memref<288x128xbf16, #tpu.memory_space<vmem>>, vector<96x128xbf16>
    %cst = arith.constant dense<0.000000e+00> : vector<1024x128xf32>
    %9 = tpu.matmul %7, %8, %cst {dimension_numbers = #tpu.dot_dimension_numbers<[1], [0], [0], [1], [0, 0, 1, 1], [], []>} : vector<1024x96xbf16>, vector<96x128xbf16>, vector<1024x128xf32> -> vector<1024x128xf32>
    %10 = vector.extract_strided_slice %0 {offsets = [0, 1, 0, 0], sizes = [1, 32, 32, 32], strides = [1, 1, 1, 1]} : vector<1x34x34x32xbf16> to vector<1x32x32x32xbf16>
    %11 = vector.shape_cast %10 : vector<1x32x32x32xbf16> to vector<1024x32xbf16>
    %12 = vector.extract_strided_slice %0 {offsets = [0, 1, 1, 0], sizes = [1, 32, 32, 32], strides = [1, 1, 1, 1]} : vector<1x34x34x32xbf16> to vector<1x32x32x32xbf16>
    %13 = vector.shape_cast %12 : vector<1x32x32x32xbf16> to vector<1024x32xbf16>
    %14 = vector.extract_strided_slice %0 {offsets = [0, 1, 2, 0], sizes = [1, 32, 32, 32], strides = [1, 1, 1, 1]} : vector<1x34x34x32xbf16> to vector<1x32x32x32xbf16>
    %15 = vector.shape_cast %14 : vector<1x32x32x32xbf16> to vector<1024x32xbf16>
    %16 = tpu.concatenate %11, %13, %15 in 1 : vector<1024x32xbf16>, vector<1024x32xbf16>, vector<1024x32xbf16> -> vector<1024x96xbf16>
    %c96 = arith.constant 96 : index
    %c0_5 = arith.constant 0 : index
    %17 = vector.load %arg2[%c96, %c0_5] : memref<288x128xbf16, #tpu.memory_space<vmem>>, vector<96x128xbf16>
    %cst_6 = arith.constant dense<0.000000e+00> : vector<1024x128xf32>
    %18 = tpu.matmul %16, %17, %cst_6 {dimension_numbers = #tpu.dot_dimension_numbers<[1], [0], [0], [1], [0, 0, 1, 1], [], []>} : vector<1024x96xbf16>, vector<96x128xbf16>, vector<1024x128xf32> -> vector<1024x128xf32>
    %19 = arith.addf %9, %18 : vector<1024x128xf32>
    %20 = vector.extract_strided_slice %0 {offsets = [0, 2, 0, 0], sizes = [1, 32, 32, 32], strides = [1, 1, 1, 1]} : vector<1x34x34x32xbf16> to vector<1x32x32x32xbf16>
    %21 = vector.shape_cast %20 : vector<1x32x32x32xbf16> to vector<1024x32xbf16>
    %22 = vector.extract_strided_slice %0 {offsets = [0, 2, 1, 0], sizes = [1, 32, 32, 32], strides = [1, 1, 1, 1]} : vector<1x34x34x32xbf16> to vector<1x32x32x32xbf16>
    %23 = vector.shape_cast %22 : vector<1x32x32x32xbf16> to vector<1024x32xbf16>
    %24 = vector.extract_strided_slice %0 {offsets = [0, 2, 2, 0], sizes = [1, 32, 32, 32], strides = [1, 1, 1, 1]} : vector<1x34x34x32xbf16> to vector<1x32x32x32xbf16>
    %25 = vector.shape_cast %24 : vector<1x32x32x32xbf16> to vector<1024x32xbf16>
    %26 = tpu.concatenate %21, %23, %25 in 1 : vector<1024x32xbf16>, vector<1024x32xbf16>, vector<1024x32xbf16> -> vector<1024x96xbf16>
    %c192 = arith.constant 192 : index
    %c0_7 = arith.constant 0 : index
    %27 = vector.load %arg2[%c192, %c0_7] : memref<288x128xbf16, #tpu.memory_space<vmem>>, vector<96x128xbf16>
    %cst_8 = arith.constant dense<0.000000e+00> : vector<1024x128xf32>
    %28 = tpu.matmul %26, %27, %cst_8 {dimension_numbers = #tpu.dot_dimension_numbers<[1], [0], [0], [1], [0, 0, 1, 1], [], []>} : vector<1024x96xbf16>, vector<96x128xbf16>, vector<1024x128xf32> -> vector<1024x128xf32>
    %29 = arith.addf %19, %28 : vector<1024x128xf32>
    %c0_9 = arith.constant 0 : index
    %c0_10 = arith.constant 0 : index
    %30 = vector.load %arg3[%c0_9, %c0_10] : memref<1x128xf32, #tpu.memory_space<vmem>>, vector<1x128xf32>
    %31 = vector.broadcast %30 : vector<1x128xf32> to vector<1024x128xf32>
    %32 = arith.addf %29, %31 : vector<1024x128xf32>
    %33 = vector.shape_cast %32 : vector<1024x128xf32> to vector<1x1024x128xf32>
    %34 = arith.truncf %33 : vector<1x1024x128xf32> to vector<1x1024x128xbf16>
    %c0_11 = arith.constant 0 : index
    %c0_12 = arith.constant 0 : index
    %c0_13 = arith.constant 0 : index
    %35 = vector.load %arg4[%c0_11, %c0_12, %c0_13] : memref<1x1024x128xbf16, #tpu.memory_space<vmem>>, vector<1x1024x128xbf16>
    tpu.vector_store %arg4[%c0_11, %c0_12, %c0_13], %34 {strides = array<i32>} : memref<1x1024x128xbf16, #tpu.memory_space<vmem>>, vector<1x1024x128xbf16>,
    return
  }
  func.func @transform_0(%arg0: i32) -> (i32, i32, i32, i32) {
    %c0_i32 = arith.constant 0 : i32
    %c0_i32_0 = arith.constant 0 : i32
    %c0_i32_1 = arith.constant 0 : i32
    %c0_i32_2 = arith.constant 0 : i32
    return %arg0, %c0_i32, %c0_i32_0, %c0_i32_1 : i32, i32, i32, i32
  }
  func.func @transform_1(%arg0: i32) -> (i32, i32) {
    %c0_i32 = arith.constant 0 : i32
    %c0_i32_0 = arith.constant 0 : i32
    %c0_i32_1 = arith.constant 0 : i32
    return %c0_i32, %c0_i32_0 : i32, i32
  }
  func.func @transform_2(%arg0: i32) -> (i32, i32) {
    %c0_i32 = arith.constant 0 : i32
    %c0_i32_0 = arith.constant 0 : i32
    %c0_i32_1 = arith.constant 0 : i32
    return %c0_i32, %c0_i32_0 : i32, i32
  }
  func.func @transform_3(%arg0: i32) -> (i32, i32, i32) {
    %c0_i32 = arith.constant 0 : i32
    %c0_i32_0 = arith.constant 0 : i32
    %c0_i32_1 = arith.constant 0 : i32
    return %arg0, %c0_i32, %c0_i32_0 : i32, i32, i32
  }
}

</mosaic_0001>

<bundles_post_ra>
// kernel: base_decoder_forward.6
= control target key start
LH: loop header
LB: loop body
LE: loop exit
PB: predicated region body
PF: predicated region fallthrough
CT: control target
= control target key end

     0   :  { %8 = vsyncpa [#allocation3], 0  ;;  %s1883_s0 = inlined_call_operand.vmem [shape: bf16[2,6,6,64], index: 0, kind: input, shape index: {}]   ;;  %s1884_s1 = inlined_call_operand.hbm [shape: bf16[576,256], index: 1, kind: input, shape index: {}]   ;;  %s1885_s2 = inlined_call_operand.hbm [shape: f32[1,256], index: 2, kind: input, shape index: {}]   ;;  %s1886_s3 = inlined_call_operand.vmem [shape: bf16[2,16,256], index: 3, kind: output, shape index: {}]  }
   0x1   :  { %9 = vsyncpa [#allocation5], 0  ;;  %s1568_s12 = smov 0  }
   0x2 LB: > { %s1574_s13 = sadd.s32 4294967295, %s1540_s12   ;;  %p1217_p0 = scmp.ge.s32.totalorder %s1540_s12, 1  ;;  %s1540_s12 = sphi %s1568_s12, %s15_s12  }
   0x3   : > { %p114_p1 = scmp.lt.s32.totalorder %s1540_s12, 3  ;;  %s1542_s14 = smov [#allocation2]  }
   0x4   : > { %s126_s15 = sshll.u32 %s1542_s14, 4  ;;  %p1887_p3 = scmp.eq.s32.totalorder %s1574_s13, 0  ;;  %s127_s15 = int_to_ptr.vmem [resolvable:$true] %s126_s15 }
   0x5   : > { %p1578_p2 = pnand %p1217_p0, %p114_p1  ;;  %s1543_s17 = smov [#allocation4]  }
   0x6   : > { %s140_s18 = sshll.u32 %s1543_s17, 4  ;;  %s1470_s22 = scalar_lea.hbm %s1884_s1, 9216  ;;  %s1591_s18 = int_to_ptr.vmem [resolvable:$true] %s140_s18 }
   0x7   : > { %s1889_s16 = scalar_select %p1578_p2, 1, 0 }
   0x8   : > { %p1332_p4 = pneg %p1578_p2  ;;  %p1471_p6 = scmp.ne.s32.totalorder %s1884_s1, %s1470_s22 }
   0x9   : > { %p1477_p10 = scmp.lt.u32.totalorder %s1470_s22, %s1884_s1 }
   0xa   : > { %p1587_p5 = pnand %p1887_p3, %p1332_p4 }
   0xc   : > { %p1472_p7 = pneg %p1587_p5 }
   0xe   : > { %p1473_p8 = pnand %p1472_p7, %p1471_p6 }
  0x10   : > { %p1474_p9 = pneg %p1473_p8 }
  0x12   : > { %p1479_p11 = pnand %p1477_p10, %p1474_p9 }
  0x14   : > { %1482 = shalt.err (!%p1479_p11)
}
  0x15   : > { %s1483_s27 = scalar_lea.vmem %s127_s15, 9216  ;;  %p1491_p1 = scmp.lt.s32.totalorder %s127_s15, %s127_s15 }
  0x16   : > { %p1484_p12 = scmp.ne.s32.totalorder %s127_s15, %s1483_s27  ;;  %p1492_p4 = scmp.lt.s32.totalorder %s1483_s27, %s1483_s27 }
  0x18   : > { %p1486_p13 = pnand %p1484_p12, %p1472_p7  ;;  %p1493_p3 = por %p1492_p4, %p1491_p1 }
  0x1a   : > { %p1487_p0 = pneg %p1486_p13 }
  0x1c   : > { %p1494_p2 = pnand %p1493_p3, %p1487_p0 }
  0x1e   : > { %1497 = shalt.err (!%p1494_p2)
}
  0x1f   : > { %s1544_s28 = smov 128   ;;  %s1545_s29 = smov 8  }
  0x20   : > { %1335 = dma.hbm_to_vmem [thread:$0]  (!%p1587_p5), %s1884_s1, 9216, %s127_s15, [#allocation3], %s1544_s28, %s1544_s28, %s1545_s29  }
  0x21   : > { %s1498_s7 = scalar_lea.hbm %s1885_s2, 32 }
  0x22   : > { %p1499_p6 = scmp.ne.s32.totalorder %s1885_s2, %s1498_s7  ;;  %p1505_p8 = scmp.lt.u32.totalorder %s1498_s7, %s1885_s2 }
  0x24   : > { %p1501_p2 = pnand %p1499_p6, %p1472_p7 }
  0x26   : > { %p1502_p3 = pneg %p1501_p2 }
  0x28   : > { %p1507_p9 = pnand %p1505_p8, %p1502_p3 }
  0x2a   : > { %1510 = shalt.err (!%p1507_p9)
}
  0x2b   : > { %s1511_s14 = scalar_lea.vmem %s1591_s18, 32  ;;  %p1519_p13 = scmp.lt.s32.totalorder %s1591_s18, %s1591_s18 }
  0x2c   : > { %p1512_p10 = scmp.ne.s32.totalorder %s1591_s18, %s1511_s14  ;;  %p1520_p0 = scmp.lt.s32.totalorder %s1511_s14, %s1511_s14 }
  0x2e   : > { %p1514_p11 = pnand %p1512_p10, %p1472_p7  ;;  %p1521_p1 = por %p1520_p0, %p1519_p13 }
  0x30   : > { %p1515_p12 = pneg %p1514_p11 }
  0x32   : > { %p1522_p4 = pnand %p1521_p1, %p1515_p12 }
  0x34   : > { %1525 = shalt.err (!%p1522_p4)
}
  0x35   : > { %1338 = dma.hbm_to_vmem [thread:$0]  (!%p1587_p5), %s1885_s2, 32, %s1591_s18, [#allocation5]  }
  0x36   : > { %p1891_p6 = scmp.ne.s32.totalorder %s1889_s16, 0 }
  0x37   : > { %p1892_p2 = scmp.eq.s32.totalorder (!%p1891_p6), %s1574_s13, 0 }
  0x38   : > { %161 = sbr.rel (%p1891_p6) target bundleno = 485 (0x1e5), region = 32 }
  0x3f   : > { %1531 = dma.done.wait (%p1892_p2), [#allocation3], 9216   ;;  %p1893_p7 = pmov %p1892_p2 }
  0x40   : > { %p1894_p3 = pmov %p1892_p2 }
  0x41   : > { %1533 = vsyncadd (%p1893_p7), [#allocation3], 4294958080 }
  0x42   : > { %1535 = dma.done.wait (%p1894_p3), [#allocation5], 32   ;;  %p1895_p8 = pmov %p1892_p2 }
  0x43   : > { %p189_p9 = scmp.lt.s32.totalorder %s1574_s13, 1  ;;  %v213_v0 = vlaneseq  ;;  %v1546_v1 = vmov 1983009808   ;;  %vm242_vm0 = vsmask.f32 1280  ;;  %vm305_vm7 = vcmask 1040384  }
  0x44   : > { %1537 = vsyncadd (%p1895_p8), [#allocation5], 4294967264  ;;  %v211_v2 = vunpack.c.l.s4 %v1546_v1  ;;  %vm243_vm1 = vsmask.f32 3336  ;;  %vm245_vm3 = vsmask.f32 5392 }
  0x45   : > { %s1905_s13 = smov (!%p189_p9, %s1574_s13), 1  ;;  %v1654_v3 = vshrl.u32 %v213_v0, 7  ;;  %vm1663_vm2 = vmor %vm242_vm0, %vm243_vm1  ;;  %vm247_vm4 = vsmask.f32 7448  ;;  %v1357_v19 = vld [vmem:[#allocation2 + $0x4] ss:$8 sps:$4 sm:$0xff]  }
  0x46   : > { %v212_v4 = vunpack.c.0.s8 %v211_v2  ;;  %s1323_s16 = smul.u32 24, %s1905_s13  ;;  %v1359_v24 = vld [vmem:[#allocation2] ss:$8 sps:$4 sm:$0xff]   ;;  %807 = vmatprep.subr.bf16.mxu0 %v1357_v19  ;;  %v1360_v29 = vld [vmem:[#allocation2 + $0x14] ss:$8 sps:$4 sm:$0xff]   ;;  %vm1729_vm5 = vmor %vm1663_vm2, %vm245_vm3  ;;  %vm306_vm8 = vcmask 1042434  }
  0x47   : > { %808 = vmatpush1.bf16.msra.mxu0 %v1359_v24  ;;  %v1362_v34 = vld [vmem:[#allocation2 + $0x10] ss:$8 sps:$4 sm:$0xff]   ;;  %v1363_v44 = vld [vmem:[#allocation2 + $0x24] ss:$8 sps:$4 sm:$0xff]   ;;  %vm1739_vm6 = vmor %vm1729_vm5, %vm247_vm4  ;;  %vm308_vm9 = vcmask 1044484   ;;  %vm310_vm10 = vcmask 1046534  }
  0x48   : > { %v1658_v5 = vsub.s32 %v212_v4, %v1654_v3  ;;  %s193_s20 = scalar_lea.vmem %s1883_s0, %s1323_s16  ;;  %809 = vmatprep.subr.bf16.mxu0 %v1360_v29  ;;  %v1365_v54 = vld [vmem:[#allocation2 + $0x20] ss:$8 sps:$4 sm:$0xff]   ;;  %v1366_v59 = vld [vmem:[#allocation2 + $0x34] ss:$8 sps:$4 sm:$0xff]   ;;  %v1368_v24 = vld [vmem:[#allocation2 + $0x30] ss:$8 sps:$4 sm:$0xff]  }
  0x49   : > { %v1667_v7 = vld [vmem:[%s193_s20] sm:$0x7]  ;;  %v1669_v8 = vld [vmem:[%s193_s20 + $0x4] sm:$0x7]  ;;  %v1671_v9 = vld [vmem:[%s193_s20 + $0x8] sm:$0x7] }
  0x4a   : > { %v1673_v10 = vld [vmem:[%s193_s20 + $0xc] sm:$0x7]  ;;  %v1675_v11 = vld [vmem:[%s193_s20 + $0x10] sm:$0x7]  ;;  %v1679_v12 = vrot.slane %v1667_v7, %v1658_v5  ;;  %v1683_v13 = vrot.slane %v1669_v8, %v1658_v5  ;;  %v1687_v14 = vrot.slane %v1671_v9, %v1658_v5  ;;  %v1689_v15 = vld [vmem:[%s193_s20 + $0x14] sm:$0x7] }
  0x4b   : > { %v1693_v16 = vrot.slane %v1673_v10, %v1658_v5  ;;  %v1697_v17 = vrot.slane %v1675_v11, %v1658_v5  ;;  %v1701_v18 = vrot.slane %v1689_v15, %v1658_v5  ;;  %810 = vmatpush1.bf16.msra.mxu0 %v1362_v34  ;;  %vm307_vm11 = vmor %vm305_vm7, %vm306_vm8  ;;  %s1547_s21 = smov 64   ;;  %vm381_vm14 = vcmask 523264   ;;  %s1312_s22 = sshll.u32 %s1905_s13, 4 }
  0x4c   : > { %v1705_v20 = vcombine.high %v1679_v12, %v1679_v12  ;;  %v1709_v21 = vcombine.high %v1683_v13, %v1683_v13  ;;  %v1713_v22 = vcombine.high %v1687_v14, %v1687_v14  ;;  %v250_v23 = vshrl.u32 %v1679_v12, 16  ;;  %811 = vmatprep.subr.bf16.mxu0 %v1363_v44  ;;  %vm309_vm12 = vmor %vm307_vm11, %vm308_vm9  ;;  %s198_s25 = scalar_lea.vmem %s1886_s3, %s1312_s22 }
  0x4d   : > { %v1718_v25 = vcombine.high %v1693_v16, %v1693_v16  ;;  %v253_v26 = vshll.u32 %v1679_v12, 16  ;;  %v264_v27 = vshrl.u32 %v1683_v13, 16  ;;  %v267_v28 = vshll.u32 %v1683_v13, 16  ;;  %vm1799_vm13 = vmor %vm309_vm12, %vm310_vm10 }
  0x4e   : > { %v252_v30 = vrot.slane %v250_v23, 6  ;;  %v259_v31 = vshll.u32 %v1705_v20, 16  ;;  %v273_v32 = vshll.u32 %v1709_v21, 16  ;;  %v278_v33 = vshrl.u32 %v1687_v14, 16 }
  0x4f   : > { %v255_v36 = vrot.slane %v253_v26, 7  ;;  %v266_v37 = vrot.slane %v264_v27, 6  ;;  %v269_v38 = vrot.slane %v267_v28, 7  ;;  %v281_v39 = vshll.u32 %v1687_v14, 16  ;;  %812 = vmatpush1.bf16.msra.mxu0 %v1365_v54 }
  0x50   : > { %v261_v40 = vrot.slane %v259_v31, 7  ;;  %v275_v41 = vrot.slane %v273_v32, 7  ;;  %v280_v42 = vrot.slane %v278_v33, 6  ;;  %v287_v43 = vshll.u32 %v1713_v22, 16  ;;  %813 = vmatprep.subr.bf16.mxu0 %v1366_v59 }
  0x51   : > { %v256_v45 = vor.u32 %v255_v36, %v252_v30  ;;  %v270_v46 = vor.u32 %v269_v38, %v266_v37  ;;  %v283_v47 = vrot.slane %v281_v39, 7  ;;  %v292_v48 = vshrl.u32 %v1693_v16, 16  ;;  %v1369_v30 = vld [vmem:[#allocation2 + $0x44] ss:$8 sps:$4 sm:$0xff]  }
  0x52   : > { %v289_v50 = vrot.slane %v287_v43, 7  ;;  %v295_v51 = vshll.u32 %v1693_v16, 16  ;;  %v301_v52 = vshll.u32 %v1718_v25, 16  ;;  %v1747_v53 = vcombine.high %v1697_v17, %v1697_v17 }
  0x53   : > { %v257_v55 = vrot.slane %v256_v45, 2  ;;  %v271_v56 = vrot.slane %v270_v46, 2  ;;  %v284_v57 = vor.u32 %v283_v47, %v280_v42  ;;  %v294_v58 = vrot.slane %v292_v48, 6  ;;  %814 = vmatpush1.bf16.msra.mxu0 %v1368_v24  ;;  %v1372_v46 = vld [vmem:[#allocation2 + $0x54] ss:$8 sps:$4 sm:$0xff]  }
  0x54   : > { %v297_v60 = vrot.slane %v295_v51, 7  ;;  %v420_v61 = vshrl.u32 %v1697_v17, 16  ;;  %v423_v62 = vshll.u32 %v1697_v17, 16  ;;  %v429_v2 = vshll.u32 %v1747_v53, 16  ;;  %815 = vmatprep.subr.bf16.mxu0 %v1369_v30 }
  0x55   : > { %v262_v63 = vsel %vm1739_vm6, %v257_v55, %v261_v40  ;;  %v276_v0 = vsel %vm1739_vm6, %v271_v56, %v275_v41  ;;  %v285_v1 = vrot.slane %v284_v57, 2  ;;  %v303_v6 = vrot.slane %v301_v52, 7  ;;  %v1371_v41 = vld [vmem:[#allocation2 + $0x40] ss:$8 sps:$4 sm:$0xff]   ;;  %v1374_v56 = vld [vmem:[#allocation2 + $0x50] ss:$8 sps:$4 sm:$0xff]  }
  0x56   : > { %v298_v4 = vor.u32 %v297_v60, %v294_v58  ;;  %v422_v19 = vrot.slane %v420_v61, 6  ;;  %v425_v23 = vrot.slane %v423_v62, 7  ;;  %v345_v27 = vcombine.low %v262_v63, %v276_v0  ;;  %v1375_v57 = vld [vmem:[#allocation2 + $0x64] ss:$8 sps:$4 sm:$0xff]  }
  0x57   : > { %v290_v26 = vsel %vm1739_vm6, %v285_v1, %v289_v50  ;;  %v1760_v28 = vcombine.high %v1701_v18, %v1701_v18  ;;  %v860_v29 = vshrl.u32 %v1701_v18, 16  ;;  %v431_v33 = vrot.slane %v429_v2, 7  ;;  %816 = vmatpush1.bf16.msra.mxu0 %v1371_v41  ;;  %v1392_v63 = vld [vmem:[#allocation2 + $0xc4] ss:$8 sps:$4 sm:$0xff]   ;;  %v1395_v1 = vld [vmem:[#allocation2 + $0xc0] ss:$8 sps:$4 sm:$0xff]  }
  0x58   : > { %v299_v31 = vrot.slane %v298_v4, 2  ;;  %v426_v32 = vor.u32 %v425_v23, %v422_v19  ;;  %v454_v34 = vcombine.low %v276_v0, %v290_v26  ;;  %v863_v36 = vshll.u32 %v1701_v18, 16  ;;  %817 = vmatprep.subr.bf16.mxu0 %v1372_v46  ;;  %641 = vmatprep.subr.bf16.mxu1 %v1392_v63  ;;  %v1384_v46 = vld [vmem:[#allocation2 + $0x94] ss:$8 sps:$4 sm:$0xff]   ;;  %v1394_v63 = vld [vmem:[#allocation2 + $0xb0] ss:$8 sps:$4 sm:$0xff]  }
  0x59   : > { %v862_v35 = vrot.slane %v860_v29, 6  ;;  %v869_v37 = vshll.u32 %v1760_v28, 16  ;;  %v328_v38 = vcombine.low %v1667_v7, %v1669_v8  ;;  %v329_v42 = vcombine.low %v1671_v9, %v1673_v10  ;;  %642 = vmatpush1.bf16.msra.mxu1 %v1395_v1  ;;  %v1433_v1 = vld [vmem:[#allocation2 + $0x120] ss:$8 sps:$4 sm:$0xff]  }
  0x5a   : > { %v304_v39 = vsel %vm1739_vm6, %v299_v31, %v303_v6  ;;  %v427_v40 = vrot.slane %v426_v32, 2  ;;  %v353_v44 = vrot.slane %v345_v27, %v1658_v5  ;;  %v865_v45 = vrot.slane %v863_v36, 7  ;;  %v1403_v32 = vld [vmem:[#allocation2 + $0xd0] ss:$8 sps:$4 sm:$0xff]  }
  0x5b   : > { %v346_v43 = vcombine.low %v290_v26, %v304_v39  ;;  %v1773_v47 = vrot.slane %v328_v38, %v1658_v5  ;;  %v462_v48 = vrot.slane %v454_v34, %v1658_v5  ;;  %v871_v50 = vrot.slane %v869_v37, 7  ;;  %818 = vmatpush1.bf16.msra.mxu0 %v1374_v56  ;;  %v1378_v26 = vld [vmem:[#allocation2 + $0x74] ss:$8 sps:$4 sm:$0xff]   ;;  %v1381_v34 = vld [vmem:[#allocation2 + $0x84] ss:$8 sps:$4 sm:$0xff]  }
  0x5c   : > { %v432_v7 = vsel %vm1739_vm6, %v427_v40, %v431_v33  ;;  %v1779_v51 = vrot.slane %v329_v42, %v1658_v5  ;;  %v866_v55 = vor.u32 %v865_v45, %v862_v35  ;;  %v1227_v58 = vrot.slane %v1679_v12, 9  ;;  %819 = vmatprep.subr.bf16.mxu0 %v1375_v57  ;;  %v1380_v33 = vld [vmem:[#allocation2 + $0x70] ss:$8 sps:$4 sm:$0xff]   ;;  %v1407_v40 = vld [vmem:[#allocation2 + $0xe4] ss:$8 sps:$4 sm:$0xff]  }
  0x5d   : > { %v360_v52 = vrot.slane %v346_v43, %v1658_v5  ;;  %v455_v54 = vcombine.low %v304_v39, %v432_v7  ;;  %v314_v0 = vrot.slane %v1705_v20, 7  ;;  %v1228_v2 = vrot.slane %v1683_v13, 9  ;;  %v1409_v42 = vld [vmem:[#allocation2 + $0xe0] ss:$8 sps:$4 sm:$0xff]   ;;  %v1413_v45 = vld [vmem:[#allocation2 + $0xf4] ss:$8 sps:$4 sm:$0xff]  }
  0x5e   : > { %v344_v59 = vcombine.low %v1773_v47, %v1779_v51  ;;  %v867_v62 = vrot.slane %v866_v55, 2  ;;  %v318_v4 = vrot.slane %v1709_v21, 7  ;;  %v1229_v12 = vrot.slane %v1687_v14, 9  ;;  %v1377_v21 = vld [vmem:[#allocation2 + $0x60] ss:$8 sps:$4 sm:$0xff]  }
  0x5f   : > { %v361_v60 = vcombine.low %v353_v44, %v360_v52  ;;  %v469_v61 = vrot.slane %v455_v54, %v1658_v5  ;;  %v322_v6 = vrot.slane %v1713_v22, 7  ;;  %v1230_v20 = vrot.slane %v1693_v16, 9  ;;  %820 = vmatpush1.bf16.msra.mxu0 %v1377_v21  ;;  %v1383_v44 = vld [vmem:[#allocation2 + $0x80] ss:$8 sps:$4 sm:$0xff]   ;;  %v1386_v54 = vld [vmem:[#allocation2 + $0x90] ss:$8 sps:$4 sm:$0xff]  }
  0x60   : > { %v872_v23 = vsel %vm1739_vm6, %v867_v62, %v871_v50  ;;  %v326_v13 = vrot.slane %v1718_v25, 7  ;;  %v1231_v22 = vrot.slane %v1697_v17, 9  ;;  %v435_v49 = vrot.slane %v1747_v53, 7  ;;  %v1399_v17 = vld [vmem:[#allocation2 + $0xd4] ss:$8 sps:$4 sm:$0xff]   ;;  %821 = vmatprep.subr.bf16.mxu0 %v1378_v26 }
  0x61   : > { %362 = vrot.lane.b32.xlu0 %v361_v60, %s1547_s21  ;;  %v470_v19 = vcombine.low %v462_v48, %v469_v61  ;;  %v886_v24 = vcombine.low %v432_v7, %v872_v23  ;;  %v315_v16 = vsel %vm1799_vm13, %v1227_v58, %v314_v0  ;;  %v1809_v25 = vsel %vm1799_vm13, %v1228_v2, %v318_v4  ;;  %v1415_v48 = vld [vmem:[#allocation2 + $0xf0] ss:$8 sps:$4 sm:$0xff]   ;;  %v1387_v55 = vld [vmem:[#allocation2 + $0xa4] ss:$8 sps:$4 sm:$0xff]   ;;  %v1421_v56 = vld [vmem:[#allocation2 + $0x100] ss:$8 sps:$4 sm:$0xff]  }
  0x62   : > { %v1813_v27 = vsel %vm1799_vm13, %v1229_v12, %v322_v6  ;;  %v1817_v29 = vsel %vm1799_vm13, %v1230_v20, %v326_v13  ;;  %v364_v30 = vcombine.low %v315_v16, %v1809_v25  ;;  %v1282_v35 = vrot.slane %v1701_v18, 9  ;;  %643 = vmatprep.subr.bf16.mxu1 %v1399_v17  ;;  %v1425_v57 = vld [vmem:[#allocation2 + $0x114] ss:$8 sps:$4 sm:$0xff]   ;;  %v1389_v58 = vld [vmem:[#allocation2 + $0xa0] ss:$8 sps:$4 sm:$0xff]  }
  0x63   : > { %v893_v53 = vrot.slane %v886_v24, %v1658_v5  ;;  %v365_v31 = vcombine.low %v1813_v27, %v1817_v29  ;;  %v875_v36 = vrot.slane %v1760_v28, 7  ;;  %644 = vmatpush1.bf16.msra.mxu1 %v1403_v32  ;;  %v436_v41 = vsel %vm1799_vm13, %v1231_v22, %v435_v49  ;;  %822 = vmatpush1.bf16.msra.mxu0 %v1380_v33  ;;  %v1390_v60 = vld [vmem:[#allocation2 + $0xb4] ss:$8 sps:$4 sm:$0xff]   ;;  %v1427_v61 = vld [vmem:[#allocation2 + $0x110] ss:$8 sps:$4 sm:$0xff]  }
  0x64   : > { %v372_v38 = vrot.slane %v364_v30, %v1658_v5  ;;  %645 = vmatprep.subr.bf16.mxu1 %v1407_v40  ;;  %823 = vmatprep.subr.bf16.mxu0 %v1381_v34  ;;  %v1431_v62 = vld [vmem:[#allocation2 + $0x124] ss:$8 sps:$4 sm:$0xff]   ;;  %v1437_v2 = vld [vmem:[#allocation2 + $0x134] ss:$8 sps:$4 sm:$0xff]   ;;  %v1439_v4 = vld [vmem:[#allocation2 + $0x130] ss:$8 sps:$4 sm:$0xff]   ;;  %v473_v12 = vcombine.low %v1809_v25, %v1813_v27  ;;  %v474_v6 = vcombine.low %v1817_v29, %v436_v41 }
  0x65   : > { %471 = vrot.lane.b32.xlu0 %v470_v19, %s1547_s21  ;;  %v894_v37 = vcombine.low %v360_v52, %v893_v53  ;;  %v1828_v39 = vrot.slane %v365_v31, %v1658_v5  ;;  %v876_v18 = vsel %vm1799_vm13, %v1282_v35, %v875_v36  ;;  %v1419_v52 = vld [vmem:[#allocation2 + $0x104] ss:$8 sps:$4 sm:$0xff]   ;;  %v437_v19 = vcombine.low %v1669_v8, %v1671_v9  ;;  %v1445_v49 = vld [vmem:[#allocation2 + $0x140] ss:$8 sps:$4 sm:$0xff]   ;;  %v1449_v8 = vld [vmem:[#allocation2 + $0x154] ss:$8 sps:$4 sm:$0xff]  }
  0x66   : > { %v897_v43 = vcombine.low %v436_v41, %v876_v18  ;;  %v1398_v0 = vld [vmem:[#allocation2 + $0x184] ss:$8 sps:$4 sm:$0xff]   ;;  %v438_v20 = vcombine.low %v1673_v10, %v1675_v11  ;;  %v481_v13 = vrot.slane %v473_v12, %v1658_v5  ;;  %v488_v24 = vrot.slane %v474_v6, %v1658_v5  ;;  %v1451_v25 = vld [vmem:[#allocation2 + $0x150] ss:$8 sps:$4 sm:$0xff]   ;;  %v1396_v17 = vld [vmem:[#allocation2 + $0x180] ss:$8 sps:$4 sm:$0xff]  }
  0x67   : > { %895 = vrot.lane.b32.xlu1 %v894_v37, %s1547_s21  ;;  %v380_v28 = vcombine.low %v372_v38, %v1828_v39  ;;  %646 = vmatpush1.bf16.msra.mxu1 %v1409_v42  ;;  %v1443_v23 = vld [vmem:[#allocation2 + $0x144] ss:$8 sps:$4 sm:$0xff]   ;;  %v445_v21 = vrot.slane %v437_v19, %v1658_v5  ;;  %v877_v22 = vcombine.low %v1675_v11, %v1689_v15  ;;  %v1457_v11 = vld [vmem:[#allocation2 + $0x160] ss:$8 sps:$4 sm:$0xff]   ;;  %v1461_v15 = vld [vmem:[#allocation2 + $0x174] ss:$8 sps:$4 sm:$0xff]  }
  0x68   : > { %v1838_v7 = vrot.slane %v897_v43, %v1658_v5  ;;  %647 = vmatprep.subr.bf16.mxu1 %v1413_v45  ;;  %824 = vmatpush1.bf16.msra.mxu0 %v1383_v44  ;;  %v452_v14 = vrot.slane %v438_v20, %v1658_v5  ;;  %v489_v26 = vcombine.low %v481_v13, %v488_v24  ;;  %v1455_v27 = vld [vmem:[#allocation2 + $0x164] ss:$8 sps:$4 sm:$0xff]   ;;  %v1463_v29 = vld [vmem:[#allocation2 + $0x170] ss:$8 sps:$4 sm:$0xff]   ;;  %v1406_v53 = vld [vmem:[#allocation2 + $0x194] ss:$8 sps:$4 sm:$0xff]  }
  0x69   : > { %1281 = vmatprep.mubr.msk.bf16.mxu0 %vm381_vm14, %v380_v28  ;;  %825 = vmatprep.subr.bf16.mxu0 %v1384_v46  ;;  %v1856_v16 = vrot.slane %v877_v22, %v1658_v5  ;;  %v1404_v31 = vld [vmem:[#allocation2 + $0x190] ss:$8 sps:$4 sm:$0xff]   ;;  %v1412_v32 = vld [vmem:[#allocation2 + $0x1a4] ss:$8 sps:$4 sm:$0xff]   ;;  %v1410_v35 = vld [vmem:[#allocation2 + $0x1a0] ss:$8 sps:$4 sm:$0xff]  }
  0x6a   : > { %v905_v50 = vcombine.low %v1828_v39, %v1838_v7  ;;  %v453_v9 = vcombine.low %v445_v21, %v452_v14  ;;  %1256 = vmatprep.mubr.msk.bf16.mxu1 %vm381_vm14, %v489_v26  ;;  %v1418_v47 = vld [vmem:[#allocation2 + $0x1b4] ss:$8 sps:$4 sm:$0xff]   ;;  %v1424_v36 = vld [vmem:[#allocation2 + $0x1c4] ss:$8 sps:$4 sm:$0xff]   ;;  %v1422_v37 = vld [vmem:[#allocation2 + $0x1c0] ss:$8 sps:$4 sm:$0xff]  }
  0x6b   : > { %648 = vmatpush1.bf16.msra.mxu1 %v1415_v48  ;;  %v885_v10 = vcombine.low %v1779_v51, %v1856_v16  ;;  %v1430_v38 = vld [vmem:[#allocation2 + $0x1d4] ss:$8 sps:$4 sm:$0xff]   ;;  %v1428_v39 = vld [vmem:[#allocation2 + $0x1d0] ss:$8 sps:$4 sm:$0xff]   ;;  %v1436_v40 = vld [vmem:[#allocation2 + $0x1e4] ss:$8 sps:$4 sm:$0xff]  }
  0x6c   : > { %649 = vmatprep.subr.bf16.mxu1 %v1419_v52  ;;  %826 = vmatpush1.bf16.msra.mxu0 %v1386_v54  ;;  %v1434_v41 = vld [vmem:[#allocation2 + $0x1e0] ss:$8 sps:$4 sm:$0xff]   ;;  %v1442_v18 = vld [vmem:[#allocation2 + $0x1f4] ss:$8 sps:$4 sm:$0xff]   ;;  %v1440_v42 = vld [vmem:[#allocation2 + $0x1f0] ss:$8 sps:$4 sm:$0xff]  }
  0x6d   : > { %827 = vmatprep.subr.bf16.mxu0 %v1387_v55  ;;  %v1448_v28 = vld [vmem:[#allocation2 + $0x204] ss:$8 sps:$4 sm:$0xff]   ;;  %v1446_v43 = vld [vmem:[#allocation2 + $0x200] ss:$8 sps:$4 sm:$0xff]   ;;  %v1454_v44 = vld [vmem:[#allocation2 + $0x214] ss:$8 sps:$4 sm:$0xff]  }
  0x6e   : > { %v1452_v45 = vld [vmem:[#allocation2 + $0x210] ss:$8 sps:$4 sm:$0xff]   ;;  %v1460_v46 = vld [vmem:[#allocation2 + $0x224] ss:$8 sps:$4 sm:$0xff]   ;;  %v1458_v7 = vld [vmem:[#allocation2 + $0x220] ss:$8 sps:$4 sm:$0xff]  }
  0x6f   : > { %650 = vmatpush1.bf16.msra.mxu1 %v1421_v56  ;;  %v1466_v48 = vld [vmem:[#allocation2 + $0x234] ss:$8 sps:$4 sm:$0xff]  }
  0x70   : > { %651 = vmatprep.subr.bf16.mxu1 %v1425_v57  ;;  %828 = vmatpush1.bf16.msra.mxu0 %v1389_v58 }
  0x71   : > { %829 = vmatprep.subr.bf16.mxu0 %v1390_v60  ;;  %v1108_v60 = vsub.s32 0, %v1654_v3 }
  0x73   : > { %652 = vmatpush1.bf16.msra.mxu1 %v1427_v61  ;;  %v1104_v61 = vld [vmem:[#allocation4] sm:$0x3] }
  0x74   : > { %653 = vmatprep.subr.bf16.mxu1 %v1431_v62  ;;  %830 = vmatpush1.bf16.msra.mxu0 %v1394_v63  ;;  %v1112_v62 = vsub.s32 1, %v1654_v3  ;;  %v1109_v63 = vrot.slane %v1104_v61, %v1108_v60 }
  0x75   : > { %1057 = vmatprep.subr.bf16.mxu0 %v1398_v0 }
  0x77   : > { %654 = vmatpush1.bf16.msra.mxu1 %v1433_v1  ;;  %v1113_v1 = vrot.slane %v1104_v61, %v1112_v62 }
  0x78   : > { %655 = vmatprep.subr.bf16.mxu1 %v1437_v2 }
  0x7b   : > { %656 = vmatpush1.bf16.msra.mxu1 %v1439_v4 }
  0x7c   : > { %657 = vmatprep.subr.bf16.mxu1 %v1443_v23 }
  0x7f   : > { %658 = vmatpush1.bf16.msra.mxu1 %v1445_v49 }
  0x80   : > { %659 = vmatprep.subr.bf16.mxu1 %v1449_v8 }
  0x83   : > { %660 = vmatpush1.bf16.msra.mxu1 %v1451_v25 }
  0x84   : > { %661 = vmatprep.subr.bf16.mxu1 %v1455_v27 }
  0x87   : > { %662 = vmatpush1.bf16.msra.mxu1 %v1457_v11 }
  0x88   : > { %663 = vmatprep.subr.bf16.mxu1 %v1461_v15 }
  0x8b   : > { %664 = vmatpush1.bf16.msra.mxu1 %v1463_v29 }
  0xd3   : > { %v363_v5 = vpop.permute.xlu0 %362 }
  0xd4   : > { %v384_v30 = vsel %vm381_vm14, %v344_v59, %v363_v5  ;;  %v1416_v59 = vld [vmem:[#allocation2 + $0x1b0] ss:$8 sps:$4 sm:$0xff]  }
  0xd5   : > { %840 = vmatmul.mubr.bf16.vlgmr.msra.gmra.mrb[0].mxu0 %v384_v30 }
  0xd6   : > { %1058 = vmatpush1.bf16.msra.mxu0 %v1396_v17  ;;  %1307 = vmatprep.mubr.msk.bf16.mxu0 %vm381_vm14, %v905_v50  ;;  %v1464_v50 = vld [vmem:[#allocation2 + $0x230] ss:$8 sps:$4 sm:$0xff]  }
  0xd7   : > { %1059 = vmatprep.subr.bf16.mxu0 %v1406_v53  ;;  %v472_v33 = vpop.permute.xlu0 %471 }
  0xd8   : > { %v492_v34 = vsel %vm381_vm14, %v453_v9, %v472_v33 }
  0xd9   : > { %674 = vmatmul.mubr.bf16.vlgmr.msra.gmra.mrb[0].mxu1 %v492_v34  ;;  %v896_v52 = vpop.permute.xlu1 %895 }
  0xda   : > { %1060 = vmatpush1.bf16.msra.mxu0 %v1404_v31  ;;  %v908_v54 = vsel %vm381_vm14, %v885_v10, %v896_v52 }
  0xdb   : > { %1061 = vmatprep.subr.bf16.mxu0 %v1412_v32 }
  0xde   : > { %1062 = vmatpush1.bf16.msra.mxu0 %v1410_v35 }
  0xdf   : > { %1063 = vmatprep.subr.bf16.mxu0 %v1418_v47 }
  0xe2   : > { %1064 = vmatpush1.bf16.msra.mxu0 %v1416_v59 }
  0xe3   : > { %1065 = vmatprep.subr.bf16.mxu0 %v1424_v36 }
  0xe6   : > { %1066 = vmatpush1.bf16.msra.mxu0 %v1422_v37 }
  0xe7   : > { %1067 = vmatprep.subr.bf16.mxu0 %v1430_v38 }
  0xea   : > { %1068 = vmatpush1.bf16.msra.mxu0 %v1428_v39 }
  0xeb   : > { %1069 = vmatprep.subr.bf16.mxu0 %v1436_v40 }
  0xee   : > { %1070 = vmatpush1.bf16.msra.mxu0 %v1434_v41 }
  0xef   : > { %1071 = vmatprep.subr.bf16.mxu0 %v1442_v18 }
  0xf2   : > { %1072 = vmatpush1.bf16.msra.mxu0 %v1440_v42 }
  0xf3   : > { %1073 = vmatprep.subr.bf16.mxu0 %v1448_v28 }
  0xf6   : > { %1074 = vmatpush1.bf16.msra.mxu0 %v1446_v43 }
  0xf7   : > { %1075 = vmatprep.subr.bf16.mxu0 %v1454_v44 }
  0xfa   : > { %1076 = vmatpush1.bf16.msra.mxu0 %v1452_v45 }
  0xfb   : > { %1077 = vmatprep.subr.bf16.mxu0 %v1460_v46 }
  0xfe   : > { %1078 = vmatpush1.bf16.msra.mxu0 %v1458_v7 }
  0xff   : > { %1079 = vmatprep.subr.bf16.mxu0 %v1466_v48 }
 0x102   : > { %1080 = vmatpush1.bf16.msra.mxu0 %v1464_v50 }
 0x105   : > { %1090 = vmatmul.mubr.bf16.vlgmr.msra.gmra.mrb[0].mxu0 %v908_v54 }
 0x1ac   : > { %v675_v55 = vpop.f32.mrb[0].mxu1 }
 0x1ad   : > { %v677_v56 = vpop.f32.mrb[1].mxu1 }
 0x1ae   : > { %v679_v57 = vpop.f32.mrb[2].mxu1 }
 0x1af   : > { %v681_v58 = vpop.f32.mrb[3].mxu1 }
 0x1d8   : > { %v1091_v0 = vpop.f32.mrb[0].mxu0 }
 0x1d9   : > { %v1315_v2 = vadd.f32 %v1091_v0, %v675_v55  ;;  %v1093_v4 = vpop.f32.mrb[1].mxu0 }
 0x1da   : > { %v1316_v12 = vadd.f32 %v1093_v4, %v677_v56  ;;  %v1095_v51 = vpop.f32.mrb[2].mxu0 }
 0x1db   : > { %v1116_v6 = vadd.f32 %v1315_v2, %v1109_v63  ;;  %v1317_v19 = vadd.f32 %v1095_v51, %v679_v57  ;;  %v1097_v23 = vpop.f32.mrb[3].mxu0 }
 0x1dc   : > { %v1117_v20 = vadd.f32 %v1316_v12, %v1113_v1  ;;  %v1318_v13 = vadd.f32 %v1097_v23, %v681_v58 }
 0x1dd   : > { %v1120_v24 = vmax.f32 %v1116_v6, 0.0  ;;  %v1118_v21 = vadd.f32 %v1317_v19, %v1109_v63 }
 0x1de   : > { %v1121_v14 = vmax.f32 %v1117_v20, 0.0  ;;  %v1119_v22 = vadd.f32 %v1318_v13, %v1113_v1 }
 0x1df   : > { %v1122_v3 = vmax.f32 %v1118_v21, 0.0 }
 0x1e0   : > { %v1313_v49 = vpack.c.bf16 %v1121_v14, %v1120_v24  ;;  %v1123_v26 = vmax.f32 %v1119_v22, 0.0 }
 0x1e2   : > { %1136 = vst [vmem:[%s198_s25] sm:$0xff] %v1313_v49  ;;  %v1314_v8 = vpack.c.bf16 %v1123_v26, %v1122_v3 }
 0x1e4   : > { %1137 = vst [vmem:[%s198_s25 + $0x8] sm:$0xff] %v1314_v8 }
 0x1e5 PF: > { %s15_s12 = sadd.s32 1, %s1540_s12  }
 0x1e6   : > { %p12_p5 = scmp.ge.s32.totalorder %s15_s12, 4  }
 0x1e8   :  { %14 = sbr.rel (!%p12_p5) target bundleno = 2 (0x2), region = 71 }
 0x1ef   :  { %1159 = vsyncpa [#allocation3], 1 }
 0x1f0   :  { %1161 = vsyncpa [#allocation3 + $0x1], 1 }
 0x1f1   :  { %1162 = vsyncpa [#allocation5], 1 }

// kernel: base_decoder_forward.5
= control target key start
LH: loop header
LB: loop body
LE: loop exit
PB: predicated region body
PF: predicated region fallthrough
CT: control target
= control target key end

     0   :  { %10 = vsyncpa [#allocation3], 0  ;;  %s4154_s0 = inlined_call_operand.vmem [shape: bf16[2,1,32], index: 0, kind: input, shape index: {}]   ;;  %s4155_s1 = inlined_call_operand.hbm [shape: bf16[32,256], index: 1, kind: input, shape index: {}]   ;;  %s4156_s2 = inlined_call_operand.hbm [shape: f32[1,256], index: 2, kind: input, shape index: {}]   ;;  %s4157_s3 = inlined_call_operand.hbm [shape: bf16[256,2304], index: 3, kind: input, shape index: {}]   ;;  %s4158_s4 = inlined_call_operand.hbm [shape: f32[1,2304], index: 4, kind: input, shape index: {}]   ;;  %s4159_s5 = inlined_call_operand.vmem [shape: bf16[2,1,2304], index: 5, kind: output, shape index: {}]  }
   0x1   :  { %11 = vsyncpa [#allocation5], 0 }
   0x2   :  { %12 = vsyncpa [#allocation8], 0  ;;  %s3836_s18 = smov 0  }
   0x3 LB: > { %s3796_s19 = smov [#allocation4]   ;;  %s3842_s21 = sadd.s32 4294967295, %s3794_s18   ;;  %s3794_s18 = sphi %s3836_s18, %s18_s18  }
   0x4   : > { %s185_s20 = sshll.u32 %s3796_s19, 4  ;;  %p2855_p0 = scmp.ge.s32.totalorder %s3794_s18, 1  ;;  %s186_s20 = int_to_ptr.vmem [resolvable:$true] %s185_s20 }
   0x5   : > { %p159_p1 = scmp.lt.s32.totalorder %s3794_s18, 3  ;;  %p4160_p2 = scmp.eq.s32.totalorder %s3842_s21, 0 }
   0x6   : > { %s3797_s23 = smov [#allocation2]   ;;  %s3798_s26 = smov [#allocation6]  }
   0x7   : > { %p3847_p3 = pnand %p2855_p0, %p159_p1  ;;  %s171_s24 = sshll.u32 %s3797_s23, 4  ;;  %s3853_s24 = int_to_ptr.vmem [resolvable:$true] %s171_s24 }
   0x8   : > { %s195_s27 = sshll.u32 %s3798_s26, 4  ;;  %s3664_s30 = scalar_lea.hbm %s4156_s2, 32  ;;  %s3861_s27 = int_to_ptr.vmem [resolvable:$true] %s195_s27 }
   0x9   : > { %s4162_s22 = scalar_select %p3847_p3, 1, 0 }
   0xa   : > { %p3187_p4 = pneg %p3847_p3  ;;  %p3665_p6 = scmp.ne.s32.totalorder %s4156_s2, %s3664_s30 }
   0xb   : > { %p3671_p10 = scmp.lt.u32.totalorder %s3664_s30, %s4156_s2 }
   0xc   : > { %p3857_p5 = pnand %p4160_p2, %p3187_p4 }
   0xe   : > { %p3871_p7 = pneg %p3857_p5 }
  0x10   : > { %p3667_p8 = pnand %p3871_p7, %p3665_p6 }
  0x12   : > { %p3668_p9 = pneg %p3667_p8 }
  0x14   : > { %p3673_p11 = pnand %p3671_p10, %p3668_p9 }
  0x16   : > { %3676 = shalt.err (!%p3673_p11)
}
  0x17   : > { %s3677_s11 = scalar_lea.vmem %s186_s20, 32  ;;  %p3685_p1 = scmp.lt.s32.totalorder %s186_s20, %s186_s20 }
  0x18   : > { %p3678_p12 = scmp.ne.s32.totalorder %s186_s20, %s3677_s11  ;;  %p3686_p4 = scmp.lt.s32.totalorder %s3677_s11, %s3677_s11 }
  0x1a   : > { %p3680_p13 = pnand %p3678_p12, %p3871_p7  ;;  %p3687_p2 = por %p3686_p4, %p3685_p1 }
  0x1c   : > { %p3681_p0 = pneg %p3680_p13 }
  0x1e   : > { %p3688_p3 = pnand %p3687_p2, %p3681_p0 }
  0x20   : > { %3691 = shalt.err (!%p3688_p3)
}
  0x21   : > { %3193 = dma.hbm_to_vmem [thread:$0]  (!%p3857_p5), %s4156_s2, 32, %s186_s20, [#allocation5]  }
  0x22   : > { %s3692_s16 = scalar_lea.hbm %s4155_s1, 512 }
  0x23   : > { %p3693_p6 = scmp.ne.s32.totalorder %s4155_s1, %s3692_s16  ;;  %p3699_p2 = scmp.lt.u32.totalorder %s3692_s16, %s4155_s1 }
  0x25   : > { %p3695_p8 = pnand %p3693_p6, %p3871_p7 }
  0x27   : > { %p3696_p9 = pneg %p3695_p8 }
  0x29   : > { %p3701_p3 = pnand %p3699_p2, %p3696_p9 }
  0x2b   : > { %3704 = shalt.err (!%p3701_p3)
}
  0x2c   : > { %s3705_s20 = scalar_lea.vmem %s3853_s24, 512  ;;  %p3713_p13 = scmp.lt.s32.totalorder %s3853_s24, %s3853_s24 }
  0x2d   : > { %p3706_p10 = scmp.ne.s32.totalorder %s3853_s24, %s3705_s20  ;;  %p3714_p0 = scmp.lt.s32.totalorder %s3705_s20, %s3705_s20 }
  0x2f   : > { %p3708_p11 = pnand %p3706_p10, %p3871_p7  ;;  %p3715_p1 = por %p3714_p0, %p3713_p13 }
  0x31   : > { %p3709_p12 = pneg %p3708_p11 }
  0x33   : > { %p3716_p4 = pnand %p3715_p1, %p3709_p12 }
  0x35   : > { %3719 = shalt.err (!%p3716_p4)
}
  0x36   : > { %s3799_s28 = smov 128   ;;  %s3800_s29 = smov 8  }
  0x37   : > { %3190 = dma.hbm_to_vmem [thread:$0]  (!%p3857_p5), %s4155_s1, 512, %s3853_s24, [#allocation3], %s3799_s28, %s3799_s28, %s3800_s29  }
  0x38   : > { %s3720_s10 = scalar_lea.hbm %s4157_s3, 36864 }
  0x39   : > { %p3721_p6 = scmp.ne.s32.totalorder %s4157_s3, %s3720_s10  ;;  %p3727_p2 = scmp.lt.u32.totalorder %s3720_s10, %s4157_s3 }
  0x3b   : > { %p3723_p8 = pnand %p3721_p6, %p3871_p7 }
  0x3d   : > { %p3724_p9 = pneg %p3723_p8 }
  0x3f   : > { %p3729_p3 = pnand %p3727_p2, %p3724_p9 }
  0x41   : > { %3732 = shalt.err (!%p3729_p3)
}
  0x42   : > { %s3733_s24 = scalar_lea.vmem %s3861_s27, 36864  ;;  %p3741_p13 = scmp.lt.s32.totalorder %s3861_s27, %s3861_s27 }
  0x43   : > { %p3734_p10 = scmp.ne.s32.totalorder %s3861_s27, %s3733_s24  ;;  %p3742_p0 = scmp.lt.s32.totalorder %s3733_s24, %s3733_s24 }
  0x45   : > { %p3736_p11 = pnand %p3734_p10, %p3871_p7  ;;  %p3743_p1 = por %p3742_p0, %p3741_p13 }
  0x47   : > { %p3737_p12 = pneg %p3736_p11 }
  0x49   : > { %p3744_p4 = pnand %p3743_p1, %p3737_p12 }
  0x4b   : > { %3747 = shalt.err (!%p3744_p4)
}
  0x4c   : > { %s3801_s15 = smov 1152   ;;  %s3802_s16 = smov 72  }
  0x4d   : > { %3196 = dma.hbm_to_vmem [thread:$0]  (!%p3857_p5), %s4157_s3, 36864, %s3861_s27, [#allocation5], %s3801_s15, %s3801_s15, %s3802_s16  }
  0x4e   : > { %s3803_s23 = smov [#allocation7]   ;;  %s3748_s29 = scalar_lea.hbm %s4158_s4, 288 }
  0x4f   : > { %s209_s26 = sshll.u32 %s3803_s23, 4  ;;  %p3749_p6 = scmp.ne.s32.totalorder %s4158_s4, %s3748_s29  ;;  %s210_s26 = int_to_ptr.vmem [resolvable:$true] %s209_s26 }
  0x50   : > { %p3755_p2 = scmp.lt.u32.totalorder %s3748_s29, %s4158_s4 }
  0x51   : > { %p3751_p8 = pnand %p3749_p6, %p3871_p7 }
  0x53   : > { %p3752_p9 = pneg %p3751_p8 }
  0x55   : > { %p3757_p3 = pnand %p3755_p2, %p3752_p9 }
  0x57   : > { %3760 = shalt.err (!%p3757_p3)
}
  0x58   : > { %s3761_s27 = scalar_lea.vmem %s210_s26, 288  ;;  %p3769_p13 = scmp.lt.s32.totalorder %s210_s26, %s210_s26 }
  0x59   : > { %p3762_p10 = scmp.ne.s32.totalorder %s210_s26, %s3761_s27  ;;  %p3770_p0 = scmp.lt.s32.totalorder %s3761_s27, %s3761_s27 }
  0x5b   : > { %p3764_p11 = pnand %p3762_p10, %p3871_p7  ;;  %p3771_p1 = por %p3770_p0, %p3769_p13 }
  0x5d   : > { %p3765_p12 = pneg %p3764_p11 }
  0x5f   : > { %p3772_p4 = pnand %p3771_p1, %p3765_p12 }
  0x61   : > { %3775 = shalt.err (!%p3772_p4)
}
  0x62   : > { %3199 = dma.hbm_to_vmem [thread:$0]  (!%p3857_p5), %s4158_s4, 288, %s210_s26, [#allocation8]  }
  0x63   : > { %p4165_p6 = scmp.ne.s32.totalorder %s4162_s22, 0 }
  0x64   : > { %p4166_p8 = scmp.eq.s32.totalorder (!%p4165_p6), %s3842_s21, 0 }
  0x65   : > { %228 = sbr.rel (%p4165_p6) target bundleno = 826 (0x33a), region = 40 }
  0x6c   : > { %3781 = dma.done.wait (%p4166_p8), [#allocation3], 512   ;;  %p4167_p7 = pmov %p4166_p8 }
  0x6e   : > { %3783 = vsyncadd (%p4167_p7), [#allocation3], 4294966784  ;;  %p4168_p9 = pmov %p4167_p7 }
  0x6f   : > { %p4169_p2 = pmov %p4167_p7 }
  0x70   : > { %3785 = dma.done.wait (%p4168_p9), [#allocation5], 36896  }
  0x71   : > { %3787 = vsyncadd (%p4169_p2), [#allocation5], 4294930400  ;;  %p4170_p3 = pmov %p4169_p2 }
  0x72   : > { %p4171_p5 = pmov %p4169_p2 }
  0x73   : > { %3789 = dma.done.wait (%p4170_p3), [#allocation8], 288  }
  0x74   : > { %3791 = vsyncadd (%p4171_p5), [#allocation8], 4294967008  ;;  %v3804_v0 = vmov 0   ;;  %p265_p10 = scmp.lt.s32.totalorder %s3842_s21, 1  ;;  %v3226_v1 = vld [vmem:[#allocation2 + $0x4] ss:$8 sps:$4 sm:$0xff]  }
  0x75   : > { %346 = vmatprep.mubr.bf16.mxu0 %v3804_v0  ;;  %v3228_v2 = vld [vmem:[#allocation2] ss:$8 sps:$4 sm:$0xff]   ;;  %314 = vmatprep.subr.bf16.mxu0 %v3226_v1  ;;  %v3229_v3 = vld [vmem:[#allocation2 + $0x14] ss:$8 sps:$4 sm:$0xff]   ;;  %v3231_v4 = vld [vmem:[#allocation2 + $0x10] ss:$8 sps:$4 sm:$0xff]  }
  0x76   : > { %s4189_s21 = smov (!%p265_p10, %s3842_s21), 1  ;;  %315 = vmatpush1.bf16.msra.mxu0 %v3228_v2  ;;  %v3232_v5 = vld [vmem:[#allocation6 + $0x4] ss:$72 sps:$4 sm:$0xff]   ;;  %v3234_v7 = vld [vmem:[#allocation6 + $0x8] ss:$72 sps:$4 sm:$0xff]   ;;  %vm310_vm0 = vcmask 261120  }
  0x77   : > { %s267_s8 = scalar_lea.vmem %s4154_s0, %s4189_s21  ;;  %316 = vmatprep.subr.bf16.mxu0 %v3229_v3  ;;  %v3236_v8 = vld [vmem:[#allocation6 + $0xc] ss:$72 sps:$4 sm:$0xff]   ;;  %2183 = vmatprep.subr.bf16.mxu1 %v3232_v5  ;;  %v3237_v9 = vld [vmem:[#allocation6] ss:$72 sps:$4 sm:$0xff]   ;;  %v3242_v11 = vld [vmem:[#allocation6 + $0x9c] ss:$72 sps:$4 sm:$0xff]  }
  0x78   : > { %v273_v6 = vld [vmem:[%s267_s8] sm:$0x1]  ;;  %v3238_v10 = vld [vmem:[#allocation6 + $0x94] ss:$72 sps:$4 sm:$0xff]   ;;  %2184 = vmatpush1.bf16.msra.mxu1 %v3237_v9  ;;  %v3243_v12 = vld [vmem:[#allocation6 + $0x90] ss:$72 sps:$4 sm:$0xff]  }
  0x79   : > { %2185 = vmatprep.subr.bf16.mxu1 %v3238_v10  ;;  %v3244_v13 = vld [vmem:[#allocation6 + $0x124] ss:$72 sps:$4 sm:$0xff]   ;;  %v3240_v14 = vld [vmem:[#allocation6 + $0x98] ss:$72 sps:$4 sm:$0xff]   ;;  %v3250_v17 = vld [vmem:[#allocation6 + $0x1b4] ss:$72 sps:$4 sm:$0xff]  }
  0x7a   : > { %317 = vmatpush1.bf16.msra.mxu0 %v3231_v4  ;;  %v3248_v15 = vld [vmem:[#allocation6 + $0x12c] ss:$72 sps:$4 sm:$0xff]   ;;  %v3249_v16 = vld [vmem:[#allocation6 + $0x120] ss:$72 sps:$4 sm:$0xff]   ;;  %v3254_v19 = vld [vmem:[#allocation6 + $0x1bc] ss:$72 sps:$4 sm:$0xff]  }
  0x7b   : > { %2224 = vmatprep.subr.bf16.mxu0 %v3236_v8  ;;  %v3246_v18 = vld [vmem:[#allocation6 + $0x128] ss:$72 sps:$4 sm:$0xff]   ;;  %v3256_v21 = vld [vmem:[#allocation6 + $0x244] ss:$72 sps:$4 sm:$0xff]   ;;  %v3252_v22 = vld [vmem:[#allocation6 + $0x1b8] ss:$72 sps:$4 sm:$0xff]   ;;  %v300_v8 = vlaneseq }
  0x7c   : > { %2186 = vmatpush1.bf16.msra.mxu1 %v3243_v12  ;;  %v3255_v20 = vld [vmem:[#allocation6 + $0x1b0] ss:$72 sps:$4 sm:$0xff]   ;;  %v3260_v23 = vld [vmem:[#allocation6 + $0x24c] ss:$72 sps:$4 sm:$0xff]   ;;  %v3261_v24 = vld [vmem:[#allocation6 + $0x240] ss:$72 sps:$4 sm:$0xff]  }
  0x7d   : > { %2870 = vmatmul.mubr.msk.bf16.vlgmr.msra.gmra.mrb[0].mxu0 %vm310_vm0, %v273_v6  ;;  %2187 = vmatprep.subr.bf16.mxu1 %v3244_v13  ;;  %v3262_v25 = vld [vmem:[#allocation6 + $0x2d4] ss:$72 sps:$4 sm:$0xff]   ;;  %v3258_v26 = vld [vmem:[#allocation6 + $0x248] ss:$72 sps:$4 sm:$0xff]   ;;  %v3268_v29 = vld [vmem:[#allocation6 + $0x364] ss:$72 sps:$4 sm:$0xff]  }
  0x7e   : > { %2225 = vmatpush1.bf16.msra.mxu0 %v3234_v7  ;;  %v3266_v27 = vld [vmem:[#allocation6 + $0x2dc] ss:$72 sps:$4 sm:$0xff]   ;;  %v3267_v28 = vld [vmem:[#allocation6 + $0x2d0] ss:$72 sps:$4 sm:$0xff]   ;;  %v3272_v31 = vld [vmem:[#allocation6 + $0x36c] ss:$72 sps:$4 sm:$0xff]  }
  0x7f   : > { %2226 = vmatprep.subr.bf16.mxu0 %v3242_v11  ;;  %v3264_v30 = vld [vmem:[#allocation6 + $0x2d8] ss:$72 sps:$4 sm:$0xff]   ;;  %v3274_v33 = vld [vmem:[#allocation6 + $0x3f4] ss:$72 sps:$4 sm:$0xff]   ;;  %v3270_v34 = vld [vmem:[#allocation6 + $0x368] ss:$72 sps:$4 sm:$0xff]  }
  0x80   : > { %2188 = vmatpush1.bf16.msra.mxu1 %v3249_v16  ;;  %v3273_v32 = vld [vmem:[#allocation6 + $0x360] ss:$72 sps:$4 sm:$0xff]   ;;  %v3278_v35 = vld [vmem:[#allocation6 + $0x3fc] ss:$72 sps:$4 sm:$0xff]   ;;  %v3279_v36 = vld [vmem:[#allocation6 + $0x3f0] ss:$72 sps:$4 sm:$0xff]  }
  0x81   : > { %2189 = vmatprep.subr.bf16.mxu1 %v3250_v17  ;;  %v3280_v37 = vld [vmem:[#allocation6 + $0x484] ss:$72 sps:$4 sm:$0xff]   ;;  %v3276_v38 = vld [vmem:[#allocation6 + $0x3f8] ss:$72 sps:$4 sm:$0xff]   ;;  %v3286_v41 = vld [vmem:[#allocation6 + $0x514] ss:$72 sps:$4 sm:$0xff]  }
  0x82   : > { %2227 = vmatpush1.bf16.msra.mxu0 %v3240_v14  ;;  %v3284_v39 = vld [vmem:[#allocation6 + $0x48c] ss:$72 sps:$4 sm:$0xff]   ;;  %v3285_v40 = vld [vmem:[#allocation6 + $0x480] ss:$72 sps:$4 sm:$0xff]   ;;  %v3290_v43 = vld [vmem:[#allocation6 + $0x51c] ss:$72 sps:$4 sm:$0xff]  }
  0x83   : > { %2228 = vmatprep.subr.bf16.mxu0 %v3248_v15  ;;  %v3282_v42 = vld [vmem:[#allocation6 + $0x488] ss:$72 sps:$4 sm:$0xff]   ;;  %v3288_v45 = vld [vmem:[#allocation6 + $0x518] ss:$72 sps:$4 sm:$0xff]   ;;  %v3292_v46 = vld [vmem:[#allocation6 + $0x5a4] ss:$72 sps:$4 sm:$0xff]  }
  0x84   : > { %2190 = vmatpush1.bf16.msra.mxu1 %v3255_v20  ;;  %v3291_v44 = vld [vmem:[#allocation6 + $0x510] ss:$72 sps:$4 sm:$0xff]   ;;  %v3296_v47 = vld [vmem:[#allocation6 + $0x5ac] ss:$72 sps:$4 sm:$0xff]   ;;  %v3297_v48 = vld [vmem:[#allocation6 + $0x5a0] ss:$72 sps:$4 sm:$0xff]  }
  0x85   : > { %2191 = vmatprep.subr.bf16.mxu1 %v3256_v21  ;;  %v3298_v49 = vld [vmem:[#allocation6 + $0x634] ss:$72 sps:$4 sm:$0xff]   ;;  %v3294_v50 = vld [vmem:[#allocation6 + $0x5a8] ss:$72 sps:$4 sm:$0xff]   ;;  %v3304_v53 = vld [vmem:[#allocation6 + $0x6c4] ss:$72 sps:$4 sm:$0xff]  }
  0x86   : > { %2229 = vmatpush1.bf16.msra.mxu0 %v3246_v18  ;;  %v3302_v51 = vld [vmem:[#allocation6 + $0x63c] ss:$72 sps:$4 sm:$0xff]   ;;  %v3303_v52 = vld [vmem:[#allocation6 + $0x630] ss:$72 sps:$4 sm:$0xff]   ;;  %v3308_v55 = vld [vmem:[#allocation6 + $0x6cc] ss:$72 sps:$4 sm:$0xff]  }
  0x87   : > { %2230 = vmatprep.subr.bf16.mxu0 %v3254_v19  ;;  %v3300_v54 = vld [vmem:[#allocation6 + $0x638] ss:$72 sps:$4 sm:$0xff]   ;;  %v3310_v57 = vld [vmem:[#allocation6 + $0x754] ss:$72 sps:$4 sm:$0xff]   ;;  %v3306_v58 = vld [vmem:[#allocation6 + $0x6c8] ss:$72 sps:$4 sm:$0xff]  }
  0x88   : > { %2192 = vmatpush1.bf16.msra.mxu1 %v3261_v24  ;;  %v3309_v56 = vld [vmem:[#allocation6 + $0x6c0] ss:$72 sps:$4 sm:$0xff]   ;;  %v3314_v59 = vld [vmem:[#allocation6 + $0x75c] ss:$72 sps:$4 sm:$0xff]   ;;  %v3315_v60 = vld [vmem:[#allocation6 + $0x750] ss:$72 sps:$4 sm:$0xff]  }
  0x89   : > { %2193 = vmatprep.subr.bf16.mxu1 %v3262_v25  ;;  %v3312_v61 = vld [vmem:[#allocation6 + $0x758] ss:$72 sps:$4 sm:$0xff]   ;;  %v3316_v62 = vld [vmem:[#allocation6 + $0x7e4] ss:$72 sps:$4 sm:$0xff]   ;;  %v3318_v0 = vld [vmem:[#allocation6 + $0x7e8] ss:$72 sps:$4 sm:$0xff]  }
  0x8a   : > { %2231 = vmatpush1.bf16.msra.mxu0 %v3252_v22  ;;  %v3320_v63 = vld [vmem:[#allocation6 + $0x7ec] ss:$72 sps:$4 sm:$0xff]   ;;  %v3321_v1 = vld [vmem:[#allocation6 + $0x7e0] ss:$72 sps:$4 sm:$0xff]   ;;  %v3326_v3 = vld [vmem:[#allocation6 + $0x87c] ss:$72 sps:$4 sm:$0xff]  }
  0x8b   : > { %2232 = vmatprep.subr.bf16.mxu0 %v3260_v23  ;;  %v3322_v2 = vld [vmem:[#allocation6 + $0x874] ss:$72 sps:$4 sm:$0xff]   ;;  %v3324_v4 = vld [vmem:[#allocation6 + $0x878] ss:$72 sps:$4 sm:$0xff]   ;;  %v3973_v9 = vshrl.u32 %v300_v8, 7  ;;  %vm2722_vm1 = vcmask 1040384  }
  0x8c   : > { %2194 = vmatpush1.bf16.msra.mxu1 %v3267_v28  ;;  %v3327_v5 = vld [vmem:[#allocation6 + $0x870] ss:$72 sps:$4 sm:$0xff]   ;;  %v3330_v6 = vld [vmem:[#allocation6 + $0x14] ss:$72 sps:$4 sm:$0xff]   ;;  %vm2723_vm2 = vsmask.f32 256 }
  0x8d   : > { %2195 = vmatprep.subr.bf16.mxu1 %v3268_v29  ;;  %v3333_v7 = vld [vmem:[#allocation6 + $0x1c] ss:$72 sps:$4 sm:$0xff]   ;;  %v3976_v10 = vsub.s32 0, %v3973_v9  ;;  %v3979_v12 = vsub.s32 1, %v3973_v9  ;;  %v3328_v24 = vld [vmem:[#allocation6 + $0x10] ss:$72 sps:$4 sm:$0xff]   ;;  %vm4026_vm5 = vmand %vm2722_vm1, %vm2723_vm2 }
  0x8e   : > { %2233 = vmatpush1.bf16.msra.mxu0 %v3258_v26  ;;  %v278_v11 = vld [vmem:[#allocation4] sm:$0x3]  ;;  %v3331_v25 = vld [vmem:[#allocation6 + $0x18] ss:$72 sps:$4 sm:$0xff]   ;;  %v3339_v28 = vld [vmem:[#allocation6 + $0xac] ss:$72 sps:$4 sm:$0xff]  }
  0x8f   : > { %2234 = vmatprep.subr.bf16.mxu0 %v3266_v27  ;;  %v303_v13 = vrot.slane %v278_v11, %v3976_v10  ;;  %v307_v14 = vrot.slane %v278_v11, %v3979_v12  ;;  %v3336_v27 = vld [vmem:[#allocation6 + $0xa4] ss:$72 sps:$4 sm:$0xff]   ;;  %v3334_v29 = vld [vmem:[#allocation6 + $0xa0] ss:$72 sps:$4 sm:$0xff]   ;;  %v3400_v11 = vld [vmem:[#allocation6 + $0x6d0] ss:$72 sps:$4 sm:$0xff]  }
  0x90   : > { %2196 = vmatpush1.bf16.msra.mxu1 %v3273_v32  ;;  %v3345_v32 = vld [vmem:[#allocation6 + $0x13c] ss:$72 sps:$4 sm:$0xff]   ;;  %vm2725_vm3 = vcmask 1041409   ;;  %vm2726_vm4 = vsmask.f32 1280  ;;  %vm2729_vm7 = vcmask 1042434  }
  0x91   : > { %2197 = vmatprep.subr.bf16.mxu1 %v3274_v33  ;;  %v3340_v33 = vld [vmem:[#allocation6 + $0x130] ss:$72 sps:$4 sm:$0xff]   ;;  %v3405_v8 = vld [vmem:[#allocation6 + $0x6dc] ss:$72 sps:$4 sm:$0xff]   ;;  %vm4030_vm6 = vmand %vm2725_vm3, %vm2726_vm4  ;;  %vm2730_vm8 = vsmask.f32 2304 }
  0x92   : > { %2235 = vmatpush1.bf16.msra.mxu0 %v3264_v30  ;;  %v3337_v30 = vld [vmem:[#allocation6 + $0xa8] ss:$72 sps:$4 sm:$0xff]   ;;  %vm2728_vm9 = vmor %vm4030_vm6, %vm4026_vm5  ;;  %vm2733_vm11 = vcmask 1043459   ;;  %vm2734_vm12 = vsmask.f32 3328  ;;  %vm2737_vm15 = vcmask 1044484  }
  0x93   : > { %2236 = vmatprep.subr.bf16.mxu0 %v3272_v31  ;;  %v3342_v31 = vld [vmem:[#allocation6 + $0x134] ss:$72 sps:$4 sm:$0xff]   ;;  %vm2731_vm10 = vmand %vm2729_vm7, %vm2730_vm8  ;;  %vm2738_vm0 = vsmask.f32 4352  ;;  %vm2741_vm3 = vcmask 1045509   ;;  %s3170_s12 = smul.u32 18, %s4189_s21 }
  0x94   : > { %2198 = vmatpush1.bf16.msra.mxu1 %v3279_v36  ;;  %v3351_v36 = vld [vmem:[#allocation6 + $0x1cc] ss:$72 sps:$4 sm:$0xff]   ;;  %vm4045_vm13 = vmor %vm2731_vm10, %vm2728_vm9  ;;  %vm2742_vm4 = vsmask.f32 5376  ;;  %vm2745_vm10 = vcmask 1046534  }
  0x95   : > { %2199 = vmatprep.subr.bf16.mxu1 %v3280_v37  ;;  %v3346_v37 = vld [vmem:[#allocation6 + $0x1c0] ss:$72 sps:$4 sm:$0xff]   ;;  %vm4051_vm14 = vmand %vm2733_vm11, %vm2734_vm12  ;;  %vm2746_vm11 = vsmask.f32 6400  ;;  %s4093_s24 = scalar_lea.vmem %s4159_s5, %s3170_s12 }
  0x96   : > { %2237 = vmatpush1.bf16.msra.mxu0 %v3270_v34  ;;  %v3343_v34 = vld [vmem:[#allocation6 + $0x138] ss:$72 sps:$4 sm:$0xff]   ;;  %vm2736_vm1 = vmor %vm4051_vm14, %vm4045_vm13  ;;  %vm2749_vm14 = vcmask 1047559  }
  0x97   : > { %2238 = vmatprep.subr.bf16.mxu0 %v3278_v35  ;;  %v3348_v35 = vld [vmem:[#allocation6 + $0x1c4] ss:$72 sps:$4 sm:$0xff]   ;;  %vm2739_vm2 = vmand %vm2737_vm15, %vm2738_vm0  ;;  %vm2750_vm15 = vsmask.f32 7424 }
  0x98   : > { %2200 = vmatpush1.bf16.msra.mxu1 %v3285_v40  ;;  %v3357_v40 = vld [vmem:[#allocation6 + $0x25c] ss:$72 sps:$4 sm:$0xff]   ;;  %vm4071_vm7 = vmor %vm2739_vm2, %vm2736_vm1 }
  0x99   : > { %2201 = vmatprep.subr.bf16.mxu1 %v3286_v41  ;;  %v3352_v41 = vld [vmem:[#allocation6 + $0x250] ss:$72 sps:$4 sm:$0xff]   ;;  %vm4075_vm8 = vmand %vm2741_vm3, %vm2742_vm4 }
  0x9a   : > { %2239 = vmatpush1.bf16.msra.mxu0 %v3276_v38  ;;  %v3349_v38 = vld [vmem:[#allocation6 + $0x1c8] ss:$72 sps:$4 sm:$0xff]   ;;  %vm2744_vm12 = vmor %vm4075_vm8, %vm4071_vm7 }
  0x9b   : > { %2240 = vmatprep.subr.bf16.mxu0 %v3284_v39  ;;  %v3354_v39 = vld [vmem:[#allocation6 + $0x254] ss:$72 sps:$4 sm:$0xff]   ;;  %vm2747_vm13 = vmand %vm2745_vm10, %vm2746_vm11 }
  0x9c   : > { %2202 = vmatpush1.bf16.msra.mxu1 %v3291_v44  ;;  %v3363_v44 = vld [vmem:[#allocation6 + $0x2ec] ss:$72 sps:$4 sm:$0xff]   ;;  %vm4086_vm0 = vmor %vm2747_vm13, %vm2744_vm12 }
  0x9d   : > { %2203 = vmatprep.subr.bf16.mxu1 %v3292_v46  ;;  %v3361_v46 = vld [vmem:[#allocation6 + $0x2e8] ss:$72 sps:$4 sm:$0xff]   ;;  %vm4095_vm1 = vmand %vm2749_vm14, %vm2750_vm15 }
  0x9e   : > { %2241 = vmatpush1.bf16.msra.mxu0 %v3282_v42  ;;  %v3355_v42 = vld [vmem:[#allocation6 + $0x258] ss:$72 sps:$4 sm:$0xff]   ;;  %vm2752_vm2 = vmor %vm4095_vm1, %vm4086_vm0 }
  0x9f   : > { %2242 = vmatprep.subr.bf16.mxu0 %v3290_v43  ;;  %v3360_v43 = vld [vmem:[#allocation6 + $0x2e4] ss:$72 sps:$4 sm:$0xff]  }
  0xa0   : > { %2204 = vmatpush1.bf16.msra.mxu1 %v3297_v48  ;;  %v3369_v48 = vld [vmem:[#allocation6 + $0x37c] ss:$72 sps:$4 sm:$0xff]  }
  0xa1   : > { %2205 = vmatprep.subr.bf16.mxu1 %v3298_v49  ;;  %v3364_v49 = vld [vmem:[#allocation6 + $0x370] ss:$72 sps:$4 sm:$0xff]  }
  0xa2   : > { %2243 = vmatpush1.bf16.msra.mxu0 %v3288_v45  ;;  %v3358_v45 = vld [vmem:[#allocation6 + $0x2e0] ss:$72 sps:$4 sm:$0xff]  }
  0xa3   : > { %2244 = vmatprep.subr.bf16.mxu0 %v3296_v47  ;;  %v3366_v47 = vld [vmem:[#allocation6 + $0x374] ss:$72 sps:$4 sm:$0xff]  }
  0xa4   : > { %2206 = vmatpush1.bf16.msra.mxu1 %v3303_v52  ;;  %v3375_v52 = vld [vmem:[#allocation6 + $0x40c] ss:$72 sps:$4 sm:$0xff]  }
  0xa5   : > { %2207 = vmatprep.subr.bf16.mxu1 %v3304_v53  ;;  %v3370_v53 = vld [vmem:[#allocation6 + $0x400] ss:$72 sps:$4 sm:$0xff]  }
  0xa6   : > { %2245 = vmatpush1.bf16.msra.mxu0 %v3294_v50  ;;  %v3367_v50 = vld [vmem:[#allocation6 + $0x378] ss:$72 sps:$4 sm:$0xff]  }
  0xa7   : > { %2246 = vmatprep.subr.bf16.mxu0 %v3302_v51  ;;  %v3372_v51 = vld [vmem:[#allocation6 + $0x404] ss:$72 sps:$4 sm:$0xff]  }
  0xa8   : > { %2208 = vmatpush1.bf16.msra.mxu1 %v3309_v56  ;;  %v3381_v56 = vld [vmem:[#allocation6 + $0x49c] ss:$72 sps:$4 sm:$0xff]  }
  0xa9   : > { %2209 = vmatprep.subr.bf16.mxu1 %v3310_v57  ;;  %v3376_v57 = vld [vmem:[#allocation6 + $0x490] ss:$72 sps:$4 sm:$0xff]  }
  0xaa   : > { %2247 = vmatpush1.bf16.msra.mxu0 %v3300_v54  ;;  %v3373_v54 = vld [vmem:[#allocation6 + $0x408] ss:$72 sps:$4 sm:$0xff]  }
  0xab   : > { %2248 = vmatprep.subr.bf16.mxu0 %v3308_v55  ;;  %v3378_v55 = vld [vmem:[#allocation6 + $0x494] ss:$72 sps:$4 sm:$0xff]  }
  0xac   : > { %2210 = vmatpush1.bf16.msra.mxu1 %v3315_v60  ;;  %v3387_v60 = vld [vmem:[#allocation6 + $0x52c] ss:$72 sps:$4 sm:$0xff]  }
  0xad   : > { %2211 = vmatprep.subr.bf16.mxu1 %v3316_v62  ;;  %v3385_v62 = vld [vmem:[#allocation6 + $0x528] ss:$72 sps:$4 sm:$0xff]  }
  0xae   : > { %2249 = vmatpush1.bf16.msra.mxu0 %v3306_v58  ;;  %v3379_v58 = vld [vmem:[#allocation6 + $0x498] ss:$72 sps:$4 sm:$0xff]  }
  0xaf   : > { %2250 = vmatprep.subr.bf16.mxu0 %v3314_v59  ;;  %v3384_v59 = vld [vmem:[#allocation6 + $0x524] ss:$72 sps:$4 sm:$0xff]  }
  0xb0   : > { %2212 = vmatpush1.bf16.msra.mxu1 %v3321_v1  ;;  %v3388_v1 = vld [vmem:[#allocation6 + $0x5b0] ss:$72 sps:$4 sm:$0xff]  }
  0xb1   : > { %2213 = vmatprep.subr.bf16.mxu1 %v3322_v2  ;;  %v3391_v2 = vld [vmem:[#allocation6 + $0x5b8] ss:$72 sps:$4 sm:$0xff]  }
  0xb2   : > { %2251 = vmatpush1.bf16.msra.mxu0 %v3312_v61  ;;  %v3382_v61 = vld [vmem:[#allocation6 + $0x520] ss:$72 sps:$4 sm:$0xff]  }
  0xb3   : > { %2252 = vmatprep.subr.bf16.mxu0 %v3320_v63  ;;  %v3390_v63 = vld [vmem:[#allocation6 + $0x5b4] ss:$72 sps:$4 sm:$0xff]  }
  0xb4   : > { %2214 = vmatpush1.bf16.msra.mxu1 %v3327_v5  ;;  %v3394_v5 = vld [vmem:[#allocation6 + $0x640] ss:$72 sps:$4 sm:$0xff]  }
  0xb5   : > { %2265 = vmatprep.subr.bf16.mxu1 %v3330_v6  ;;  %v3397_v6 = vld [vmem:[#allocation6 + $0x648] ss:$72 sps:$4 sm:$0xff]  }
  0xb6   : > { %2253 = vmatpush1.bf16.msra.mxu0 %v3318_v0  ;;  %v3393_v0 = vld [vmem:[#allocation6 + $0x5bc] ss:$72 sps:$4 sm:$0xff]  }
  0xb7   : > { %2254 = vmatprep.subr.bf16.mxu0 %v3326_v3  ;;  %v3396_v3 = vld [vmem:[#allocation6 + $0x644] ss:$72 sps:$4 sm:$0xff]  }
  0xba   : > { %2255 = vmatpush1.bf16.msra.mxu0 %v3324_v4  ;;  %v3399_v4 = vld [vmem:[#allocation6 + $0x64c] ss:$72 sps:$4 sm:$0xff]  }
  0xbb   : > { %2306 = vmatprep.subr.bf16.mxu0 %v3333_v7  ;;  %v3402_v7 = vld [vmem:[#allocation6 + $0x6d4] ss:$72 sps:$4 sm:$0xff]  }
 0x150   : > { %v348_v15 = vpop.f32.mrb[0].mxu0 }
 0x151   : > { %v349_v16 = vadd.f32 %v348_v15, %v303_v13  ;;  %v350_v17 = vpop.f32.mrb[1].mxu0  ;;  %v3403_v13 = vld [vmem:[#allocation6 + $0x6d8] ss:$72 sps:$4 sm:$0xff]   ;;  %v3411_v15 = vld [vmem:[#allocation6 + $0x76c] ss:$72 sps:$4 sm:$0xff]  }
 0x152   : > { %v351_v18 = vadd.f32 %v350_v17, %v307_v14  ;;  %v352_v19 = vpop.f32.mrb[2].mxu0  ;;  %v3408_v14 = vld [vmem:[#allocation6 + $0x764] ss:$72 sps:$4 sm:$0xff]   ;;  %v3409_v17 = vld [vmem:[#allocation6 + $0x768] ss:$72 sps:$4 sm:$0xff]  }
 0x153   : > { %v355_v20 = vmax.f32 %v349_v16, 0.0  ;;  %v353_v21 = vpop.f32.mrb[3].mxu0  ;;  %v3406_v16 = vld [vmem:[#allocation6 + $0x760] ss:$72 sps:$4 sm:$0xff]   ;;  %v3417_v19 = vld [vmem:[#allocation6 + $0x7fc] ss:$72 sps:$4 sm:$0xff]  }
 0x154   : > { %v356_v22 = vmax.f32 %v351_v18, 0.0  ;;  %v3414_v18 = vld [vmem:[#allocation6 + $0x7f4] ss:$72 sps:$4 sm:$0xff]   ;;  %v3415_v21 = vld [vmem:[#allocation6 + $0x7f8] ss:$72 sps:$4 sm:$0xff]  }
 0x155   : > { %v3985_v26 = vpack.c.bf16 %v355_v20, %v355_v20  ;;  %v3412_v20 = vld [vmem:[#allocation6 + $0x7f0] ss:$72 sps:$4 sm:$0xff]  }
 0x156   : > { %v3983_v23 = vpack.c.bf16 %v356_v22, %v356_v22  ;;  %v3420_v22 = vld [vmem:[#allocation6 + $0x884] ss:$72 sps:$4 sm:$0xff]  }
 0x158   : > { %2215 = vmatprep.mubr.bf16.mxu1 %v3983_v23  ;;  %2256 = vmatprep.mubr.bf16.mxu0 %v3983_v23 }
 0x159   : > { %2216 = vmatmul.mubr.bf16.vlgmr.msra.gmra.mrb[0].mxu1 %v3985_v26  ;;  %2257 = vmatmul.mubr.bf16.vlgmr.msra.gmra.mrb[4].mxu0 %v3985_v26 }
 0x15a   : > { %2266 = vmatpush1.bf16.msra.mxu1 %v3328_v24  ;;  %2307 = vmatpush1.bf16.msra.mxu0 %v3331_v25  ;;  %v3423_v24 = vld [vmem:[#allocation6 + $0x88c] ss:$72 sps:$4 sm:$0xff]   ;;  %v3418_v25 = vld [vmem:[#allocation6 + $0x880] ss:$72 sps:$4 sm:$0xff]  }
 0x15b   : > { %2297 = vmatprep.mubr.bf16.mxu1 %v3983_v23  ;;  %2338 = vmatprep.mubr.bf16.mxu0 %v3983_v23 }
 0x15c   : > { %2267 = vmatprep.subr.bf16.mxu1 %v3336_v27  ;;  %2308 = vmatprep.subr.bf16.mxu0 %v3339_v28  ;;  %v3421_v27 = vld [vmem:[#allocation6 + $0x888] ss:$72 sps:$4 sm:$0xff]   ;;  %v3426_v28 = vld [vmem:[#allocation6 + $0x24] ss:$72 sps:$4 sm:$0xff]  }
 0x15e   : > { %2268 = vmatpush1.bf16.msra.mxu1 %v3334_v29  ;;  %2309 = vmatpush1.bf16.msra.mxu0 %v3337_v30  ;;  %v3429_v29 = vld [vmem:[#allocation6 + $0x2c] ss:$72 sps:$4 sm:$0xff]   ;;  %v3424_v30 = vld [vmem:[#allocation6 + $0x20] ss:$72 sps:$4 sm:$0xff]  }
 0x15f   : > { %2269 = vmatprep.subr.bf16.mxu1 %v3342_v31  ;;  %2310 = vmatprep.subr.bf16.mxu0 %v3345_v32  ;;  %v3427_v31 = vld [vmem:[#allocation6 + $0x28] ss:$72 sps:$4 sm:$0xff]   ;;  %v3432_v32 = vld [vmem:[#allocation6 + $0xb4] ss:$72 sps:$4 sm:$0xff]  }
 0x162   : > { %2270 = vmatpush1.bf16.msra.mxu1 %v3340_v33  ;;  %2311 = vmatpush1.bf16.msra.mxu0 %v3343_v34  ;;  %v3435_v33 = vld [vmem:[#allocation6 + $0xbc] ss:$72 sps:$4 sm:$0xff]   ;;  %v3430_v34 = vld [vmem:[#allocation6 + $0xb0] ss:$72 sps:$4 sm:$0xff]  }
 0x163   : > { %2271 = vmatprep.subr.bf16.mxu1 %v3348_v35  ;;  %2312 = vmatprep.subr.bf16.mxu0 %v3351_v36  ;;  %v3433_v35 = vld [vmem:[#allocation6 + $0xb8] ss:$72 sps:$4 sm:$0xff]   ;;  %v3438_v36 = vld [vmem:[#allocation6 + $0x144] ss:$72 sps:$4 sm:$0xff]  }
 0x166   : > { %2272 = vmatpush1.bf16.msra.mxu1 %v3346_v37  ;;  %2313 = vmatpush1.bf16.msra.mxu0 %v3349_v38  ;;  %v3441_v37 = vld [vmem:[#allocation6 + $0x14c] ss:$72 sps:$4 sm:$0xff]   ;;  %v3436_v38 = vld [vmem:[#allocation6 + $0x140] ss:$72 sps:$4 sm:$0xff]  }
 0x167   : > { %2273 = vmatprep.subr.bf16.mxu1 %v3354_v39  ;;  %2314 = vmatprep.subr.bf16.mxu0 %v3357_v40  ;;  %v3439_v39 = vld [vmem:[#allocation6 + $0x148] ss:$72 sps:$4 sm:$0xff]   ;;  %v3444_v40 = vld [vmem:[#allocation6 + $0x1d4] ss:$72 sps:$4 sm:$0xff]  }
 0x16a   : > { %2274 = vmatpush1.bf16.msra.mxu1 %v3352_v41  ;;  %2315 = vmatpush1.bf16.msra.mxu0 %v3355_v42  ;;  %v3447_v41 = vld [vmem:[#allocation6 + $0x1dc] ss:$72 sps:$4 sm:$0xff]   ;;  %v3442_v42 = vld [vmem:[#allocation6 + $0x1d0] ss:$72 sps:$4 sm:$0xff]  }
 0x16b   : > { %2275 = vmatprep.subr.bf16.mxu1 %v3360_v43  ;;  %2316 = vmatprep.subr.bf16.mxu0 %v3363_v44  ;;  %v3445_v43 = vld [vmem:[#allocation6 + $0x1d8] ss:$72 sps:$4 sm:$0xff]   ;;  %v3450_v44 = vld [vmem:[#allocation6 + $0x264] ss:$72 sps:$4 sm:$0xff]  }
 0x16e   : > { %2276 = vmatpush1.bf16.msra.mxu1 %v3358_v45  ;;  %2317 = vmatpush1.bf16.msra.mxu0 %v3361_v46  ;;  %v3453_v45 = vld [vmem:[#allocation6 + $0x26c] ss:$72 sps:$4 sm:$0xff]   ;;  %v3448_v46 = vld [vmem:[#allocation6 + $0x260] ss:$72 sps:$4 sm:$0xff]  }
 0x16f   : > { %2277 = vmatprep.subr.bf16.mxu1 %v3366_v47  ;;  %2318 = vmatprep.subr.bf16.mxu0 %v3369_v48  ;;  %v3451_v47 = vld [vmem:[#allocation6 + $0x268] ss:$72 sps:$4 sm:$0xff]   ;;  %v3456_v48 = vld [vmem:[#allocation6 + $0x2f4] ss:$72 sps:$4 sm:$0xff]  }
 0x172   : > { %2278 = vmatpush1.bf16.msra.mxu1 %v3364_v49  ;;  %2319 = vmatpush1.bf16.msra.mxu0 %v3367_v50  ;;  %v3459_v49 = vld [vmem:[#allocation6 + $0x2fc] ss:$72 sps:$4 sm:$0xff]   ;;  %v3454_v50 = vld [vmem:[#allocation6 + $0x2f0] ss:$72 sps:$4 sm:$0xff]  }
 0x173   : > { %2279 = vmatprep.subr.bf16.mxu1 %v3372_v51  ;;  %2320 = vmatprep.subr.bf16.mxu0 %v3375_v52  ;;  %v3457_v51 = vld [vmem:[#allocation6 + $0x2f8] ss:$72 sps:$4 sm:$0xff]   ;;  %v3462_v52 = vld [vmem:[#allocation6 + $0x384] ss:$72 sps:$4 sm:$0xff]  }
 0x176   : > { %2280 = vmatpush1.bf16.msra.mxu1 %v3370_v53  ;;  %2321 = vmatpush1.bf16.msra.mxu0 %v3373_v54  ;;  %v3465_v53 = vld [vmem:[#allocation6 + $0x38c] ss:$72 sps:$4 sm:$0xff]   ;;  %v3460_v54 = vld [vmem:[#allocation6 + $0x380] ss:$72 sps:$4 sm:$0xff]  }
 0x177   : > { %2281 = vmatprep.subr.bf16.mxu1 %v3378_v55  ;;  %2322 = vmatprep.subr.bf16.mxu0 %v3381_v56  ;;  %v3463_v55 = vld [vmem:[#allocation6 + $0x388] ss:$72 sps:$4 sm:$0xff]   ;;  %v3468_v56 = vld [vmem:[#allocation6 + $0x414] ss:$72 sps:$4 sm:$0xff]  }
 0x17a   : > { %2282 = vmatpush1.bf16.msra.mxu1 %v3376_v57  ;;  %2323 = vmatpush1.bf16.msra.mxu0 %v3379_v58  ;;  %v3471_v57 = vld [vmem:[#allocation6 + $0x41c] ss:$72 sps:$4 sm:$0xff]   ;;  %v3466_v58 = vld [vmem:[#allocation6 + $0x410] ss:$72 sps:$4 sm:$0xff]  }
 0x17b   : > { %2283 = vmatprep.subr.bf16.mxu1 %v3384_v59  ;;  %2324 = vmatprep.subr.bf16.mxu0 %v3387_v60  ;;  %v3469_v59 = vld [vmem:[#allocation6 + $0x418] ss:$72 sps:$4 sm:$0xff]   ;;  %v3474_v60 = vld [vmem:[#allocation6 + $0x4a4] ss:$72 sps:$4 sm:$0xff]  }
 0x17e   : > { %2284 = vmatpush1.bf16.msra.mxu1 %v3382_v61  ;;  %2325 = vmatpush1.bf16.msra.mxu0 %v3385_v62  ;;  %v3477_v61 = vld [vmem:[#allocation6 + $0x4ac] ss:$72 sps:$4 sm:$0xff]   ;;  %v3472_v62 = vld [vmem:[#allocation6 + $0x4a0] ss:$72 sps:$4 sm:$0xff]  }
 0x17f   : > { %2285 = vmatprep.subr.bf16.mxu1 %v3390_v63  ;;  %2326 = vmatprep.subr.bf16.mxu0 %v3393_v0  ;;  %v3475_v63 = vld [vmem:[#allocation6 + $0x4a8] ss:$72 sps:$4 sm:$0xff]   ;;  %v3480_v0 = vld [vmem:[#allocation6 + $0x534] ss:$72 sps:$4 sm:$0xff]  }
 0x182   : > { %2286 = vmatpush1.bf16.msra.mxu1 %v3388_v1  ;;  %2327 = vmatpush1.bf16.msra.mxu0 %v3391_v2  ;;  %v3483_v1 = vld [vmem:[#allocation6 + $0x53c] ss:$72 sps:$4 sm:$0xff]   ;;  %v3478_v2 = vld [vmem:[#allocation6 + $0x530] ss:$72 sps:$4 sm:$0xff]  }
 0x183   : > { %2287 = vmatprep.subr.bf16.mxu1 %v3396_v3  ;;  %2328 = vmatprep.subr.bf16.mxu0 %v3399_v4  ;;  %v3481_v3 = vld [vmem:[#allocation6 + $0x538] ss:$72 sps:$4 sm:$0xff]   ;;  %v3486_v4 = vld [vmem:[#allocation6 + $0x5c4] ss:$72 sps:$4 sm:$0xff]  }
 0x186   : > { %2288 = vmatpush1.bf16.msra.mxu1 %v3394_v5  ;;  %2329 = vmatpush1.bf16.msra.mxu0 %v3397_v6  ;;  %v3489_v5 = vld [vmem:[#allocation6 + $0x5cc] ss:$72 sps:$4 sm:$0xff]   ;;  %v3484_v6 = vld [vmem:[#allocation6 + $0x5c0] ss:$72 sps:$4 sm:$0xff]  }
 0x187   : > { %2289 = vmatprep.subr.bf16.mxu1 %v3402_v7  ;;  %2330 = vmatprep.subr.bf16.mxu0 %v3405_v8  ;;  %v3487_v7 = vld [vmem:[#allocation6 + $0x5c8] ss:$72 sps:$4 sm:$0xff]   ;;  %v3492_v8 = vld [vmem:[#allocation6 + $0x654] ss:$72 sps:$4 sm:$0xff]  }
 0x18a   : > { %2290 = vmatpush1.bf16.msra.mxu1 %v3400_v11  ;;  %2331 = vmatpush1.bf16.msra.mxu0 %v3403_v13  ;;  %v3495_v11 = vld [vmem:[#allocation6 + $0x65c] ss:$72 sps:$4 sm:$0xff]   ;;  %v3490_v13 = vld [vmem:[#allocation6 + $0x650] ss:$72 sps:$4 sm:$0xff]  }
 0x18b   : > { %2291 = vmatprep.subr.bf16.mxu1 %v3408_v14  ;;  %2332 = vmatprep.subr.bf16.mxu0 %v3411_v15  ;;  %v3493_v14 = vld [vmem:[#allocation6 + $0x658] ss:$72 sps:$4 sm:$0xff]   ;;  %v3498_v15 = vld [vmem:[#allocation6 + $0x6e4] ss:$72 sps:$4 sm:$0xff]  }
 0x18e   : > { %2292 = vmatpush1.bf16.msra.mxu1 %v3406_v16  ;;  %2333 = vmatpush1.bf16.msra.mxu0 %v3409_v17  ;;  %v3501_v16 = vld [vmem:[#allocation6 + $0x6ec] ss:$72 sps:$4 sm:$0xff]   ;;  %v3496_v17 = vld [vmem:[#allocation6 + $0x6e0] ss:$72 sps:$4 sm:$0xff]  }
 0x18f   : > { %2293 = vmatprep.subr.bf16.mxu1 %v3414_v18  ;;  %2334 = vmatprep.subr.bf16.mxu0 %v3417_v19  ;;  %v3499_v18 = vld [vmem:[#allocation6 + $0x6e8] ss:$72 sps:$4 sm:$0xff]   ;;  %v3504_v19 = vld [vmem:[#allocation6 + $0x774] ss:$72 sps:$4 sm:$0xff]  }
 0x192   : > { %2294 = vmatpush1.bf16.msra.mxu1 %v3412_v20  ;;  %2335 = vmatpush1.bf16.msra.mxu0 %v3415_v21  ;;  %v3507_v20 = vld [vmem:[#allocation6 + $0x77c] ss:$72 sps:$4 sm:$0xff]   ;;  %v3502_v21 = vld [vmem:[#allocation6 + $0x770] ss:$72 sps:$4 sm:$0xff]  }
 0x193   : > { %2295 = vmatprep.subr.bf16.mxu1 %v3420_v22  ;;  %2336 = vmatprep.subr.bf16.mxu0 %v3423_v24  ;;  %v3505_v22 = vld [vmem:[#allocation6 + $0x778] ss:$72 sps:$4 sm:$0xff]   ;;  %v3510_v24 = vld [vmem:[#allocation6 + $0x804] ss:$72 sps:$4 sm:$0xff]  }
 0x196   : > { %2296 = vmatpush1.bf16.msra.mxu1 %v3418_v25  ;;  %2337 = vmatpush1.bf16.msra.mxu0 %v3421_v27  ;;  %v3513_v25 = vld [vmem:[#allocation6 + $0x80c] ss:$72 sps:$4 sm:$0xff]   ;;  %v3508_v27 = vld [vmem:[#allocation6 + $0x800] ss:$72 sps:$4 sm:$0xff]  }
 0x197   : > { %2347 = vmatprep.subr.bf16.mxu1 %v3426_v28  ;;  %2388 = vmatprep.subr.bf16.mxu0 %v3429_v29  ;;  %v3511_v28 = vld [vmem:[#allocation6 + $0x808] ss:$72 sps:$4 sm:$0xff]   ;;  %v3516_v29 = vld [vmem:[#allocation6 + $0x894] ss:$72 sps:$4 sm:$0xff]  }
 0x199   : > { %2298 = vmatmul.mubr.bf16.vlgmr.msra.gmra.mrb[4].mxu1 %v3985_v26  ;;  %2339 = vmatmul.mubr.bf16.vlgmr.msra.gmra.mrb[8].mxu0 %v3985_v26 }
 0x19a   : > { %2348 = vmatpush1.bf16.msra.mxu1 %v3424_v30  ;;  %2379 = vmatprep.mubr.bf16.mxu1 %v3983_v23  ;;  %v3519_v30 = vld [vmem:[#allocation6 + $0x89c] ss:$72 sps:$4 sm:$0xff]  }
 0x19b   : > { %2389 = vmatpush1.bf16.msra.mxu0 %v3427_v31  ;;  %2420 = vmatprep.mubr.bf16.mxu0 %v3983_v23  ;;  %v3514_v31 = vld [vmem:[#allocation6 + $0x890] ss:$72 sps:$4 sm:$0xff]  }
 0x19c   : > { %2349 = vmatprep.subr.bf16.mxu1 %v3432_v32  ;;  %2390 = vmatprep.subr.bf16.mxu0 %v3435_v33  ;;  %v3517_v32 = vld [vmem:[#allocation6 + $0x898] ss:$72 sps:$4 sm:$0xff]   ;;  %v3522_v33 = vld [vmem:[#allocation6 + $0x34] ss:$72 sps:$4 sm:$0xff]  }
 0x19e   : > { %2350 = vmatpush1.bf16.msra.mxu1 %v3430_v34  ;;  %v3525_v34 = vld [vmem:[#allocation6 + $0x3c] ss:$72 sps:$4 sm:$0xff]  }
 0x19f   : > { %2391 = vmatpush1.bf16.msra.mxu0 %v3433_v35  ;;  %2351 = vmatprep.subr.bf16.mxu1 %v3438_v36  ;;  %v3520_v35 = vld [vmem:[#allocation6 + $0x30] ss:$72 sps:$4 sm:$0xff]  }
 0x1a0   : > { %2392 = vmatprep.subr.bf16.mxu0 %v3441_v37  ;;  %v3523_v36 = vld [vmem:[#allocation6 + $0x38] ss:$72 sps:$4 sm:$0xff]   ;;  %v3528_v37 = vld [vmem:[#allocation6 + $0xc4] ss:$72 sps:$4 sm:$0xff]  }
 0x1a2   : > { %2352 = vmatpush1.bf16.msra.mxu1 %v3436_v38  ;;  %v3531_v38 = vld [vmem:[#allocation6 + $0xcc] ss:$72 sps:$4 sm:$0xff]  }
 0x1a3   : > { %2393 = vmatpush1.bf16.msra.mxu0 %v3439_v39  ;;  %2353 = vmatprep.subr.bf16.mxu1 %v3444_v40  ;;  %v3526_v39 = vld [vmem:[#allocation6 + $0xc0] ss:$72 sps:$4 sm:$0xff]  }
 0x1a4   : > { %2394 = vmatprep.subr.bf16.mxu0 %v3447_v41  ;;  %v3529_v40 = vld [vmem:[#allocation6 + $0xc8] ss:$72 sps:$4 sm:$0xff]   ;;  %v3534_v41 = vld [vmem:[#allocation6 + $0x154] ss:$72 sps:$4 sm:$0xff]  }
 0x1a6   : > { %2354 = vmatpush1.bf16.msra.mxu1 %v3442_v42  ;;  %v3537_v42 = vld [vmem:[#allocation6 + $0x15c] ss:$72 sps:$4 sm:$0xff]  }
 0x1a7   : > { %2395 = vmatpush1.bf16.msra.mxu0 %v3445_v43  ;;  %2355 = vmatprep.subr.bf16.mxu1 %v3450_v44  ;;  %v3532_v43 = vld [vmem:[#allocation6 + $0x150] ss:$72 sps:$4 sm:$0xff]  }
 0x1a8   : > { %2396 = vmatprep.subr.bf16.mxu0 %v3453_v45  ;;  %v3535_v44 = vld [vmem:[#allocation6 + $0x158] ss:$72 sps:$4 sm:$0xff]   ;;  %v3540_v45 = vld [vmem:[#allocation6 + $0x1e4] ss:$72 sps:$4 sm:$0xff]  }
 0x1aa   : > { %2356 = vmatpush1.bf16.msra.mxu1 %v3448_v46  ;;  %v3543_v46 = vld [vmem:[#allocation6 + $0x1ec] ss:$72 sps:$4 sm:$0xff]  }
 0x1ab   : > { %2397 = vmatpush1.bf16.msra.mxu0 %v3451_v47  ;;  %2357 = vmatprep.subr.bf16.mxu1 %v3456_v48  ;;  %v3538_v47 = vld [vmem:[#allocation6 + $0x1e0] ss:$72 sps:$4 sm:$0xff]  }
 0x1ac   : > { %2398 = vmatprep.subr.bf16.mxu0 %v3459_v49  ;;  %v3541_v48 = vld [vmem:[#allocation6 + $0x1e8] ss:$72 sps:$4 sm:$0xff]   ;;  %v3546_v49 = vld [vmem:[#allocation6 + $0x274] ss:$72 sps:$4 sm:$0xff]  }
 0x1ae   : > { %2358 = vmatpush1.bf16.msra.mxu1 %v3454_v50  ;;  %v3549_v50 = vld [vmem:[#allocation6 + $0x27c] ss:$72 sps:$4 sm:$0xff]  }
 0x1af   : > { %2399 = vmatpush1.bf16.msra.mxu0 %v3457_v51  ;;  %2359 = vmatprep.subr.bf16.mxu1 %v3462_v52  ;;  %v3544_v51 = vld [vmem:[#allocation6 + $0x270] ss:$72 sps:$4 sm:$0xff]  }
 0x1b0   : > { %2400 = vmatprep.subr.bf16.mxu0 %v3465_v53  ;;  %v3547_v52 = vld [vmem:[#allocation6 + $0x278] ss:$72 sps:$4 sm:$0xff]   ;;  %v3552_v53 = vld [vmem:[#allocation6 + $0x304] ss:$72 sps:$4 sm:$0xff]  }
 0x1b2   : > { %2360 = vmatpush1.bf16.msra.mxu1 %v3460_v54  ;;  %v3555_v54 = vld [vmem:[#allocation6 + $0x30c] ss:$72 sps:$4 sm:$0xff]  }
 0x1b3   : > { %2401 = vmatpush1.bf16.msra.mxu0 %v3463_v55  ;;  %2361 = vmatprep.subr.bf16.mxu1 %v3468_v56  ;;  %v3550_v55 = vld [vmem:[#allocation6 + $0x300] ss:$72 sps:$4 sm:$0xff]  }
 0x1b4   : > { %2402 = vmatprep.subr.bf16.mxu0 %v3471_v57  ;;  %v3553_v56 = vld [vmem:[#allocation6 + $0x308] ss:$72 sps:$4 sm:$0xff]   ;;  %v3558_v57 = vld [vmem:[#allocation6 + $0x394] ss:$72 sps:$4 sm:$0xff]  }
 0x1b6   : > { %2362 = vmatpush1.bf16.msra.mxu1 %v3466_v58  ;;  %v3561_v58 = vld [vmem:[#allocation6 + $0x39c] ss:$72 sps:$4 sm:$0xff]  }
 0x1b7   : > { %2403 = vmatpush1.bf16.msra.mxu0 %v3469_v59  ;;  %2363 = vmatprep.subr.bf16.mxu1 %v3474_v60  ;;  %v3556_v59 = vld [vmem:[#allocation6 + $0x390] ss:$72 sps:$4 sm:$0xff]  }
 0x1b8   : > { %2404 = vmatprep.subr.bf16.mxu0 %v3477_v61  ;;  %v3559_v60 = vld [vmem:[#allocation6 + $0x398] ss:$72 sps:$4 sm:$0xff]   ;;  %v3564_v61 = vld [vmem:[#allocation6 + $0x424] ss:$72 sps:$4 sm:$0xff]  }
 0x1ba   : > { %2364 = vmatpush1.bf16.msra.mxu1 %v3472_v62  ;;  %v3567_v62 = vld [vmem:[#allocation6 + $0x42c] ss:$72 sps:$4 sm:$0xff]  }
 0x1bb   : > { %2405 = vmatpush1.bf16.msra.mxu0 %v3475_v63  ;;  %2365 = vmatprep.subr.bf16.mxu1 %v3480_v0  ;;  %v3562_v63 = vld [vmem:[#allocation6 + $0x420] ss:$72 sps:$4 sm:$0xff]  }
 0x1bc   : > { %2406 = vmatprep.subr.bf16.mxu0 %v3483_v1  ;;  %v3565_v0 = vld [vmem:[#allocation6 + $0x428] ss:$72 sps:$4 sm:$0xff]   ;;  %v3570_v1 = vld [vmem:[#allocation6 + $0x4b4] ss:$72 sps:$4 sm:$0xff]  }
 0x1be   : > { %2366 = vmatpush1.bf16.msra.mxu1 %v3478_v2  ;;  %v3573_v2 = vld [vmem:[#allocation6 + $0x4bc] ss:$72 sps:$4 sm:$0xff]  }
 0x1bf   : > { %2407 = vmatpush1.bf16.msra.mxu0 %v3481_v3  ;;  %2367 = vmatprep.subr.bf16.mxu1 %v3486_v4  ;;  %v3568_v3 = vld [vmem:[#allocation6 + $0x4b0] ss:$72 sps:$4 sm:$0xff]  }
 0x1c0   : > { %2408 = vmatprep.subr.bf16.mxu0 %v3489_v5  ;;  %v3571_v4 = vld [vmem:[#allocation6 + $0x4b8] ss:$72 sps:$4 sm:$0xff]   ;;  %v3576_v5 = vld [vmem:[#allocation6 + $0x544] ss:$72 sps:$4 sm:$0xff]  }
 0x1c2   : > { %2368 = vmatpush1.bf16.msra.mxu1 %v3484_v6  ;;  %v3579_v6 = vld [vmem:[#allocation6 + $0x54c] ss:$72 sps:$4 sm:$0xff]  }
 0x1c3   : > { %2409 = vmatpush1.bf16.msra.mxu0 %v3487_v7  ;;  %2369 = vmatprep.subr.bf16.mxu1 %v3492_v8  ;;  %v3574_v7 = vld [vmem:[#allocation6 + $0x540] ss:$72 sps:$4 sm:$0xff]  }
 0x1c4   : > { %2410 = vmatprep.subr.bf16.mxu0 %v3495_v11  ;;  %v3577_v8 = vld [vmem:[#allocation6 + $0x548] ss:$72 sps:$4 sm:$0xff]   ;;  %v3582_v11 = vld [vmem:[#allocation6 + $0x5d4] ss:$72 sps:$4 sm:$0xff]  }
 0x1c6   : > { %2370 = vmatpush1.bf16.msra.mxu1 %v3490_v13  ;;  %v3585_v13 = vld [vmem:[#allocation6 + $0x5dc] ss:$72 sps:$4 sm:$0xff]  }
 0x1c7   : > { %2411 = vmatpush1.bf16.msra.mxu0 %v3493_v14  ;;  %2371 = vmatprep.subr.bf16.mxu1 %v3498_v15  ;;  %v3580_v14 = vld [vmem:[#allocation6 + $0x5d0] ss:$72 sps:$4 sm:$0xff]  }
 0x1c8   : > { %2412 = vmatprep.subr.bf16.mxu0 %v3501_v16  ;;  %v3583_v15 = vld [vmem:[#allocation6 + $0x5d8] ss:$72 sps:$4 sm:$0xff]   ;;  %v3588_v16 = vld [vmem:[#allocation6 + $0x664] ss:$72 sps:$4 sm:$0xff]  }
 0x1ca   : > { %2372 = vmatpush1.bf16.msra.mxu1 %v3496_v17  ;;  %v3591_v17 = vld [vmem:[#allocation6 + $0x66c] ss:$72 sps:$4 sm:$0xff]  }
 0x1cb   : > { %2413 = vmatpush1.bf16.msra.mxu0 %v3499_v18  ;;  %2373 = vmatprep.subr.bf16.mxu1 %v3504_v19  ;;  %v3586_v18 = vld [vmem:[#allocation6 + $0x660] ss:$72 sps:$4 sm:$0xff]  }
 0x1cc   : > { %2414 = vmatprep.subr.bf16.mxu0 %v3507_v20  ;;  %v3589_v19 = vld [vmem:[#allocation6 + $0x668] ss:$72 sps:$4 sm:$0xff]   ;;  %v3594_v20 = vld [vmem:[#allocation6 + $0x6f4] ss:$72 sps:$4 sm:$0xff]  }
 0x1ce   : > { %2374 = vmatpush1.bf16.msra.mxu1 %v3502_v21  ;;  %v3597_v21 = vld [vmem:[#allocation6 + $0x6fc] ss:$72 sps:$4 sm:$0xff]  }
 0x1cf   : > { %2415 = vmatpush1.bf16.msra.mxu0 %v3505_v22  ;;  %2375 = vmatprep.subr.bf16.mxu1 %v3510_v24  ;;  %v3592_v22 = vld [vmem:[#allocation6 + $0x6f0] ss:$72 sps:$4 sm:$0xff]  }
 0x1d0   : > { %2416 = vmatprep.subr.bf16.mxu0 %v3513_v25  ;;  %v3595_v24 = vld [vmem:[#allocation6 + $0x6f8] ss:$72 sps:$4 sm:$0xff]   ;;  %v3600_v25 = vld [vmem:[#allocation6 + $0x784] ss:$72 sps:$4 sm:$0xff]  }
 0x1d2   : > { %2376 = vmatpush1.bf16.msra.mxu1 %v3508_v27  ;;  %v3603_v27 = vld [vmem:[#allocation6 + $0x78c] ss:$72 sps:$4 sm:$0xff]  }
 0x1d3   : > { %2417 = vmatpush1.bf16.msra.mxu0 %v3511_v28  ;;  %2377 = vmatprep.subr.bf16.mxu1 %v3516_v29  ;;  %v3598_v28 = vld [vmem:[#allocation6 + $0x780] ss:$72 sps:$4 sm:$0xff]  }
 0x1d4   : > { %2418 = vmatprep.subr.bf16.mxu0 %v3519_v30  ;;  %v3601_v29 = vld [vmem:[#allocation6 + $0x788] ss:$72 sps:$4 sm:$0xff]   ;;  %v3606_v30 = vld [vmem:[#allocation6 + $0x814] ss:$72 sps:$4 sm:$0xff]  }
 0x1d6   : > { %2378 = vmatpush1.bf16.msra.mxu1 %v3514_v31  ;;  %v3609_v31 = vld [vmem:[#allocation6 + $0x81c] ss:$72 sps:$4 sm:$0xff]  }
 0x1d7   : > { %2419 = vmatpush1.bf16.msra.mxu0 %v3517_v32  ;;  %2429 = vmatprep.subr.bf16.mxu1 %v3522_v33  ;;  %v3604_v32 = vld [vmem:[#allocation6 + $0x810] ss:$72 sps:$4 sm:$0xff]  }
 0x1d8   : > { %2470 = vmatprep.subr.bf16.mxu0 %v3525_v34  ;;  %v3607_v33 = vld [vmem:[#allocation6 + $0x818] ss:$72 sps:$4 sm:$0xff]   ;;  %v3612_v34 = vld [vmem:[#allocation6 + $0x8a4] ss:$72 sps:$4 sm:$0xff]  }
 0x1d9   : > { %2380 = vmatmul.mubr.bf16.vlgmr.msra.gmra.mrb[8].mxu1 %v3985_v26 }
 0x1da   : > { %2421 = vmatmul.mubr.bf16.vlgmr.msra.gmra.mrb[12].mxu0 %v3985_v26  ;;  %2430 = vmatpush1.bf16.msra.mxu1 %v3520_v35  ;;  %v3615_v35 = vld [vmem:[#allocation6 + $0x8ac] ss:$72 sps:$4 sm:$0xff]  }
 0x1db   : > { %2461 = vmatprep.mubr.bf16.mxu1 %v3983_v23  ;;  %2471 = vmatpush1.bf16.msra.mxu0 %v3523_v36  ;;  %v3610_v36 = vld [vmem:[#allocation6 + $0x8a0] ss:$72 sps:$4 sm:$0xff]  }
 0x1dc   : > { %2502 = vmatprep.mubr.bf16.mxu0 %v3983_v23  ;;  %2431 = vmatprep.subr.bf16.mxu1 %v3528_v37  ;;  %v3613_v37 = vld [vmem:[#allocation6 + $0x8a8] ss:$72 sps:$4 sm:$0xff]  }
 0x1dd   : > { %2472 = vmatprep.subr.bf16.mxu0 %v3531_v38  ;;  %v3618_v38 = vld [vmem:[#allocation6 + $0x44] ss:$72 sps:$4 sm:$0xff]  }
 0x1de   : > { %2432 = vmatpush1.bf16.msra.mxu1 %v3526_v39  ;;  %v3616_v39 = vld [vmem:[#allocation6 + $0x40] ss:$72 sps:$4 sm:$0xff]  }
 0x1df   : > { %2473 = vmatpush1.bf16.msra.mxu0 %v3529_v40  ;;  %2433 = vmatprep.subr.bf16.mxu1 %v3534_v41  ;;  %v3621_v40 = vld [vmem:[#allocation6 + $0xd4] ss:$72 sps:$4 sm:$0xff]   ;;  %v3619_v41 = vld [vmem:[#allocation6 + $0xd0] ss:$72 sps:$4 sm:$0xff]  }
 0x1e0   : > { %2474 = vmatprep.subr.bf16.mxu0 %v3537_v42  ;;  %v3624_v42 = vld [vmem:[#allocation6 + $0x164] ss:$72 sps:$4 sm:$0xff]  }
 0x1e2   : > { %2434 = vmatpush1.bf16.msra.mxu1 %v3532_v43  ;;  %v3622_v43 = vld [vmem:[#allocation6 + $0x160] ss:$72 sps:$4 sm:$0xff]  }
 0x1e3   : > { %2475 = vmatpush1.bf16.msra.mxu0 %v3535_v44  ;;  %2435 = vmatprep.subr.bf16.mxu1 %v3540_v45  ;;  %v3627_v44 = vld [vmem:[#allocation6 + $0x1f4] ss:$72 sps:$4 sm:$0xff]   ;;  %v3625_v45 = vld [vmem:[#allocation6 + $0x1f0] ss:$72 sps:$4 sm:$0xff]  }
 0x1e4   : > { %2476 = vmatprep.subr.bf16.mxu0 %v3543_v46  ;;  %v3630_v46 = vld [vmem:[#allocation6 + $0x284] ss:$72 sps:$4 sm:$0xff]  }
 0x1e6   : > { %2436 = vmatpush1.bf16.msra.mxu1 %v3538_v47  ;;  %v2103_v47 = vsub.s32 2, %v3973_v9 }
 0x1e7   : > { %2477 = vmatpush1.bf16.msra.mxu0 %v3541_v48  ;;  %2437 = vmatprep.subr.bf16.mxu1 %v3546_v49  ;;  %v3628_v48 = vld [vmem:[#allocation6 + $0x280] ss:$72 sps:$4 sm:$0xff]  }
 0x1e8   : > { %2478 = vmatprep.subr.bf16.mxu0 %v3549_v50  ;;  %v4005_v49 = vld [vmem:[#allocation7] sm:$0xff]  ;;  %v2107_v50 = vsub.s32 3, %v3973_v9 }
 0x1ea   : > { %2438 = vmatpush1.bf16.msra.mxu1 %v3544_v51  ;;  %v3805_v51 = vmov 1966171168  }
 0x1eb   : > { %2479 = vmatpush1.bf16.msra.mxu0 %v3547_v52  ;;  %2439 = vmatprep.subr.bf16.mxu1 %v3552_v53  ;;  %v2611_v52 = vunpack.c.l.s4 %v3805_v51  ;;  %v2096_v53 = vrot.slane %v4005_v49, %v3976_v10 }
 0x1ec   : > { %2480 = vmatprep.subr.bf16.mxu0 %v3555_v54  ;;  %v2104_v54 = vrot.slane %v4005_v49, %v2103_v47 }
 0x1ee   : > { %2440 = vmatpush1.bf16.msra.mxu1 %v3550_v55  ;;  %v3631_v55 = vld [vmem:[#allocation6 + $0x310] ss:$72 sps:$4 sm:$0xff]  }
 0x1ef   : > { %2481 = vmatpush1.bf16.msra.mxu0 %v3553_v56  ;;  %2441 = vmatprep.subr.bf16.mxu1 %v3558_v57  ;;  %v2100_v56 = vrot.slane %v4005_v49, %v3979_v12  ;;  %v2108_v57 = vrot.slane %v4005_v49, %v2107_v50 }
 0x1f0   : > { %2482 = vmatprep.subr.bf16.mxu0 %v3561_v58  ;;  %v3636_v58 = vld [vmem:[#allocation6 + $0x3a4] ss:$72 sps:$4 sm:$0xff]  }
 0x1f2   : > { %2442 = vmatpush1.bf16.msra.mxu1 %v3556_v59  ;;  %v2612_v59 = vunpack.c.0.s8 %v2611_v52 }
 0x1f3   : > { %2483 = vmatpush1.bf16.msra.mxu0 %v3559_v60  ;;  %2443 = vmatprep.subr.bf16.mxu1 %v3564_v61 }
 0x1f4   : > { %2484 = vmatprep.subr.bf16.mxu0 %v3567_v62 }
 0x1f6   : > { %2444 = vmatpush1.bf16.msra.mxu1 %v3562_v63 }
 0x1f7   : > { %2485 = vmatpush1.bf16.msra.mxu0 %v3565_v0  ;;  %2445 = vmatprep.subr.bf16.mxu1 %v3570_v1 }
 0x1f8   : > { %2486 = vmatprep.subr.bf16.mxu0 %v3573_v2 }
 0x1fa   : > { %2446 = vmatpush1.bf16.msra.mxu1 %v3568_v3 }
 0x1fb   : > { %2487 = vmatpush1.bf16.msra.mxu0 %v3571_v4  ;;  %2447 = vmatprep.subr.bf16.mxu1 %v3576_v5 }
 0x1fc   : > { %2488 = vmatprep.subr.bf16.mxu0 %v3579_v6  ;;  %v3634_v6 = vld [vmem:[#allocation6 + $0x3a0] ss:$72 sps:$4 sm:$0xff]  }
 0x1fe   : > { %2448 = vmatpush1.bf16.msra.mxu1 %v3574_v7 }
 0x1ff   : > { %2489 = vmatpush1.bf16.msra.mxu0 %v3577_v8  ;;  %2449 = vmatprep.subr.bf16.mxu1 %v3582_v11 }
 0x200   : > { %2490 = vmatprep.subr.bf16.mxu0 %v3585_v13 }
 0x202   : > { %2450 = vmatpush1.bf16.msra.mxu1 %v3580_v14  ;;  %v3639_v14 = vld [vmem:[#allocation6 + $0x434] ss:$72 sps:$4 sm:$0xff]  }
 0x203   : > { %2491 = vmatpush1.bf16.msra.mxu0 %v3583_v15  ;;  %2451 = vmatprep.subr.bf16.mxu1 %v3588_v16  ;;  %v4019_v15 = vsub.s32 %v2612_v59, %v3973_v9 }
 0x204   : > { %2492 = vmatprep.subr.bf16.mxu0 %v3591_v17 }
 0x206   : > { %2452 = vmatpush1.bf16.msra.mxu1 %v3586_v18 }
 0x207   : > { %2493 = vmatpush1.bf16.msra.mxu0 %v3589_v19  ;;  %2453 = vmatprep.subr.bf16.mxu1 %v3594_v20  ;;  %v3637_v20 = vld [vmem:[#allocation6 + $0x430] ss:$72 sps:$4 sm:$0xff]  }
 0x208   : > { %2494 = vmatprep.subr.bf16.mxu0 %v3597_v21  ;;  %v3642_v21 = vld [vmem:[#allocation6 + $0x4c4] ss:$72 sps:$4 sm:$0xff]  }
 0x20a   : > { %2454 = vmatpush1.bf16.msra.mxu1 %v3592_v22 }
 0x20b   : > { %2495 = vmatpush1.bf16.msra.mxu0 %v3595_v24  ;;  %2455 = vmatprep.subr.bf16.mxu1 %v3600_v25 }
 0x20c   : > { %2496 = vmatprep.subr.bf16.mxu0 %v3603_v27  ;;  %v3640_v27 = vld [vmem:[#allocation6 + $0x4c0] ss:$72 sps:$4 sm:$0xff]  }
 0x20e   : > { %2456 = vmatpush1.bf16.msra.mxu1 %v3598_v28  ;;  %v3645_v28 = vld [vmem:[#allocation6 + $0x554] ss:$72 sps:$4 sm:$0xff]  }
 0x20f   : > { %2497 = vmatpush1.bf16.msra.mxu0 %v3601_v29  ;;  %2457 = vmatprep.subr.bf16.mxu1 %v3606_v30  ;;  %v3643_v29 = vld [vmem:[#allocation6 + $0x550] ss:$72 sps:$4 sm:$0xff]   ;;  %v3648_v30 = vld [vmem:[#allocation6 + $0x5e4] ss:$72 sps:$4 sm:$0xff]  }
 0x210   : > { %2498 = vmatprep.subr.bf16.mxu0 %v3609_v31  ;;  %v3646_v31 = vld [vmem:[#allocation6 + $0x5e0] ss:$72 sps:$4 sm:$0xff]  }
 0x212   : > { %2458 = vmatpush1.bf16.msra.mxu1 %v3604_v32  ;;  %v3651_v32 = vld [vmem:[#allocation6 + $0x674] ss:$72 sps:$4 sm:$0xff]  }
 0x213   : > { %2499 = vmatpush1.bf16.msra.mxu0 %v3607_v33  ;;  %2459 = vmatprep.subr.bf16.mxu1 %v3612_v34  ;;  %v3649_v33 = vld [vmem:[#allocation6 + $0x670] ss:$72 sps:$4 sm:$0xff]   ;;  %v3654_v34 = vld [vmem:[#allocation6 + $0x704] ss:$72 sps:$4 sm:$0xff]  }
 0x214   : > { %2500 = vmatprep.subr.bf16.mxu0 %v3615_v35  ;;  %v3652_v35 = vld [vmem:[#allocation6 + $0x700] ss:$72 sps:$4 sm:$0xff]  }
 0x216   : > { %2460 = vmatpush1.bf16.msra.mxu1 %v3610_v36  ;;  %v3657_v36 = vld [vmem:[#allocation6 + $0x794] ss:$72 sps:$4 sm:$0xff]  }
 0x217   : > { %2501 = vmatpush1.bf16.msra.mxu0 %v3613_v37  ;;  %2511 = vmatprep.subr.bf16.mxu1 %v3618_v38  ;;  %v3655_v37 = vld [vmem:[#allocation6 + $0x790] ss:$72 sps:$4 sm:$0xff]   ;;  %v3660_v38 = vld [vmem:[#allocation6 + $0x824] ss:$72 sps:$4 sm:$0xff]  }
 0x219   : > { %2462 = vmatmul.mubr.bf16.vlgmr.msra.gmra.mrb[12].mxu1 %v3985_v26 }
 0x21a   : > { %2503 = vmatmul.mubr.bf16.vlgmr.msra.gmra.mrb[16].mxu0 %v3985_v26  ;;  %2512 = vmatpush1.bf16.msra.mxu1 %v3616_v39  ;;  %v3658_v39 = vld [vmem:[#allocation6 + $0x820] ss:$72 sps:$4 sm:$0xff]  }
 0x21b   : > { %2543 = vmatprep.mubr.bf16.mxu1 %v3983_v23  ;;  %2513 = vmatprep.subr.bf16.mxu1 %v3621_v40  ;;  %v3633_v23 = vld [vmem:[#allocation6 + $0x314] ss:$72 sps:$4 sm:$0xff]  }
 0x21c   : > { %v3663_v40 = vld [vmem:[#allocation6 + $0x8b4] ss:$72 sps:$4 sm:$0xff]  }
 0x21e   : > { %2514 = vmatpush1.bf16.msra.mxu1 %v3619_v41  ;;  %v3661_v41 = vld [vmem:[#allocation6 + $0x8b0] ss:$72 sps:$4 sm:$0xff]  }
 0x21f   : > { %2515 = vmatprep.subr.bf16.mxu1 %v3624_v42 }
 0x222   : > { %2516 = vmatpush1.bf16.msra.mxu1 %v3622_v43 }
 0x223   : > { %2517 = vmatprep.subr.bf16.mxu1 %v3627_v44  ;;  %v2119_v44 = vsub.s32 6, %v3973_v9 }
 0x225   : > { %v2120_v52 = vrot.slane %v4005_v49, %v2119_v44 }
 0x226   : > { %2518 = vmatpush1.bf16.msra.mxu1 %v3625_v45 }
 0x227   : > { %2519 = vmatprep.subr.bf16.mxu1 %v3630_v46  ;;  %v2115_v46 = vsub.s32 5, %v3973_v9 }
 0x22a   : > { %2520 = vmatpush1.bf16.msra.mxu1 %v3628_v48  ;;  %v2123_v48 = vsub.s32 7, %v3973_v9 }
 0x22b   : > { %2521 = vmatprep.subr.bf16.mxu1 %v3633_v23 }
 0x22c   : > { %v2217_v60 = vpop.f32.mrb[0].mxu1  ;;  %v2258_v61 = vpop.f32.mrb[4].mxu0 }
 0x22d   : > { %v2218_v62 = vadd.f32 %v2217_v60, %v2096_v53  ;;  %v2259_v63 = vadd.f32 %v2258_v61, %v2104_v54  ;;  %v2219_v0 = vpop.f32.mrb[1].mxu1  ;;  %v2260_v1 = vpop.f32.mrb[5].mxu0  ;;  %v2116_v53 = vrot.slane %v4005_v49, %v2115_v46  ;;  %v2124_v54 = vrot.slane %v4005_v49, %v2123_v48 }
 0x22e   : > { %v2220_v2 = vadd.f32 %v2219_v0, %v2100_v56  ;;  %v2261_v3 = vadd.f32 %v2260_v1, %v2108_v57  ;;  %2522 = vmatpush1.bf16.msra.mxu1 %v3631_v55  ;;  %v2221_v4 = vpop.f32.mrb[2].mxu1  ;;  %v2262_v5 = vpop.f32.mrb[6].mxu0 }
 0x22f   : > { %v2552_v7 = vmax.f32 %v2218_v62, 0.0  ;;  %v2554_v8 = vmax.f32 %v2259_v63, 0.0  ;;  %v2222_v11 = vpop.f32.mrb[3].mxu1  ;;  %v2263_v13 = vpop.f32.mrb[7].mxu0  ;;  %2523 = vmatprep.subr.bf16.mxu1 %v3636_v58 }
 0x230   : > { %v2553_v16 = vmax.f32 %v2220_v2, 0.0  ;;  %v2555_v17 = vmax.f32 %v2261_v3, 0.0 }
 0x232   : > { %v3159_v18 = vpack.c.bf16 %v2553_v16, %v2552_v7  ;;  %v3160_v19 = vpack.c.bf16 %v2555_v17, %v2554_v8  ;;  %2524 = vmatpush1.bf16.msra.mxu1 %v3634_v6 }
 0x233   : > { %2525 = vmatprep.subr.bf16.mxu1 %v3639_v14 }
 0x234   : > { %v2616_v22 = vrot.slane %v3159_v18, %v4019_v15  ;;  %v2623_v24 = vrot.slane %v3160_v19, %v4019_v15 }
 0x236   : > { %v4023_v25 = vcombine.low %v2616_v22, %v2623_v24  ;;  %2526 = vmatpush1.bf16.msra.mxu1 %v3637_v20 }
 0x237   : > { %2527 = vmatprep.subr.bf16.mxu1 %v3642_v21  ;;  %v2753_v21 = vld [vmem:[%s4093_s24] sm:$0xff] }
 0x238   : > { %v2646_v19 = vrot.slane %v4023_v25, %v4019_v15 }
 0x23a   : > { %2528 = vmatpush1.bf16.msra.mxu1 %v3640_v27  ;;  %v648_v27 = vld [vmem:[#allocation7 + $0x8] sm:$0xff] }
 0x23b   : > { %2529 = vmatprep.subr.bf16.mxu1 %v3645_v28  ;;  %v2128_v28 = vrot.slane %v648_v27, %v3976_v10  ;;  %v2136_v25 = vrot.slane %v648_v27, %v2103_v47 }
 0x23e   : > { %2530 = vmatpush1.bf16.msra.mxu1 %v3643_v29  ;;  %v2132_v29 = vrot.slane %v648_v27, %v3979_v12 }
 0x23f   : > { %2531 = vmatprep.subr.bf16.mxu1 %v3648_v30  ;;  %v2140_v30 = vrot.slane %v648_v27, %v2107_v50 }
 0x242   : > { %2532 = vmatpush1.bf16.msra.mxu1 %v3646_v31 }
 0x243   : > { %2533 = vmatprep.subr.bf16.mxu1 %v3651_v32 }
 0x246   : > { %2534 = vmatpush1.bf16.msra.mxu1 %v3649_v33 }
 0x247   : > { %2535 = vmatprep.subr.bf16.mxu1 %v3654_v34 }
 0x24a   : > { %2536 = vmatpush1.bf16.msra.mxu1 %v3652_v35 }
 0x24b   : > { %2537 = vmatprep.subr.bf16.mxu1 %v3657_v36 }
 0x24e   : > { %2538 = vmatpush1.bf16.msra.mxu1 %v3655_v37 }
 0x24f   : > { %2539 = vmatprep.subr.bf16.mxu1 %v3660_v38 }
 0x252   : > { %2540 = vmatpush1.bf16.msra.mxu1 %v3658_v39 }
 0x253   : > { %2541 = vmatprep.subr.bf16.mxu1 %v3663_v40 }
 0x256   : > { %2542 = vmatpush1.bf16.msra.mxu1 %v3661_v41 }
 0x259   : > { %2544 = vmatmul.mubr.bf16.vlgmr.msra.gmra.mrb[16].mxu1 %v3985_v26  ;;  %v2111_v26 = vsub.s32 4, %v3973_v9 }
 0x25b   : > { %v2112_v51 = vrot.slane %v4005_v49, %v2111_v26 }
 0x26c   : > { %v2299_v55 = vpop.f32.mrb[4].mxu1  ;;  %v2340_v56 = vpop.f32.mrb[8].mxu0 }
 0x26d   : > { %v2300_v57 = vadd.f32 %v2299_v55, %v2112_v51  ;;  %v2341_v58 = vadd.f32 %v2340_v56, %v2120_v52  ;;  %v2301_v59 = vpop.f32.mrb[5].mxu1  ;;  %v2342_v60 = vpop.f32.mrb[9].mxu0 }
 0x26e   : > { %v2302_v62 = vadd.f32 %v2301_v59, %v2116_v53  ;;  %v2343_v63 = vadd.f32 %v2342_v60, %v2124_v54  ;;  %v2303_v0 = vpop.f32.mrb[6].mxu1  ;;  %v2344_v1 = vpop.f32.mrb[10].mxu0  ;;  %v2148_v59 = vrot.slane %v648_v27, %v2115_v46  ;;  %v2156_v60 = vrot.slane %v648_v27, %v2123_v48 }
 0x26f   : > { %v2556_v2 = vmax.f32 %v2300_v57, 0.0  ;;  %v2558_v3 = vmax.f32 %v2341_v58, 0.0  ;;  %v2304_v4 = vpop.f32.mrb[7].mxu1  ;;  %v2345_v5 = vpop.f32.mrb[11].mxu0  ;;  %v2144_v57 = vrot.slane %v648_v27, %v2111_v26  ;;  %v2152_v58 = vrot.slane %v648_v27, %v2119_v44 }
 0x270   : > { %v2557_v6 = vmax.f32 %v2302_v62, 0.0  ;;  %v2559_v7 = vmax.f32 %v2343_v63, 0.0 }
 0x272   : > { %v3161_v8 = vpack.c.bf16 %v2557_v6, %v2556_v2  ;;  %v3162_v11 = vpack.c.bf16 %v2559_v7, %v2558_v3 }
 0x274   : > { %v2630_v13 = vrot.slane %v3161_v8, %v4019_v15  ;;  %v2637_v14 = vrot.slane %v3162_v11, %v4019_v15 }
 0x276   : > { %v2639_v17 = vcombine.low %v2630_v13, %v2637_v14 }
 0x278   : > { %v2653_v20 = vrot.slane %v2639_v17, %v4019_v15 }
 0x27a   : > { %v2654_v22 = vcombine.low %v2646_v19, %v2653_v20  ;;  %v2756_v20 = vld [vmem:[%s4093_s24 + $0x8] sm:$0xff] }
 0x27c   : > { %v2754_v24 = vsel %vm2752_vm2, %v2654_v22, %v2753_v21 }
 0x27d   : > { %2755 = vst [vmem:[%s4093_s24] sm:$0xff] %v2754_v24  ;;  %v649_v24 = vld [vmem:[#allocation7 + $0x10] sm:$0x3] }
 0x27e   : > { %v2160_v27 = vrot.slane %v649_v24, %v3976_v10 }
 0x2ac   : > { %v2381_v31 = vpop.f32.mrb[8].mxu1 }
 0x2ad   : > { %v2382_v32 = vadd.f32 %v2381_v31, %v2128_v28  ;;  %v2422_v33 = vpop.f32.mrb[12].mxu0  ;;  %v2383_v34 = vpop.f32.mrb[9].mxu1  ;;  %v2164_v28 = vrot.slane %v649_v24, %v3979_v12 }
 0x2ae   : > { %v2423_v35 = vadd.f32 %v2422_v33, %v2136_v25  ;;  %v2384_v36 = vadd.f32 %v2383_v34, %v2132_v29  ;;  %v2424_v37 = vpop.f32.mrb[13].mxu0  ;;  %v2385_v38 = vpop.f32.mrb[10].mxu1 }
 0x2af   : > { %v2560_v39 = vmax.f32 %v2382_v32, 0.0  ;;  %v2425_v40 = vadd.f32 %v2424_v37, %v2140_v30  ;;  %v2426_v41 = vpop.f32.mrb[14].mxu0  ;;  %v2386_v45 = vpop.f32.mrb[11].mxu1 }
 0x2b0   : > { %v2562_v23 = vmax.f32 %v2423_v35, 0.0  ;;  %v2561_v51 = vmax.f32 %v2384_v36, 0.0  ;;  %v2427_v47 = vpop.f32.mrb[15].mxu0  ;;  %v2759_v36 = vld [vmem:[%s4093_s24 + $0x10] sm:$0x3] }
 0x2b1   : > { %v2563_v52 = vmax.f32 %v2425_v40, 0.0 }
 0x2b2   : > { %v3163_v53 = vpack.c.bf16 %v2561_v51, %v2560_v39 }
 0x2b3   : > { %v3164_v54 = vpack.c.bf16 %v2563_v52, %v2562_v23 }
 0x2b4   : > { %v2665_v50 = vrot.slane %v3163_v53, %v4019_v15 }
 0x2b5   : > { %v2672_v55 = vrot.slane %v3164_v54, %v4019_v15 }
 0x2b7   : > { %v2687_v56 = vcombine.low %v2665_v50, %v2672_v55 }
 0x2b9   : > { %v2695_v17 = vrot.slane %v2687_v56, %v4019_v15 }
 0x2ec   : > { %v2463_v61 = vpop.f32.mrb[12].mxu1 }
 0x2ed   : > { %v2464_v62 = vadd.f32 %v2463_v61, %v2144_v57  ;;  %v2504_v63 = vpop.f32.mrb[16].mxu0  ;;  %v2465_v0 = vpop.f32.mrb[13].mxu1 }
 0x2ee   : > { %v2505_v1 = vadd.f32 %v2504_v63, %v2152_v58  ;;  %v2466_v49 = vadd.f32 %v2465_v0, %v2148_v59  ;;  %v2506_v2 = vpop.f32.mrb[17].mxu0  ;;  %v2467_v3 = vpop.f32.mrb[14].mxu1 }
 0x2ef   : > { %v2564_v4 = vmax.f32 %v2464_v62, 0.0  ;;  %v2507_v26 = vadd.f32 %v2506_v2, %v2156_v60  ;;  %v2508_v5 = vpop.f32.mrb[18].mxu0  ;;  %v2468_v44 = vpop.f32.mrb[15].mxu1 }
 0x2f0   : > { %v2566_v6 = vmax.f32 %v2505_v1, 0.0  ;;  %v2565_v7 = vmax.f32 %v2466_v49, 0.0  ;;  %v2509_v46 = vpop.f32.mrb[19].mxu0 }
 0x2f1   : > { %v2567_v8 = vmax.f32 %v2507_v26, 0.0 }
 0x2f2   : > { %v3165_v9 = vpack.c.bf16 %v2565_v7, %v2564_v4 }
 0x2f3   : > { %v3166_v48 = vpack.c.bf16 %v2567_v8, %v2566_v6 }
 0x2f4   : > { %v2679_v11 = vrot.slane %v3165_v9, %v4019_v15 }
 0x2f5   : > { %v2686_v13 = vrot.slane %v3166_v48, %v4019_v15 }
 0x2f7   : > { %v2688_v14 = vcombine.low %v2679_v11, %v2686_v13 }
 0x2f9   : > { %v2702_v19 = vrot.slane %v2688_v14, %v4019_v15 }
 0x2fb   : > { %v2703_v21 = vcombine.low %v2695_v17, %v2702_v19 }
 0x2fd   : > { %v2757_v22 = vsel %vm2752_vm2, %v2703_v21, %v2756_v20 }
 0x2fe   : > { %2758 = vst [vmem:[%s4093_s24 + $0x8] sm:$0xff] %v2757_v22 }
 0x32c   : > { %v2545_v25 = vpop.f32.mrb[16].mxu1 }
 0x32d   : > { %v2546_v29 = vadd.f32 %v2545_v25, %v2160_v27  ;;  %v2547_v30 = vpop.f32.mrb[17].mxu1 }
 0x32e   : > { %v2548_v31 = vadd.f32 %v2547_v30, %v2164_v28  ;;  %v2549_v32 = vpop.f32.mrb[18].mxu1 }
 0x32f   : > { %v2568_v33 = vmax.f32 %v2546_v29, 0.0  ;;  %v2550_v34 = vpop.f32.mrb[19].mxu1 }
 0x330   : > { %v2569_v18 = vmax.f32 %v2548_v31, 0.0 }
 0x332   : > { %v3167_v35 = vpack.c.bf16 %v2569_v18, %v2568_v33 }
 0x334   : > { %v2711_v16 = vrot.slane %v3167_v35, %v4019_v15 }
 0x336   : > { %v2718_v37 = vrot.slane %v2711_v16, %v4019_v15 }
 0x338   : > { %v2760_v10 = vsel %vm2728_vm9, %v2718_v37, %v2759_v36 }
 0x339   : > { %2761 = vst [vmem:[%s4093_s24 + $0x10] sm:$0x3] %v2760_v10 }
 0x33a PF: > { %s18_s18 = sadd.s32 1, %s3794_s18  }
 0x33b   : > { %p15_p11 = scmp.ge.s32.totalorder %s18_s18, 4  }
 0x33d   :  { %17 = sbr.rel (!%p15_p11) target bundleno = 3 (0x3), region = 87 }
 0x344   :  { %2781 = vsyncpa [#allocation3], 1 }
 0x345   :  { %2783 = vsyncpa [#allocation3 + $0x1], 1 }
 0x346   :  { %2784 = vsyncpa [#allocation5], 1 }
 0x347   :  { %2785 = vsyncpa [#allocation8], 1 }

// kernel: base_decoder_forward.7
= control target key start
LH: loop header
LB: loop body
LE: loop exit
PB: predicated region body
PF: predicated region fallthrough
CT: control target
= control target key end

     0   :  { %8 = vsyncpa [#allocation3], 0  ;;  %s1987_s0 = inlined_call_operand.vmem [shape: bf16[2,10,10,64], index: 0, kind: input, shape index: {}]   ;;  %s1988_s1 = inlined_call_operand.hbm [shape: bf16[576,128], index: 1, kind: input, shape index: {}]   ;;  %s1989_s2 = inlined_call_operand.hbm [shape: f32[1,128], index: 2, kind: input, shape index: {}]   ;;  %s1990_s3 = inlined_call_operand.vmem [shape: bf16[2,64,128], index: 3, kind: output, shape index: {}]  }
   0x1   :  { %9 = vsyncpa [#allocation5], 0  ;;  %s1537_s12 = smov 0  }
   0x2 LB: > { %s1543_s13 = sadd.s32 4294967295, %s1509_s12   ;;  %p1198_p0 = scmp.ge.s32.totalorder %s1509_s12, 1  ;;  %s1509_s12 = sphi %s1537_s12, %s15_s12  }
   0x3   : > { %p114_p1 = scmp.lt.s32.totalorder %s1509_s12, 3  ;;  %s1511_s14 = smov [#allocation2]  }
   0x4   : > { %s126_s15 = sshll.u32 %s1511_s14, 4  ;;  %p1991_p3 = scmp.eq.s32.totalorder %s1543_s13, 0  ;;  %s127_s15 = int_to_ptr.vmem [resolvable:$true] %s126_s15 }
   0x5   : > { %p1547_p2 = pnand %p1198_p0, %p114_p1  ;;  %s1512_s17 = smov [#allocation4]  }
   0x6   : > { %s140_s18 = sshll.u32 %s1512_s17, 4  ;;  %s1439_s22 = scalar_lea.hbm %s1988_s1, 4608  ;;  %s1560_s18 = int_to_ptr.vmem [resolvable:$true] %s140_s18 }
   0x7   : > { %s1993_s16 = scalar_select %p1547_p2, 1, 0 }
   0x8   : > { %p1369_p4 = pneg %p1547_p2  ;;  %p1440_p6 = scmp.ne.s32.totalorder %s1988_s1, %s1439_s22 }
   0x9   : > { %p1446_p10 = scmp.lt.u32.totalorder %s1439_s22, %s1988_s1 }
   0xa   : > { %p1556_p5 = pnand %p1991_p3, %p1369_p4 }
   0xc   : > { %p1441_p7 = pneg %p1556_p5 }
   0xe   : > { %p1442_p8 = pnand %p1441_p7, %p1440_p6 }
  0x10   : > { %p1443_p9 = pneg %p1442_p8 }
  0x12   : > { %p1448_p11 = pnand %p1446_p10, %p1443_p9 }
  0x14   : > { %1451 = shalt.err (!%p1448_p11)
}
  0x15   : > { %s1452_s27 = scalar_lea.vmem %s127_s15, 4608  ;;  %p1460_p1 = scmp.lt.s32.totalorder %s127_s15, %s127_s15 }
  0x16   : > { %p1453_p12 = scmp.ne.s32.totalorder %s127_s15, %s1452_s27  ;;  %p1461_p4 = scmp.lt.s32.totalorder %s1452_s27, %s1452_s27 }
  0x18   : > { %p1455_p13 = pnand %p1453_p12, %p1441_p7  ;;  %p1462_p3 = por %p1461_p4, %p1460_p1 }
  0x1a   : > { %p1456_p0 = pneg %p1455_p13 }
  0x1c   : > { %p1463_p2 = pnand %p1462_p3, %p1456_p0 }
  0x1e   : > { %1466 = shalt.err (!%p1463_p2)
}
  0x1f   : > { %s1513_s28 = smov 64   ;;  %s1514_s29 = smov 4  }
  0x20   : > { %1372 = dma.hbm_to_vmem [thread:$0]  (!%p1556_p5), %s1988_s1, 4608, %s127_s15, [#allocation3], %s1513_s28, %s1513_s28, %s1514_s29  }
  0x21   : > { %s1467_s7 = scalar_lea.hbm %s1989_s2, 16 }
  0x22   : > { %p1468_p6 = scmp.ne.s32.totalorder %s1989_s2, %s1467_s7  ;;  %p1474_p8 = scmp.lt.u32.totalorder %s1467_s7, %s1989_s2 }
  0x24   : > { %p1470_p2 = pnand %p1468_p6, %p1441_p7 }
  0x26   : > { %p1471_p3 = pneg %p1470_p2 }
  0x28   : > { %p1476_p9 = pnand %p1474_p8, %p1471_p3 }
  0x2a   : > { %1479 = shalt.err (!%p1476_p9)
}
  0x2b   : > { %s1480_s14 = scalar_lea.vmem %s1560_s18, 16  ;;  %s1487_s15 = scalar_lea.vmem %s1560_s18, 32 }
  0x2c   : > { %p1481_p10 = scmp.ne.s32.totalorder %s1560_s18, %s1480_s14  ;;  %p1488_p13 = scmp.lt.s32.totalorder %s1560_s18, %s1560_s18 }
  0x2d   : > { %p1489_p0 = scmp.lt.s32.totalorder %s1487_s15, %s1480_s14 }
  0x2e   : > { %p1483_p11 = pnand %p1481_p10, %p1441_p7 }
  0x2f   : > { %p1490_p1 = por %p1489_p0, %p1488_p13 }
  0x30   : > { %p1484_p12 = pneg %p1483_p11 }
  0x32   : > { %p1491_p4 = pnand %p1490_p1, %p1484_p12 }
  0x34   : > { %1494 = shalt.err (!%p1491_p4)
}
  0x35   : > { %1375 = dma.hbm_to_vmem [thread:$0]  (!%p1556_p5), %s1989_s2, 16, %s1560_s18, [#allocation5]  }
  0x36   : > { %p1995_p6 = scmp.ne.s32.totalorder %s1993_s16, 0 }
  0x37   : > { %p1996_p7 = scmp.eq.s32.totalorder (!%p1995_p6), %s1543_s13, 0 }
  0x38   : > { %161 = sbr.rel (%p1995_p6) target bundleno = 487 (0x1e7), region = 32 }
  0x3f   : > { %1500 = dma.done.wait (%p1996_p7), [#allocation3], 4608   ;;  %p1997_p2 = pmov %p1996_p7 }
  0x41   : > { %1502 = vsyncadd (%p1997_p2), [#allocation3], 4294962688  ;;  %p1998_p3 = pmov %p1997_p2 }
  0x42   : > { %p1999_p8 = pmov %p1997_p2 }
  0x43   : > { %1504 = dma.done.wait (%p1998_p3), [#allocation5], 16  }
  0x44   : > { %1506 = vsyncadd (%p1999_p8), [#allocation5], 4294967280  ;;  %p189_p9 = scmp.lt.s32.totalorder %s1543_s13, 1  ;;  %v1515_v0 = vmov 0   ;;  %vm220_vm0 = vsmask.f32 3328 }
  0x45   : > { %787 = vmatprep.subr.bf16.mxu1 %v1515_v0  ;;  %638 = vmatprep.subr.bf16.mxu0 %v1515_v0  ;;  %vm221_vm1 = vsmask.f32 7440  ;;  %v1394_v31 = vld [vmem:[#allocation2] sm:$0xff]   ;;  %s1516_s22 = smov 64   ;;  %vm351_vm3 = vcmask 1042432   ;;  %vm352_vm4 = vcmask 1046532  }
  0x46   : > { %s2005_s13 = smov (!%p189_p9, %s1543_s13), 1  ;;  %vm1674_vm2 = vmor %vm220_vm0, %vm221_vm1  ;;  %788 = vmatpush1.bf16.msra.mxu1 %v1394_v31  ;;  %vm430_vm6 = vcmask 523264  }
  0x47   : > { %s1360_s16 = smul.u32 80, %s2005_s13  ;;  %789 = vmatprep.subr.bf16.mxu1 %v1515_v0  ;;  %vm1767_vm5 = vmor %vm351_vm3, %vm352_vm4  ;;  %s1304_s23 = sshll.u32 %s2005_s13, 5 }
  0x48   : > { %s1977_s26 = scalar_lea.vmem %s1990_s3, %s1304_s23 }
  0x49   : > { %s1630_s21 = scalar_lea.vmem %s1987_s0, %s1360_s16 }
  0x4a   : > { %v1633_v1 = vld [vmem:[%s1630_s21] sm:$0xf]  ;;  %v1636_v2 = vld [vmem:[%s1630_s21 + $0x4] sm:$0x1]  ;;  %v1639_v3 = vld [vmem:[%s1630_s21 + $0x8] sm:$0xf] }
  0x4b   : > { %v1642_v4 = vld [vmem:[%s1630_s21 + $0xc] sm:$0x1]  ;;  %v1645_v5 = vld [vmem:[%s1630_s21 + $0x10] sm:$0xf]  ;;  %v1648_v6 = vld [vmem:[%s1630_s21 + $0x14] sm:$0x1]  ;;  %v1216_v7 = vcombine.low %v1633_v1, %v1639_v3 }
  0x4c   : > { %v224_v8 = vshrl.u32 %v1633_v1, 16  ;;  %v227_v9 = vshll.u32 %v1633_v1, 16  ;;  %v233_v10 = vshll.u32 %v1636_v2, 16  ;;  %v238_v11 = vshrl.u32 %v1639_v3, 16  ;;  %v1657_v12 = vld [vmem:[%s1630_s21 + $0x18] sm:$0xf] }
  0x4d   : > { %v241_v13 = vshll.u32 %v1639_v3, 16  ;;  %v247_v14 = vshll.u32 %v1642_v4, 16  ;;  %v252_v15 = vshrl.u32 %v1645_v5, 16  ;;  %v255_v16 = vshll.u32 %v1645_v5, 16  ;;  %v1664_v17 = vld [vmem:[%s1630_s21 + $0x1c] sm:$0x1] }
  0x4e   : > { %v226_v18 = vrot.slane %v224_v8, 4  ;;  %v229_v19 = vrot.slane %v227_v9, 5  ;;  %v235_v20 = vrot.slane %v233_v10, 5  ;;  %v240_v21 = vrot.slane %v238_v11, 4  ;;  %v1667_v22 = vld [vmem:[%s1630_s21 + $0x20] sm:$0xf] }
  0x4f   : > { %v243_v23 = vrot.slane %v241_v13, 5  ;;  %v249_v24 = vrot.slane %v247_v14, 5  ;;  %v254_v25 = vrot.slane %v252_v15, 4  ;;  %v257_v26 = vrot.slane %v255_v16, 5  ;;  %v1679_v35 = vld [vmem:[%s1630_s21 + $0x24] sm:$0x1] }
  0x50   : > { %v230_v27 = vor.u32 %v229_v19, %v226_v18  ;;  %v261_v28 = vshll.u32 %v1648_v6, 16  ;;  %v266_v29 = vshrl.u32 %v1657_v12, 16  ;;  %v269_v30 = vshll.u32 %v1657_v12, 16  ;;  %v1684_v42 = vld [vmem:[%s1630_s21 + $0x28] sm:$0xf] }
  0x51   : > { %v244_v33 = vor.u32 %v243_v23, %v240_v21  ;;  %v258_v34 = vor.u32 %v257_v26, %v254_v25  ;;  %v275_v36 = vshll.u32 %v1664_v17, 16  ;;  %v280_v37 = vshrl.u32 %v1667_v22, 16  ;;  %v1692_v51 = vld [vmem:[%s1630_s21 + $0x2c] sm:$0x1]  ;;  %v1701_v56 = vld [vmem:[%s1630_s21 + $0x30] sm:$0xf] }
  0x52   : > { %v231_v38 = vrot.slane %v230_v27, 4  ;;  %v263_v39 = vrot.slane %v261_v28, 5  ;;  %v268_v40 = vrot.slane %v266_v29, 4  ;;  %v271_v41 = vrot.slane %v269_v30, 5  ;;  %v1704_v57 = vld [vmem:[%s1630_s21 + $0x34] sm:$0x1] }
  0x53   : > { %v245_v43 = vrot.slane %v244_v33, 4  ;;  %v259_v44 = vrot.slane %v258_v34, 4  ;;  %v277_v45 = vrot.slane %v275_v36, 5  ;;  %v282_v46 = vrot.slane %v280_v37, 4  ;;  %v1707_v61 = vld [vmem:[%s1630_s21 + $0x38] sm:$0xf] }
  0x54   : > { %v236_v47 = vsel %vm1674_vm2, %v231_v38, %v235_v20  ;;  %v272_v48 = vor.u32 %v271_v41, %v268_v40  ;;  %v283_v49 = vshll.u32 %v1667_v22, 16  ;;  %v289_v50 = vshll.u32 %v1679_v35, 16  ;;  %v1711_v10 = vld [vmem:[%s1630_s21 + $0x3c] sm:$0x1]  ;;  %v1719_v21 = vld [vmem:[%s1630_s21 + $0x40] sm:$0xf] }
  0x55   : > { %v250_v52 = vsel %vm1674_vm2, %v245_v43, %v249_v24  ;;  %v264_v53 = vsel %vm1674_vm2, %v259_v44, %v263_v39  ;;  %v294_v54 = vshrl.u32 %v1684_v42, 16  ;;  %v297_v55 = vshll.u32 %v1684_v42, 16  ;;  %v1395_v23 = vld [vmem:[#allocation2 + $0x60] sm:$0xff]   ;;  %v1396_v24 = vld [vmem:[#allocation2 + $0x8] sm:$0xff]   ;;  %v1729_v34 = vld [vmem:[%s1630_s21 + $0x48] sm:$0xf] }
  0x56   : > { %v1220_v58 = vcombine.low %v236_v47, %v250_v52  ;;  %v273_v59 = vrot.slane %v272_v48, 4  ;;  %v285_v60 = vrot.slane %v283_v49, 5  ;;  %v1233_v62 = vcombine.low %v250_v52, %v264_v53  ;;  %v1723_v28 = vld [vmem:[%s1630_s21 + $0x44] sm:$0x1]  ;;  %639 = vmatpush1.bf16.msra.mxu0 %v1395_v23  ;;  %v1736_v39 = vld [vmem:[%s1630_s21 + $0x4c] sm:$0x1]  ;;  %790 = vmatpush1.bf16.msra.mxu1 %v1396_v24 }
  0x57   : > { %v296_v63 = vrot.slane %v294_v54, 4  ;;  %v299_v8 = vrot.slane %v297_v55, 5  ;;  %v303_v9 = vshll.u32 %v1692_v51, 16  ;;  %v291_v14 = vrot.slane %v289_v50, 5  ;;  %v1397_v40 = vld [vmem:[#allocation2 + $0x68] sm:$0xff]   ;;  %640 = vmatprep.subr.bf16.mxu0 %v1515_v0  ;;  %791 = vmatprep.subr.bf16.mxu1 %v1515_v0  ;;  %v1399_v55 = vld [vmem:[#allocation2 + $0x70] sm:$0xff]  }
  0x58   : > { %410 = vrot.lane.b32.xlu0 %v1220_v58, %s1516_s22  ;;  %v278_v11 = vsel %vm1674_vm2, %v273_v59, %v277_v45  ;;  %v286_v13 = vor.u32 %v285_v60, %v282_v46  ;;  %v308_v15 = vshrl.u32 %v1701_v56, 16  ;;  %v311_v20 = vshll.u32 %v1701_v56, 16  ;;  %v1398_v46 = vld [vmem:[#allocation2 + $0x10] sm:$0xff]   ;;  %v1402_v24 = vld [vmem:[#allocation2 + $0x20] sm:$0xff]  }
  0x59   : > { %v1221_v16 = vcombine.low %v264_v53, %v278_v11  ;;  %v300_v18 = vor.u32 %v299_v8, %v296_v63  ;;  %v305_v19 = vrot.slane %v303_v9, 5  ;;  %v317_v27 = vshll.u32 %v1704_v57, 16  ;;  %v1400_v63 = vld [vmem:[#allocation2 + $0x18] sm:$0xff]  }
  0x5a   : > { %v287_v25 = vrot.slane %v286_v13, 4  ;;  %v310_v26 = vrot.slane %v308_v15, 4  ;;  %v313_v30 = vrot.slane %v311_v20, 5  ;;  %v322_v31 = vshrl.u32 %v1707_v61, 16  ;;  %641 = vmatpush1.bf16.msra.mxu0 %v1397_v40  ;;  %792 = vmatpush1.bf16.msra.mxu1 %v1398_v46  ;;  %v1403_v40 = vld [vmem:[#allocation2 + $0x80] sm:$0xff]  }
  0x5b   : > { %412 = vrot.lane.b32.xlu1 %v1221_v16, %s1516_s22  ;;  %v301_v29 = vrot.slane %v300_v18, 4  ;;  %v325_v33 = vshll.u32 %v1707_v61, 16  ;;  %v319_v37 = vrot.slane %v317_v27, 5  ;;  %v331_v38 = vshll.u32 %v1711_v10, 16  ;;  %642 = vmatprep.subr.bf16.mxu0 %v1515_v0 }
  0x5c   : > { %501 = vrot.lane.b32.xlu0 %v1233_v62, %s1516_s22  ;;  %v292_v36 = vsel %vm1674_vm2, %v287_v25, %v291_v14  ;;  %v314_v44 = vor.u32 %v313_v30, %v310_v26  ;;  %v324_v45 = vrot.slane %v322_v31, 4  ;;  %v472_v50 = vshrl.u32 %v1719_v21, 16  ;;  %793 = vmatprep.subr.bf16.mxu1 %v1515_v0 }
  0x5d   : > { %v1234_v41 = vcombine.low %v278_v11, %v292_v36  ;;  %v306_v43 = vsel %vm1674_vm2, %v301_v29, %v305_v19  ;;  %v327_v48 = vrot.slane %v325_v33, 5  ;;  %v333_v49 = vrot.slane %v331_v38, 5  ;;  %v1401_v19 = vld [vmem:[#allocation2 + $0x78] sm:$0xff]  }
  0x5e   : > { %v1222_v47 = vcombine.low %v292_v36, %v306_v43  ;;  %v315_v52 = vrot.slane %v314_v44, 4  ;;  %v475_v53 = vshll.u32 %v1719_v21, 16  ;;  %v481_v54 = vshll.u32 %v1723_v28, 16  ;;  %643 = vmatpush1.bf16.msra.mxu0 %v1399_v55  ;;  %794 = vmatpush1.bf16.msra.mxu1 %v1400_v63  ;;  %v1407_v63 = vld [vmem:[#allocation2 + $0x90] sm:$0xff]  }
  0x5f   : > { %503 = vrot.lane.b32.xlu1 %v1234_v41, %s1516_s22  ;;  %v328_v58 = vor.u32 %v327_v48, %v324_v45  ;;  %v474_v59 = vrot.slane %v472_v50, 4  ;;  %v853_v60 = vshrl.u32 %v1729_v34, 16  ;;  %v856_v62 = vshll.u32 %v1729_v34, 16  ;;  %644 = vmatprep.subr.bf16.mxu0 %v1515_v0  ;;  %v1404_v45 = vld [vmem:[#allocation2 + $0x28] sm:$0xff]  }
  0x60   : > { %414 = vrot.lane.b32.xlu0 %v1222_v47, %s1516_s22  ;;  %v320_v8 = vsel %vm1674_vm2, %v315_v52, %v319_v37  ;;  %v477_v9 = vrot.slane %v475_v53, 5  ;;  %v483_v11 = vrot.slane %v481_v54, 5  ;;  %v862_v13 = vshll.u32 %v1736_v39, 16  ;;  %795 = vmatprep.subr.bf16.mxu1 %v1515_v0  ;;  %v1405_v50 = vld [vmem:[#allocation2 + $0x88] sm:$0xff]   ;;  %v1419_v37 = vld [vmem:[#allocation2 + $0xc0] sm:$0xff]  }
  0x61   : > { %v1235_v14 = vcombine.low %v306_v43, %v320_v8  ;;  %v329_v15 = vrot.slane %v328_v58, 4  ;;  %v855_v16 = vrot.slane %v853_v60, 4  ;;  %v858_v18 = vrot.slane %v856_v62, 5 }
  0x62   : > { %v478_v20 = vor.u32 %v477_v9, %v474_v59  ;;  %v864_v23 = vrot.slane %v862_v13, 5  ;;  %v1229_v25 = vcombine.low %v1639_v3, %v1645_v5  ;;  %v1217_v29 = vcombine.low %v1645_v5, %v1657_v12  ;;  %645 = vmatpush1.bf16.msra.mxu0 %v1401_v19  ;;  %796 = vmatpush1.bf16.msra.mxu1 %v1402_v24  ;;  %v1409_v19 = vld [vmem:[#allocation2 + $0x98] sm:$0xff]  }
  0x63   : > { %505 = vrot.lane.b32.xlu1 %v1235_v14, %s1516_s22  ;;  %v334_v26 = vsel %vm1674_vm2, %v329_v15, %v333_v49  ;;  %v859_v27 = vor.u32 %v858_v18, %v855_v16  ;;  %v1230_v33 = vcombine.low %v1657_v12, %v1667_v22  ;;  %v1208_v41 = vrot.slane %v1633_v1, 9  ;;  %646 = vmatprep.subr.bf16.mxu0 %v1515_v0  ;;  %v1422_v1 = vld [vmem:[#allocation2 + $0xd0] sm:$0xff]  }
  0x64   : > { %v1223_v30 = vcombine.low %v320_v8, %v334_v26  ;;  %v479_v31 = vrot.slane %v478_v20, 4  ;;  %v356_v46 = vrot.slane %v1636_v2, 5  ;;  %797 = vmatprep.subr.bf16.mxu1 %v1515_v0  ;;  %v1209_v48 = vrot.slane %v1639_v3, 9  ;;  %v1406_v2 = vld [vmem:[#allocation2 + $0x30] sm:$0xff]   ;;  %v1423_v3 = vld [vmem:[#allocation2 + $0xd8] sm:$0xff]  }
  0x65   : > { %v860_v36 = vrot.slane %v859_v27, 4  ;;  %v1218_v49 = vcombine.low %v1667_v22, %v1684_v42  ;;  %v360_v52 = vrot.slane %v1642_v4, 5  ;;  %v1231_v53 = vcombine.low %v1684_v42, %v1701_v56 }
  0x66   : > { %416 = vrot.lane.b32.xlu0 %v1223_v30, %s1516_s22  ;;  %v484_v38 = vsel %vm1674_vm2, %v479_v31, %v483_v11  ;;  %v357_v32 = vsel %vm1767_vm5, %v1208_v41, %v356_v46  ;;  %647 = vmatpush1.bf16.msra.mxu0 %v1403_v40  ;;  %v1210_v55 = vrot.slane %v1645_v5, 9  ;;  %v376_v58 = vrot.slane %v1692_v51, 5  ;;  %v1408_v51 = vld [vmem:[#allocation2 + $0x38] sm:$0xff]   ;;  %v1411_v40 = vld [vmem:[#allocation2 + $0xa0] sm:$0xff]   ;;  %v1413_v46 = vld [vmem:[#allocation2 + $0xa8] sm:$0xff]  }
  0x67   : > { %v1236_v43 = vcombine.low %v334_v26, %v484_v38  ;;  %v865_v44 = vsel %vm1674_vm2, %v860_v36, %v864_v23  ;;  %798 = vmatpush1.bf16.msra.mxu1 %v1404_v45  ;;  %648 = vmatprep.subr.bf16.mxu0 %v1515_v0  ;;  %v361_v54 = vsel %vm1767_vm5, %v1209_v48, %v360_v52  ;;  %v364_v59 = vrot.slane %v1648_v6, 5  ;;  %v1414_v48 = vld [vmem:[#allocation2 + $0x50] sm:$0xff]   ;;  %v1416_v52 = vld [vmem:[#allocation2 + $0x58] sm:$0xff]  }
  0x68   : > { %v1275_v47 = vcombine.low %v484_v38, %v865_v44  ;;  %799 = vmatprep.subr.bf16.mxu1 %v1515_v0  ;;  %v1224_v4 = vcombine.low %v357_v32, %v361_v54  ;;  %v380_v60 = vrot.slane %v1704_v57, 5  ;;  %v1211_v62 = vrot.slane %v1657_v12, 9  ;;  %v1412_v44 = vld [vmem:[#allocation2 + $0x48] sm:$0xff]   ;;  %v1415_v32 = vld [vmem:[#allocation2 + $0xb0] sm:$0xff]  }
  0x69   : > { %507 = vrot.lane.b32.xlu1 %v1236_v43, %s1516_s22  ;;  %v365_v8 = vsel %vm1767_vm5, %v1210_v55, %v364_v59  ;;  %v368_v9 = vrot.slane %v1664_v17, 5  ;;  %v1212_v11 = vrot.slane %v1667_v22, 9  ;;  %v384_v57 = vrot.slane %v1711_v10, 5  ;;  %v1417_v55 = vld [vmem:[#allocation2 + $0xb8] sm:$0xff]   ;;  %v1421_v59 = vld [vmem:[#allocation2 + $0xc8] sm:$0xff]  }
  0x6a   : > { %876 = vrot.lane.b32.xlu0 %v1275_v47, %s1516_s22  ;;  %649 = vmatpush1.bf16.msra.mxu0 %v1405_v50  ;;  %v1237_v6 = vcombine.low %v361_v54, %v365_v8  ;;  %v372_v14 = vrot.slane %v1679_v35, 5  ;;  %v1219_v17 = vcombine.low %v1701_v56, %v1707_v61  ;;  %v489_v15 = vrot.slane %v1723_v28, 5  ;;  %v1410_v28 = vld [vmem:[#allocation2 + $0x40] sm:$0xff]  }
  0x6b   : > { %1269 = vmatprep.mubr.msk.bf16.mxu1 %vm430_vm6, %v1224_v4  ;;  %800 = vmatpush1.bf16.msra.mxu1 %v1406_v2  ;;  %v1809_v13 = vsel %vm1767_vm5, %v1211_v62, %v368_v9  ;;  %v1213_v10 = vrot.slane %v1684_v42, 9  ;;  %v1232_v18 = vcombine.low %v1707_v61, %v1719_v21  ;;  %v1214_v20 = vrot.slane %v1701_v56, 9 }
  0x6c   : > { %650 = vmatprep.subr.bf16.mxu0 %v1515_v0  ;;  %801 = vmatprep.subr.bf16.mxu1 %v1515_v0  ;;  %v1816_v16 = vcombine.low %v365_v8, %v1809_v13  ;;  %v1824_v35 = vsel %vm1767_vm5, %v1212_v11, %v372_v14  ;;  %v1215_v26 = vrot.slane %v1707_v61, 9  ;;  %v1228_v31 = vrot.slane %v1719_v21, 9  ;;  %v1433_v61 = vld [vmem:[#allocation2 + $0x108] sm:$0xff]  }
  0x6d   : > { %1253 = vmatprep.mubr.msk.bf16.mxu0 %vm430_vm6, %v1237_v6  ;;  %v1238_v23 = vcombine.low %v1809_v13, %v1824_v35  ;;  %v1832_v24 = vsel %vm1767_vm5, %v1213_v10, %v376_v58  ;;  %v1842_v30 = vsel %vm1767_vm5, %v1214_v20, %v380_v60  ;;  %v870_v47 = vrot.slane %v1736_v39, 5  ;;  %v1432_v6 = vld [vmem:[#allocation2 + $0x100] sm:$0xff]   ;;  %v1437_v13 = vld [vmem:[#allocation2 + $0x118] sm:$0xff]  }
  0x6e   : > { %651 = vmatpush1.bf16.msra.mxu0 %v1407_v63  ;;  %v1838_v27 = vcombine.low %v1824_v35, %v1832_v24  ;;  %v1239_v36 = vcombine.low %v1832_v24, %v1842_v30  ;;  %v1849_v38 = vsel %vm1767_vm5, %v1215_v26, %v384_v57  ;;  %v1857_v43 = vsel %vm1767_vm5, %v1228_v31, %v489_v15  ;;  %v1436_v57 = vld [vmem:[#allocation2 + $0x110] sm:$0xff]  }
  0x6f   : > { %802 = vmatpush1.bf16.msra.mxu1 %v1408_v51  ;;  %652 = vmatprep.subr.bf16.mxu0 %v1515_v0  ;;  %v1853_v41 = vcombine.low %v1842_v30, %v1849_v38  ;;  %v1240_v45 = vcombine.low %v1849_v38, %v1857_v43  ;;  %v1273_v50 = vrot.slane %v1729_v34, 9  ;;  %v1274_v39 = vcombine.low %v1719_v21, %v1729_v34  ;;  %v1428_v51 = vld [vmem:[#allocation2 + $0xf0] sm:$0xff]  }
  0x70   : > { %803 = vmatprep.subr.bf16.mxu1 %v1515_v0 }
  0x71   : > { %v1870_v2 = vsel %vm1767_vm5, %v1273_v50, %v870_v47 }
  0x72   : > { %653 = vmatpush1.bf16.msra.mxu0 %v1409_v19  ;;  %v1276_v54 = vcombine.low %v1857_v43, %v1870_v2 }
  0x73   : > { %804 = vmatpush1.bf16.msra.mxu1 %v1410_v28  ;;  %654 = vmatprep.subr.bf16.mxu0 %v1515_v0 }
  0x74   : > { %805 = vmatprep.subr.bf16.mxu1 %v1515_v0 }
  0x76   : > { %655 = vmatpush1.bf16.msra.mxu0 %v1411_v40 }
  0x77   : > { %806 = vmatpush1.bf16.msra.mxu1 %v1412_v44  ;;  %656 = vmatprep.subr.bf16.mxu0 %v1515_v0 }
  0x78   : > { %807 = vmatprep.subr.bf16.mxu1 %v1515_v0 }
  0x7a   : > { %657 = vmatpush1.bf16.msra.mxu0 %v1413_v46 }
  0x7b   : > { %808 = vmatpush1.bf16.msra.mxu1 %v1414_v48  ;;  %658 = vmatprep.subr.bf16.mxu0 %v1515_v0 }
  0x7c   : > { %809 = vmatprep.subr.bf16.mxu1 %v1515_v0 }
  0x7e   : > { %659 = vmatpush1.bf16.msra.mxu0 %v1415_v32 }
  0x7f   : > { %810 = vmatpush1.bf16.msra.mxu1 %v1416_v52  ;;  %660 = vmatprep.subr.bf16.mxu0 %v1515_v0 }
  0x80   : > { %1336 = vmatprep.subr.bf16.mxu1 %v1515_v0 }
  0x82   : > { %661 = vmatpush1.bf16.msra.mxu0 %v1417_v55 }
  0x83   : > { %983 = vmatprep.subr.bf16.mxu0 %v1515_v0 }
  0xca   : > { %v411_v58 = vpop.permute.xlu0 %410 }
  0xcb   : > { %v433_v4 = vsel %vm430_vm6, %v1216_v7, %v411_v58 }
  0xcc   : > { %820 = vmatmul.mubr.bf16.vlgmr.msra.gmra.mrb[0].mxu1 %v433_v4 }
  0xcd   : > { %1348 = vmatpush1.bf16.msra.mxu1 %v1419_v37  ;;  %v413_v60 = vpop.permute.xlu1 %412  ;;  %1270 = vmatprep.mubr.msk.bf16.mxu1 %vm430_vm6, %v1816_v16 }
  0xce   : > { %v502_v62 = vpop.permute.xlu0 %501  ;;  %1337 = vmatprep.subr.bf16.mxu1 %v1515_v0  ;;  %v1895_v7 = vsel %vm430_vm6, %v1217_v29, %v413_v60  ;;  %v1424_v29 = vld [vmem:[#allocation2 + $0xe0] sm:$0xff]  }
  0xcf   : > { %v516_v63 = vsel %vm430_vm6, %v1229_v25, %v502_v62 }
  0xd0   : > { %671 = vmatmul.mubr.bf16.vlgmr.msra.gmra.mrb[0].mxu0 %v516_v63 }
  0xd1   : > { %984 = vmatpush1.bf16.msra.mxu0 %v1419_v37  ;;  %1349 = vmatpush1.bf16.msra.mxu1 %v1421_v59  ;;  %v504_v8 = vpop.permute.xlu1 %503 }
  0xd2   : > { %985 = vmatprep.subr.bf16.mxu0 %v1515_v0  ;;  %1338 = vmatprep.subr.bf16.mxu1 %v1515_v0  ;;  %v520_v5 = vsel %vm430_vm6, %v1230_v33, %v504_v8  ;;  %v415_v25 = vpop.permute.xlu0 %414  ;;  %v1426_v33 = vld [vmem:[#allocation2 + $0xe8] sm:$0xff]  }
  0xd3   : > { %1254 = vmatprep.mubr.msk.bf16.mxu0 %vm430_vm6, %v1238_v23  ;;  %v1913_v9 = vsel %vm430_vm6, %v1218_v49, %v415_v25 }
  0xd4   : > { %828 = vmatmul.mubr.bf16.gmra.mrb[4].mxu1 %v1895_v7 }
  0xd5   : > { %986 = vmatpush1.bf16.msra.mxu0 %v1421_v59  ;;  %1350 = vmatpush1.bf16.msra.mxu1 %v1422_v1  ;;  %v506_v12 = vpop.permute.xlu1 %505 }
  0xd6   : > { %987 = vmatprep.subr.bf16.mxu0 %v1515_v0  ;;  %1339 = vmatprep.subr.bf16.mxu1 %v1515_v0  ;;  %v524_v22 = vsel %vm430_vm6, %v1231_v53, %v506_v12  ;;  %v1429_v53 = vld [vmem:[#allocation2 + $0xf8] sm:$0xff]  }
  0xd7   : > { %1271 = vmatprep.mubr.msk.bf16.mxu1 %vm430_vm6, %v1838_v27 }
  0xd8   : > { %679 = vmatmul.mubr.bf16.gmra.mrb[4].mxu0 %v520_v5  ;;  %v417_v49 = vpop.permute.xlu0 %416 }
  0xd9   : > { %988 = vmatpush1.bf16.msra.mxu0 %v1422_v1  ;;  %1351 = vmatpush1.bf16.msra.mxu1 %v1423_v3  ;;  %v445_v11 = vsel %vm430_vm6, %v1219_v17, %v417_v49  ;;  %v1293_v1 = vld [vmem:[#allocation4] ss:$0 sm:$0xff] }
  0xda   : > { %989 = vmatprep.subr.bf16.mxu0 %v1515_v0  ;;  %1340 = vmatprep.subr.bf16.mxu1 %v1515_v0 }
  0xdb   : > { %1255 = vmatprep.mubr.msk.bf16.mxu0 %vm430_vm6, %v1239_v36  ;;  %v508_v42 = vpop.permute.xlu1 %507 }
  0xdc   : > { %836 = vmatmul.mubr.bf16.gmra.mrb[8].mxu1 %v1913_v9  ;;  %v528_v56 = vsel %vm430_vm6, %v1232_v18, %v508_v42  ;;  %v877_v14 = vpop.permute.xlu0 %876 }
  0xdd   : > { %990 = vmatpush1.bf16.msra.mxu0 %v1423_v3  ;;  %1352 = vmatpush1.bf16.msra.mxu1 %v1424_v29  ;;  %v882_v17 = vsel %vm430_vm6, %v1274_v39, %v877_v14 }
  0xde   : > { %991 = vmatprep.subr.bf16.mxu0 %v1515_v0  ;;  %1341 = vmatprep.subr.bf16.mxu1 %v1515_v0 }
  0xdf   : > { %1272 = vmatprep.mubr.msk.bf16.mxu1 %vm430_vm6, %v1853_v41 }
  0xe0   : > { %687 = vmatmul.mubr.bf16.gmra.mrb[8].mxu0 %v524_v22 }
  0xe1   : > { %992 = vmatpush1.bf16.msra.mxu0 %v1424_v29  ;;  %1353 = vmatpush1.bf16.msra.mxu1 %v1426_v33 }
  0xe2   : > { %993 = vmatprep.subr.bf16.mxu0 %v1515_v0  ;;  %1342 = vmatprep.subr.bf16.mxu1 %v1515_v0 }
  0xe3   : > { %1256 = vmatprep.mubr.msk.bf16.mxu0 %vm430_vm6, %v1240_v45 }
  0xe4   : > { %844 = vmatmul.mubr.bf16.gmra.mrb[12].mxu1 %v445_v11 }
  0xe5   : > { %994 = vmatpush1.bf16.msra.mxu0 %v1426_v33  ;;  %1354 = vmatpush1.bf16.msra.mxu1 %v1428_v51 }
  0xe6   : > { %995 = vmatprep.subr.bf16.mxu0 %v1515_v0  ;;  %1343 = vmatprep.subr.bf16.mxu1 %v1515_v0 }
  0xe7   : > { %1291 = vmatprep.mubr.msk.bf16.mxu1 %vm430_vm6, %v1853_v41 }
  0xe8   : > { %695 = vmatmul.mubr.bf16.gmra.mrb[12].mxu0 %v528_v56 }
  0xe9   : > { %996 = vmatpush1.bf16.msra.mxu0 %v1428_v51  ;;  %1355 = vmatpush1.bf16.msra.mxu1 %v1429_v53 }
  0xea   : > { %997 = vmatprep.subr.bf16.mxu0 %v1515_v0  ;;  %1344 = vmatprep.subr.bf16.mxu1 %v1515_v0 }
  0xeb   : > { %1289 = vmatprep.mubr.msk.bf16.mxu0 %vm430_vm6, %v1816_v16 }
  0xed   : > { %998 = vmatpush1.bf16.msra.mxu0 %v1429_v53  ;;  %1356 = vmatpush1.bf16.msra.mxu1 %v1432_v6 }
  0xee   : > { %999 = vmatprep.subr.bf16.mxu0 %v1515_v0  ;;  %1345 = vmatprep.subr.bf16.mxu1 %v1515_v0 }
  0xf1   : > { %1000 = vmatpush1.bf16.msra.mxu0 %v1432_v6  ;;  %1357 = vmatpush1.bf16.msra.mxu1 %v1433_v61 }
  0xf2   : > { %1001 = vmatprep.subr.bf16.mxu0 %v1515_v0  ;;  %1346 = vmatprep.subr.bf16.mxu1 %v1515_v0 }
  0xf5   : > { %1002 = vmatpush1.bf16.msra.mxu0 %v1433_v61  ;;  %1358 = vmatpush1.bf16.msra.mxu1 %v1436_v57 }
  0xf6   : > { %1003 = vmatprep.subr.bf16.mxu0 %v1515_v0  ;;  %1347 = vmatprep.subr.bf16.mxu1 %v1515_v0 }
  0xf9   : > { %1004 = vmatpush1.bf16.msra.mxu0 %v1436_v57  ;;  %1359 = vmatpush1.bf16.msra.mxu1 %v1437_v13 }
  0xfa   : > { %1005 = vmatprep.subr.bf16.mxu0 %v1515_v0 }
  0xfc   : > { %1032 = vmatmul.mubr.bf16.vlgmr.msra.gmra.mrb[16].mxu1 %v445_v11 }
  0xfd   : > { %1006 = vmatpush1.bf16.msra.mxu0 %v1437_v13  ;;  %1292 = vmatprep.mubr.msk.bf16.mxu1 %vm430_vm6, %v1276_v54 }
 0x100   : > { %1016 = vmatmul.mubr.bf16.vlgmr.msra.gmra.mrb[16].mxu0 %v1895_v7 }
 0x101   : > { %1290 = vmatprep.mubr.msk.bf16.mxu0 %vm430_vm6, %v1838_v27 }
 0x104   : > { %1040 = vmatmul.mubr.bf16.gmra.mrb[20].mxu1 %v882_v17 }
 0x108   : > { %1024 = vmatmul.mubr.bf16.gmra.mrb[20].mxu0 %v1913_v9 }
 0x19f   : > { %v821_v0 = vpop.f32.mrb[0].mxu1 }
 0x1a0   : > { %v823_v15 = vpop.f32.mrb[1].mxu1 }
 0x1a1   : > { %v824_v16 = vpop.f32.mrb[2].mxu1 }
 0x1a2   : > { %v826_v10 = vpop.f32.mrb[3].mxu1 }
 0x1a3   : > { %v672_v18 = vpop.f32.mrb[0].mxu0 }
 0x1a4   : > { %v822_v19 = vadd.f32 %v821_v0, %v672_v18  ;;  %v674_v35 = vpop.f32.mrb[1].mxu0 }
 0x1a5   : > { %v675_v20 = vpop.f32.mrb[2].mxu0 }
 0x1a6   : > { %v825_v28 = vadd.f32 %v824_v16, %v675_v20  ;;  %v677_v23 = vpop.f32.mrb[3].mxu0 }
 0x1a7   : > { %v829_v24 = vpop.f32.mrb[4].mxu1 }
 0x1a8   : > { %v831_v21 = vpop.f32.mrb[5].mxu1 }
 0x1a9   : > { %v832_v34 = vpop.f32.mrb[6].mxu1 }
 0x1aa   : > { %v834_v26 = vpop.f32.mrb[7].mxu1 }
 0x1ab   : > { %v680_v30 = vpop.f32.mrb[4].mxu0 }
 0x1ac   : > { %v830_v31 = vadd.f32 %v829_v24, %v680_v30  ;;  %v682_v27 = vpop.f32.mrb[5].mxu0 }
 0x1ad   : > { %v683_v36 = vpop.f32.mrb[6].mxu0 }
 0x1ae   : > { %v1971_v38 = vadd.f32 %v832_v34, %v683_v36  ;;  %v685_v40 = vpop.f32.mrb[7].mxu0 }
 0x1af   : > { %v837_v41 = vpop.f32.mrb[8].mxu1 }
 0x1b0   : > { %v839_v43 = vpop.f32.mrb[9].mxu1 }
 0x1b1   : > { %v840_v44 = vpop.f32.mrb[10].mxu1 }
 0x1b2   : > { %v842_v45 = vpop.f32.mrb[11].mxu1 }
 0x1b3   : > { %v688_v46 = vpop.f32.mrb[8].mxu0 }
 0x1b4   : > { %v838_v47 = vadd.f32 %v837_v41, %v688_v46  ;;  %v690_v48 = vpop.f32.mrb[9].mxu0 }
 0x1b5   : > { %v691_v50 = vpop.f32.mrb[10].mxu0 }
 0x1b6   : > { %v841_v32 = vadd.f32 %v840_v44, %v691_v50  ;;  %v693_v52 = vpop.f32.mrb[11].mxu0 }
 0x1b7   : > { %v845_v2 = vpop.f32.mrb[12].mxu1 }
 0x1b8   : > { %v847_v39 = vpop.f32.mrb[13].mxu1 }
 0x1b9   : > { %v848_v54 = vpop.f32.mrb[14].mxu1 }
 0x1ba   : > { %v850_v55 = vpop.f32.mrb[15].mxu1 }
 0x1bb   : > { %v696_v37 = vpop.f32.mrb[12].mxu0 }
 0x1bc   : > { %v846_v58 = vadd.f32 %v845_v2, %v696_v37  ;;  %v698_v4 = vpop.f32.mrb[13].mxu0 }
 0x1bd   : > { %v699_v59 = vpop.f32.mrb[14].mxu0 }
 0x1be   : > { %v849_v60 = vadd.f32 %v848_v54, %v699_v59  ;;  %v701_v62 = vpop.f32.mrb[15].mxu0 }
 0x1cf   : > { %v1033_v63 = vpop.f32.mrb[16].mxu1 }
 0x1d0   : > { %v1052_v7 = vadd.f32 %v1033_v63, %v838_v47  ;;  %v1035_v8 = vpop.f32.mrb[17].mxu1 }
 0x1d1   : > { %v1036_v3 = vpop.f32.mrb[18].mxu1 }
 0x1d2   : > { %v1067_v5 = vadd.f32 %v1293_v1, %v1052_v7  ;;  %v1053_v25 = vadd.f32 %v1036_v3, %v841_v32  ;;  %v1038_v29 = vpop.f32.mrb[19].mxu1 }
 0x1d3   : > { %v1017_v9 = vpop.f32.mrb[16].mxu0 }
 0x1d4   : > { %v1068_v12 = vadd.f32 %v1293_v1, %v1053_v25  ;;  %v1048_v33 = vadd.f32 %v1017_v9, %v822_v19  ;;  %v1019_v22 = vpop.f32.mrb[17].mxu0  ;;  %v1075_v51 = vmax.f32 %v1067_v5, 0.0 }
 0x1d5   : > { %v1020_v49 = vpop.f32.mrb[18].mxu0 }
 0x1d6   : > { %v1076_v11 = vmax.f32 %v1068_v12, 0.0  ;;  %v1063_v42 = vadd.f32 %v1293_v1, %v1048_v33  ;;  %v1049_v53 = vadd.f32 %v1020_v49, %v825_v28  ;;  %v1022_v56 = vpop.f32.mrb[19].mxu0 }
 0x1d7   : > { %v1041_v6 = vpop.f32.mrb[20].mxu1 }
 0x1d8   : > { %v1326_v61 = vpack.c.bf16 %v1076_v11, %v1075_v51  ;;  %v1064_v57 = vadd.f32 %v1293_v1, %v1049_v53  ;;  %v1054_v13 = vadd.f32 %v1041_v6, %v846_v58  ;;  %v1043_v14 = vpop.f32.mrb[21].mxu1  ;;  %v1071_v0 = vmax.f32 %v1063_v42, 0.0 }
 0x1d9   : > { %v1044_v17 = vpop.f32.mrb[22].mxu1 }
 0x1da   : > { %1334 = vst [vmem:[%s1977_s26 + $0x10] sm:$0xff] %v1326_v61   ;;  %v1072_v15 = vmax.f32 %v1064_v57, 0.0  ;;  %v1069_v16 = vadd.f32 %v1293_v1, %v1054_v13  ;;  %v1055_v10 = vadd.f32 %v1044_v17, %v849_v60  ;;  %v1046_v18 = vpop.f32.mrb[23].mxu1 }
 0x1db   : > { %v1025_v19 = vpop.f32.mrb[20].mxu0 }
 0x1dc   : > { %v1316_v35 = vpack.c.bf16 %v1072_v15, %v1071_v0  ;;  %v1070_v20 = vadd.f32 %v1293_v1, %v1055_v10  ;;  %v1050_v28 = vadd.f32 %v1025_v19, %v830_v31  ;;  %v1027_v23 = vpop.f32.mrb[21].mxu0  ;;  %v1077_v21 = vmax.f32 %v1069_v16, 0.0 }
 0x1dd   : > { %v1028_v24 = vpop.f32.mrb[22].mxu0 }
 0x1de   : > { %1317 = vst [vmem:[%s1977_s26] sm:$0xff] %v1316_v35   ;;  %v1078_v34 = vmax.f32 %v1070_v20, 0.0  ;;  %v1065_v26 = vadd.f32 %v1293_v1, %v1050_v28  ;;  %v1051_v30 = vadd.f32 %v1028_v24, %v1971_v38  ;;  %v1030_v27 = vpop.f32.mrb[23].mxu0 }
 0x1e0   : > { %v1331_v36 = vpack.c.bf16 %v1078_v34, %v1077_v21  ;;  %v1066_v40 = vadd.f32 %v1293_v1, %v1051_v30  ;;  %v1073_v41 = vmax.f32 %v1065_v26, 0.0 }
 0x1e2   : > { %1335 = vst [vmem:[%s1977_s26 + $0x18] sm:$0xff] %v1331_v36   ;;  %v1074_v43 = vmax.f32 %v1066_v40, 0.0 }
 0x1e4   : > { %v1321_v44 = vpack.c.bf16 %v1074_v43, %v1073_v41 }
 0x1e6   : > { %1333 = vst [vmem:[%s1977_s26 + $0x8] sm:$0xff] %v1321_v44  }
 0x1e7 PF: > { %s15_s12 = sadd.s32 1, %s1509_s12  }
 0x1e8   : > { %p12_p5 = scmp.ge.s32.totalorder %s15_s12, 4  }
 0x1ea   :  { %14 = sbr.rel (!%p12_p5) target bundleno = 2 (0x2), region = 71 }
 0x1f1   :  { %1140 = vsyncpa [#allocation3], 1 }
 0x1f2   :  { %1142 = vsyncpa [#allocation3 + $0x1], 1 }
 0x1f3   :  { %1143 = vsyncpa [#allocation5], 1 }

// kernel: base_decoder_forward.8
= control target key start
LH: loop header
LB: loop body
LE: loop exit
PB: predicated region body
PF: predicated region fallthrough
CT: control target
= control target key end

     0   :  { %8 = vsyncpa [#allocation3], 0  ;;  %s3743_s0 = inlined_call_operand.vmem [shape: bf16[2,18,18,32], index: 0, kind: input, shape index: {}]   ;;  %s3744_s1 = inlined_call_operand.hbm [shape: bf16[288,128], index: 1, kind: input, shape index: {}]   ;;  %s3745_s2 = inlined_call_operand.hbm [shape: f32[1,128], index: 2, kind: input, shape index: {}]   ;;  %s3746_s3 = inlined_call_operand.vmem [shape: bf16[2,256,128], index: 3, kind: output, shape index: {}]  }
   0x1   :  { %9 = vsyncpa [#allocation5], 0  ;;  %s2973_s12 = smov 0  }
   0x2 LB: > { %s2979_s13 = sadd.s32 4294967295, %s2945_s12   ;;  %p2204_p0 = scmp.ge.s32.totalorder %s2945_s12, 1  ;;  %s2945_s12 = sphi %s2973_s12, %s15_s12  }
   0x3   : > { %p114_p1 = scmp.lt.s32.totalorder %s2945_s12, 3  ;;  %s2947_s14 = smov [#allocation2]  }
   0x4   : > { %s126_s15 = sshll.u32 %s2947_s14, 4  ;;  %p3747_p3 = scmp.eq.s32.totalorder %s2979_s13, 0  ;;  %s127_s15 = int_to_ptr.vmem [resolvable:$true] %s126_s15 }
   0x5   : > { %p2983_p2 = pnand %p2204_p0, %p114_p1  ;;  %s2948_s17 = smov [#allocation4]  }
   0x6   : > { %s140_s18 = sshll.u32 %s2948_s17, 4  ;;  %s2875_s22 = scalar_lea.hbm %s3744_s1, 2304  ;;  %s2996_s18 = int_to_ptr.vmem [resolvable:$true] %s140_s18 }
   0x7   : > { %s3749_s16 = scalar_select %p2983_p2, 1, 0 }
   0x8   : > { %p2798_p4 = pneg %p2983_p2  ;;  %p2876_p6 = scmp.ne.s32.totalorder %s3744_s1, %s2875_s22 }
   0x9   : > { %p2882_p10 = scmp.lt.u32.totalorder %s2875_s22, %s3744_s1 }
   0xa   : > { %p2992_p5 = pnand %p3747_p3, %p2798_p4 }
   0xc   : > { %p2877_p7 = pneg %p2992_p5 }
   0xe   : > { %p2878_p8 = pnand %p2877_p7, %p2876_p6 }
  0x10   : > { %p2879_p9 = pneg %p2878_p8 }
  0x12   : > { %p2884_p11 = pnand %p2882_p10, %p2879_p9 }
  0x14   : > { %2887 = shalt.err (!%p2884_p11)
}
  0x15   : > { %s2888_s27 = scalar_lea.vmem %s127_s15, 2304  ;;  %p2896_p1 = scmp.lt.s32.totalorder %s127_s15, %s127_s15 }
  0x16   : > { %p2889_p12 = scmp.ne.s32.totalorder %s127_s15, %s2888_s27  ;;  %p2897_p4 = scmp.lt.s32.totalorder %s2888_s27, %s2888_s27 }
  0x18   : > { %p2891_p13 = pnand %p2889_p12, %p2877_p7  ;;  %p2898_p3 = por %p2897_p4, %p2896_p1 }
  0x1a   : > { %p2892_p0 = pneg %p2891_p13 }
  0x1c   : > { %p2899_p2 = pnand %p2898_p3, %p2892_p0 }
  0x1e   : > { %2902 = shalt.err (!%p2899_p2)
}
  0x1f   : > { %s2949_s28 = smov 64   ;;  %s2950_s29 = smov 4  }
  0x20   : > { %2801 = dma.hbm_to_vmem [thread:$0]  (!%p2992_p5), %s3744_s1, 2304, %s127_s15, [#allocation3], %s2949_s28, %s2949_s28, %s2950_s29  }
  0x21   : > { %s2903_s7 = scalar_lea.hbm %s3745_s2, 16 }
  0x22   : > { %p2904_p6 = scmp.ne.s32.totalorder %s3745_s2, %s2903_s7  ;;  %p2910_p8 = scmp.lt.u32.totalorder %s2903_s7, %s3745_s2 }
  0x24   : > { %p2906_p2 = pnand %p2904_p6, %p2877_p7 }
  0x26   : > { %p2907_p3 = pneg %p2906_p2 }
  0x28   : > { %p2912_p9 = pnand %p2910_p8, %p2907_p3 }
  0x2a   : > { %2915 = shalt.err (!%p2912_p9)
}
  0x2b   : > { %s2916_s14 = scalar_lea.vmem %s2996_s18, 16  ;;  %s2923_s15 = scalar_lea.vmem %s2996_s18, 32 }
  0x2c   : > { %p2917_p10 = scmp.ne.s32.totalorder %s2996_s18, %s2916_s14  ;;  %p2924_p13 = scmp.lt.s32.totalorder %s2996_s18, %s2996_s18 }
  0x2d   : > { %p2925_p0 = scmp.lt.s32.totalorder %s2923_s15, %s2916_s14 }
  0x2e   : > { %p2919_p11 = pnand %p2917_p10, %p2877_p7 }
  0x2f   : > { %p2926_p1 = por %p2925_p0, %p2924_p13 }
  0x30   : > { %p2920_p12 = pneg %p2919_p11 }
  0x32   : > { %p2927_p4 = pnand %p2926_p1, %p2920_p12 }
  0x34   : > { %2930 = shalt.err (!%p2927_p4)
}
  0x35   : > { %2804 = dma.hbm_to_vmem [thread:$0]  (!%p2992_p5), %s3745_s2, 16, %s2996_s18, [#allocation5]  }
  0x36   : > { %p3751_p6 = scmp.ne.s32.totalorder %s3749_s16, 0 }
  0x37   : > { %p3752_p7 = scmp.eq.s32.totalorder (!%p3751_p6), %s2979_s13, 0 }
  0x38   : > { %161 = sbr.rel (%p3751_p6) target bundleno = 554 (0x22a), region = 32 }
  0x3f   : > { %2936 = dma.done.wait (%p3752_p7), [#allocation3], 2304   ;;  %p3753_p2 = pmov %p3752_p7 }
  0x41   : > { %2938 = vsyncadd (%p3753_p2), [#allocation3], 4294964992  ;;  %p3754_p3 = pmov %p3753_p2 }
  0x42   : > { %p3755_p8 = pmov %p3753_p2 }
  0x43   : > { %2940 = dma.done.wait (%p3754_p3), [#allocation5], 16  }
  0x44   : > { %2942 = vsyncadd (%p3755_p8), [#allocation5], 4294967280  ;;  %p189_p9 = scmp.lt.s32.totalorder %s2979_s13, 1  ;;  %vm689_vm0 = vcmask 1042432   ;;  %vm690_vm1 = vcmask 1046532   ;;  %v2823_v19 = vld [vmem:[#allocation2 + $0x30] sm:$0xff]  }
  0x45   : > { %vm3066_vm2 = vmor %vm689_vm0, %vm690_vm1  ;;  %vm254_vm3 = vsmask.f32 3328  ;;  %vm255_vm4 = vsmask.f32 7440  ;;  %2581 = vmatprep.subr.bf16.mxu1 %v2823_v19  ;;  %v3092_v29 = vld [vmem:[#allocation2] sm:$0xff]   ;;  %v2825_v35 = vld [vmem:[#allocation2 + $0x38] sm:$0xff]  }
  0x46   : > { %s3761_s13 = smov (!%p189_p9, %s2979_s13), 1  ;;  %2582 = vmatpush3.bf16.msra.mxu1 %v2823_v19  ;;  %vm3100_vm5 = vmor %vm254_vm3, %vm255_vm4  ;;  %2625 = vmatprep.subr.bf16.mxu0 %v3092_v29  ;;  %s2951_s22 = smov 64   ;;  %v2826_v50 = vld [vmem:[#allocation2 + $0x8] sm:$0xff]   ;;  %v2827_v55 = vld [vmem:[#allocation2 + $0x40] sm:$0xff]   ;;  %vm1012_vm6 = vcmask 261120   ;;  %vm1061_vm7 = vcmask 523264  }
  0x47   : > { %s2789_s16 = smul.u32 216, %s3761_s13  ;;  %2626 = vmatpush3.bf16.msra.mxu0 %v3092_v29  ;;  %2583 = vmatprep.subr.bf16.mxu1 %v2825_v35  ;;  %v2828_v60 = vld [vmem:[#allocation2 + $0x10] sm:$0xff]   ;;  %s2952_s23 = smov 32   ;;  %vm1206_vm8 = vcmask 785408  }
  0x48   : > { %2627 = vmatprep.subr.bf16.mxu0 %v2826_v50  ;;  %s2387_s24 = sshll.u32 %s3761_s13, 7 }
  0x49   : > { %s3064_s21 = scalar_lea.vmem %s3743_s0, %s2789_s16  ;;  %s3690_s27 = scalar_lea.vmem %s3746_s3, %s2387_s24 }
  0x4a   : > { %v200_v1 = vld [vmem:[%s3064_s21] sm:$0xf]  ;;  %v201_v2 = vld [vmem:[%s3064_s21 + $0x4] sm:$0xf]  ;;  %v202_v3 = vld [vmem:[%s3064_s21 + $0x8] sm:$0x1]  ;;  %2584 = vmatpush3.bf16.msra.mxu1 %v2825_v35 }
  0x4b   : > { %v2214_v4 = vrot.slane %v200_v1, 9  ;;  %v694_v5 = vrot.slane %v201_v2, 5  ;;  %v697_v6 = vrot.slane %v202_v3, 5  ;;  %v258_v7 = vshrl.u32 %v200_v1, 16  ;;  %v3074_v8 = vld [vmem:[%s3064_s21 + $0x18] sm:$0xf]  ;;  %2628 = vmatpush3.bf16.msra.mxu0 %v2826_v50  ;;  %2585 = vmatprep.subr.bf16.mxu1 %v2827_v55 }
  0x4c   : > { %v261_v9 = vshll.u32 %v200_v1, 16  ;;  %v267_v10 = vshll.u32 %v201_v2, 16  ;;  %v271_v11 = vshrl.u32 %v201_v2, 16  ;;  %v277_v12 = vshll.u32 %v202_v3, 16  ;;  %v3077_v13 = vld [vmem:[%s3064_s21 + $0x1c] sm:$0xf]  ;;  %2629 = vmatprep.subr.bf16.mxu0 %v2828_v60 }
  0x4d   : > { %v695_v14 = vsel %vm3066_vm2, %v2214_v4, %v694_v5  ;;  %v696_v15 = vrot.slane %v694_v5, 4  ;;  %v260_v16 = vrot.slane %v258_v7, 4  ;;  %v3082_v17 = vld [vmem:[%s3064_s21 + $0x20] sm:$0x1]  ;;  %v306_v18 = vshrl.u32 %v3074_v8, 16 }
  0x4e   : > { %v263_v20 = vrot.slane %v261_v9, 5  ;;  %v269_v21 = vrot.slane %v267_v10, 5  ;;  %v273_v22 = vrot.slane %v271_v11, 4  ;;  %v279_v23 = vrot.slane %v277_v12, 5  ;;  %v3086_v24 = vld [vmem:[%s3064_s21 + $0xc] sm:$0xf]  ;;  %2586 = vmatpush3.bf16.msra.mxu1 %v2827_v55 }
  0x4f   : > { %v698_v25 = vsel %vm3066_vm2, %v696_v15, %v697_v6  ;;  %v308_v26 = vrot.slane %v306_v18, 4  ;;  %v309_v27 = vshll.u32 %v3074_v8, 16  ;;  %v315_v28 = vshll.u32 %v3077_v13, 16  ;;  %v3096_v34 = vld [vmem:[%s3064_s21 + $0x10] sm:$0xf]  ;;  %v2829_v2 = vld [vmem:[#allocation2 + $0x48] sm:$0xff]   ;;  %2630 = vmatpush3.bf16.msra.mxu0 %v2828_v60 }
  0x50   : > { %v2262_v30 = vcombine.low %v695_v14, %v698_v25  ;;  %v264_v31 = vor.u32 %v263_v20, %v260_v16  ;;  %v274_v32 = vor.u32 %v273_v22, %v269_v21  ;;  %v319_v33 = vshrl.u32 %v3077_v13, 16  ;;  %v3111_v47 = vld [vmem:[%s3064_s21 + $0x14] sm:$0x1]  ;;  %v3127_v7 = vld [vmem:[%s3064_s21 + $0x30] sm:$0xf]  ;;  %2587 = vmatprep.subr.bf16.mxu1 %v2829_v2  ;;  %v2832_v18 = vld [vmem:[#allocation2 + $0x50] sm:$0xff]  }
  0x51   : > { %v311_v37 = vrot.slane %v309_v27, 5  ;;  %v317_v38 = vrot.slane %v315_v28, 5  ;;  %v325_v39 = vshll.u32 %v3082_v17, 16  ;;  %v282_v40 = vshrl.u32 %v3086_v24, 16  ;;  %v2830_v9 = vld [vmem:[#allocation2 + $0x18] sm:$0xff]  }
  0x52   : > { %980 = vrot.lane.b32.xlu1 %v2262_v30, %s2951_s22  ;;  %v265_v41 = vrot.slane %v264_v31, 4  ;;  %v275_v42 = vrot.slane %v274_v32, 4  ;;  %v321_v43 = vrot.slane %v319_v33, 4  ;;  %v285_v44 = vshll.u32 %v3086_v24, 16  ;;  %v3133_v14 = vld [vmem:[%s3064_s21 + $0x34] sm:$0xf]  ;;  %2631 = vmatprep.subr.bf16.mxu0 %v2830_v9 }
  0x53   : > { %v312_v45 = vor.u32 %v311_v37, %v308_v26  ;;  %v327_v46 = vrot.slane %v325_v39, 5  ;;  %v284_v48 = vrot.slane %v282_v40, 4  ;;  %v291_v49 = vshll.u32 %v3096_v34, 16  ;;  %v3142_v22 = vld [vmem:[%s3064_s21 + $0x38] sm:$0x1]  ;;  %2588 = vmatpush3.bf16.msra.mxu1 %v2829_v2  ;;  %2632 = vmatpush3.bf16.msra.mxu0 %v2830_v9 }
  0x54   : > { %v270_v51 = vsel %vm3100_vm5, %v265_v41, %v269_v21  ;;  %v280_v52 = vsel %vm3100_vm5, %v275_v42, %v279_v23  ;;  %v322_v53 = vor.u32 %v321_v43, %v317_v38  ;;  %v287_v54 = vrot.slane %v285_v44, 5  ;;  %v3151_v28 = vld [vmem:[%s3064_s21 + $0x24] sm:$0xf]  ;;  %v2833_v30 = vld [vmem:[#allocation2 + $0x20] sm:$0xff]   ;;  %v210_v40 = vld [vmem:[%s3064_s21 + $0x28] sm:$0xf]  ;;  %2589 = vmatprep.subr.bf16.mxu1 %v2832_v18 }
  0x55   : > { %v2246_v56 = vcombine.low %v270_v51, %v280_v52  ;;  %v313_v57 = vrot.slane %v312_v45, 4  ;;  %v293_v58 = vrot.slane %v291_v49, 5  ;;  %v295_v59 = vshrl.u32 %v3096_v34, 16  ;;  %v2836_v41 = vld [vmem:[#allocation2 + $0x58] sm:$0xff]   ;;  %v3163_v45 = vld [vmem:[%s3064_s21 + $0x2c] sm:$0x1]  ;;  %2633 = vmatprep.subr.bf16.mxu0 %v2833_v30 }
  0x56   : > { %v323_v61 = vrot.slane %v322_v53, 4  ;;  %v288_v62 = vor.u32 %v287_v54, %v284_v48  ;;  %v301_v63 = vshll.u32 %v3111_v47, 16  ;;  %v2216_v1 = vrot.slane %v3074_v8, 9  ;;  %v2837_v51 = vld [vmem:[#allocation2 + $0x28] sm:$0xff]  }
  0x57   : > { %900 = vrot.lane.b32.xlu0 %v2246_v56, %s2952_s23  ;;  %v318_v3 = vsel %vm3100_vm5, %v313_v57, %v317_v38  ;;  %v297_v4 = vrot.slane %v295_v59, 4  ;;  %v708_v5 = vrot.slane %v3077_v13, 5  ;;  %v711_v6 = vrot.slane %v3082_v17, 5  ;;  %2590 = vmatpush3.bf16.msra.mxu1 %v2832_v18 }
  0x58   : > { %v328_v8 = vsel %vm3100_vm5, %v323_v61, %v327_v46  ;;  %v289_v10 = vrot.slane %v288_v62, 4  ;;  %v303_v11 = vrot.slane %v301_v63, 5  ;;  %v2215_v12 = vrot.slane %v3086_v24, 9  ;;  %2591 = vmatprep.subr.bf16.mxu1 %v2836_v41  ;;  %2634 = vmatpush3.bf16.msra.mxu0 %v2833_v30 }
  0x59   : > { %v2248_v15 = vcombine.low %v318_v3, %v328_v8  ;;  %v298_v16 = vor.u32 %v297_v4, %v293_v58  ;;  %v709_v13 = vsel %vm3066_vm2, %v2216_v1, %v708_v5  ;;  %v710_v17 = vrot.slane %v708_v5, 4  ;;  %2635 = vmatprep.subr.bf16.mxu0 %v2837_v51  ;;  %v3174_v5 = vld [vmem:[#allocation2 + $0x60] sm:$0xff]  }
  0x5a   : > { %v294_v19 = vsel %vm3100_vm5, %v289_v10, %v293_v58  ;;  %v701_v20 = vrot.slane %v3096_v34, 5  ;;  %v704_v21 = vrot.slane %v3111_v47, 5  ;;  %v354_v23 = vshrl.u32 %v3127_v7, 16  ;;  %v3181_v10 = vld [vmem:[%s3064_s21 + $0x48] sm:$0xf] }
  0x5b   : > { %904 = vrot.lane.b32.xlu1 %v2248_v15, %s2952_s23  ;;  %v299_v24 = vrot.slane %v298_v16, 4  ;;  %v712_v25 = vsel %vm3066_vm2, %v710_v17, %v711_v6  ;;  %v357_v26 = vshll.u32 %v3127_v7, 16  ;;  %v363_v27 = vshll.u32 %v3133_v14, 16  ;;  %2592 = vmatpush3.bf16.msra.mxu1 %v2836_v41  ;;  %v3187_v16 = vld [vmem:[%s3064_s21 + $0x4c] sm:$0xf] }
  0x5c   : > { %v2264_v31 = vcombine.low %v709_v13, %v712_v25  ;;  %v702_v32 = vsel %vm3066_vm2, %v2215_v12, %v701_v20  ;;  %v703_v33 = vrot.slane %v701_v20, 4  ;;  %v356_v34 = vrot.slane %v354_v23, 4  ;;  %2713 = vmatprep.subr.bf16.mxu1 %v3092_v29  ;;  %v3194_v20 = vld [vmem:[%s3064_s21 + $0x50] sm:$0x1]  ;;  %2636 = vmatpush3.bf16.msra.mxu0 %v2837_v51 }
  0x5d   : > { %v304_v35 = vsel %vm3100_vm5, %v299_v24, %v303_v11  ;;  %v359_v37 = vrot.slane %v357_v26, 5  ;;  %v365_v38 = vrot.slane %v363_v27, 5  ;;  %v367_v39 = vshrl.u32 %v3133_v14, 16  ;;  %2669 = vmatprep.subr.bf16.mxu0 %v3174_v5 }
  0x5e   : > { %v2247_v42 = vcombine.low %v294_v19, %v304_v35  ;;  %v705_v43 = vsel %vm3066_vm2, %v703_v33, %v704_v21  ;;  %v373_v44 = vshll.u32 %v3142_v22, 16  ;;  %v330_v46 = vshrl.u32 %v3151_v28, 16  ;;  %v217_v35 = vld [vmem:[%s3064_s21 + $0x44] sm:$0x1] }
  0x5f   : > { %984 = vrot.lane.b32.xlu1 %v2264_v31, %s2951_s22  ;;  %v2263_v47 = vcombine.low %v702_v32, %v705_v43  ;;  %v360_v48 = vor.u32 %v359_v37, %v356_v34  ;;  %v369_v49 = vrot.slane %v367_v39, 4  ;;  %v333_v50 = vshll.u32 %v3151_v28, 16  ;;  %v3215_v34 = vld [vmem:[%s3064_s21 + $0x40] sm:$0xf] }
  0x60   : > { %902 = vrot.lane.b32.xlu0 %v2247_v42, %s2952_s23  ;;  %v375_v52 = vrot.slane %v373_v44, 5  ;;  %v332_v53 = vrot.slane %v330_v46, 4  ;;  %v339_v54 = vshll.u32 %v210_v40, 16  ;;  %v343_v55 = vshrl.u32 %v210_v40, 16 }
  0x61   : > { %v361_v56 = vrot.slane %v360_v48, 4  ;;  %v370_v57 = vor.u32 %v369_v49, %v365_v38  ;;  %v335_v58 = vrot.slane %v333_v50, 5  ;;  %v349_v59 = vshll.u32 %v3163_v45, 16 }
  0x62   : > { %v341_v60 = vrot.slane %v339_v54, 5  ;;  %v345_v61 = vrot.slane %v343_v55, 4  ;;  %v2218_v62 = vrot.slane %v3127_v7, 9  ;;  %v722_v63 = vrot.slane %v3133_v14, 5 }
  0x63   : > { %v366_v1 = vsel %vm3100_vm5, %v361_v56, %v365_v38  ;;  %v371_v2 = vrot.slane %v370_v57, 4  ;;  %v336_v3 = vor.u32 %v335_v58, %v332_v53  ;;  %v351_v4 = vrot.slane %v349_v59, 5 }
  0x64   : > { %982 = vrot.lane.b32.xlu0 %v2263_v47, %s2951_s22  ;;  %v346_v6 = vor.u32 %v345_v61, %v341_v60  ;;  %v723_v7 = vsel %vm3066_vm2, %v2218_v62, %v722_v63  ;;  %v724_v9 = vrot.slane %v722_v63, 4  ;;  %v725_v8 = vrot.slane %v3142_v22, 5 }
  0x65   : > { %v376_v11 = vsel %vm3100_vm5, %v371_v2, %v375_v52  ;;  %v337_v12 = vrot.slane %v336_v3, 4  ;;  %v2217_v14 = vrot.slane %v3151_v28, 9  ;;  %v715_v15 = vrot.slane %v210_v40, 5  ;;  %v3208_v28 = vld [vmem:[%s3064_s21 + $0x3c] sm:$0xf] }
  0x66   : > { %v2250_v13 = vcombine.low %v366_v1, %v376_v11  ;;  %v347_v17 = vrot.slane %v346_v6, 4  ;;  %v726_v18 = vsel %vm3066_vm2, %v724_v9, %v725_v8  ;;  %v718_v19 = vrot.slane %v3163_v45, 5  ;;  %v3233_v2 = vld [vmem:[%s3064_s21 + $0x60] sm:$0xf]  ;;  %v3236_v3 = vld [vmem:[%s3064_s21 + $0x64] sm:$0xf] }
  0x67   : > { %v342_v21 = vsel %vm3100_vm5, %v337_v12, %v341_v60  ;;  %v2266_v22 = vcombine.low %v723_v7, %v726_v18  ;;  %v716_v29 = vsel %vm3066_vm2, %v2217_v14, %v715_v15  ;;  %v717_v23 = vrot.slane %v715_v15, 4  ;;  %v3243_v8 = vld [vmem:[%s3064_s21 + $0x68] sm:$0x1] }
  0x68   : > { %908 = vrot.lane.b32.xlu1 %v2250_v13, %s2952_s23  ;;  %v352_v24 = vsel %vm3100_vm5, %v347_v17, %v351_v4  ;;  %v402_v25 = vshrl.u32 %v3181_v10, 16  ;;  %v405_v26 = vshll.u32 %v3181_v10, 16  ;;  %v411_v27 = vshll.u32 %v3187_v16, 16  ;;  %v3248_v13 = vld [vmem:[%s3064_s21 + $0x54] sm:$0xf] }
  0x69   : > { %v2249_v30 = vcombine.low %v342_v21, %v352_v24  ;;  %v719_v31 = vsel %vm3066_vm2, %v717_v23, %v718_v19  ;;  %v415_v32 = vshrl.u32 %v3187_v16, 16  ;;  %v421_v33 = vshll.u32 %v3194_v20, 16  ;;  %v3251_v17 = vld [vmem:[%s3064_s21 + $0x58] sm:$0xf] }
  0x6a   : > { %v2265_v37 = vcombine.low %v716_v29, %v719_v31  ;;  %v404_v38 = vrot.slane %v402_v25, 4  ;;  %v407_v39 = vrot.slane %v405_v26, 5  ;;  %v413_v40 = vrot.slane %v411_v27, 5 }
  0x6b   : > { %906 = vrot.lane.b32.xlu0 %v2249_v30, %s2952_s23  ;;  %v417_v41 = vrot.slane %v415_v32, 4  ;;  %v423_v42 = vrot.slane %v421_v33, 5  ;;  %v378_v43 = vshrl.u32 %v3208_v28, 16  ;;  %v381_v44 = vshll.u32 %v3208_v28, 16 }
  0x6c   : > { %988 = vrot.lane.b32.xlu1 %v2266_v22, %s2951_s22  ;;  %v408_v45 = vor.u32 %v407_v39, %v404_v38  ;;  %v387_v46 = vshll.u32 %v3215_v34, 16  ;;  %v391_v47 = vshrl.u32 %v3215_v34, 16  ;;  %v397_v48 = vshll.u32 %v217_v35, 16  ;;  %v3259_v22 = vld [vmem:[%s3064_s21 + $0x5c] sm:$0x1] }
  0x6d   : > { %v418_v49 = vor.u32 %v417_v41, %v413_v40  ;;  %v380_v50 = vrot.slane %v378_v43, 4  ;;  %v383_v51 = vrot.slane %v381_v44, 5  ;;  %v2220_v52 = vrot.slane %v3181_v10, 9 }
  0x6e   : > { %v409_v53 = vrot.slane %v408_v45, 4  ;;  %v389_v54 = vrot.slane %v387_v46, 5  ;;  %v393_v55 = vrot.slane %v391_v47, 4  ;;  %v399_v56 = vrot.slane %v397_v48, 5 }
  0x6f   : > { %986 = vrot.lane.b32.xlu0 %v2265_v37, %s2951_s22  ;;  %v419_v57 = vrot.slane %v418_v49, 4  ;;  %v384_v58 = vor.u32 %v383_v51, %v380_v50  ;;  %v736_v59 = vrot.slane %v3187_v16, 5  ;;  %v739_v60 = vrot.slane %v3194_v20, 5 }
  0x70   : > { %v414_v61 = vsel %vm3100_vm5, %v409_v53, %v413_v40  ;;  %v394_v62 = vor.u32 %v393_v55, %v389_v54  ;;  %v2219_v63 = vrot.slane %v3208_v28, 9  ;;  %v729_v1 = vrot.slane %v3215_v34, 5 }
  0x71   : > { %v424_v4 = vsel %vm3100_vm5, %v419_v57, %v423_v42  ;;  %v385_v6 = vrot.slane %v384_v58, 4  ;;  %v737_v7 = vsel %vm3066_vm2, %v2220_v52, %v736_v59  ;;  %v738_v9 = vrot.slane %v736_v59, 4  ;;  %v3285_v59 = vld [vmem:[%s3064_s21 + $0x7c] sm:$0xf] }
  0x72   : > { %v2252_v11 = vcombine.low %v414_v61, %v424_v4  ;;  %v395_v12 = vrot.slane %v394_v62, 4  ;;  %v730_v14 = vsel %vm3066_vm2, %v2219_v63, %v729_v1  ;;  %v731_v15 = vrot.slane %v729_v1, 4 }
  0x73   : > { %v390_v18 = vsel %vm3100_vm5, %v385_v6, %v389_v54  ;;  %v740_v19 = vsel %vm3066_vm2, %v738_v9, %v739_v60  ;;  %v732_v20 = vrot.slane %v217_v35, 5  ;;  %v450_v21 = vshrl.u32 %v3233_v2, 16  ;;  %v3279_v54 = vld [vmem:[%s3064_s21 + $0x78] sm:$0xf]  ;;  %v3296_v9 = vld [vmem:[%s3064_s21 + $0x80] sm:$0x1] }
  0x74   : > { %912 = vrot.lane.b32.xlu1 %v2252_v11, %s2952_s23  ;;  %v400_v29 = vsel %vm3100_vm5, %v395_v12, %v399_v56  ;;  %v2268_v23 = vcombine.low %v737_v7, %v740_v19  ;;  %v453_v24 = vshll.u32 %v3233_v2, 16  ;;  %v459_v25 = vshll.u32 %v3236_v3, 16 }
  0x75   : > { %v2251_v26 = vcombine.low %v390_v18, %v400_v29  ;;  %v733_v27 = vsel %vm3066_vm2, %v731_v15, %v732_v20  ;;  %v452_v30 = vrot.slane %v450_v21, 4  ;;  %v463_v31 = vshrl.u32 %v3236_v3, 16  ;;  %v3301_v15 = vld [vmem:[%s3064_s21 + $0x6c] sm:$0xf]  ;;  %v3304_v18 = vld [vmem:[%s3064_s21 + $0x70] sm:$0xf] }
  0x76   : > { %v2267_v32 = vcombine.low %v730_v14, %v733_v27  ;;  %v455_v33 = vrot.slane %v453_v24, 5  ;;  %v461_v35 = vrot.slane %v459_v25, 5  ;;  %v469_v37 = vshll.u32 %v3243_v8, 16 }
  0x77   : > { %910 = vrot.lane.b32.xlu0 %v2251_v26, %s2952_s23  ;;  %v465_v38 = vrot.slane %v463_v31, 4  ;;  %v426_v39 = vshrl.u32 %v3248_v13, 16  ;;  %v429_v40 = vshll.u32 %v3248_v13, 16  ;;  %v435_v41 = vshll.u32 %v3251_v17, 16 }
  0x78   : > { %992 = vrot.lane.b32.xlu1 %v2268_v23, %s2951_s22  ;;  %v456_v42 = vor.u32 %v455_v33, %v452_v30  ;;  %v471_v43 = vrot.slane %v469_v37, 5  ;;  %v439_v44 = vshrl.u32 %v3251_v17, 16  ;;  %v445_v45 = vshll.u32 %v3259_v22, 16  ;;  %v3313_v23 = vld [vmem:[%s3064_s21 + $0x74] sm:$0x1] }
  0x79   : > { %v466_v46 = vor.u32 %v465_v38, %v461_v35  ;;  %v428_v47 = vrot.slane %v426_v39, 4  ;;  %v431_v48 = vrot.slane %v429_v40, 5  ;;  %v437_v49 = vrot.slane %v435_v41, 5 }
  0x7a   : > { %v457_v50 = vrot.slane %v456_v42, 4  ;;  %v441_v51 = vrot.slane %v439_v44, 4  ;;  %v447_v52 = vrot.slane %v445_v45, 5  ;;  %v2222_v53 = vrot.slane %v3233_v2, 9 }
  0x7b   : > { %990 = vrot.lane.b32.xlu0 %v2267_v32, %s2951_s22  ;;  %v467_v55 = vrot.slane %v466_v46, 4  ;;  %v432_v56 = vor.u32 %v431_v48, %v428_v47  ;;  %v750_v57 = vrot.slane %v3236_v3, 5  ;;  %v753_v58 = vrot.slane %v3243_v8, 5 }
  0x7c   : > { %v462_v60 = vsel %vm3100_vm5, %v457_v50, %v461_v35  ;;  %v442_v61 = vor.u32 %v441_v51, %v437_v49  ;;  %v2221_v62 = vrot.slane %v3248_v13, 9  ;;  %v743_v63 = vrot.slane %v3251_v17, 5 }
  0x7d   : > { %v472_v1 = vsel %vm3100_vm5, %v467_v55, %v471_v43  ;;  %v433_v4 = vrot.slane %v432_v56, 4  ;;  %v751_v6 = vsel %vm3066_vm2, %v2222_v53, %v750_v57  ;;  %v752_v7 = vrot.slane %v750_v57, 4  ;;  %v3333_v56 = vld [vmem:[%s3064_s21 + $0x90] sm:$0xf] }
  0x7e   : > { %v2254_v8 = vcombine.low %v462_v60, %v472_v1  ;;  %v443_v11 = vrot.slane %v442_v61, 4  ;;  %v744_v12 = vsel %vm3066_vm2, %v2221_v62, %v743_v63  ;;  %v745_v14 = vrot.slane %v743_v63, 4 }
  0x7f   : > { %v438_v19 = vsel %vm3100_vm5, %v433_v4, %v437_v49  ;;  %v754_v20 = vsel %vm3066_vm2, %v752_v7, %v753_v58  ;;  %v746_v21 = vrot.slane %v3259_v22, 5  ;;  %v498_v29 = vshrl.u32 %v3279_v54, 16 }
  0x80   : > { %916 = vrot.lane.b32.xlu1 %v2254_v8, %s2952_s23  ;;  %v448_v24 = vsel %vm3100_vm5, %v443_v11, %v447_v52  ;;  %v2270_v25 = vcombine.low %v751_v6, %v754_v20  ;;  %v501_v26 = vshll.u32 %v3279_v54, 16  ;;  %v507_v27 = vshll.u32 %v3285_v59, 16 }
  0x81   : > { %v2253_v30 = vcombine.low %v438_v19, %v448_v24  ;;  %v747_v31 = vsel %vm3066_vm2, %v745_v14, %v746_v21  ;;  %v500_v32 = vrot.slane %v498_v29, 4  ;;  %v511_v22 = vshrl.u32 %v3285_v59, 16 }
  0x82   : > { %v2269_v33 = vcombine.low %v744_v12, %v747_v31  ;;  %v503_v35 = vrot.slane %v501_v26, 5  ;;  %v509_v37 = vrot.slane %v507_v27, 5  ;;  %v517_v38 = vshll.u32 %v3296_v9, 16  ;;  %v3347_v12 = vld [vmem:[%s3064_s21 + $0x94] sm:$0xf] }
  0x83   : > { %914 = vrot.lane.b32.xlu0 %v2253_v30, %s2952_s23  ;;  %v513_v39 = vrot.slane %v511_v22, 4  ;;  %v474_v40 = vshrl.u32 %v3301_v15, 16  ;;  %v477_v41 = vshll.u32 %v3301_v15, 16  ;;  %v483_v42 = vshll.u32 %v3304_v18, 16  ;;  %v3364_v22 = vld [vmem:[%s3064_s21 + $0x84] sm:$0xf] }
  0x84   : > { %996 = vrot.lane.b32.xlu1 %v2270_v25, %s2951_s22  ;;  %v504_v43 = vor.u32 %v503_v35, %v500_v32  ;;  %v519_v44 = vrot.slane %v517_v38, 5  ;;  %v487_v45 = vshrl.u32 %v3304_v18, 16  ;;  %v493_v46 = vshll.u32 %v3313_v23, 16  ;;  %v238_v25 = vld [vmem:[%s3064_s21 + $0x98] sm:$0x1] }
  0x85   : > { %v514_v47 = vor.u32 %v513_v39, %v509_v37  ;;  %v476_v48 = vrot.slane %v474_v40, 4  ;;  %v479_v49 = vrot.slane %v477_v41, 5  ;;  %v485_v50 = vrot.slane %v483_v42, 5  ;;  %v235_v39 = vld [vmem:[%s3064_s21 + $0x8c] sm:$0x1] }
  0x86   : > { %v505_v51 = vrot.slane %v504_v43, 4  ;;  %v489_v52 = vrot.slane %v487_v45, 4  ;;  %v495_v53 = vrot.slane %v493_v46, 5  ;;  %v2224_v55 = vrot.slane %v3279_v54, 9 }
  0x87   : > { %994 = vrot.lane.b32.xlu0 %v2269_v33, %s2951_s22  ;;  %v515_v57 = vrot.slane %v514_v47, 4  ;;  %v480_v58 = vor.u32 %v479_v49, %v476_v48  ;;  %v764_v60 = vrot.slane %v3285_v59, 5  ;;  %v767_v61 = vrot.slane %v3296_v9, 5  ;;  %v3367_v33 = vld [vmem:[%s3064_s21 + $0x88] sm:$0xf] }
  0x88   : > { %v510_v62 = vsel %vm3100_vm5, %v505_v51, %v509_v37  ;;  %v490_v63 = vor.u32 %v489_v52, %v485_v50  ;;  %v2223_v1 = vrot.slane %v3301_v15, 9  ;;  %v757_v4 = vrot.slane %v3304_v18, 5 }
  0x89   : > { %v520_v6 = vsel %vm3100_vm5, %v515_v57, %v519_v44  ;;  %v481_v7 = vrot.slane %v480_v58, 4  ;;  %v765_v8 = vsel %vm3066_vm2, %v2224_v55, %v764_v60  ;;  %v766_v11 = vrot.slane %v764_v60, 4 }
  0x8a   : > { %v2256_v9 = vcombine.low %v510_v62, %v520_v6  ;;  %v491_v14 = vrot.slane %v490_v63, 4  ;;  %v758_v19 = vsel %vm3066_vm2, %v2223_v1, %v757_v4  ;;  %v759_v20 = vrot.slane %v757_v4, 4 }
  0x8b   : > { %v486_v21 = vsel %vm3100_vm5, %v481_v7, %v485_v50  ;;  %v768_v29 = vsel %vm3066_vm2, %v766_v11, %v767_v61  ;;  %v760_v24 = vrot.slane %v3313_v23, 5  ;;  %v546_v26 = vshrl.u32 %v3333_v56, 16 }
  0x8c   : > { %920 = vrot.lane.b32.xlu1 %v2256_v9, %s2952_s23  ;;  %v496_v27 = vsel %vm3100_vm5, %v491_v14, %v495_v53  ;;  %v2272_v30 = vcombine.low %v765_v8, %v768_v29  ;;  %v549_v31 = vshll.u32 %v3333_v56, 16  ;;  %v555_v32 = vshll.u32 %v3347_v12, 16  ;;  %v3387_v14 = vld [vmem:[%s3064_s21 + $0xa8] sm:$0xf] }
  0x8d   : > { %v2255_v35 = vcombine.low %v486_v21, %v496_v27  ;;  %v761_v23 = vsel %vm3066_vm2, %v759_v20, %v760_v24  ;;  %v548_v37 = vrot.slane %v546_v26, 4  ;;  %v559_v38 = vshrl.u32 %v3347_v12, 16  ;;  %v3394_v24 = vld [vmem:[%s3064_s21 + $0xac] sm:$0xf] }
  0x8e   : > { %v2271_v40 = vcombine.low %v758_v19, %v761_v23  ;;  %v551_v41 = vrot.slane %v549_v31, 5  ;;  %v557_v42 = vrot.slane %v555_v32, 5  ;;  %v565_v43 = vshll.u32 %v238_v25, 16  ;;  %v244_v23 = vld [vmem:[%s3064_s21 + $0xb0] sm:$0x1] }
  0x8f   : > { %918 = vrot.lane.b32.xlu0 %v2255_v35, %s2952_s23  ;;  %v561_v44 = vrot.slane %v559_v38, 4  ;;  %v522_v45 = vshrl.u32 %v3364_v22, 16  ;;  %v525_v46 = vshll.u32 %v3364_v22, 16  ;;  %v531_v47 = vshll.u32 %v3367_v33, 16 }
  0x90   : > { %1000 = vrot.lane.b32.xlu1 %v2272_v30, %s2951_s22  ;;  %v552_v48 = vor.u32 %v551_v41, %v548_v37  ;;  %v567_v49 = vrot.slane %v565_v43, 5  ;;  %v535_v50 = vshrl.u32 %v3367_v33, 16  ;;  %v541_v51 = vshll.u32 %v235_v39, 16  ;;  %v3410_v43 = vld [vmem:[%s3064_s21 + $0x9c] sm:$0xf] }
  0x91   : > { %v562_v52 = vor.u32 %v561_v44, %v557_v42  ;;  %v524_v53 = vrot.slane %v522_v45, 4  ;;  %v527_v55 = vrot.slane %v525_v46, 5  ;;  %v533_v57 = vrot.slane %v531_v47, 5  ;;  %v3413_v44 = vld [vmem:[%s3064_s21 + $0xa0] sm:$0xf] }
  0x92   : > { %v553_v58 = vrot.slane %v552_v48, 4  ;;  %v537_v60 = vrot.slane %v535_v50, 4  ;;  %v543_v61 = vrot.slane %v541_v51, 5  ;;  %v2226_v62 = vrot.slane %v3333_v56, 9  ;;  %v241_v48 = vld [vmem:[%s3064_s21 + $0xa4] sm:$0x1] }
  0x93   : > { %998 = vrot.lane.b32.xlu0 %v2271_v40, %s2951_s22  ;;  %v563_v63 = vrot.slane %v562_v52, 4  ;;  %v528_v1 = vor.u32 %v527_v55, %v524_v53  ;;  %v778_v4 = vrot.slane %v3347_v12, 5  ;;  %v781_v6 = vrot.slane %v238_v25, 5 }
  0x94   : > { %v558_v7 = vsel %vm3100_vm5, %v553_v58, %v557_v42  ;;  %v538_v8 = vor.u32 %v537_v60, %v533_v57  ;;  %v2225_v11 = vrot.slane %v3364_v22, 9  ;;  %v771_v9 = vrot.slane %v3367_v33, 5 }
  0x95   : > { %v568_v19 = vsel %vm3100_vm5, %v563_v63, %v567_v49  ;;  %v529_v20 = vrot.slane %v528_v1, 4  ;;  %v779_v21 = vsel %vm3066_vm2, %v2226_v62, %v778_v4  ;;  %v780_v29 = vrot.slane %v778_v4, 4 }
  0x96   : > { %v2258_v25 = vcombine.low %v558_v7, %v568_v19  ;;  %v539_v26 = vrot.slane %v538_v8, 4  ;;  %v772_v27 = vsel %vm3066_vm2, %v2225_v11, %v771_v9  ;;  %v773_v30 = vrot.slane %v771_v9, 4 }
  0x97   : > { %v534_v31 = vsel %vm3100_vm5, %v529_v20, %v533_v57  ;;  %v782_v32 = vsel %vm3066_vm2, %v780_v29, %v781_v6  ;;  %v774_v35 = vrot.slane %v235_v39, 5  ;;  %v594_v37 = vshrl.u32 %v3387_v14, 16 }
  0x98   : > { %924 = vrot.lane.b32.xlu1 %v2258_v25, %s2952_s23  ;;  %v544_v38 = vsel %vm3100_vm5, %v539_v26, %v543_v61  ;;  %v2274_v40 = vcombine.low %v779_v21, %v782_v32  ;;  %v597_v41 = vshll.u32 %v3387_v14, 16  ;;  %v603_v42 = vshll.u32 %v3394_v24, 16  ;;  %v3433_v32 = vld [vmem:[%s3064_s21 + $0xb4] sm:$0xf] }
  0x99   : > { %v2257_v45 = vcombine.low %v534_v31, %v544_v38  ;;  %v775_v39 = vsel %vm3066_vm2, %v773_v30, %v774_v35  ;;  %v596_v46 = vrot.slane %v594_v37, 4  ;;  %v607_v47 = vshrl.u32 %v3394_v24, 16 }
  0x9a   : > { %v2273_v49 = vcombine.low %v772_v27, %v775_v39  ;;  %v599_v50 = vrot.slane %v597_v41, 5  ;;  %v605_v51 = vrot.slane %v603_v42, 5  ;;  %v613_v52 = vshll.u32 %v244_v23, 16 }
  0x9b   : > { %922 = vrot.lane.b32.xlu0 %v2257_v45, %s2952_s23  ;;  %v609_v53 = vrot.slane %v607_v47, 4  ;;  %v570_v55 = vshrl.u32 %v3410_v43, 16  ;;  %v573_v57 = vshll.u32 %v3410_v43, 16  ;;  %v579_v58 = vshll.u32 %v3413_v44, 16 }
  0x9c   : > { %1004 = vrot.lane.b32.xlu1 %v2274_v40, %s2951_s22  ;;  %v600_v60 = vor.u32 %v599_v50, %v596_v46  ;;  %v615_v61 = vrot.slane %v613_v52, 5  ;;  %v583_v62 = vshrl.u32 %v3413_v44, 16  ;;  %v589_v63 = vshll.u32 %v241_v48, 16  ;;  %v247_v50 = vld [vmem:[%s3064_s21 + $0xbc] sm:$0x1] }
  0x9d   : > { %v610_v1 = vor.u32 %v609_v53, %v605_v51  ;;  %v572_v4 = vrot.slane %v570_v55, 4  ;;  %v575_v6 = vrot.slane %v573_v57, 5  ;;  %v581_v7 = vrot.slane %v579_v58, 5 }
  0x9e   : > { %v601_v8 = vrot.slane %v600_v60, 4  ;;  %v585_v11 = vrot.slane %v583_v62, 4  ;;  %v591_v9 = vrot.slane %v589_v63, 5  ;;  %v2228_v19 = vrot.slane %v3387_v14, 9  ;;  %v3459_v62 = vld [vmem:[%s3064_s21 + $0xc0] sm:$0xf] }
  0x9f   : > { %1002 = vrot.lane.b32.xlu0 %v2273_v49, %s2951_s22  ;;  %v611_v20 = vrot.slane %v610_v1, 4  ;;  %v576_v21 = vor.u32 %v575_v6, %v572_v4  ;;  %v792_v29 = vrot.slane %v3394_v24, 5  ;;  %v795_v25 = vrot.slane %v244_v23, 5  ;;  %v3440_v23 = vld [vmem:[%s3064_s21 + $0xb8] sm:$0xf] }
  0xa0   : > { %v606_v26 = vsel %vm3100_vm5, %v601_v8, %v605_v51  ;;  %v586_v27 = vor.u32 %v585_v11, %v581_v7  ;;  %v2227_v30 = vrot.slane %v3410_v43, 9  ;;  %v785_v31 = vrot.slane %v3413_v44, 5 }
  0xa1   : > { %v616_v35 = vsel %vm3100_vm5, %v611_v20, %v615_v61  ;;  %v577_v37 = vrot.slane %v576_v21, 4  ;;  %v793_v38 = vsel %vm3066_vm2, %v2228_v19, %v792_v29  ;;  %v794_v40 = vrot.slane %v792_v29, 4  ;;  %v250_v29 = vld [vmem:[%s3064_s21 + $0xc8] sm:$0x1] }
  0xa2   : > { %v2260_v41 = vcombine.low %v606_v26, %v616_v35  ;;  %v587_v42 = vrot.slane %v586_v27, 4  ;;  %v786_v45 = vsel %vm3066_vm2, %v2227_v30, %v785_v31  ;;  %v787_v39 = vrot.slane %v785_v31, 4 }
  0xa3   : > { %v582_v46 = vsel %vm3100_vm5, %v577_v37, %v581_v7  ;;  %v796_v47 = vsel %vm3066_vm2, %v794_v40, %v795_v25  ;;  %v788_v49 = vrot.slane %v241_v48, 5  ;;  %v618_v51 = vshrl.u32 %v3433_v32, 16  ;;  %v3462_v7 = vld [vmem:[%s3064_s21 + $0xc4] sm:$0xf] }
  0xa4   : > { %928 = vrot.lane.b32.xlu1 %v2260_v41, %s2952_s23  ;;  %v592_v52 = vsel %vm3100_vm5, %v587_v42, %v591_v9  ;;  %v2276_v53 = vcombine.low %v793_v38, %v796_v47  ;;  %v621_v55 = vshll.u32 %v3433_v32, 16  ;;  %v627_v57 = vshll.u32 %v3440_v23, 16 }
  0xa5   : > { %v2259_v58 = vcombine.low %v582_v46, %v592_v52  ;;  %v789_v60 = vsel %vm3066_vm2, %v787_v39, %v788_v49  ;;  %v620_v61 = vrot.slane %v618_v51, 4  ;;  %v631_v48 = vshrl.u32 %v3440_v23, 16  ;;  %v3481_v52 = vld [vmem:[%s3064_s21 + $0xcc] sm:$0xf] }
  0xa6   : > { %v2275_v63 = vcombine.low %v786_v45, %v789_v60  ;;  %v623_v1 = vrot.slane %v621_v55, 5  ;;  %v629_v4 = vrot.slane %v627_v57, 5  ;;  %v637_v6 = vshll.u32 %v247_v50, 16  ;;  %v3488_v60 = vld [vmem:[%s3064_s21 + $0xd0] sm:$0xf] }
  0xa7   : > { %926 = vrot.lane.b32.xlu0 %v2259_v58, %s2952_s23  ;;  %v633_v8 = vrot.slane %v631_v48, 4  ;;  %v2229_v11 = vrot.slane %v3433_v32, 9  ;;  %v799_v9 = vrot.slane %v3440_v23, 5  ;;  %v802_v19 = vrot.slane %v247_v50, 5 }
  0xa8   : > { %1008 = vrot.lane.b32.xlu1 %v2276_v53, %s2951_s22  ;;  %v624_v20 = vor.u32 %v623_v1, %v620_v61  ;;  %v639_v21 = vrot.slane %v637_v6, 5  ;;  %v1107_v25 = vshrl.u32 %v3459_v62, 16  ;;  %v1110_v26 = vshll.u32 %v3459_v62, 16 }
  0xa9   : > { %v634_v27 = vor.u32 %v633_v8, %v629_v4  ;;  %v800_v30 = vsel %vm3066_vm2, %v2229_v11, %v799_v9  ;;  %v801_v31 = vrot.slane %v799_v9, 4  ;;  %v1116_v35 = vshll.u32 %v3462_v7, 16 }
  0xaa   : > { %v625_v37 = vrot.slane %v624_v20, 4  ;;  %v1109_v38 = vrot.slane %v1107_v25, 4  ;;  %v1112_v40 = vrot.slane %v1110_v26, 5  ;;  %v1120_v41 = vshrl.u32 %v3462_v7, 16 }
  0xab   : > { %1006 = vrot.lane.b32.xlu0 %v2275_v63, %s2951_s22  ;;  %v635_v42 = vrot.slane %v634_v27, 4  ;;  %v803_v45 = vsel %vm3066_vm2, %v801_v31, %v802_v19  ;;  %v1118_v39 = vrot.slane %v1116_v35, 5  ;;  %v1126_v46 = vshll.u32 %v250_v29, 16 }
  0xac   : > { %v630_v47 = vsel %vm3100_vm5, %v625_v37, %v629_v4  ;;  %v2277_v49 = vcombine.low %v800_v30, %v803_v45  ;;  %v1113_v50 = vor.u32 %v1112_v40, %v1109_v38  ;;  %v1122_v51 = vrot.slane %v1120_v41, 4  ;;  %v253_v4 = vld [vmem:[%s3064_s21 + $0xd4] sm:$0x1] }
  0xad   : > { %v640_v53 = vsel %vm3100_vm5, %v635_v42, %v639_v21  ;;  %v1128_v55 = vrot.slane %v1126_v46, 5  ;;  %v2278_v57 = vrot.slane %v3459_v62, 9  ;;  %v1135_v58 = vrot.slane %v3462_v7, 5 }
  0xae   : > { %v2261_v61 = vcombine.low %v630_v47, %v640_v53  ;;  %1010 = vrot.lane.b32.xlu1 %v2277_v49, %s2951_s22  ;;  %v1114_v48 = vrot.slane %v1113_v50, 4  ;;  %v1123_v63 = vor.u32 %v1122_v51, %v1118_v39  ;;  %v1138_v1 = vrot.slane %v250_v29, 5 }
  0xaf   : > { %v1136_v6 = vsel %vm3066_vm2, %v2278_v57, %v1135_v58  ;;  %v1137_v8 = vrot.slane %v1135_v58, 4  ;;  %v1600_v11 = vshrl.u32 %v3481_v52, 16  ;;  %v1603_v9 = vshll.u32 %v3481_v52, 16 }
  0xb0   : > { %930 = vrot.lane.b32.xlu0 %v2261_v61, %s2952_s23  ;;  %v1119_v19 = vsel %vm3100_vm5, %v1114_v48, %v1118_v39  ;;  %v1124_v20 = vrot.slane %v1123_v63, 4  ;;  %v1609_v21 = vshll.u32 %v3488_v60, 16  ;;  %v1613_v25 = vshrl.u32 %v3488_v60, 16 }
  0xb1   : > { %v1139_v29 = vsel %vm3066_vm2, %v1137_v8, %v1138_v1  ;;  %v1602_v26 = vrot.slane %v1600_v11, 4  ;;  %v1605_v27 = vrot.slane %v1603_v9, 5  ;;  %v1619_v30 = vshll.u32 %v253_v4, 16 }
  0xb2   : > { %v1129_v31 = vsel %vm3100_vm5, %v1124_v20, %v1128_v55  ;;  %v2281_v35 = vcombine.low %v1136_v6, %v1139_v29  ;;  %v1611_v37 = vrot.slane %v1609_v21, 5  ;;  %v1615_v38 = vrot.slane %v1613_v25, 4  ;;  %v2860_v20 = vld [vmem:[%s3064_s21 + $0x4] sm:$0xf] }
  0xb3   : > { %v2280_v40 = vcombine.low %v1119_v19, %v1129_v31  ;;  %v1606_v41 = vor.u32 %v1605_v27, %v1602_v26  ;;  %v2326_v42 = vrot.slane %v3481_v52, 9  ;;  %v1621_v39 = vrot.slane %v1619_v30, 5  ;;  %v2859_v19 = vld [vmem:[%s3064_s21] sm:$0xf]  ;;  %v2861_v31 = vld [vmem:[%s3064_s21 + $0x18] sm:$0xf] }
  0xb4   : > { %1151 = vrot.lane.b32.xlu1 %v2281_v35, %s2951_s22  ;;  %v1616_v45 = vor.u32 %v1615_v38, %v1611_v37  ;;  %v1628_v46 = vrot.slane %v3488_v60, 5  ;;  %v1631_v47 = vrot.slane %v253_v4, 5  ;;  %v2240_v63 = vcombine.low %v3279_v54, %v3285_v59  ;;  %v2862_v35 = vld [vmem:[%s3064_s21 + $0x1c] sm:$0xf]  ;;  %v2863_v38 = vld [vmem:[%s3064_s21 + $0xc] sm:$0xf] }
  0xb5   : > { %1146 = vrot.lane.b32.xlu0 %v2280_v40, %s2952_s23  ;;  %v1607_v49 = vrot.slane %v1606_v41, 4  ;;  %v2239_v1 = vcombine.low %v3301_v15, %v3304_v18  ;;  %v2242_v4 = vcombine.low %v3333_v56, %v3347_v12  ;;  %v2241_v36 = vcombine.low %v3364_v22, %v3367_v33  ;;  %v2864_v40 = vld [vmem:[%s3064_s21 + $0x10] sm:$0xf] }
  0xb6   : > { %v1617_v50 = vrot.slane %v1616_v45, 4  ;;  %v1629_v51 = vsel %vm3066_vm2, %v2326_v42, %v1628_v46  ;;  %v1630_v53 = vrot.slane %v1628_v46, 4  ;;  %v2244_v6 = vcombine.low %v3387_v14, %v3394_v24 }
  0xb7   : > { %v1612_v55 = vsel %vm3100_vm5, %v1607_v49, %v1611_v37  ;;  %v2243_v0 = vcombine.low %v3410_v43, %v3413_v44  ;;  %v2245_v8 = vcombine.low %v3433_v32, %v3440_v23  ;;  %v2279_v11 = vcombine.low %v3459_v62, %v3462_v7 }
  0xb8   : > { %v1622_v57 = vsel %vm3100_vm5, %v1617_v50, %v1621_v39  ;;  %v1632_v58 = vsel %vm3066_vm2, %v1630_v53, %v1631_v47  ;;  %v2327_v9 = vcombine.low %v3481_v52, %v3488_v60  ;;  %v2230_v21 = vcombine.low %v2859_v19, %v2860_v20  ;;  %v2841_v50 = vld [vmem:[#allocation2 + $0x68] sm:$0xff]  }
  0xb9   : > { %v2328_v61 = vcombine.low %v1612_v55, %v1622_v57  ;;  %v2329_v48 = vcombine.low %v1629_v51, %v1632_v58  ;;  %v2232_v37 = vcombine.low %v2861_v31, %v2862_v35  ;;  %v2231_v41 = vcombine.low %v2863_v38, %v2864_v40  ;;  %v2865_v55 = vld [vmem:[#allocation2] sm:$0xff]   ;;  %v2866_v57 = vld [vmem:[#allocation2 + $0x8] sm:$0xff]   ;;  %v2844_v58 = vld [vmem:[#allocation2 + $0x70] sm:$0xff]  }
  0xba   : > { %v2869_v20 = vld [vmem:[%s3064_s21 + $0x24] sm:$0xf]  ;;  %v2846_v35 = vld [vmem:[#allocation2 + $0x78] sm:$0xff]   ;;  %v2848_v40 = vld [vmem:[#allocation2 + $0x80] sm:$0xff]  }
  0xbb   : > { %1639 = vrot.lane.b32.xlu0 %v2328_v61, %s2952_s23  ;;  %1644 = vrot.lane.b32.xlu1 %v2329_v48, %s2951_s22  ;;  %v2867_v61 = vld [vmem:[%s3064_s21 + $0x30] sm:$0xf]  ;;  %v2868_v48 = vld [vmem:[%s3064_s21 + $0x34] sm:$0xf] }
  0xbc   : > { %v2234_v19 = vcombine.low %v2867_v61, %v2868_v48 }
  0xc4   : > { %v981_v25 = vpop.permute.xlu1 %980 }
  0xc9   : > { %v901_v29 = vpop.permute.xlu0 %900 }
  0xca   : > { %v1015_v26 = vsel %vm1012_vm6, %v2230_v21, %v901_v29  ;;  %v2870_v21 = vld [vmem:[%s3064_s21 + $0x28] sm:$0xf] }
  0xcb   : > { %v1063_v27 = vsel %vm1061_vm7, %v1015_v26, %v981_v25  ;;  %v2233_v25 = vcombine.low %v2869_v20, %v2870_v21  ;;  %v2871_v26 = vld [vmem:[#allocation2 + $0x10] sm:$0xff]  }
  0xcc   : > { %2637 = vmatprep.mubr.msk.bf16.mxu0 %vm1206_vm8, %v1063_v27 }
  0xcd   : > { %v905_v30 = vpop.permute.xlu1 %904 }
  0xce   : > { %v1021_v39 = vsel %vm1012_vm6, %v2232_v37, %v905_v30 }
  0xd1   : > { %v985_v45 = vpop.permute.xlu1 %984 }
  0xd2   : > { %v903_v42 = vpop.permute.xlu0 %902  ;;  %v3550_v51 = vsel %vm1061_vm7, %v1021_v39, %v985_v45  ;;  %v2851_v45 = vld [vmem:[#allocation2 + $0x88] sm:$0xff]   ;;  %v2873_v39 = vld [vmem:[#allocation2 + $0x20] sm:$0xff]  }
  0xd3   : > { %v1018_v46 = vsel %vm1012_vm6, %v2231_v41, %v903_v42  ;;  %v2872_v41 = vld [vmem:[#allocation2 + $0x18] sm:$0xff]  }
  0xd6   : > { %v983_v47 = vpop.permute.xlu0 %982 }
  0xd7   : > { %v1065_v49 = vsel %vm1061_vm7, %v1018_v46, %v983_v47  ;;  %v2236_v46 = vcombine.low %v3181_v10, %v3187_v16  ;;  %v2235_v47 = vcombine.low %v3208_v28, %v3215_v34  ;;  %v2238_v28 = vcombine.low %v3233_v2, %v3236_v3 }
  0xd8   : > { %2593 = vmatprep.mubr.msk.bf16.mxu1 %vm1206_vm8, %v1065_v49  ;;  %2638 = vmatmul.mubr.msk.bf16.vlgmr.msra.gmra.mrb[0].mxu0 %vm1206_vm8, %v1065_v49  ;;  %v2237_v34 = vcombine.low %v3248_v13, %v3251_v17 }
  0xd9   : > { %2594 = vmatmul.mubr.msk.bf16.vlgmr.msra.gmra.mrb[0].mxu1 %vm1206_vm8, %v3550_v51  ;;  %2641 = vmatprep.mubr.msk.bf16.mxu0 %vm1206_vm8, %v3550_v51 }
  0xda   : > { %v909_v53 = vpop.permute.xlu1 %908  ;;  %2719 = vmatpush3.bf16.msra.mxu1 %v2865_v55  ;;  %2670 = vmatpush3.bf16.msra.mxu0 %v3174_v5 }
  0xdb   : > { %2671 = vmatprep.subr.bf16.mxu0 %v2841_v50  ;;  %2714 = vmatprep.subr.bf16.mxu1 %v2866_v57  ;;  %v1027_v27 = vsel %vm1012_vm6, %v2234_v19, %v909_v53 }
  0xdd   : > { %v907_v29 = vpop.permute.xlu0 %906 }
  0xde   : > { %2672 = vmatpush3.bf16.msra.mxu0 %v2841_v50  ;;  %2720 = vmatpush3.bf16.msra.mxu1 %v2866_v57  ;;  %v989_v30 = vpop.permute.xlu1 %988  ;;  %v1024_v5 = vsel %vm1012_vm6, %v2233_v25, %v907_v29  ;;  %v2874_v50 = vld [vmem:[#allocation2 + $0x28] sm:$0xff]  }
  0xdf   : > { %2673 = vmatprep.subr.bf16.mxu0 %v2844_v58  ;;  %2715 = vmatprep.subr.bf16.mxu1 %v2871_v26  ;;  %v1071_v38 = vsel %vm1061_vm7, %v1027_v27, %v989_v30 }
  0xe1   : > { %v987_v31 = vpop.permute.xlu0 %986 }
  0xe2   : > { %v1069_v37 = vsel %vm1061_vm7, %v1024_v5, %v987_v31  ;;  %2674 = vmatpush3.bf16.msra.mxu0 %v2844_v58  ;;  %2721 = vmatpush3.bf16.msra.mxu1 %v2871_v26 }
  0xe3   : > { %2597 = vmatprep.mubr.msk.bf16.mxu1 %vm1206_vm8, %v1069_v37  ;;  %2642 = vmatmul.mubr.msk.bf16.gmra.mrb[4].mxu0 %vm1206_vm8, %v1069_v37 }
  0xe4   : > { %2598 = vmatmul.mubr.msk.bf16.gmra.mrb[4].mxu1 %vm1206_vm8, %v1071_v38  ;;  %2645 = vmatprep.mubr.msk.bf16.mxu0 %vm1206_vm8, %v1071_v38 }
  0xe5   : > { %2675 = vmatprep.subr.bf16.mxu0 %v2846_v35  ;;  %2716 = vmatprep.subr.bf16.mxu1 %v2872_v41 }
  0xe6   : > { %v913_v42 = vpop.permute.xlu1 %912  ;;  %2676 = vmatpush3.bf16.msra.mxu0 %v2846_v35  ;;  %2722 = vmatpush3.bf16.msra.mxu1 %v2872_v41 }
  0xe7   : > { %2677 = vmatprep.subr.bf16.mxu0 %v2848_v40  ;;  %2717 = vmatprep.subr.bf16.mxu1 %v2873_v39  ;;  %v1033_v53 = vsel %vm1012_vm6, %v2236_v46, %v913_v42 }
  0xe9   : > { %v911_v49 = vpop.permute.xlu0 %910 }
  0xea   : > { %2678 = vmatpush3.bf16.msra.mxu0 %v2848_v40  ;;  %2723 = vmatpush3.bf16.msra.mxu1 %v2873_v39  ;;  %v993_v55 = vpop.permute.xlu1 %992  ;;  %v1030_v57 = vsel %vm1012_vm6, %v2235_v47, %v911_v49 }
  0xeb   : > { %2679 = vmatprep.subr.bf16.mxu0 %v2851_v45  ;;  %2718 = vmatprep.subr.bf16.mxu1 %v2874_v50  ;;  %v1075_v10 = vsel %vm1061_vm7, %v1033_v53, %v993_v55 }
  0xed   : > { %v991_v58 = vpop.permute.xlu0 %990 }
  0xee   : > { %v1073_v61 = vsel %vm1061_vm7, %v1030_v57, %v991_v58  ;;  %2680 = vmatpush3.bf16.msra.mxu0 %v2851_v45  ;;  %2724 = vmatpush3.bf16.msra.mxu1 %v2874_v50 }
  0xef   : > { %2601 = vmatprep.mubr.msk.bf16.mxu1 %vm1206_vm8, %v1073_v61  ;;  %2646 = vmatmul.mubr.msk.bf16.gmra.mrb[8].mxu0 %vm1206_vm8, %v1073_v61 }
  0xf0   : > { %2602 = vmatmul.mubr.msk.bf16.gmra.mrb[8].mxu1 %vm1206_vm8, %v1075_v10  ;;  %2649 = vmatprep.mubr.msk.bf16.mxu0 %vm1206_vm8, %v1075_v10 }
  0xf2   : > { %v917_v16 = vpop.permute.xlu1 %916 }
  0xf3   : > { %v1039_v19 = vsel %vm1012_vm6, %v2238_v28, %v917_v16 }
  0xf5   : > { %v915_v48 = vpop.permute.xlu0 %914 }
  0xf6   : > { %v997_v20 = vpop.permute.xlu1 %996  ;;  %v1036_v21 = vsel %vm1012_vm6, %v2237_v34, %v915_v48 }
  0xf7   : > { %v1079_v26 = vsel %vm1061_vm7, %v1039_v19, %v997_v20 }
  0xf9   : > { %v995_v25 = vpop.permute.xlu0 %994 }
  0xfa   : > { %v1077_v29 = vsel %vm1061_vm7, %v1036_v21, %v995_v25 }
  0xfb   : > { %2605 = vmatprep.mubr.msk.bf16.mxu1 %vm1206_vm8, %v1077_v29  ;;  %2650 = vmatmul.mubr.msk.bf16.gmra.mrb[12].mxu0 %vm1206_vm8, %v1077_v29 }
  0xfc   : > { %2606 = vmatmul.mubr.msk.bf16.gmra.mrb[12].mxu1 %vm1206_vm8, %v1079_v26  ;;  %2681 = vmatprep.mubr.msk.bf16.mxu0 %vm1206_vm8, %v3550_v51 }
  0xfe   : > { %v921_v2 = vpop.permute.xlu1 %920 }
  0xff   : > { %v1045_v13 = vsel %vm1012_vm6, %v2240_v63, %v921_v2 }
 0x101   : > { %v919_v3 = vpop.permute.xlu0 %918 }
 0x102   : > { %v1001_v17 = vpop.permute.xlu1 %1000  ;;  %v1042_v27 = vsel %vm1012_vm6, %v2239_v1, %v919_v3 }
 0x103   : > { %2682 = vmatmul.mubr.msk.bf16.vlgmr.msra.gmra.mrb[0].mxu0 %vm1206_vm8, %v1069_v37  ;;  %v1083_v5 = vsel %vm1061_vm7, %v1045_v13, %v1001_v17 }
 0x104   : > { %2685 = vmatprep.mubr.msk.bf16.mxu0 %vm1206_vm8, %v1071_v38 }
 0x105   : > { %v999_v30 = vpop.permute.xlu0 %998 }
 0x106   : > { %v1081_v51 = vsel %vm1061_vm7, %v1042_v27, %v999_v30 }
 0x107   : > { %2609 = vmatprep.mubr.msk.bf16.mxu1 %vm1206_vm8, %v1081_v51 }
 0x108   : > { %2610 = vmatmul.mubr.msk.bf16.gmra.mrb[16].mxu1 %vm1206_vm8, %v1083_v5 }
 0x10a   : > { %v925_v54 = vpop.permute.xlu1 %924 }
 0x10b   : > { %2686 = vmatmul.mubr.msk.bf16.gmra.mrb[4].mxu0 %vm1206_vm8, %v1073_v61  ;;  %v1051_v15 = vsel %vm1012_vm6, %v2242_v4, %v925_v54 }
 0x10c   : > { %2689 = vmatprep.mubr.msk.bf16.mxu0 %vm1206_vm8, %v1075_v10  ;;  %v3680_v10 = vld [vmem:[#allocation4] ss:$0 sm:$0xff] }
 0x10d   : > { %v923_v59 = vpop.permute.xlu0 %922 }
 0x10e   : > { %v1005_v18 = vpop.permute.xlu1 %1004  ;;  %v1048_v63 = vsel %vm1012_vm6, %v2241_v36, %v923_v59 }
 0x10f   : > { %v1087_v35 = vsel %vm1061_vm7, %v1051_v15, %v1005_v18 }
 0x111   : > { %v1003_v1 = vpop.permute.xlu0 %1002 }
 0x112   : > { %v1085_v31 = vsel %vm1061_vm7, %v1048_v63, %v1003_v1 }
 0x113   : > { %2613 = vmatprep.mubr.msk.bf16.mxu1 %vm1206_vm8, %v1085_v31  ;;  %2690 = vmatmul.mubr.msk.bf16.gmra.mrb[8].mxu0 %vm1206_vm8, %v1077_v29 }
 0x114   : > { %2614 = vmatmul.mubr.msk.bf16.gmra.mrb[20].mxu1 %vm1206_vm8, %v1087_v35  ;;  %2693 = vmatprep.mubr.msk.bf16.mxu0 %vm1206_vm8, %v1079_v26 }
 0x116   : > { %v929_v56 = vpop.permute.xlu1 %928 }
 0x117   : > { %v1057_v22 = vsel %vm1012_vm6, %v2244_v6, %v929_v56 }
 0x119   : > { %v927_v12 = vpop.permute.xlu0 %926 }
 0x11a   : > { %v1009_v33 = vpop.permute.xlu1 %1008  ;;  %v1054_v4 = vsel %vm1012_vm6, %v2243_v0, %v927_v12 }
 0x11b   : > { %2694 = vmatmul.mubr.msk.bf16.gmra.mrb[12].mxu0 %vm1206_vm8, %v1081_v51  ;;  %v1091_v38 = vsel %vm1061_vm7, %v1057_v22, %v1009_v33 }
 0x11c   : > { %2697 = vmatprep.mubr.msk.bf16.mxu0 %vm1206_vm8, %v1083_v5 }
 0x11d   : > { %v1007_v36 = vpop.permute.xlu0 %1006 }
 0x11e   : > { %v1089_v37 = vsel %vm1061_vm7, %v1054_v4, %v1007_v36 }
 0x11f   : > { %2617 = vmatprep.mubr.msk.bf16.mxu1 %vm1206_vm8, %v1089_v37 }
 0x120   : > { %2618 = vmatmul.mubr.msk.bf16.gmra.mrb[24].mxu1 %vm1206_vm8, %v1091_v38  ;;  %v1011_v14 = vpop.permute.xlu1 %1010 }
 0x122   : > { %v931_v24 = vpop.permute.xlu0 %930 }
 0x123   : > { %v1060_v6 = vsel %vm1012_vm6, %v2245_v8, %v931_v24  ;;  %2698 = vmatmul.mubr.msk.bf16.gmra.mrb[16].mxu0 %vm1206_vm8, %v1085_v31 }
 0x124   : > { %v1093_v43 = vsel %vm1061_vm7, %v1060_v6, %v1011_v14  ;;  %2701 = vmatprep.mubr.msk.bf16.mxu0 %vm1206_vm8, %v1087_v35 }
 0x125   : > { %2621 = vmatprep.mubr.msk.bf16.mxu1 %vm1206_vm8, %v1093_v43 }
 0x126   : > { %v1152_v44 = vpop.permute.xlu1 %1151 }
 0x127   : > { %v1147_v0 = vpop.permute.xlu0 %1146 }
 0x128   : > { %v1155_v40 = vsel %vm1012_vm6, %v2279_v11, %v1147_v0 }
 0x129   : > { %v1157_v41 = vsel %vm1061_vm7, %v1155_v40, %v1152_v44 }
 0x12a   : > { %2622 = vmatmul.mubr.msk.bf16.gmra.mrb[28].mxu1 %vm1206_vm8, %v1157_v41 }
 0x12b   : > { %2653 = vmatprep.mubr.msk.bf16.mxu1 %vm1206_vm8, %v1079_v26  ;;  %2702 = vmatmul.mubr.msk.bf16.gmra.mrb[20].mxu0 %vm1206_vm8, %v1089_v37 }
 0x12c   : > { %2705 = vmatprep.mubr.msk.bf16.mxu0 %vm1206_vm8, %v1091_v38 }
 0x12d   : > { %v1640_v32 = vpop.permute.xlu0 %1639  ;;  %v1645_v62 = vpop.permute.xlu1 %1644 }
 0x12e   : > { %v1648_v23 = vsel %vm1012_vm6, %v2327_v9, %v1640_v32 }
 0x12f   : > { %v1650_v7 = vsel %vm1061_vm7, %v1648_v23, %v1645_v62 }
 0x132   : > { %2654 = vmatmul.mubr.msk.bf16.vlgmr.msra.gmra.mrb[16].mxu1 %vm1206_vm8, %v1081_v51 }
 0x133   : > { %2657 = vmatprep.mubr.msk.bf16.mxu1 %vm1206_vm8, %v1083_v5  ;;  %2706 = vmatmul.mubr.msk.bf16.gmra.mrb[24].mxu0 %vm1206_vm8, %v1093_v43 }
 0x134   : > { %2709 = vmatprep.mubr.msk.bf16.mxu0 %vm1206_vm8, %v1157_v41 }
 0x13a   : > { %2658 = vmatmul.mubr.msk.bf16.gmra.mrb[20].mxu1 %vm1206_vm8, %v1085_v31 }
 0x13b   : > { %2661 = vmatprep.mubr.msk.bf16.mxu1 %vm1206_vm8, %v1087_v35  ;;  %2710 = vmatmul.mubr.msk.bf16.gmra.mrb[28].mxu0 %vm1206_vm8, %v1650_v7 }
 0x142   : > { %2662 = vmatmul.mubr.msk.bf16.gmra.mrb[24].mxu1 %vm1206_vm8, %v1089_v37 }
 0x143   : > { %2665 = vmatprep.mubr.msk.bf16.mxu1 %vm1206_vm8, %v1091_v38 }
 0x14a   : > { %2666 = vmatmul.mubr.msk.bf16.gmra.mrb[28].mxu1 %vm1206_vm8, %v1093_v43 }
 0x1ac   : > { %v2595_v8 = vpop.f32.mrb[0].mxu1 }
 0x1ad   : > { %v1273_v11 = vpop.f32.mrb[1].mxu1 }
 0x1ae   : > { %v2596_v52 = vpop.f32.mrb[2].mxu1 }
 0x1af   : > { %v1276_v60 = vpop.f32.mrb[3].mxu1 }
 0x1b7   : > { %v2599_v9 = vpop.f32.mrb[4].mxu1 }
 0x1b8   : > { %v1289_v42 = vpop.f32.mrb[5].mxu1 }
 0x1b9   : > { %v2600_v45 = vpop.f32.mrb[6].mxu1 }
 0x1ba   : > { %v1292_v39 = vpop.f32.mrb[7].mxu1 }
 0x1c3   : > { %v2603_v46 = vpop.f32.mrb[8].mxu1 }
 0x1c4   : > { %v1305_v47 = vpop.f32.mrb[9].mxu1 }
 0x1c5   : > { %v2604_v49 = vpop.f32.mrb[10].mxu1 }
 0x1c6   : > { %v1308_v50 = vpop.f32.mrb[11].mxu1 }
 0x1cf   : > { %v3672_v53 = vpop.f32.mrb[12].mxu1 }
 0x1d0   : > { %v3674_v55 = vpop.f32.mrb[13].mxu1 }
 0x1d1   : > { %v3676_v57 = vpop.f32.mrb[14].mxu1 }
 0x1d2   : > { %v3678_v58 = vpop.f32.mrb[15].mxu1 }
 0x1d6   : > { %v2683_v61 = vpop.f32.mrb[0].mxu0 }
 0x1d7   : > { %v2725_v16 = vadd.f32 %v2683_v61, %v2595_v8  ;;  %v1735_v28 = vpop.f32.mrb[1].mxu0 }
 0x1d8   : > { %v2726_v34 = vadd.f32 %v1735_v28, %v1273_v11  ;;  %v2684_v48 = vpop.f32.mrb[2].mxu0 }
 0x1d9   : > { %v1903_v19 = vadd.f32 %v2725_v16, %v3680_v10  ;;  %v2727_v20 = vadd.f32 %v2684_v48, %v2596_v52  ;;  %v1738_v21 = vpop.f32.mrb[3].mxu0 }
 0x1da   : > { %v1901_v25 = vadd.f32 %v2726_v34, %v3680_v10  ;;  %v2728_v29 = vadd.f32 %v1738_v21, %v1276_v60 }
 0x1db   : > { %v1904_v26 = vadd.f32 %v2727_v20, %v3680_v10  ;;  %v1935_v3 = vmax.f32 %v1903_v19, 0.0 }
 0x1dc   : > { %v1902_v2 = vadd.f32 %v2728_v29, %v3680_v10  ;;  %v1933_v17 = vmax.f32 %v1901_v25, 0.0 }
 0x1dd   : > { %v1936_v13 = vmax.f32 %v1904_v26, 0.0 }
 0x1de   : > { %v1934_v27 = vmax.f32 %v1902_v2, 0.0  ;;  %v2687_v30 = vpop.f32.mrb[4].mxu0 }
 0x1df   : > { %v2428_v51 = vpack.c.bf16 %v1936_v13, %v1935_v3  ;;  %v2729_v5 = vadd.f32 %v2687_v30, %v2599_v9  ;;  %v1751_v54 = vpop.f32.mrb[5].mxu0 }
 0x1e0   : > { %v2423_v59 = vpack.c.bf16 %v1934_v27, %v1933_v17  ;;  %v2730_v15 = vadd.f32 %v1751_v54, %v1289_v42  ;;  %v2688_v18 = vpop.f32.mrb[6].mxu0 }
 0x1e1   : > { %2500 = vst [vmem:[%s3690_s27 + $0x8] sm:$0xff] %v2428_v51   ;;  %v1907_v63 = vadd.f32 %v2729_v5, %v3680_v10  ;;  %v2731_v1 = vadd.f32 %v2688_v18, %v2600_v45  ;;  %v1754_v31 = vpop.f32.mrb[7].mxu0 }
 0x1e2   : > { %2424 = vst [vmem:[%s3690_s27] sm:$0xff] %v2423_v59   ;;  %v1905_v35 = vadd.f32 %v2730_v15, %v3680_v10  ;;  %v2732_v56 = vadd.f32 %v1754_v31, %v1292_v39 }
 0x1e3   : > { %v1908_v12 = vadd.f32 %v2731_v1, %v3680_v10  ;;  %v1939_v33 = vmax.f32 %v1907_v63, 0.0 }
 0x1e4   : > { %v1906_v22 = vadd.f32 %v2732_v56, %v3680_v10  ;;  %v1937_v36 = vmax.f32 %v1905_v35, 0.0 }
 0x1e5   : > { %v1940_v4 = vmax.f32 %v1908_v12, 0.0 }
 0x1e6   : > { %v1938_v37 = vmax.f32 %v1906_v22, 0.0  ;;  %v2691_v38 = vpop.f32.mrb[8].mxu0 }
 0x1e7   : > { %v2438_v14 = vpack.c.bf16 %v1940_v4, %v1939_v33  ;;  %v2733_v24 = vadd.f32 %v2691_v38, %v2603_v46  ;;  %v1767_v6 = vpop.f32.mrb[9].mxu0 }
 0x1e8   : > { %v2433_v43 = vpack.c.bf16 %v1938_v37, %v1937_v36  ;;  %v2734_v44 = vadd.f32 %v1767_v6, %v1305_v47  ;;  %v2692_v0 = vpop.f32.mrb[10].mxu0 }
 0x1e9   : > { %2502 = vst [vmem:[%s3690_s27 + $0x18] sm:$0xff] %v2438_v14   ;;  %v1911_v40 = vadd.f32 %v2733_v24, %v3680_v10  ;;  %v2735_v41 = vadd.f32 %v2692_v0, %v2604_v49  ;;  %v1770_v32 = vpop.f32.mrb[11].mxu0 }
 0x1ea   : > { %2501 = vst [vmem:[%s3690_s27 + $0x10] sm:$0xff] %v2433_v43   ;;  %v1909_v23 = vadd.f32 %v2734_v44, %v3680_v10  ;;  %v2736_v62 = vadd.f32 %v1770_v32, %v1308_v50 }
 0x1eb   : > { %v1912_v7 = vadd.f32 %v2735_v41, %v3680_v10  ;;  %v1943_v11 = vmax.f32 %v1911_v40, 0.0 }
 0x1ec   : > { %v1910_v8 = vadd.f32 %v2736_v62, %v3680_v10  ;;  %v1941_v60 = vmax.f32 %v1909_v23, 0.0 }
 0x1ed   : > { %v1944_v52 = vmax.f32 %v1912_v7, 0.0 }
 0x1ee   : > { %v1942_v9 = vmax.f32 %v1910_v8, 0.0  ;;  %v2695_v42 = vpop.f32.mrb[12].mxu0 }
 0x1ef   : > { %v2448_v45 = vpack.c.bf16 %v1944_v52, %v1943_v11  ;;  %v2737_v39 = vadd.f32 %v2695_v42, %v3672_v53  ;;  %v1783_v46 = vpop.f32.mrb[13].mxu0 }
 0x1f0   : > { %v2443_v47 = vpack.c.bf16 %v1942_v9, %v1941_v60  ;;  %v2738_v49 = vadd.f32 %v1783_v46, %v3674_v55  ;;  %v2696_v61 = vpop.f32.mrb[14].mxu0 }
 0x1f1   : > { %2504 = vst [vmem:[%s3690_s27 + $0x28] sm:$0xff] %v2448_v45   ;;  %v1915_v50 = vadd.f32 %v2737_v39, %v3680_v10  ;;  %v2739_v16 = vadd.f32 %v2696_v61, %v3676_v57  ;;  %v1786_v28 = vpop.f32.mrb[15].mxu0 }
 0x1f2   : > { %2503 = vst [vmem:[%s3690_s27 + $0x20] sm:$0xff] %v2443_v47   ;;  %v1913_v34 = vadd.f32 %v2738_v49, %v3680_v10  ;;  %v2740_v48 = vadd.f32 %v1786_v28, %v3678_v58 }
 0x1f3   : > { %v1916_v53 = vadd.f32 %v2739_v16, %v3680_v10  ;;  %v1947_v20 = vmax.f32 %v1915_v50, 0.0 }
 0x1f4   : > { %v1914_v19 = vadd.f32 %v2740_v48, %v3680_v10  ;;  %v1945_v21 = vmax.f32 %v1913_v34, 0.0 }
 0x1f5   : > { %v1948_v55 = vmax.f32 %v1916_v53, 0.0 }
 0x1f6   : > { %v1946_v25 = vmax.f32 %v1914_v19, 0.0  ;;  %v2699_v29 = vpop.f32.mrb[16].mxu0 }
 0x1f7   : > { %v2458_v26 = vpack.c.bf16 %v1948_v55, %v1947_v20  ;;  %v1799_v2 = vpop.f32.mrb[17].mxu0 }
 0x1f8   : > { %v2453_v57 = vpack.c.bf16 %v1946_v25, %v1945_v21  ;;  %v2700_v3 = vpop.f32.mrb[18].mxu0 }
 0x1f9   : > { %2506 = vst [vmem:[%s3690_s27 + $0x38] sm:$0xff] %v2458_v26   ;;  %v1802_v13 = vpop.f32.mrb[19].mxu0 }
 0x1fa   : > { %2505 = vst [vmem:[%s3690_s27 + $0x30] sm:$0xff] %v2453_v57  }
 0x1fe   : > { %v2703_v17 = vpop.f32.mrb[20].mxu0 }
 0x1ff   : > { %v1815_v27 = vpop.f32.mrb[21].mxu0 }
 0x200   : > { %v2704_v30 = vpop.f32.mrb[22].mxu0 }
 0x201   : > { %v1818_v58 = vpop.f32.mrb[23].mxu0 }
 0x205   : > { %v2655_v51 = vpop.f32.mrb[16].mxu1 }
 0x206   : > { %v2741_v5 = vadd.f32 %v2699_v29, %v2655_v51  ;;  %v1536_v54 = vpop.f32.mrb[17].mxu1  ;;  %v2707_v59 = vpop.f32.mrb[24].mxu0 }
 0x207   : > { %v2742_v15 = vadd.f32 %v1799_v2, %v1536_v54  ;;  %v2656_v18 = vpop.f32.mrb[18].mxu1  ;;  %v1831_v63 = vpop.f32.mrb[25].mxu0 }
 0x208   : > { %v1919_v1 = vadd.f32 %v2741_v5, %v3680_v10  ;;  %v2743_v31 = vadd.f32 %v2700_v3, %v2656_v18  ;;  %v1539_v35 = vpop.f32.mrb[19].mxu1  ;;  %v2708_v56 = vpop.f32.mrb[26].mxu0 }
 0x209   : > { %v1917_v12 = vadd.f32 %v2742_v15, %v3680_v10  ;;  %v2744_v22 = vadd.f32 %v1802_v13, %v1539_v35  ;;  %v1834_v33 = vpop.f32.mrb[27].mxu0 }
 0x20a   : > { %v1920_v4 = vadd.f32 %v2743_v31, %v3680_v10  ;;  %v1951_v37 = vmax.f32 %v1919_v1, 0.0 }
 0x20b   : > { %v1918_v36 = vadd.f32 %v2744_v22, %v3680_v10  ;;  %v1949_v14 = vmax.f32 %v1917_v12, 0.0 }
 0x20c   : > { %v1952_v38 = vmax.f32 %v1920_v4, 0.0 }
 0x20d   : > { %v1950_v24 = vmax.f32 %v1918_v36, 0.0  ;;  %v2659_v6 = vpop.f32.mrb[20].mxu1 }
 0x20e   : > { %v2468_v43 = vpack.c.bf16 %v1952_v38, %v1951_v37  ;;  %v2745_v44 = vadd.f32 %v2703_v17, %v2659_v6  ;;  %v1552_v0 = vpop.f32.mrb[21].mxu1  ;;  %v2711_v40 = vpop.f32.mrb[28].mxu0 }
 0x20f   : > { %v2463_v41 = vpack.c.bf16 %v1950_v24, %v1949_v14  ;;  %v2746_v32 = vadd.f32 %v1815_v27, %v1552_v0  ;;  %v2660_v23 = vpop.f32.mrb[22].mxu1  ;;  %v1847_v62 = vpop.f32.mrb[29].mxu0 }
 0x210   : > { %2508 = vst [vmem:[%s3690_s27 + $0x48] sm:$0xff] %v2468_v43   ;;  %v1923_v7 = vadd.f32 %v2745_v44, %v3680_v10  ;;  %v2747_v8 = vadd.f32 %v2704_v30, %v2660_v23  ;;  %v1555_v11 = vpop.f32.mrb[23].mxu1  ;;  %v2712_v52 = vpop.f32.mrb[30].mxu0 }
 0x211   : > { %2507 = vst [vmem:[%s3690_s27 + $0x40] sm:$0xff] %v2463_v41   ;;  %v1921_v60 = vadd.f32 %v2746_v32, %v3680_v10  ;;  %v2748_v9 = vadd.f32 %v1818_v58, %v1555_v11  ;;  %v1850_v42 = vpop.f32.mrb[31].mxu0 }
 0x212   : > { %v1924_v45 = vadd.f32 %v2747_v8, %v3680_v10  ;;  %v1955_v46 = vmax.f32 %v1923_v7, 0.0 }
 0x213   : > { %v1922_v39 = vadd.f32 %v2748_v9, %v3680_v10  ;;  %v1953_v49 = vmax.f32 %v1921_v60, 0.0 }
 0x214   : > { %v1956_v47 = vmax.f32 %v1924_v45, 0.0 }
 0x215   : > { %v1954_v61 = vmax.f32 %v1922_v39, 0.0  ;;  %v2663_v50 = vpop.f32.mrb[24].mxu1 }
 0x216   : > { %v2478_v16 = vpack.c.bf16 %v1956_v47, %v1955_v46  ;;  %v2749_v28 = vadd.f32 %v2707_v59, %v2663_v50  ;;  %v1568_v34 = vpop.f32.mrb[25].mxu1 }
 0x217   : > { %v2473_v48 = vpack.c.bf16 %v1954_v61, %v1953_v49  ;;  %v2750_v53 = vadd.f32 %v1831_v63, %v1568_v34  ;;  %v2664_v19 = vpop.f32.mrb[26].mxu1 }
 0x218   : > { %2510 = vst [vmem:[%s3690_s27 + $0x58] sm:$0xff] %v2478_v16   ;;  %v1927_v20 = vadd.f32 %v2749_v28, %v3680_v10  ;;  %v2751_v55 = vadd.f32 %v2708_v56, %v2664_v19  ;;  %v1571_v21 = vpop.f32.mrb[27].mxu1 }
 0x219   : > { %2509 = vst [vmem:[%s3690_s27 + $0x50] sm:$0xff] %v2473_v48   ;;  %v1925_v25 = vadd.f32 %v2750_v53, %v3680_v10  ;;  %v2752_v29 = vadd.f32 %v1834_v33, %v1571_v21 }
 0x21a   : > { %v1928_v26 = vadd.f32 %v2751_v55, %v3680_v10  ;;  %v1959_v57 = vmax.f32 %v1927_v20, 0.0 }
 0x21b   : > { %v1926_v2 = vadd.f32 %v2752_v29, %v3680_v10  ;;  %v1957_v13 = vmax.f32 %v1925_v25, 0.0 }
 0x21c   : > { %v1960_v3 = vmax.f32 %v1928_v26, 0.0 }
 0x21d   : > { %v1958_v17 = vmax.f32 %v1926_v2, 0.0  ;;  %v2667_v27 = vpop.f32.mrb[28].mxu1 }
 0x21e   : > { %v2488_v30 = vpack.c.bf16 %v1960_v3, %v1959_v57  ;;  %v2753_v58 = vadd.f32 %v2711_v40, %v2667_v27  ;;  %v1584_v51 = vpop.f32.mrb[29].mxu1 }
 0x21f   : > { %v2483_v5 = vpack.c.bf16 %v1958_v17, %v1957_v13  ;;  %v2754_v54 = vadd.f32 %v1847_v62, %v1584_v51  ;;  %v2668_v59 = vpop.f32.mrb[30].mxu1 }
 0x220   : > { %2512 = vst [vmem:[%s3690_s27 + $0x68] sm:$0xff] %v2488_v30   ;;  %v1931_v15 = vadd.f32 %v2753_v58, %v3680_v10  ;;  %v2755_v18 = vadd.f32 %v2712_v52, %v2668_v59  ;;  %v1587_v63 = vpop.f32.mrb[31].mxu1 }
 0x221   : > { %2511 = vst [vmem:[%s3690_s27 + $0x60] sm:$0xff] %v2483_v5   ;;  %v1929_v1 = vadd.f32 %v2754_v54, %v3680_v10  ;;  %v2756_v31 = vadd.f32 %v1850_v42, %v1587_v63 }
 0x222   : > { %v1932_v35 = vadd.f32 %v2755_v18, %v3680_v10  ;;  %v1963_v12 = vmax.f32 %v1931_v15, 0.0 }
 0x223   : > { %v1930_v56 = vadd.f32 %v2756_v31, %v3680_v10  ;;  %v1961_v33 = vmax.f32 %v1929_v1, 0.0 }
 0x224   : > { %v1964_v22 = vmax.f32 %v1932_v35, 0.0 }
 0x225   : > { %v1962_v4 = vmax.f32 %v1930_v56, 0.0 }
 0x226   : > { %v2498_v36 = vpack.c.bf16 %v1964_v22, %v1963_v12 }
 0x227   : > { %v2493_v37 = vpack.c.bf16 %v1962_v4, %v1961_v33 }
 0x228   : > { %2514 = vst [vmem:[%s3690_s27 + $0x78] sm:$0xff] %v2498_v36  }
 0x229   : > { %2513 = vst [vmem:[%s3690_s27 + $0x70] sm:$0xff] %v2493_v37  }
 0x22a PF: > { %s15_s12 = sadd.s32 1, %s2945_s12  }
 0x22b   : > { %p12_p5 = scmp.ge.s32.totalorder %s15_s12, 4  }
 0x22d   :  { %14 = sbr.rel (!%p12_p5) target bundleno = 2 (0x2), region = 71 }
 0x234   :  { %2146 = vsyncpa [#allocation3], 1 }
 0x235   :  { %2148 = vsyncpa [#allocation3 + $0x1], 1 }
 0x236   :  { %2149 = vsyncpa [#allocation5], 1 }

// kernel: base_decoder_forward.9
= control target key start
LH: loop header
LB: loop body
LE: loop exit
PB: predicated region body
PF: predicated region fallthrough
CT: control target
= control target key end

     0   :  { %s8806_s12 = smov 0   ;;  %s12089_s0 = inlined_call_operand.vmem [shape: bf16[2,34,34,32], index: 0, kind: input, shape index: {}]   ;;  %s12090_s1 = inlined_call_operand.vmem [shape: bf16[288,128], index: 1, kind: input, shape index: {}]   ;;  %s12091_s2 = inlined_call_operand.vmem [shape: f32[1,128], index: 2, kind: input, shape index: {}]   ;;  %s12092_s3 = inlined_call_operand.vmem [shape: bf16[2,1024,128], index: 3, kind: output, shape index: {}]  }
   0x1 LB: > { %s6556_s13 = sadd.s32 4294967295, %s8782_s12   ;;  %p6560_p0 = scmp.ge.s32.totalorder %s8782_s12, 1  ;;  %s8782_s12 = sphi %s8806_s12, %s13_s12  }
   0x2   : > { %p137_p1 = scmp.lt.s32.totalorder %s8782_s12, 3 }
   0x4   : > { %p138_p2 = pnand %p6560_p0, %p137_p1 }
   0x6   : > { %141 = sbr.rel (%p138_p2) target bundleno = 902 (0x386), region = 32 }
   0xd   : > { %p161_p3 = scmp.lt.s32.totalorder %s6556_s13, 1  ;;  %vm1913_vm0 = vcmask 1042432   ;;  %vm1914_vm1 = vcmask 1046532   ;;  %vm342_vm3 = vsmask.f32 3328  ;;  %s8784_s18 = smov 64  }
   0xe   : > { %vm8817_vm2 = vmor %vm1913_vm0, %vm1914_vm1  ;;  %vm343_vm4 = vsmask.f32 7440  ;;  %s8785_s19 = smov 32   ;;  %vm3164_vm6 = vcmask 261120   ;;  %vm3357_vm7 = vcmask 523264   ;;  %vm3644_vm8 = vcmask 785408  }
   0xf   : > { %s12241_s13 = smov (!%p161_p3, %s6556_s13), 1  ;;  %vm8863_vm5 = vmor %vm342_vm3, %vm343_vm4 }
  0x10   : > { %s8553_s14 = smul.u32 680, %s12241_s13 }
  0x12   : > { %s8824_s17 = scalar_lea.vmem %s12089_s0, %s8553_s14 }
  0x13   : > { %v8827_v1 = vld [vmem:[%s8824_s17 + $0x14] sm:$0xf]  ;;  %v8830_v2 = vld [vmem:[%s8824_s17 + $0x18] sm:$0xf]  ;;  %v179_v3 = vld [vmem:[%s8824_s17 + $0x1c] sm:$0xf] }
  0x14   : > { %v6565_v4 = vrot.slane %v8827_v1, 9  ;;  %v1931_v5 = vrot.slane %v8830_v2, 5  ;;  %v1934_v6 = vrot.slane %v179_v3, 5  ;;  %v172_v7 = vld [vmem:[%s8824_s17] sm:$0xf]  ;;  %v409_v8 = vshll.u32 %v179_v3, 16 }
  0x15   : > { %v173_v9 = vld [vmem:[%s8824_s17 + $0x4] sm:$0xf]  ;;  %v174_v10 = vld [vmem:[%s8824_s17 + $0x8] sm:$0xf]  ;;  %v6564_v11 = vrot.slane %v172_v7, 9  ;;  %v346_v12 = vshrl.u32 %v172_v7, 16 }
  0x16   : > { %v1932_v13 = vsel %vm8817_vm2, %v6565_v4, %v1931_v5  ;;  %v1933_v14 = vrot.slane %v1931_v5, 4  ;;  %v8840_v15 = vrot.slane %v1934_v6, 4  ;;  %v1918_v16 = vrot.slane %v173_v9, 5  ;;  %v8843_v17 = vld [vmem:[%s8824_s17 + $0xc] sm:$0xf] }
  0x17   : > { %v1921_v18 = vrot.slane %v174_v10, 5  ;;  %v8846_v19 = vld [vmem:[%s8824_s17 + $0x10] sm:$0x1]  ;;  %v365_v20 = vshll.u32 %v174_v10, 16  ;;  %v369_v21 = vshrl.u32 %v174_v10, 16  ;;  %v375_v22 = vshll.u32 %v8843_v17, 16 }
  0x18   : > { %v1935_v23 = vsel %vm8817_vm2, %v1933_v14, %v1934_v6  ;;  %v1919_v24 = vsel %vm8817_vm2, %v6564_v11, %v1918_v16  ;;  %v1920_v25 = vrot.slane %v1918_v16, 4  ;;  %v379_v26 = vshrl.u32 %v8843_v17, 16  ;;  %v180_v39 = vld [vmem:[%s8824_s17 + $0x20] sm:$0xf]  ;;  %v8869_v47 = vld [vmem:[%s8824_s17 + $0x24] sm:$0x1] }
  0x19   : > { %v6726_v27 = vcombine.low %v1932_v13, %v1935_v23  ;;  %v8854_v28 = vrot.slane %v1921_v18, 4  ;;  %v367_v29 = vrot.slane %v365_v20, 5  ;;  %v371_v30 = vrot.slane %v369_v21, 4  ;;  %v8889_v20 = vld [vmem:[%s8824_s17 + $0x30] sm:$0xf] }
  0x1a   : > { %v1922_v31 = vsel %vm8817_vm2, %v1920_v25, %v1921_v18  ;;  %v377_v32 = vrot.slane %v375_v22, 5  ;;  %v381_v33 = vrot.slane %v379_v26, 4  ;;  %v385_v34 = vshll.u32 %v8846_v19, 16 }
  0x1b   : > { %3040 = vrot.lane.b32.xlu1 %v6726_v27, %s8784_s18  ;;  %v6724_v35 = vcombine.low %v1919_v24, %v1922_v31  ;;  %v372_v36 = vor.u32 %v371_v30, %v367_v29  ;;  %v348_v37 = vrot.slane %v346_v12, 4  ;;  %v349_v38 = vshll.u32 %v172_v7, 16  ;;  %v185_v31 = vld [vmem:[%s8824_s17 + $0x34] sm:$0xf] }
  0x1c   : > { %v382_v41 = vor.u32 %v381_v33, %v377_v32  ;;  %v387_v42 = vrot.slane %v385_v34, 5  ;;  %v355_v43 = vshll.u32 %v173_v9, 16  ;;  %v359_v44 = vshrl.u32 %v173_v9, 16 }
  0x1d   : > { %3036 = vrot.lane.b32.xlu0 %v6724_v35, %s8784_s18  ;;  %v373_v45 = vrot.slane %v372_v36, 4  ;;  %v351_v46 = vrot.slane %v349_v38, 5  ;;  %v8871_v48 = vrot.slane %v409_v8, 5  ;;  %v413_v49 = vshrl.u32 %v179_v3, 16 }
  0x1e   : > { %v383_v50 = vrot.slane %v382_v41, 4  ;;  %v357_v51 = vrot.slane %v355_v43, 5  ;;  %v361_v52 = vrot.slane %v359_v44, 4  ;;  %v419_v53 = vshll.u32 %v180_v39, 16 }
  0x1f   : > { %v378_v54 = vsel %vm8863_vm5, %v373_v45, %v377_v32  ;;  %v352_v55 = vor.u32 %v351_v46, %v348_v37  ;;  %v415_v56 = vrot.slane %v413_v49, 4  ;;  %v423_v57 = vshrl.u32 %v180_v39, 16  ;;  %v186_v37 = vld [vmem:[%s8824_s17 + $0x38] sm:$0x1]  ;;  %v183_v49 = vld [vmem:[%s8824_s17 + $0x2c] sm:$0xf] }
  0x20   : > { %v388_v58 = vsel %vm8863_vm5, %v383_v50, %v387_v42  ;;  %v362_v59 = vor.u32 %v361_v52, %v357_v51  ;;  %v421_v60 = vrot.slane %v419_v53, 5  ;;  %v429_v61 = vshll.u32 %v8869_v47, 16 }
  0x21   : > { %v6661_v62 = vcombine.low %v378_v54, %v388_v58  ;;  %v353_v63 = vrot.slane %v352_v55, 4  ;;  %v416_v3 = vor.u32 %v415_v56, %v8871_v48  ;;  %v425_v4 = vrot.slane %v423_v57, 4 }
  0x22   : > { %v363_v5 = vrot.slane %v362_v59, 4  ;;  %v431_v6 = vrot.slane %v429_v61, 5  ;;  %v390_v7 = vshrl.u32 %v8827_v1, 16  ;;  %v393_v8 = vshll.u32 %v8827_v1, 16 }
  0x23   : > { %2718 = vrot.lane.b32.xlu1 %v6661_v62, %s8785_s19  ;;  %v358_v9 = vsel %vm8863_vm5, %v353_v63, %v357_v51  ;;  %v417_v10 = vrot.slane %v416_v3, 4  ;;  %v426_v11 = vor.u32 %v425_v4, %v421_v60  ;;  %v399_v12 = vshll.u32 %v8830_v2, 16 }
  0x24   : > { %v368_v13 = vsel %vm8863_vm5, %v363_v5, %v367_v29  ;;  %v392_v14 = vrot.slane %v390_v7, 4  ;;  %v395_v16 = vrot.slane %v393_v8, 5  ;;  %v403_v18 = vshrl.u32 %v8830_v2, 16 }
  0x25   : > { %v6660_v1 = vcombine.low %v358_v9, %v368_v13  ;;  %v422_v21 = vsel %vm8863_vm5, %v417_v10, %v421_v60  ;;  %v427_v22 = vrot.slane %v426_v11, 4  ;;  %v401_v23 = vrot.slane %v399_v12, 5  ;;  %v8928_v12 = vld [vmem:[%s8824_s17 + $0x44] sm:$0xf] }
  0x26   : > { %v396_v24 = vor.u32 %v395_v16, %v392_v14  ;;  %v405_v25 = vrot.slane %v403_v18, 4  ;;  %v1937_v26 = vrot.slane %v180_v39, 5  ;;  %v1940_v27 = vrot.slane %v8869_v47, 5  ;;  %v182_v47 = vld [vmem:[%s8824_s17 + $0x28] sm:$0xf] }
  0x27   : > { %2716 = vrot.lane.b32.xlu0 %v6660_v1, %s8785_s19  ;;  %v432_v29 = vsel %vm8863_vm5, %v427_v22, %v431_v6  ;;  %v1924_v2 = vrot.slane %v8843_v17, 5  ;;  %v1927_v30 = vrot.slane %v8846_v19, 5  ;;  %v453_v32 = vshll.u32 %v8889_v20, 16 }
  0x28   : > { %v6663_v33 = vcombine.low %v422_v21, %v432_v29  ;;  %v397_v34 = vrot.slane %v396_v24, 4  ;;  %v406_v35 = vor.u32 %v405_v25, %v401_v23  ;;  %v1938_v36 = vsel %vm8817_vm2, %v8840_v15, %v1937_v26  ;;  %v8564_v24 = vld [vmem:[%s12090_s1 + $0x30] sm:$0xff]   ;;  %v8946_v29 = vld [vmem:[%s8824_s17 + $0x4c] sm:$0x1] }
  0x29   : > { %v1939_v38 = vrot.slane %v1937_v26, 4  ;;  %v1925_v17 = vsel %vm8817_vm2, %v8854_v28, %v1924_v2  ;;  %v1926_v39 = vrot.slane %v1924_v2, 4  ;;  %v8908_v19 = vrot.slane %v453_v32, 5  ;;  %7865 = vmatprep.subr.bf16.mxu1 %v8564_v24 }
  0x2a   : > { %2722 = vrot.lane.b32.xlu1 %v6663_v33, %s8785_s19  ;;  %v402_v41 = vsel %vm8863_vm5, %v397_v34, %v401_v23  ;;  %v407_v42 = vrot.slane %v406_v35, 4  ;;  %v457_v43 = vshrl.u32 %v8889_v20, 16  ;;  %v463_v44 = vshll.u32 %v185_v31, 16  ;;  %v8938_v23 = vld [vmem:[%s8824_s17 + $0x48] sm:$0xf]  ;;  %7866 = vmatpush3.bf16.msra.mxu1 %v8564_v24 }
  0x2b   : > { %v1941_v15 = vsel %vm8817_vm2, %v1939_v38, %v1940_v27  ;;  %v1928_v45 = vsel %vm8817_vm2, %v1926_v39, %v1927_v30  ;;  %v467_v46 = vshrl.u32 %v185_v31, 16  ;;  %v473_v28 = vshll.u32 %v186_v37, 16  ;;  %v8959_v38 = vld [vmem:[%s8824_s17 + $0x3c] sm:$0xf]  ;;  %v9013_v24 = vld [vmem:[%s8824_s17 + $0x60] sm:$0x1] }
  0x2c   : > { %v412_v50 = vsel %vm8863_vm5, %v407_v42, %v8871_v48  ;;  %v6727_v51 = vcombine.low %v1938_v36, %v1941_v15  ;;  %v6725_v52 = vcombine.low %v1925_v17, %v1928_v45  ;;  %v459_v53 = vrot.slane %v457_v43, 4  ;;  %v8964_v17 = vld [vmem:[%s12090_s1] sm:$0xff]  }
  0x2d   : > { %v6662_v54 = vcombine.low %v402_v41, %v412_v50  ;;  %v465_v55 = vrot.slane %v463_v44, 5  ;;  %v469_v56 = vrot.slane %v467_v46, 4  ;;  %v475_v57 = vrot.slane %v473_v28, 5  ;;  %v188_v44 = vld [vmem:[%s8824_s17 + $0x40] sm:$0xf]  ;;  %8005 = vmatprep.subr.bf16.mxu0 %v8964_v17 }
  0x2e   : > { %3042 = vrot.lane.b32.xlu1 %v6727_v51, %s8784_s18  ;;  %v460_v58 = vor.u32 %v459_v53, %v8908_v19  ;;  %v434_v59 = vshrl.u32 %v182_v47, 16  ;;  %v437_v60 = vshll.u32 %v182_v47, 16  ;;  %v443_v61 = vshll.u32 %v183_v49, 16  ;;  %8006 = vmatpush3.bf16.msra.mxu0 %v8964_v17 }
  0x2f   : > { %2720 = vrot.lane.b32.xlu0 %v6662_v54, %s8785_s19  ;;  %v470_v62 = vor.u32 %v469_v56, %v465_v55  ;;  %v447_v63 = vshrl.u32 %v183_v49, 16  ;;  %v1947_v48 = vrot.slane %v8889_v20, 5  ;;  %v1950_v3 = vrot.slane %v185_v31, 5 }
  0x30   : > { %v461_v4 = vrot.slane %v460_v58, 4  ;;  %v436_v5 = vrot.slane %v434_v59, 4  ;;  %v439_v6 = vrot.slane %v437_v60, 5  ;;  %v445_v7 = vrot.slane %v443_v61, 5  ;;  %v8567_v60 = vld [vmem:[%s12090_s1 + $0x8] sm:$0xff]  }
  0x31   : > { %v471_v8 = vrot.slane %v470_v62, 4  ;;  %v449_v9 = vrot.slane %v447_v63, 4  ;;  %v1949_v10 = vrot.slane %v1947_v48, 4  ;;  %v1952_v11 = vrot.slane %v1950_v3, 4  ;;  %8007 = vmatprep.subr.bf16.mxu0 %v8567_v60 }
  0x32   : > { %v466_v13 = vsel %vm8863_vm5, %v461_v4, %v465_v55  ;;  %v440_v14 = vor.u32 %v439_v6, %v436_v5  ;;  %v1953_v16 = vrot.slane %v186_v37, 5  ;;  %v6566_v18 = vrot.slane %v182_v47, 9  ;;  %v8566_v55 = vld [vmem:[%s12090_s1 + $0x38] sm:$0xff]   ;;  %8008 = vmatpush3.bf16.msra.mxu0 %v8567_v60 }
  0x33   : > { %3038 = vrot.lane.b32.xlu0 %v6725_v52, %s8784_s18  ;;  %v476_v20 = vsel %vm8863_vm5, %v471_v8, %v475_v57  ;;  %v450_v1 = vor.u32 %v449_v9, %v445_v7  ;;  %v1951_v21 = vsel %vm8817_vm2, %v1949_v10, %v1950_v3  ;;  %v1944_v22 = vrot.slane %v183_v49, 5  ;;  %7867 = vmatprep.subr.bf16.mxu1 %v8566_v55  ;;  %v8568_v8 = vld [vmem:[%s12090_s1 + $0x40] sm:$0xff]  }
  0x34   : > { %v6665_v25 = vcombine.low %v466_v13, %v476_v20  ;;  %v441_v26 = vrot.slane %v440_v14, 4  ;;  %v1954_v27 = vsel %vm8817_vm2, %v1952_v11, %v1953_v16  ;;  %v497_v2 = vshll.u32 %v8928_v12, 16  ;;  %7868 = vmatpush3.bf16.msra.mxu1 %v8566_v55  ;;  %v8569_v13 = vld [vmem:[%s12090_s1 + $0x10] sm:$0xff]  }
  0x35   : > { %v451_v30 = vrot.slane %v450_v1, 4  ;;  %v6729_v31 = vcombine.low %v1951_v21, %v1954_v27  ;;  %v1945_v32 = vsel %vm8817_vm2, %v6566_v18, %v1944_v22  ;;  %v1946_v33 = vrot.slane %v1944_v22, 4  ;;  %v9010_v1 = vld [vmem:[%s8824_s17 + $0x5c] sm:$0xf]  ;;  %7869 = vmatprep.subr.bf16.mxu1 %v8568_v8  ;;  %8009 = vmatprep.subr.bf16.mxu0 %v8569_v13 }
  0x36   : > { %2726 = vrot.lane.b32.xlu1 %v6665_v25, %s8785_s19  ;;  %v446_v34 = vsel %vm8863_vm5, %v441_v26, %v445_v7  ;;  %v8954_v35 = vrot.slane %v497_v2, 5  ;;  %v501_v36 = vshrl.u32 %v8928_v12, 16  ;;  %v507_v37 = vshll.u32 %v8938_v23, 16  ;;  %v8991_v7 = vld [vmem:[%s8824_s17 + $0x58] sm:$0xf]  ;;  %8010 = vmatpush3.bf16.msra.mxu0 %v8569_v13 }
  0x37   : > { %v456_v39 = vsel %vm8863_vm5, %v451_v30, %v8908_v19  ;;  %v1948_v41 = vsel %vm8817_vm2, %v1946_v33, %v1947_v48  ;;  %v511_v42 = vshrl.u32 %v8938_v23, 16  ;;  %v517_v43 = vshll.u32 %v8946_v29, 16  ;;  %v9022_v30 = vld [vmem:[%s8824_s17 + $0x50] sm:$0xf] }
  0x38   : > { %v6664_v15 = vcombine.low %v446_v34, %v456_v39  ;;  %v6728_v45 = vcombine.low %v1945_v32, %v1948_v41  ;;  %v503_v46 = vrot.slane %v501_v36, 4  ;;  %v509_v28 = vrot.slane %v507_v37, 5  ;;  %7870 = vmatpush3.bf16.msra.mxu1 %v8568_v8  ;;  %v193_v36 = vld [vmem:[%s8824_s17 + $0x54] sm:$0xf] }
  0x39   : > { %v513_v47 = vrot.slane %v511_v42, 4  ;;  %v519_v49 = vrot.slane %v517_v43, 5  ;;  %v478_v50 = vshrl.u32 %v8959_v38, 16  ;;  %v481_v19 = vshll.u32 %v8959_v38, 16 }
  0x3a   : > { %2724 = vrot.lane.b32.xlu0 %v6664_v15, %s8785_s19  ;;  %3046 = vrot.lane.b32.xlu1 %v6729_v31, %s8784_s18  ;;  %v504_v51 = vor.u32 %v503_v46, %v8954_v35  ;;  %v487_v52 = vshll.u32 %v188_v44, 16  ;;  %v491_v53 = vshrl.u32 %v188_v44, 16  ;;  %v1960_v54 = vrot.slane %v8928_v12, 5  ;;  %v8570_v15 = vld [vmem:[%s12090_s1 + $0x48] sm:$0xff]  }
  0x3b   : > { %v514_v56 = vor.u32 %v513_v47, %v509_v28  ;;  %v480_v57 = vrot.slane %v478_v50, 4  ;;  %v483_v58 = vrot.slane %v481_v19, 5  ;;  %v1963_v59 = vrot.slane %v8938_v23, 5  ;;  %7871 = vmatprep.subr.bf16.mxu1 %v8570_v15 }
  0x3c   : > { %v505_v61 = vrot.slane %v504_v51, 4  ;;  %v489_v62 = vrot.slane %v487_v52, 5  ;;  %v493_v63 = vrot.slane %v491_v53, 4  ;;  %v1962_v48 = vrot.slane %v1960_v54, 4  ;;  %v9049_v53 = vld [vmem:[%s8824_s17 + $0x6c] sm:$0xf]  ;;  %7872 = vmatpush3.bf16.msra.mxu1 %v8570_v15 }
  0x3d   : > { %v515_v3 = vrot.slane %v514_v56, 4  ;;  %v484_v4 = vor.u32 %v483_v58, %v480_v57  ;;  %v1965_v5 = vrot.slane %v1963_v59, 4  ;;  %v1966_v6 = vrot.slane %v8946_v29, 5 }
  0x3e   : > { %3044 = vrot.lane.b32.xlu0 %v6728_v45, %s8784_s18  ;;  %v510_v9 = vsel %vm8863_vm5, %v505_v61, %v509_v28  ;;  %v494_v10 = vor.u32 %v493_v63, %v489_v62  ;;  %v1964_v11 = vsel %vm8817_vm2, %v1962_v48, %v1963_v59  ;;  %v6567_v12 = vrot.slane %v8959_v38, 9 }
  0x3f   : > { %v520_v14 = vsel %vm8863_vm5, %v515_v3, %v519_v49  ;;  %v485_v16 = vrot.slane %v484_v4, 4  ;;  %v1967_v18 = vsel %vm8817_vm2, %v1965_v5, %v1966_v6  ;;  %v1957_v20 = vrot.slane %v188_v44, 5  ;;  %v8571_v49 = vld [vmem:[%s12090_s1 + $0x18] sm:$0xff]   ;;  %v8574_v5 = vld [vmem:[%s12090_s1 + $0x50] sm:$0xff]   ;;  %v8575_v6 = vld [vmem:[%s12090_s1 + $0x20] sm:$0xff]  }
  0x40   : > { %v6667_v21 = vcombine.low %v510_v9, %v520_v14  ;;  %v495_v22 = vrot.slane %v494_v10, 4  ;;  %v6731_v23 = vcombine.low %v1964_v11, %v1967_v18  ;;  %v541_v25 = vshll.u32 %v8991_v7, 16  ;;  %8011 = vmatprep.subr.bf16.mxu0 %v8571_v49  ;;  %v9073_v14 = vld [vmem:[%s8824_s17 + $0x74] sm:$0x1]  ;;  %7873 = vmatprep.subr.bf16.mxu1 %v8574_v5 }
  0x41   : > { %v490_v26 = vsel %vm8863_vm5, %v485_v16, %v489_v62  ;;  %v1958_v27 = vsel %vm8817_vm2, %v6567_v12, %v1957_v20  ;;  %v1959_v29 = vrot.slane %v1957_v20, 4  ;;  %v545_v2 = vshrl.u32 %v8991_v7, 16  ;;  %v9054_v62 = vld [vmem:[%s8824_s17 + $0x70] sm:$0xf]  ;;  %8012 = vmatpush3.bf16.msra.mxu0 %v8571_v49  ;;  %7874 = vmatpush3.bf16.msra.mxu1 %v8574_v5 }
  0x42   : > { %2730 = vrot.lane.b32.xlu1 %v6667_v21, %s8785_s19  ;;  %v500_v31 = vsel %vm8863_vm5, %v495_v22, %v8954_v35  ;;  %v9028_v32 = vrot.slane %v541_v25, 5  ;;  %v551_v33 = vshll.u32 %v9010_v1, 16  ;;  %v555_v34 = vshrl.u32 %v9010_v1, 16  ;;  %8013 = vmatprep.subr.bf16.mxu0 %v8575_v6  ;;  %v9079_v22 = vld [vmem:[%s8824_s17 + $0x64] sm:$0xf] }
  0x43   : > { %v6666_v37 = vcombine.low %v490_v26, %v500_v31  ;;  %v1961_v38 = vsel %vm8817_vm2, %v1959_v29, %v1960_v54  ;;  %v547_v39 = vrot.slane %v545_v2, 4  ;;  %v561_v41 = vshll.u32 %v9013_v24, 16 }
  0x44   : > { %v6730_v42 = vcombine.low %v1958_v27, %v1961_v38  ;;  %v553_v43 = vrot.slane %v551_v33, 5  ;;  %v557_v44 = vrot.slane %v555_v34, 4  ;;  %v522_v35 = vshrl.u32 %v9022_v30, 16  ;;  %v198_v27 = vld [vmem:[%s8824_s17 + $0x68] sm:$0xf]  ;;  %v8578_v38 = vld [vmem:[%s12090_s1 + $0x58] sm:$0xff]  }
  0x45   : > { %2728 = vrot.lane.b32.xlu0 %v6666_v37, %s8785_s19  ;;  %v548_v45 = vor.u32 %v547_v39, %v9028_v32  ;;  %v563_v46 = vrot.slane %v561_v41, 5  ;;  %v525_v28 = vshll.u32 %v9022_v30, 16  ;;  %v531_v47 = vshll.u32 %v193_v36, 16  ;;  %8014 = vmatpush3.bf16.msra.mxu0 %v8575_v6  ;;  %v8579_v39 = vld [vmem:[%s12090_s1 + $0x28] sm:$0xff]   ;;  %v202_v6 = vld [vmem:[%s8824_s17 + $0x78] sm:$0xf] }
  0x46   : > { %3050 = vrot.lane.b32.xlu1 %v6731_v23, %s8784_s18  ;;  %v558_v50 = vor.u32 %v557_v44, %v553_v43  ;;  %v524_v19 = vrot.slane %v522_v35, 4  ;;  %v535_v51 = vshrl.u32 %v193_v36, 16  ;;  %v1973_v52 = vrot.slane %v8991_v7, 5  ;;  %7875 = vmatprep.subr.bf16.mxu1 %v8578_v38 }
  0x47   : > { %v549_v54 = vrot.slane %v548_v45, 4  ;;  %v527_v55 = vrot.slane %v525_v28, 5  ;;  %v533_v56 = vrot.slane %v531_v47, 5  ;;  %v1976_v57 = vrot.slane %v9010_v1, 5  ;;  %8015 = vmatprep.subr.bf16.mxu0 %v8579_v39  ;;  %7876 = vmatpush3.bf16.msra.mxu1 %v8578_v38 }
  0x48   : > { %v559_v58 = vrot.slane %v558_v50, 4  ;;  %v537_v59 = vrot.slane %v535_v51, 4  ;;  %v1975_v60 = vrot.slane %v1973_v52, 4  ;;  %v1979_v61 = vrot.slane %v9013_v24, 5  ;;  %8285 = vmatprep.subr.bf16.mxu1 %v8964_v17 }
  0x49   : > { %3048 = vrot.lane.b32.xlu0 %v6730_v42, %s8784_s18  ;;  %v554_v63 = vsel %vm8863_vm5, %v549_v54, %v553_v43  ;;  %v528_v48 = vor.u32 %v527_v55, %v524_v19  ;;  %v1978_v3 = vrot.slane %v1976_v57, 4  ;;  %v6568_v4 = vrot.slane %v9022_v30, 9  ;;  %8016 = vmatpush3.bf16.msra.mxu0 %v8579_v39 }
  0x4a   : > { %v564_v7 = vsel %vm8863_vm5, %v559_v58, %v563_v46  ;;  %v538_v8 = vor.u32 %v537_v59, %v533_v56  ;;  %v1977_v9 = vsel %vm8817_vm2, %v1975_v60, %v1976_v57  ;;  %v1970_v10 = vrot.slane %v193_v36, 5  ;;  %v9111_v57 = vld [vmem:[%s8824_s17 + $0x80] sm:$0xf] }
  0x4b   : > { %v6669_v11 = vcombine.low %v554_v63, %v564_v7  ;;  %v529_v12 = vrot.slane %v528_v48, 4  ;;  %v1980_v13 = vsel %vm8817_vm2, %v1978_v3, %v1979_v61  ;;  %v585_v16 = vshll.u32 %v9049_v53, 16  ;;  %v8580_v58 = vld [vmem:[%s12090_s1 + $0x60] sm:$0xff]   ;;  %v206_v48 = vld [vmem:[%s8824_s17 + $0x88] sm:$0x1] }
  0x4c   : > { %v539_v18 = vrot.slane %v538_v8, 4  ;;  %v6733_v20 = vcombine.low %v1977_v9, %v1980_v13  ;;  %v1971_v1 = vsel %vm8817_vm2, %v6568_v4, %v1970_v10  ;;  %v1972_v21 = vrot.slane %v1970_v10, 4  ;;  %v205_v63 = vld [vmem:[%s8824_s17 + $0x84] sm:$0xf]  ;;  %8145 = vmatprep.subr.bf16.mxu0 %v8580_v58  ;;  %v211_v58 = vld [vmem:[%s8824_s17 + $0x9c] sm:$0x1] }
  0x4d   : > { %2734 = vrot.lane.b32.xlu1 %v6669_v11, %s8785_s19  ;;  %v534_v23 = vsel %vm8863_vm5, %v529_v12, %v533_v56  ;;  %v9084_v24 = vrot.slane %v585_v16, 5  ;;  %v589_v25 = vshrl.u32 %v9049_v53, 16  ;;  %v595_v26 = vshll.u32 %v9054_v62, 16  ;;  %v203_v11 = vld [vmem:[%s8824_s17 + $0x7c] sm:$0xf] }
  0x4e   : > { %v544_v29 = vsel %vm8863_vm5, %v539_v18, %v9028_v32  ;;  %v1974_v2 = vsel %vm8817_vm2, %v1972_v21, %v1973_v52  ;;  %v599_v30 = vshrl.u32 %v9054_v62, 16  ;;  %v605_v31 = vshll.u32 %v9073_v14, 16 }
  0x4f   : > { %v6668_v33 = vcombine.low %v534_v23, %v544_v29  ;;  %v6732_v34 = vcombine.low %v1971_v1, %v1974_v2  ;;  %v591_v36 = vrot.slane %v589_v25, 4  ;;  %v597_v37 = vrot.slane %v595_v26, 5 }
  0x50   : > { %v601_v32 = vrot.slane %v599_v30, 4  ;;  %v607_v41 = vrot.slane %v605_v31, 5  ;;  %v566_v42 = vshrl.u32 %v9079_v22, 16  ;;  %v569_v43 = vshll.u32 %v9079_v22, 16 }
  0x51   : > { %2732 = vrot.lane.b32.xlu0 %v6668_v33, %s8785_s19  ;;  %3054 = vrot.lane.b32.xlu1 %v6733_v20, %s8784_s18  ;;  %v592_v44 = vor.u32 %v591_v36, %v9084_v24  ;;  %v575_v35 = vshll.u32 %v198_v27, 16  ;;  %v579_v15 = vshrl.u32 %v198_v27, 16  ;;  %v1986_v45 = vrot.slane %v9049_v53, 5 }
  0x52   : > { %v602_v46 = vor.u32 %v601_v32, %v597_v37  ;;  %v568_v28 = vrot.slane %v566_v42, 4  ;;  %v571_v47 = vrot.slane %v569_v43, 5  ;;  %v1989_v49 = vrot.slane %v9054_v62, 5 }
  0x53   : > { %v593_v50 = vrot.slane %v592_v44, 4  ;;  %v577_v19 = vrot.slane %v575_v35, 5  ;;  %v581_v51 = vrot.slane %v579_v15, 4  ;;  %v1988_v52 = vrot.slane %v1986_v45, 4 }
  0x54   : > { %v603_v54 = vrot.slane %v602_v46, 4  ;;  %v572_v55 = vor.u32 %v571_v47, %v568_v28  ;;  %v1991_v56 = vrot.slane %v1989_v49, 4  ;;  %v1992_v53 = vrot.slane %v9073_v14, 5  ;;  %v9147_v46 = vld [vmem:[%s8824_s17 + $0x94] sm:$0xf] }
  0x55   : > { %3052 = vrot.lane.b32.xlu0 %v6732_v34, %s8784_s18  ;;  %v598_v59 = vsel %vm8863_vm5, %v593_v50, %v597_v37  ;;  %v582_v60 = vor.u32 %v581_v51, %v577_v19  ;;  %v1990_v61 = vsel %vm8817_vm2, %v1988_v52, %v1989_v49  ;;  %v6569_v62 = vrot.slane %v9079_v22, 9 }
  0x56   : > { %v608_v17 = vsel %vm8863_vm5, %v603_v54, %v607_v41  ;;  %v573_v3 = vrot.slane %v572_v55, 4  ;;  %v1993_v4 = vsel %vm8817_vm2, %v1991_v56, %v1992_v53  ;;  %v1983_v5 = vrot.slane %v198_v27, 5  ;;  %v210_v55 = vld [vmem:[%s8824_s17 + $0x98] sm:$0xf] }
  0x57   : > { %v6671_v7 = vcombine.low %v598_v59, %v608_v17  ;;  %v583_v8 = vrot.slane %v582_v60, 4  ;;  %v6735_v9 = vcombine.low %v1990_v61, %v1993_v4  ;;  %v629_v10 = vshll.u32 %v9111_v57, 16 }
  0x58   : > { %v578_v12 = vsel %vm8863_vm5, %v573_v3, %v577_v19  ;;  %v1984_v13 = vsel %vm8817_vm2, %v6569_v62, %v1983_v5  ;;  %v1985_v14 = vrot.slane %v1983_v5, 4  ;;  %v633_v16 = vshrl.u32 %v9111_v57, 16  ;;  %v207_v5 = vld [vmem:[%s8824_s17 + $0x8c] sm:$0xf] }
  0x59   : > { %2738 = vrot.lane.b32.xlu1 %v6671_v7, %s8785_s19  ;;  %v588_v18 = vsel %vm8863_vm5, %v583_v8, %v9084_v24  ;;  %v631_v20 = vrot.slane %v629_v10, 5  ;;  %v639_v1 = vshll.u32 %v205_v63, 16  ;;  %v643_v21 = vshrl.u32 %v205_v63, 16  ;;  %v208_v10 = vld [vmem:[%s8824_s17 + $0x90] sm:$0xf] }
  0x5a   : > { %v6670_v22 = vcombine.low %v578_v12, %v588_v18  ;;  %v1987_v23 = vsel %vm8817_vm2, %v1985_v14, %v1986_v45  ;;  %v635_v25 = vrot.slane %v633_v16, 4  ;;  %v649_v26 = vshll.u32 %v206_v48, 16 }
  0x5b   : > { %v6734_v27 = vcombine.low %v1984_v13, %v1987_v23  ;;  %v641_v29 = vrot.slane %v639_v1, 5  ;;  %v645_v2 = vrot.slane %v643_v21, 4  ;;  %v610_v30 = vshrl.u32 %v202_v6, 16 }
  0x5c   : > { %2736 = vrot.lane.b32.xlu0 %v6670_v22, %s8785_s19  ;;  %v636_v31 = vor.u32 %v635_v25, %v631_v20  ;;  %v651_v33 = vrot.slane %v649_v26, 5  ;;  %v613_v34 = vshll.u32 %v202_v6, 16  ;;  %v619_v24 = vshll.u32 %v203_v11, 16 }
  0x5d   : > { %3058 = vrot.lane.b32.xlu1 %v6735_v9, %s8784_s18  ;;  %v646_v36 = vor.u32 %v645_v2, %v641_v29  ;;  %v612_v37 = vrot.slane %v610_v30, 4  ;;  %v623_v38 = vshrl.u32 %v203_v11, 16  ;;  %v1999_v39 = vrot.slane %v9111_v57, 5 }
  0x5e   : > { %v637_v32 = vrot.slane %v636_v31, 4  ;;  %v615_v41 = vrot.slane %v613_v34, 5  ;;  %v621_v42 = vrot.slane %v619_v24, 5  ;;  %v2002_v43 = vrot.slane %v205_v63, 5 }
  0x5f   : > { %v647_v44 = vrot.slane %v646_v36, 4  ;;  %v625_v35 = vrot.slane %v623_v38, 4  ;;  %v2001_v15 = vrot.slane %v1999_v39, 4  ;;  %v2005_v45 = vrot.slane %v206_v48, 5 }
  0x60   : > { %3056 = vrot.lane.b32.xlu0 %v6734_v27, %s8784_s18  ;;  %v642_v28 = vsel %vm8863_vm5, %v637_v32, %v641_v29  ;;  %v616_v47 = vor.u32 %v615_v41, %v612_v37  ;;  %v2004_v49 = vrot.slane %v2002_v43, 4  ;;  %v6570_v50 = vrot.slane %v202_v6, 9 }
  0x61   : > { %v652_v19 = vsel %vm8863_vm5, %v647_v44, %v651_v33  ;;  %v626_v51 = vor.u32 %v625_v35, %v621_v42  ;;  %v2003_v52 = vsel %vm8817_vm2, %v2001_v15, %v2002_v43  ;;  %v1996_v54 = vrot.slane %v203_v11, 5 }
  0x62   : > { %v6673_v56 = vcombine.low %v642_v28, %v652_v19  ;;  %v617_v53 = vrot.slane %v616_v47, 4  ;;  %v2006_v57 = vsel %vm8817_vm2, %v2004_v49, %v2005_v45  ;;  %v673_v59 = vshll.u32 %v9147_v46, 16 }
  0x63   : > { %v627_v60 = vrot.slane %v626_v51, 4  ;;  %v6737_v61 = vcombine.low %v2003_v52, %v2006_v57  ;;  %v1997_v62 = vsel %vm8817_vm2, %v6570_v50, %v1996_v54  ;;  %v1998_v63 = vrot.slane %v1996_v54, 4  ;;  %v216_v50 = vld [vmem:[%s8824_s17 + $0xb0] sm:$0x1] }
  0x64   : > { %2742 = vrot.lane.b32.xlu1 %v6673_v56, %s8785_s19  ;;  %v622_v48 = vsel %vm8863_vm5, %v617_v53, %v621_v42  ;;  %v9166_v17 = vrot.slane %v673_v59, 5  ;;  %v677_v3 = vshrl.u32 %v9147_v46, 16  ;;  %v683_v4 = vshll.u32 %v210_v55, 16  ;;  %v212_v56 = vld [vmem:[%s8824_s17 + $0xa0] sm:$0xf] }
  0x65   : > { %v632_v6 = vsel %vm8863_vm5, %v627_v60, %v631_v20  ;;  %v2000_v7 = vsel %vm8817_vm2, %v1998_v63, %v1999_v39  ;;  %v687_v8 = vshrl.u32 %v210_v55, 16  ;;  %v693_v9 = vshll.u32 %v211_v58, 16  ;;  %v9180_v39 = vld [vmem:[%s8824_s17 + $0xa8] sm:$0xf]  ;;  %v213_v60 = vld [vmem:[%s8824_s17 + $0xa4] sm:$0xf] }
  0x66   : > { %v6672_v11 = vcombine.low %v622_v48, %v632_v6  ;;  %v6736_v12 = vcombine.low %v1997_v62, %v2000_v7  ;;  %v679_v13 = vrot.slane %v677_v3, 4  ;;  %v685_v14 = vrot.slane %v683_v4, 5 }
  0x67   : > { %v689_v16 = vrot.slane %v687_v8, 4  ;;  %v695_v18 = vrot.slane %v693_v9, 5  ;;  %v654_v1 = vshrl.u32 %v207_v5, 16  ;;  %v657_v21 = vshll.u32 %v207_v5, 16 }
  0x68   : > { %2740 = vrot.lane.b32.xlu0 %v6672_v11, %s8785_s19  ;;  %3062 = vrot.lane.b32.xlu1 %v6737_v61, %s8784_s18  ;;  %v680_v20 = vor.u32 %v679_v13, %v9166_v17  ;;  %v663_v22 = vshll.u32 %v208_v10, 16  ;;  %v667_v23 = vshrl.u32 %v208_v10, 16  ;;  %v2012_v25 = vrot.slane %v9147_v46, 5  ;;  %v215_v46 = vld [vmem:[%s8824_s17 + $0xac] sm:$0xf] }
  0x69   : > { %v690_v26 = vor.u32 %v689_v16, %v685_v14  ;;  %v656_v27 = vrot.slane %v654_v1, 4  ;;  %v659_v29 = vrot.slane %v657_v21, 5  ;;  %v2015_v2 = vrot.slane %v210_v55, 5 }
  0x6a   : > { %v681_v30 = vrot.slane %v680_v20, 4  ;;  %v665_v31 = vrot.slane %v663_v22, 5  ;;  %v669_v33 = vrot.slane %v667_v23, 4  ;;  %v2014_v34 = vrot.slane %v2012_v25, 4 }
  0x6b   : > { %v691_v24 = vrot.slane %v690_v26, 4  ;;  %v660_v36 = vor.u32 %v659_v29, %v656_v27  ;;  %v2017_v37 = vrot.slane %v2015_v2, 4  ;;  %v2018_v38 = vrot.slane %v211_v58, 5 }
  0x6c   : > { %3060 = vrot.lane.b32.xlu0 %v6736_v12, %s8784_s18  ;;  %v686_v32 = vsel %vm8863_vm5, %v681_v30, %v685_v14  ;;  %v670_v41 = vor.u32 %v669_v33, %v665_v31  ;;  %v2016_v42 = vsel %vm8817_vm2, %v2014_v34, %v2015_v2  ;;  %v6571_v43 = vrot.slane %v207_v5, 9 }
  0x6d   : > { %v696_v44 = vsel %vm8863_vm5, %v691_v24, %v695_v18  ;;  %v661_v35 = vrot.slane %v660_v36, 4  ;;  %v2019_v15 = vsel %vm8817_vm2, %v2017_v37, %v2018_v38  ;;  %v2009_v45 = vrot.slane %v208_v10, 5  ;;  %v220_v24 = vld [vmem:[%s8824_s17 + $0xc0] sm:$0xf] }
  0x6e   : > { %v6675_v28 = vcombine.low %v686_v32, %v696_v44  ;;  %v671_v47 = vrot.slane %v670_v41, 4  ;;  %v6739_v49 = vcombine.low %v2016_v42, %v2019_v15  ;;  %v717_v19 = vshll.u32 %v9180_v39, 16 }
  0x6f   : > { %v666_v51 = vsel %vm8863_vm5, %v661_v35, %v665_v31  ;;  %v2010_v52 = vsel %vm8817_vm2, %v6571_v43, %v2009_v45  ;;  %v2011_v54 = vrot.slane %v2009_v45, 4  ;;  %v721_v55 = vshrl.u32 %v9180_v39, 16 }
  0x70   : > { %2746 = vrot.lane.b32.xlu1 %v6675_v28, %s8785_s19  ;;  %v676_v53 = vsel %vm8863_vm5, %v671_v47, %v9166_v17  ;;  %v719_v57 = vrot.slane %v717_v19, 5  ;;  %v727_v58 = vshll.u32 %v215_v46, 16  ;;  %v731_v59 = vshrl.u32 %v215_v46, 16  ;;  %v217_v28 = vld [vmem:[%s8824_s17 + $0xb4] sm:$0xf] }
  0x71   : > { %v6674_v61 = vcombine.low %v666_v51, %v676_v53  ;;  %v2013_v62 = vsel %vm8817_vm2, %v2011_v54, %v2012_v25  ;;  %v723_v63 = vrot.slane %v721_v55, 4  ;;  %v737_v48 = vshll.u32 %v216_v50, 16  ;;  %v9211_v25 = vld [vmem:[%s8824_s17 + $0xbc] sm:$0xf]  ;;  %v218_v51 = vld [vmem:[%s8824_s17 + $0xb8] sm:$0xf] }
  0x72   : > { %v6738_v3 = vcombine.low %v2010_v52, %v2013_v62  ;;  %v729_v4 = vrot.slane %v727_v58, 5  ;;  %v733_v5 = vrot.slane %v731_v59, 4  ;;  %v698_v6 = vshrl.u32 %v212_v56, 16 }
  0x73   : > { %2744 = vrot.lane.b32.xlu0 %v6674_v61, %s8785_s19  ;;  %v724_v7 = vor.u32 %v723_v63, %v719_v57  ;;  %v739_v8 = vrot.slane %v737_v48, 5  ;;  %v701_v17 = vshll.u32 %v212_v56, 16  ;;  %v707_v9 = vshll.u32 %v213_v60, 16 }
  0x74   : > { %3066 = vrot.lane.b32.xlu1 %v6739_v49, %s8784_s18  ;;  %v734_v10 = vor.u32 %v733_v5, %v729_v4  ;;  %v700_v11 = vrot.slane %v698_v6, 4  ;;  %v711_v12 = vshrl.u32 %v213_v60, 16  ;;  %v2025_v13 = vrot.slane %v9180_v39, 5  ;;  %v221_v39 = vld [vmem:[%s8824_s17 + $0xc4] sm:$0x1] }
  0x75   : > { %v725_v14 = vrot.slane %v724_v7, 4  ;;  %v703_v16 = vrot.slane %v701_v17, 5  ;;  %v709_v18 = vrot.slane %v707_v9, 5  ;;  %v2028_v1 = vrot.slane %v215_v46, 5 }
  0x76   : > { %v735_v21 = vrot.slane %v734_v10, 4  ;;  %v713_v20 = vrot.slane %v711_v12, 4  ;;  %v2027_v22 = vrot.slane %v2025_v13, 4  ;;  %v2031_v23 = vrot.slane %v216_v50, 5 }
  0x77   : > { %3064 = vrot.lane.b32.xlu0 %v6738_v3, %s8784_s18  ;;  %v730_v26 = vsel %vm8863_vm5, %v725_v14, %v729_v4  ;;  %v704_v27 = vor.u32 %v703_v16, %v700_v11  ;;  %v2030_v29 = vrot.slane %v2028_v1, 4  ;;  %v6572_v2 = vrot.slane %v212_v56, 9 }
  0x78   : > { %v740_v30 = vsel %vm8863_vm5, %v735_v21, %v739_v8  ;;  %v714_v31 = vor.u32 %v713_v20, %v709_v18  ;;  %v2029_v33 = vsel %vm8817_vm2, %v2027_v22, %v2028_v1  ;;  %v2022_v34 = vrot.slane %v213_v60, 5 }
  0x79   : > { %v6677_v36 = vcombine.low %v730_v26, %v740_v30  ;;  %v705_v37 = vrot.slane %v704_v27, 4  ;;  %v2032_v38 = vsel %vm8817_vm2, %v2030_v29, %v2031_v23  ;;  %v761_v32 = vshll.u32 %v9211_v25, 16 }
  0x7a   : > { %v715_v41 = vrot.slane %v714_v31, 4  ;;  %v6741_v42 = vcombine.low %v2029_v33, %v2032_v38  ;;  %v2023_v43 = vsel %vm8817_vm2, %v6572_v2, %v2022_v34  ;;  %v2024_v44 = vrot.slane %v2022_v34, 4  ;;  %v226_v2 = vld [vmem:[%s8824_s17 + $0xd8] sm:$0x1] }
  0x7b   : > { %2750 = vrot.lane.b32.xlu1 %v6677_v36, %s8785_s19  ;;  %v710_v35 = vsel %vm8863_vm5, %v705_v37, %v709_v18  ;;  %v9230_v15 = vrot.slane %v761_v32, 5  ;;  %v765_v45 = vshrl.u32 %v9211_v25, 16  ;;  %v771_v46 = vshll.u32 %v220_v24, 16  ;;  %v222_v36 = vld [vmem:[%s8824_s17 + $0xc8] sm:$0xf] }
  0x7c   : > { %v720_v47 = vsel %vm8863_vm5, %v715_v41, %v719_v57  ;;  %v2026_v49 = vsel %vm8817_vm2, %v2024_v44, %v2025_v13  ;;  %v775_v50 = vshrl.u32 %v220_v24, 16  ;;  %v781_v19 = vshll.u32 %v221_v39, 16  ;;  %v9244_v13 = vld [vmem:[%s8824_s17 + $0xd0] sm:$0xf]  ;;  %v223_v41 = vld [vmem:[%s8824_s17 + $0xcc] sm:$0xf] }
  0x7d   : > { %v6676_v52 = vcombine.low %v710_v35, %v720_v47  ;;  %v6740_v54 = vcombine.low %v2023_v43, %v2026_v49  ;;  %v767_v55 = vrot.slane %v765_v45, 4  ;;  %v773_v56 = vrot.slane %v771_v46, 5 }
  0x7e   : > { %v777_v53 = vrot.slane %v775_v50, 4  ;;  %v783_v58 = vrot.slane %v781_v19, 5  ;;  %v742_v59 = vshrl.u32 %v217_v28, 16  ;;  %v745_v60 = vshll.u32 %v217_v28, 16 }
  0x7f   : > { %2748 = vrot.lane.b32.xlu0 %v6676_v52, %s8785_s19  ;;  %3070 = vrot.lane.b32.xlu1 %v6741_v42, %s8784_s18  ;;  %v768_v57 = vor.u32 %v767_v55, %v9230_v15  ;;  %v751_v61 = vshll.u32 %v218_v51, 16  ;;  %v755_v62 = vshrl.u32 %v218_v51, 16  ;;  %v2038_v63 = vrot.slane %v9211_v25, 5  ;;  %v225_v25 = vld [vmem:[%s8824_s17 + $0xd4] sm:$0xf] }
  0x80   : > { %v778_v48 = vor.u32 %v777_v53, %v773_v56  ;;  %v744_v3 = vrot.slane %v742_v59, 4  ;;  %v747_v4 = vrot.slane %v745_v60, 5  ;;  %v2041_v5 = vrot.slane %v220_v24, 5 }
  0x81   : > { %v769_v6 = vrot.slane %v768_v57, 4  ;;  %v753_v7 = vrot.slane %v751_v61, 5  ;;  %v757_v8 = vrot.slane %v755_v62, 4  ;;  %v2040_v17 = vrot.slane %v2038_v63, 4 }
  0x82   : > { %v779_v9 = vrot.slane %v778_v48, 4  ;;  %v748_v10 = vor.u32 %v747_v4, %v744_v3  ;;  %v2043_v11 = vrot.slane %v2041_v5, 4  ;;  %v2044_v12 = vrot.slane %v221_v39, 5 }
  0x83   : > { %3068 = vrot.lane.b32.xlu0 %v6740_v54, %s8784_s18  ;;  %v774_v14 = vsel %vm8863_vm5, %v769_v6, %v773_v56  ;;  %v758_v16 = vor.u32 %v757_v8, %v753_v7  ;;  %v2042_v18 = vsel %vm8817_vm2, %v2040_v17, %v2041_v5  ;;  %v6573_v1 = vrot.slane %v217_v28, 9 }
  0x84   : > { %v784_v21 = vsel %vm8863_vm5, %v779_v9, %v783_v58  ;;  %v749_v20 = vrot.slane %v748_v10, 4  ;;  %v2045_v22 = vsel %vm8817_vm2, %v2043_v11, %v2044_v12  ;;  %v2035_v23 = vrot.slane %v218_v51, 5  ;;  %v230_v9 = vld [vmem:[%s8824_s17 + $0xe8] sm:$0xf] }
  0x85   : > { %v6679_v26 = vcombine.low %v774_v14, %v784_v21  ;;  %v759_v27 = vrot.slane %v758_v16, 4  ;;  %v6743_v29 = vcombine.low %v2042_v18, %v2045_v22  ;;  %v805_v30 = vshll.u32 %v9244_v13, 16 }
  0x86   : > { %v754_v31 = vsel %vm8863_vm5, %v749_v20, %v753_v7  ;;  %v2036_v33 = vsel %vm8817_vm2, %v6573_v1, %v2035_v23  ;;  %v2037_v34 = vrot.slane %v2035_v23, 4  ;;  %v809_v24 = vshrl.u32 %v9244_v13, 16 }
  0x87   : > { %2754 = vrot.lane.b32.xlu1 %v6679_v26, %s8785_s19  ;;  %v764_v37 = vsel %vm8863_vm5, %v759_v27, %v9230_v15  ;;  %v807_v38 = vrot.slane %v805_v30, 5  ;;  %v815_v39 = vshll.u32 %v225_v25, 16  ;;  %v819_v32 = vshrl.u32 %v225_v25, 16  ;;  %v227_v26 = vld [vmem:[%s8824_s17 + $0xdc] sm:$0xf] }
  0x88   : > { %v6678_v42 = vcombine.low %v754_v31, %v764_v37  ;;  %v2039_v43 = vsel %vm8817_vm2, %v2037_v34, %v2038_v63  ;;  %v811_v44 = vrot.slane %v809_v24, 4  ;;  %v825_v35 = vshll.u32 %v226_v2, 16  ;;  %v9275_v63 = vld [vmem:[%s8824_s17 + $0xe4] sm:$0xf]  ;;  %v228_v31 = vld [vmem:[%s8824_s17 + $0xe0] sm:$0xf] }
  0x89   : > { %v6742_v45 = vcombine.low %v2036_v33, %v2039_v43  ;;  %v817_v46 = vrot.slane %v815_v39, 5  ;;  %v821_v28 = vrot.slane %v819_v32, 4  ;;  %v786_v47 = vshrl.u32 %v222_v36, 16 }
  0x8a   : > { %2752 = vrot.lane.b32.xlu0 %v6678_v42, %s8785_s19  ;;  %v812_v49 = vor.u32 %v811_v44, %v807_v38  ;;  %v827_v50 = vrot.slane %v825_v35, 5  ;;  %v789_v15 = vshll.u32 %v222_v36, 16  ;;  %v795_v19 = vshll.u32 %v223_v41, 16 }
  0x8b   : > { %3074 = vrot.lane.b32.xlu1 %v6743_v29, %s8784_s18  ;;  %v822_v51 = vor.u32 %v821_v28, %v817_v46  ;;  %v788_v52 = vrot.slane %v786_v47, 4  ;;  %v799_v54 = vshrl.u32 %v223_v41, 16  ;;  %v2051_v55 = vrot.slane %v9244_v13, 5  ;;  %v231_v13 = vld [vmem:[%s8824_s17 + $0xec] sm:$0x1] }
  0x8c   : > { %v813_v56 = vrot.slane %v812_v49, 4  ;;  %v791_v53 = vrot.slane %v789_v15, 5  ;;  %v797_v58 = vrot.slane %v795_v19, 5  ;;  %v2054_v59 = vrot.slane %v225_v25, 5 }
  0x8d   : > { %v823_v60 = vrot.slane %v822_v51, 4  ;;  %v801_v57 = vrot.slane %v799_v54, 4  ;;  %v2053_v61 = vrot.slane %v2051_v55, 4  ;;  %v2057_v62 = vrot.slane %v226_v2, 5 }
  0x8e   : > { %3072 = vrot.lane.b32.xlu0 %v6742_v45, %s8784_s18  ;;  %v818_v48 = vsel %vm8863_vm5, %v813_v56, %v817_v46  ;;  %v792_v3 = vor.u32 %v791_v53, %v788_v52  ;;  %v2056_v4 = vrot.slane %v2054_v59, 4  ;;  %v6574_v5 = vrot.slane %v222_v36, 9 }
  0x8f   : > { %v828_v6 = vsel %vm8863_vm5, %v823_v60, %v827_v50  ;;  %v802_v7 = vor.u32 %v801_v57, %v797_v58  ;;  %v2055_v8 = vsel %vm8817_vm2, %v2053_v61, %v2054_v59  ;;  %v2048_v17 = vrot.slane %v223_v41, 5 }
  0x90   : > { %v6681_v10 = vcombine.low %v818_v48, %v828_v6  ;;  %v793_v11 = vrot.slane %v792_v3, 4  ;;  %v2058_v12 = vsel %vm8817_vm2, %v2056_v4, %v2057_v62  ;;  %v849_v14 = vshll.u32 %v9275_v63, 16  ;;  %v9320_v48 = vpop.permute.xlu1 %3040  ;;  %v236_v6 = vld [vmem:[%s8824_s17 + $0x100] sm:$0x1] }
  0x91   : > { %v803_v16 = vrot.slane %v802_v7, 4  ;;  %v6745_v18 = vcombine.low %v2055_v8, %v2058_v12  ;;  %v2049_v1 = vsel %vm8817_vm2, %v6574_v5, %v2048_v17  ;;  %v2050_v21 = vrot.slane %v2048_v17, 4  ;;  %v9324_v8 = vpop.permute.xlu0 %3036  ;;  %v232_v12 = vld [vmem:[%s8824_s17 + $0xf0] sm:$0xf] }
  0x92   : > { %2758 = vrot.lane.b32.xlu1 %v6681_v10, %s8785_s19  ;;  %v798_v20 = vsel %vm8863_vm5, %v793_v11, %v797_v58  ;;  %v9294_v22 = vrot.slane %v849_v14, 5  ;;  %v853_v23 = vshrl.u32 %v9275_v63, 16  ;;  %v859_v25 = vshll.u32 %v230_v9, 16 }
  0x93   : > { %v808_v27 = vsel %vm8863_vm5, %v803_v16, %v807_v38  ;;  %v2052_v29 = vsel %vm8817_vm2, %v2050_v21, %v2051_v55  ;;  %v863_v2 = vshrl.u32 %v230_v9, 16  ;;  %v869_v30 = vshll.u32 %v231_v13, 16  ;;  %v9308_v55 = vld [vmem:[%s8824_s17 + $0xf8] sm:$0xf] }
  0x94   : > { %v6680_v33 = vcombine.low %v798_v20, %v808_v27  ;;  %v6744_v34 = vcombine.low %v2049_v1, %v2052_v29  ;;  %v855_v24 = vrot.slane %v853_v23, 4  ;;  %v861_v36 = vrot.slane %v859_v25, 5  ;;  %v233_v1 = vld [vmem:[%s8824_s17 + $0xf4] sm:$0xf] }
  0x95   : > { %v865_v37 = vrot.slane %v863_v2, 4  ;;  %v871_v39 = vrot.slane %v869_v30, 5  ;;  %v830_v32 = vshrl.u32 %v227_v26, 16  ;;  %v833_v41 = vshll.u32 %v227_v26, 16 }
  0x96   : > { %2756 = vrot.lane.b32.xlu0 %v6680_v33, %s8785_s19  ;;  %3078 = vrot.lane.b32.xlu1 %v6745_v18, %s8784_s18  ;;  %v856_v38 = vor.u32 %v855_v24, %v9294_v22  ;;  %v839_v42 = vshll.u32 %v228_v31, 16  ;;  %v843_v43 = vshrl.u32 %v228_v31, 16  ;;  %v2064_v44 = vrot.slane %v9275_v63, 5  ;;  %v235_v63 = vld [vmem:[%s8824_s17 + $0xfc] sm:$0xf] }
  0x97   : > { %v866_v35 = vor.u32 %v865_v37, %v861_v36  ;;  %v832_v45 = vrot.slane %v830_v32, 4  ;;  %v835_v46 = vrot.slane %v833_v41, 5  ;;  %v2067_v28 = vrot.slane %v230_v9, 5 }
  0x98   : > { %v857_v47 = vrot.slane %v856_v38, 4  ;;  %v841_v49 = vrot.slane %v839_v42, 5  ;;  %v845_v50 = vrot.slane %v843_v43, 4  ;;  %v2066_v15 = vrot.slane %v2064_v44, 4 }
  0x99   : > { %v867_v19 = vrot.slane %v866_v35, 4  ;;  %v836_v51 = vor.u32 %v835_v46, %v832_v45  ;;  %v2069_v52 = vrot.slane %v2067_v28, 4  ;;  %v2070_v54 = vrot.slane %v231_v13, 5  ;;  %v9347_v32 = vpop.permute.xlu0 %2716 }
  0x9a   : > { %3076 = vrot.lane.b32.xlu0 %v6744_v34, %s8784_s18  ;;  %v862_v56 = vsel %vm8863_vm5, %v857_v47, %v861_v36  ;;  %v846_v53 = vor.u32 %v845_v50, %v841_v49  ;;  %v2068_v58 = vsel %vm8817_vm2, %v2066_v15, %v2067_v28  ;;  %v6575_v59 = vrot.slane %v227_v26, 9  ;;  %v9343_v34 = vpop.permute.xlu1 %2718  ;;  %v9350_v28 = vld [vmem:[%s8824_s17 + $0x10c] sm:$0xf] }
  0x9b   : > { %v872_v60 = vsel %vm8863_vm5, %v867_v19, %v871_v39  ;;  %v837_v57 = vrot.slane %v836_v51, 4  ;;  %v2071_v61 = vsel %vm8817_vm2, %v2069_v52, %v2070_v54  ;;  %v2061_v62 = vrot.slane %v228_v31, 5 }
  0x9c   : > { %v6683_v3 = vcombine.low %v862_v56, %v872_v60  ;;  %v847_v4 = vrot.slane %v846_v53, 4  ;;  %v6747_v5 = vcombine.low %v2068_v58, %v2071_v61  ;;  %v893_v7 = vshll.u32 %v9308_v55, 16 }
  0x9d   : > { %v842_v17 = vsel %vm8863_vm5, %v837_v57, %v841_v49  ;;  %v2062_v9 = vsel %vm8817_vm2, %v6575_v59, %v2061_v62  ;;  %v2063_v10 = vrot.slane %v2061_v62, 4  ;;  %v897_v11 = vshrl.u32 %v9308_v55, 16  ;;  %v241_v59 = vld [vmem:[%s8824_s17 + $0x114] sm:$0x1] }
  0x9e   : > { %2762 = vrot.lane.b32.xlu1 %v6683_v3, %s8785_s19  ;;  %v852_v13 = vsel %vm8863_vm5, %v847_v4, %v9294_v22  ;;  %v9336_v14 = vrot.slane %v893_v7, 5  ;;  %v903_v16 = vshll.u32 %v235_v63, 16  ;;  %v907_v18 = vshrl.u32 %v235_v63, 16  ;;  %v9364_v57 = vpop.permute.xlu1 %2722 }
  0x9f   : > { %v6682_v21 = vcombine.low %v842_v17, %v852_v13  ;;  %v2065_v20 = vsel %vm8817_vm2, %v2063_v10, %v2064_v44  ;;  %v899_v23 = vrot.slane %v897_v11, 4  ;;  %v913_v25 = vshll.u32 %v236_v6, 16 }
  0xa0   : > { %v6746_v26 = vcombine.low %v2062_v9, %v2065_v20  ;;  %v905_v27 = vrot.slane %v903_v16, 5  ;;  %v909_v29 = vrot.slane %v907_v18, 4  ;;  %v874_v2 = vshrl.u32 %v232_v12, 16  ;;  %v237_v9 = vld [vmem:[%s8824_s17 + $0x104] sm:$0xf] }
  0xa1   : > { %2760 = vrot.lane.b32.xlu0 %v6682_v21, %s8785_s19  ;;  %v900_v30 = vor.u32 %v899_v23, %v9336_v14  ;;  %v915_v22 = vrot.slane %v913_v25, 5  ;;  %v877_v31 = vshll.u32 %v232_v12, 16  ;;  %v883_v33 = vshll.u32 %v233_v1, 16  ;;  %v9368_v4 = vpop.permute.xlu0 %2720  ;;  %v238_v16 = vld [vmem:[%s8824_s17 + $0x108] sm:$0xf] }
  0xa2   : > { %3082 = vrot.lane.b32.xlu1 %v6747_v5, %s8784_s18  ;;  %v910_v24 = vor.u32 %v909_v29, %v905_v27  ;;  %v876_v36 = vrot.slane %v874_v2, 4  ;;  %v887_v37 = vshrl.u32 %v233_v1, 16  ;;  %v2077_v39 = vrot.slane %v9308_v55, 5  ;;  %v240_v55 = vld [vmem:[%s8824_s17 + $0x110] sm:$0xf] }
  0xa3   : > { %v901_v41 = vrot.slane %v900_v30, 4  ;;  %v879_v38 = vrot.slane %v877_v31, 5  ;;  %v885_v42 = vrot.slane %v883_v33, 5  ;;  %v2080_v43 = vrot.slane %v235_v63, 5 }
  0xa4   : > { %v911_v44 = vrot.slane %v910_v24, 4  ;;  %v889_v35 = vrot.slane %v887_v37, 4  ;;  %v2079_v45 = vrot.slane %v2077_v39, 4  ;;  %v2083_v46 = vrot.slane %v236_v6, 5 }
  0xa5   : > { %3080 = vrot.lane.b32.xlu0 %v6746_v26, %s8784_s18  ;;  %v906_v47 = vsel %vm8863_vm5, %v901_v41, %v905_v27  ;;  %v880_v49 = vor.u32 %v879_v38, %v876_v36  ;;  %v2082_v50 = vrot.slane %v2080_v43, 4  ;;  %v6576_v15 = vrot.slane %v232_v12, 9  ;;  %v9389_v37 = vpop.permute.xlu0 %3038 }
  0xa6   : > { %v916_v19 = vsel %vm8863_vm5, %v911_v44, %v915_v22  ;;  %v890_v51 = vor.u32 %v889_v35, %v885_v42  ;;  %v2081_v52 = vsel %vm8817_vm2, %v2079_v45, %v2080_v43  ;;  %v2074_v54 = vrot.slane %v233_v1, 5  ;;  %v9387_v22 = vpop.permute.xlu1 %3042 }
  0xa7   : > { %v6685_v56 = vcombine.low %v906_v47, %v916_v19  ;;  %v881_v53 = vrot.slane %v880_v49, 4  ;;  %v2084_v58 = vsel %vm8817_vm2, %v2082_v50, %v2083_v46  ;;  %v937_v60 = vshll.u32 %v9350_v28, 16  ;;  %v9392_v46 = vld [vmem:[%s8824_s17 + $0x120] sm:$0xf] }
  0xa8   : > { %v891_v61 = vrot.slane %v890_v51, 4  ;;  %v6749_v62 = vcombine.low %v2081_v52, %v2084_v58  ;;  %v2075_v63 = vsel %vm8817_vm2, %v6576_v15, %v2074_v54  ;;  %v2076_v3 = vrot.slane %v2074_v54, 4  ;;  %v245_v54 = vld [vmem:[%s8824_s17 + $0x124] sm:$0xf]  ;;  %v246_v58 = vld [vmem:[%s8824_s17 + $0x128] sm:$0x1] }
  0xa9   : > { %2766 = vrot.lane.b32.xlu1 %v6685_v56, %s8785_s19  ;;  %v886_v5 = vsel %vm8863_vm5, %v881_v53, %v885_v42  ;;  %v9373_v6 = vrot.slane %v937_v60, 5  ;;  %v941_v7 = vshrl.u32 %v9350_v28, 16  ;;  %v947_v17 = vshll.u32 %v240_v55, 16 }
  0xaa   : > { %v896_v10 = vsel %vm8863_vm5, %v891_v61, %v9336_v14  ;;  %v2078_v11 = vsel %vm8817_vm2, %v2076_v3, %v2077_v39  ;;  %v951_v12 = vshrl.u32 %v240_v55, 16  ;;  %v957_v13 = vshll.u32 %v241_v59, 16  ;;  %v9406_v60 = vpop.permute.xlu1 %2726 }
  0xab   : > { %v6684_v18 = vcombine.low %v886_v5, %v896_v10  ;;  %v6748_v1 = vcombine.low %v2075_v63, %v2078_v11  ;;  %v943_v21 = vrot.slane %v941_v7, 4  ;;  %v949_v20 = vrot.slane %v947_v17, 5  ;;  %v242_v5 = vld [vmem:[%s8824_s17 + $0x118] sm:$0xf] }
  0xac   : > { %v953_v23 = vrot.slane %v951_v12, 4  ;;  %v959_v25 = vrot.slane %v957_v13, 5  ;;  %v918_v26 = vshrl.u32 %v237_v9, 16  ;;  %v921_v27 = vshll.u32 %v237_v9, 16  ;;  %v9414_v7 = vpop.permute.xlu0 %2724  ;;  %v243_v12 = vld [vmem:[%s8824_s17 + $0x11c] sm:$0xf] }
  0xad   : > { %2764 = vrot.lane.b32.xlu0 %v6684_v18, %s8785_s19  ;;  %3086 = vrot.lane.b32.xlu1 %v6749_v62, %s8784_s18  ;;  %v944_v14 = vor.u32 %v943_v21, %v9373_v6  ;;  %v927_v29 = vshll.u32 %v238_v16, 16  ;;  %v931_v2 = vshrl.u32 %v238_v16, 16  ;;  %v2090_v30 = vrot.slane %v9350_v28, 5 }
  0xae   : > { %v954_v31 = vor.u32 %v953_v23, %v949_v20  ;;  %v920_v33 = vrot.slane %v918_v26, 4  ;;  %v923_v24 = vrot.slane %v921_v27, 5  ;;  %v2093_v36 = vrot.slane %v240_v55, 5 }
  0xaf   : > { %v945_v39 = vrot.slane %v944_v14, 4  ;;  %v929_v41 = vrot.slane %v927_v29, 5  ;;  %v933_v38 = vrot.slane %v931_v2, 4  ;;  %v2092_v42 = vrot.slane %v2090_v30, 4 }
  0xb0   : > { %v955_v43 = vrot.slane %v954_v31, 4  ;;  %v924_v44 = vor.u32 %v923_v24, %v920_v33  ;;  %v2095_v35 = vrot.slane %v2093_v36, 4  ;;  %v2096_v45 = vrot.slane %v241_v59, 5  ;;  %v9429_v33 = vpop.permute.xlu1 %3046 }
  0xb1   : > { %3084 = vrot.lane.b32.xlu0 %v6748_v1, %s8784_s18  ;;  %v950_v28 = vsel %vm8863_vm5, %v945_v39, %v949_v20  ;;  %v934_v47 = vor.u32 %v933_v38, %v929_v41  ;;  %v2094_v49 = vsel %vm8817_vm2, %v2092_v42, %v2093_v36  ;;  %v6577_v50 = vrot.slane %v237_v9, 9  ;;  %v9431_v38 = vpop.permute.xlu0 %3044 }
  0xb2   : > { %v960_v15 = vsel %vm8863_vm5, %v955_v43, %v959_v25  ;;  %v925_v19 = vrot.slane %v924_v44, 4  ;;  %v2097_v51 = vsel %vm8817_vm2, %v2095_v35, %v2096_v45  ;;  %v2087_v52 = vrot.slane %v238_v16, 5 }
  0xb3   : > { %v6687_v55 = vcombine.low %v950_v28, %v960_v15  ;;  %v935_v56 = vrot.slane %v934_v47, 4  ;;  %v6751_v53 = vcombine.low %v2094_v49, %v2097_v51  ;;  %v981_v59 = vshll.u32 %v9392_v46, 16  ;;  %v9441_v51 = vld [vmem:[%s8824_s17 + $0x134] sm:$0xf] }
  0xb4   : > { %v930_v61 = vsel %vm8863_vm5, %v925_v19, %v929_v41  ;;  %v2088_v62 = vsel %vm8817_vm2, %v6577_v50, %v2087_v52  ;;  %v2089_v63 = vrot.slane %v2087_v52, 4  ;;  %v985_v3 = vshrl.u32 %v9392_v46, 16 }
  0xb5   : > { %2770 = vrot.lane.b32.xlu1 %v6687_v55, %s8785_s19  ;;  %v940_v17 = vsel %vm8863_vm5, %v935_v56, %v9373_v6  ;;  %v9420_v9 = vrot.slane %v981_v59, 5  ;;  %v991_v10 = vshll.u32 %v245_v54, 16  ;;  %v995_v11 = vshrl.u32 %v245_v54, 16  ;;  %v8650_v56 = vld [vmem:[%s8824_s17 + $0x8] sm:$0xf] }
  0xb6   : > { %v6686_v13 = vcombine.low %v930_v61, %v940_v17  ;;  %v2091_v16 = vsel %vm8817_vm2, %v2089_v63, %v2090_v30  ;;  %v987_v18 = vrot.slane %v985_v3, 4  ;;  %v1001_v1 = vshll.u32 %v246_v58, 16  ;;  %v9449_v3 = vpop.permute.xlu1 %2730  ;;  %v8652_v17 = vld [vmem:[%s8824_s17] sm:$0xf] }
  0xb7   : > { %v6750_v21 = vcombine.low %v2088_v62, %v2091_v16  ;;  %v993_v20 = vrot.slane %v991_v10, 5  ;;  %v997_v23 = vrot.slane %v995_v11, 4  ;;  %v962_v25 = vshrl.u32 %v242_v5, 16  ;;  %v8653_v10 = vld [vmem:[%s8824_s17 + $0x4] sm:$0xf] }
  0xb8   : > { %2768 = vrot.lane.b32.xlu0 %v6686_v13, %s8785_s19  ;;  %v988_v26 = vor.u32 %v987_v18, %v9420_v9  ;;  %v1003_v6 = vrot.slane %v1001_v1, 5  ;;  %v965_v27 = vshll.u32 %v242_v5, 16  ;;  %v971_v14 = vshll.u32 %v243_v12, 16  ;;  %v9460_v13 = vld [vmem:[%s8824_s17 + $0x13c] sm:$0x1]  ;;  %v9463_v18 = vpop.permute.xlu0 %2728 }
  0xb9   : > { %3090 = vrot.lane.b32.xlu1 %v6751_v53, %s8784_s18  ;;  %v998_v29 = vor.u32 %v997_v23, %v993_v20  ;;  %v964_v2 = vrot.slane %v962_v25, 4  ;;  %v975_v31 = vshrl.u32 %v243_v12, 16  ;;  %v2103_v30 = vrot.slane %v9392_v46, 5  ;;  %v8651_v53 = vld [vmem:[%s8824_s17 + $0xc] sm:$0xf] }
  0xba   : > { %v989_v24 = vrot.slane %v988_v26, 4  ;;  %v967_v36 = vrot.slane %v965_v27, 5  ;;  %v973_v39 = vrot.slane %v971_v14, 5  ;;  %v2106_v41 = vrot.slane %v245_v54, 5  ;;  %v9476_v25 = vld [vmem:[%s8824_s17 + $0x12c] sm:$0xf] }
  0xbb   : > { %v999_v42 = vrot.slane %v998_v29, 4  ;;  %v977_v43 = vrot.slane %v975_v31, 4  ;;  %v2105_v44 = vrot.slane %v2103_v30, 4  ;;  %v2109_v35 = vrot.slane %v246_v58, 5  ;;  %v9479_v26 = vld [vmem:[%s8824_s17 + $0x130] sm:$0xf] }
  0xbc   : > { %3088 = vrot.lane.b32.xlu0 %v6750_v21, %s8784_s18  ;;  %v994_v45 = vsel %vm8863_vm5, %v989_v24, %v993_v20  ;;  %v968_v46 = vor.u32 %v967_v36, %v964_v2  ;;  %v2108_v28 = vrot.slane %v2106_v41, 4  ;;  %v6578_v47 = vrot.slane %v242_v5, 9 }
  0xbd   : > { %v1004_v49 = vsel %vm8863_vm5, %v999_v42, %v1003_v6  ;;  %v978_v50 = vor.u32 %v977_v43, %v973_v39  ;;  %v2107_v15 = vsel %vm8817_vm2, %v2105_v44, %v2106_v41  ;;  %v2100_v19 = vrot.slane %v243_v12, 5  ;;  %v9457_v12 = vld [vmem:[%s8824_s17 + $0x138] sm:$0xf]  ;;  %v9492_v44 = vpop.permute.xlu1 %3050 }
  0xbe   : > { %v6689_v52 = vcombine.low %v994_v45, %v1004_v49  ;;  %v969_v54 = vrot.slane %v968_v46, 4  ;;  %v2110_v55 = vsel %vm8817_vm2, %v2108_v28, %v2109_v35  ;;  %v6597_v58 = vcombine.low %v8650_v56, %v8651_v53 }
  0xbf   : > { %v979_v59 = vrot.slane %v978_v50, 4  ;;  %v6753_v61 = vcombine.low %v2107_v15, %v2110_v55  ;;  %v2101_v62 = vsel %vm8817_vm2, %v6578_v47, %v2100_v19  ;;  %v2102_v63 = vrot.slane %v2100_v19, 4  ;;  %v9494_v47 = vpop.permute.xlu0 %3048  ;;  %v8655_v55 = vld [vmem:[%s8824_s17 + $0x20] sm:$0xf] }
  0xc0   : > { %2774 = vrot.lane.b32.xlu1 %v6689_v52, %s8785_s19  ;;  %v974_v5 = vsel %vm8863_vm5, %v969_v54, %v973_v39  ;;  %v6596_v11 = vcombine.low %v8652_v17, %v8653_v10  ;;  %v1025_v16 = vshll.u32 %v9441_v51, 16  ;;  %v9472_v20 = vsel %vm3164_vm6, %v6597_v58, %v9343_v34  ;;  %v8654_v54 = vld [vmem:[%s8824_s17 + $0x1c] sm:$0xf] }
  0xc1   : > { %v984_v1 = vsel %vm8863_vm5, %v979_v59, %v9420_v9  ;;  %v2104_v21 = vsel %vm8817_vm2, %v2102_v63, %v2103_v30  ;;  %v1029_v23 = vshrl.u32 %v9441_v51, 16  ;;  %v1035_v2 = vshll.u32 %v9457_v12, 16  ;;  %v8656_v59 = vld [vmem:[%s8824_s17 + $0x14] sm:$0xf] }
  0xc2   : > { %v6688_v6 = vcombine.low %v974_v5, %v984_v1  ;;  %v6752_v27 = vcombine.low %v2101_v62, %v2104_v21  ;;  %v3167_v14 = vsel %vm3164_vm6, %v6596_v11, %v9347_v32  ;;  %v1027_v29 = vrot.slane %v1025_v16, 5 }
  0xc3   : > { %v1031_v9 = vrot.slane %v1029_v23, 4  ;;  %v1039_v31 = vshrl.u32 %v9457_v12, 16  ;;  %v1045_v34 = vshll.u32 %v9460_v13, 16  ;;  %v1006_v30 = vshrl.u32 %v9476_v25, 16  ;;  %v9515_v23 = vpop.permute.xlu1 %2734 }
  0xc4   : > { %2772 = vrot.lane.b32.xlu0 %v6688_v6, %s8785_s19  ;;  %3094 = vrot.lane.b32.xlu1 %v6753_v61, %s8784_s18  ;;  %v1009_v24 = vshll.u32 %v9476_v25, 16  ;;  %v1015_v36 = vshll.u32 %v9479_v26, 16  ;;  %v1019_v32 = vshrl.u32 %v9479_v26, 16  ;;  %v1037_v41 = vrot.slane %v1035_v2, 5  ;;  %v8657_v61 = vld [vmem:[%s8824_s17 + $0x18] sm:$0xf] }
  0xc5   : > { %v1032_v39 = vor.u32 %v1031_v9, %v1027_v29  ;;  %v1041_v42 = vrot.slane %v1039_v31, 4  ;;  %v1047_v43 = vrot.slane %v1045_v34, 5  ;;  %v1008_v35 = vrot.slane %v1006_v30, 4  ;;  %v9531_v31 = vld [vmem:[%s8824_s17 + $0x14c] sm:$0xf] }
  0xc6   : > { %v1011_v45 = vrot.slane %v1009_v24, 5  ;;  %v1017_v46 = vrot.slane %v1015_v36, 5  ;;  %v1021_v28 = vrot.slane %v1019_v32, 4  ;;  %v3359_v52 = vsel %vm3357_vm7, %v3167_v14, %v9324_v8  ;;  %v9524_v14 = vpop.permute.xlu0 %2732  ;;  %v9534_v34 = vld [vmem:[%s8824_s17 + $0x150] sm:$0x1] }
  0xc7   : > { %v1033_v49 = vrot.slane %v1032_v39, 4  ;;  %v1042_v50 = vor.u32 %v1041_v42, %v1037_v41  ;;  %v6599_v56 = vcombine.low %v8654_v54, %v8655_v55  ;;  %8017 = vmatprep.mubr.msk.bf16.mxu0 %vm3644_vm8, %v3359_v52  ;;  %v6598_v62 = vcombine.low %v8656_v59, %v8657_v61  ;;  %v8659_v55 = vld [vmem:[%s12090_s1 + $0x60] sm:$0xff]  }
  0xc8   : > { %3092 = vrot.lane.b32.xlu0 %v6752_v27, %s8784_s18  ;;  %v1012_v15 = vor.u32 %v1011_v45, %v1008_v35  ;;  %v1022_v19 = vor.u32 %v1021_v28, %v1017_v46  ;;  %v2116_v63 = vrot.slane %v9441_v51, 5  ;;  %v2119_v10 = vrot.slane %v9457_v12, 5  ;;  %v9522_v27 = vld [vmem:[%s8824_s17 + $0x148] sm:$0xf] }
  0xc9   : > { %v1038_v53 = vsel %vm8863_vm5, %v1033_v49, %v1037_v41  ;;  %v1043_v58 = vrot.slane %v1042_v50, 4  ;;  %v3176_v8 = vsel %vm3164_vm6, %v6599_v56, %v9364_v57  ;;  %v3173_v16 = vsel %vm3164_vm6, %v6598_v62, %v9368_v4  ;;  %v8658_v49 = vld [vmem:[%s12090_s1] sm:$0xff]   ;;  %v9579_v50 = vpop.permute.xlu1 %3054  ;;  %v8660_v62 = vld [vmem:[%s12090_s1 + $0x8] sm:$0xff]  }
  0xca   : > { %v1013_v5 = vrot.slane %v1012_v15, 4  ;;  %v1023_v17 = vrot.slane %v1022_v19, 4  ;;  %v2118_v1 = vrot.slane %v2116_v63, 4  ;;  %v2122_v21 = vrot.slane %v9460_v13, 5  ;;  %v9585_v56 = vpop.permute.xlu0 %3052 }
  0xcb   : > { %v1048_v11 = vsel %vm8863_vm5, %v1043_v58, %v1047_v43  ;;  %v2121_v12 = vrot.slane %v2119_v10, 4  ;;  %v6579_v13 = vrot.slane %v9476_v25, 9  ;;  %v2113_v2 = vrot.slane %v9479_v26, 5  ;;  %v9549_v26 = vld [vmem:[%s8824_s17 + $0x140] sm:$0xf] }
  0xcc   : > { %v6691_v51 = vcombine.low %v1038_v53, %v1048_v11  ;;  %v1018_v6 = vsel %vm8863_vm5, %v1013_v5, %v1017_v46  ;;  %v1028_v57 = vsel %vm8863_vm5, %v1023_v17, %v1027_v29  ;;  %v2120_v4 = vsel %vm8817_vm2, %v2118_v1, %v2119_v10  ;;  %v9564_v43 = vld [vmem:[%s8824_s17 + $0x144] sm:$0xf]  ;;  %v8661_v10 = vld [vmem:[%s8824_s17 + $0x30] sm:$0xf]  ;;  %v8662_v11 = vld [vmem:[%s8824_s17 + $0x34] sm:$0xf] }
  0xcd   : > { %v6690_v9 = vcombine.low %v1018_v6, %v1028_v57  ;;  %v2123_v29 = vsel %vm8817_vm2, %v2121_v12, %v2122_v21  ;;  %v3363_v30 = vsel %vm3357_vm7, %v3173_v16, %v9320_v48  ;;  %v9543_v24 = vsel %vm3357_vm7, %v3176_v8, %v9387_v22  ;;  %v8587_v22 = vld [vmem:[%s12090_s1 + $0x68] sm:$0xff]  }
  0xce   : > { %2778 = vrot.lane.b32.xlu1 %v6691_v51, %s8785_s19  ;;  %v3361_v25 = vsel %vm3357_vm7, %v9472_v20, %v9389_v37  ;;  %v6755_v36 = vcombine.low %v2120_v4, %v2123_v29  ;;  %v2114_v32 = vsel %vm8817_vm2, %v6579_v13, %v2113_v2  ;;  %v2115_v39 = vrot.slane %v2113_v2, 4  ;;  %7877 = vmatprep.mubr.msk.bf16.mxu1 %vm3644_vm8, %v3363_v30  ;;  %v8663_v51 = vld [vmem:[%s8824_s17 + $0x28] sm:$0xf]  ;;  %v8664_v6 = vld [vmem:[%s8824_s17 + $0x2c] sm:$0xf]  ;;  %v8665_v29 = vld [vmem:[%s12090_s1 + $0x10] sm:$0xff]  }
  0xcf   : > { %2776 = vrot.lane.b32.xlu0 %v6690_v9, %s8785_s19  ;;  %v1069_v48 = vshll.u32 %v9522_v27, 16  ;;  %v1073_v41 = vshrl.u32 %v9522_v27, 16  ;;  %v1079_v37 = vshll.u32 %v9531_v31, 16  ;;  %v1083_v20 = vshrl.u32 %v9531_v31, 16  ;;  %7878 = vmatmul.mubr.msk.bf16.vlgmr.msra.gmra.mrb[0].mxu1 %vm3644_vm8, %v9543_v24 }
  0xd0   : > { %v1089_v42 = vshll.u32 %v9534_v34, 16  ;;  %8018 = vmatmul.mubr.msk.bf16.vlgmr.msra.gmra.mrb[0].mxu0 %vm3644_vm8, %v3361_v25  ;;  %v2117_v35 = vsel %vm8817_vm2, %v2115_v39, %v2116_v63  ;;  %v1050_v46 = vshrl.u32 %v9549_v26, 16  ;;  %v1053_v28 = vshll.u32 %v9549_v26, 16  ;;  %8291 = vmatpush3.bf16.msra.mxu1 %v8658_v49  ;;  %v8594_v63 = vld [vmem:[%s12090_s1 + $0x70] sm:$0xff]   ;;  %v9638_v49 = vld [vmem:[%s8824_s17 + $0x160] sm:$0xf] }
  0xd1   : > { %v9571_v45 = vrot.slane %v1069_v48, 5  ;;  %8021 = vmatprep.mubr.msk.bf16.mxu0 %vm3644_vm8, %v3363_v30  ;;  %v6754_v15 = vcombine.low %v2114_v32, %v2117_v35  ;;  %v1075_v19 = vrot.slane %v1073_v41, 4  ;;  %v1081_v52 = vrot.slane %v1079_v37, 5  ;;  %8146 = vmatpush3.bf16.msra.mxu0 %v8659_v55  ;;  %v9610_v32 = vpop.permute.xlu1 %2738  ;;  %v9621_v41 = vld [vmem:[%s8824_s17 + $0x15c] sm:$0xf] }
  0xd2   : > { %3098 = vrot.lane.b32.xlu1 %v6755_v36, %s8784_s18  ;;  %v1085_v54 = vrot.slane %v1083_v20, 4  ;;  %v1091_v53 = vrot.slane %v1089_v42, 5  ;;  %v1052_v58 = vrot.slane %v1050_v46, 4  ;;  %v1055_v59 = vrot.slane %v1053_v28, 5  ;;  %8147 = vmatprep.subr.bf16.mxu0 %v8587_v22 }
  0xd3   : > { %v1059_v61 = vshll.u32 %v9564_v43, 16  ;;  %8286 = vmatprep.subr.bf16.mxu1 %v8660_v62  ;;  %3096 = vrot.lane.b32.xlu0 %v6754_v15, %s8784_s18  ;;  %v1076_v5 = vor.u32 %v1075_v19, %v9571_v45  ;;  %v1063_v8 = vshrl.u32 %v9564_v43, 16  ;;  %v6601_v16 = vcombine.low %v8661_v10, %v8662_v11  ;;  %v8666_v15 = vld [vmem:[%s12090_s1 + $0x18] sm:$0xff]  }
  0xd4   : > { %v1086_v17 = vor.u32 %v1085_v54, %v1081_v52  ;;  %v1056_v1 = vor.u32 %v1055_v59, %v1052_v58  ;;  %v6600_v57 = vcombine.low %v8663_v51, %v8664_v6  ;;  %v2129_v12 = vrot.slane %v9522_v27, 5  ;;  %8292 = vmatpush3.bf16.msra.mxu1 %v8660_v62  ;;  %v9656_v54 = vld [vmem:[%s8824_s17 + $0x154] sm:$0xf] }
  0xd5   : > { %v1061_v21 = vrot.slane %v1059_v61, 5  ;;  %v1077_v9 = vrot.slane %v1076_v5, 4  ;;  %v1065_v13 = vrot.slane %v1063_v8, 4  ;;  %v3182_v2 = vsel %vm3164_vm6, %v6601_v16, %v9406_v60  ;;  %8148 = vmatpush3.bf16.msra.mxu0 %v8587_v22  ;;  %8287 = vmatprep.subr.bf16.mxu1 %v8665_v29  ;;  %v8599_v60 = vld [vmem:[%s12090_s1 + $0x78] sm:$0xff]  }
  0xd6   : > { %v1087_v4 = vrot.slane %v1086_v17, 4  ;;  %v1057_v30 = vrot.slane %v1056_v1, 4  ;;  %v3179_v25 = vsel %vm3164_vm6, %v6600_v57, %v9414_v7  ;;  %v2131_v36 = vrot.slane %v2129_v12, 4  ;;  %8149 = vmatprep.subr.bf16.mxu0 %v8594_v63  ;;  %v9671_v5 = vld [vmem:[%s8824_s17 + $0x158] sm:$0xf] }
  0xd7   : > { %v2132_v27 = vrot.slane %v9531_v31, 5  ;;  %v1082_v39 = vsel %vm8863_vm5, %v1077_v9, %v1081_v52  ;;  %v1066_v22 = vor.u32 %v1065_v13, %v1061_v21  ;;  %v2135_v7 = vrot.slane %v9534_v34, 5  ;;  %v9625_v31 = vpop.permute.xlu0 %2736  ;;  %v8667_v13 = vld [vmem:[%s12090_s1 + $0x20] sm:$0xff]  }
  0xd8   : > { %v1092_v48 = vsel %vm8863_vm5, %v1087_v4, %v1091_v53  ;;  %8022 = vmatmul.mubr.msk.bf16.gmra.mrb[4].mxu0 %vm3644_vm8, %v9543_v24  ;;  %v1062_v20 = vsel %vm8863_vm5, %v1057_v30, %v1061_v21  ;;  %8293 = vmatpush3.bf16.msra.mxu1 %v8665_v29  ;;  %v6580_v34 = vrot.slane %v9549_v26, 9  ;;  %v2126_v28 = vrot.slane %v9564_v43, 5 }
  0xd9   : > { %v6693_v37 = vcombine.low %v1082_v39, %v1092_v48  ;;  %v2133_v42 = vsel %vm8817_vm2, %v2131_v36, %v2132_v27  ;;  %v2134_v35 = vrot.slane %v2132_v27, 4  ;;  %v1067_v46 = vrot.slane %v1066_v22, 4  ;;  %8150 = vmatpush3.bf16.msra.mxu0 %v8594_v63  ;;  %8288 = vmatprep.subr.bf16.mxu1 %v8666_v15  ;;  %v8669_v36 = vld [vmem:[%s8824_s17 + $0x48] sm:$0xf]  ;;  %v8670_v48 = vld [vmem:[%s8824_s17 + $0x3c] sm:$0xf] }
  0xda   : > { %v9635_v24 = vsel %vm3357_vm7, %v3182_v2, %v9429_v33  ;;  %v9648_v26 = vsel %vm3357_vm7, %v3179_v25, %v9431_v38  ;;  %v9651_v33 = vld [vmem:[%s8824_s17 + $0x164] sm:$0x1]  ;;  %v1113_v43 = vshll.u32 %v9621_v41, 16  ;;  %v1117_v52 = vshrl.u32 %v9621_v41, 16  ;;  %8151 = vmatprep.subr.bf16.mxu0 %v8599_v60  ;;  %v8671_v22 = vld [vmem:[%s8824_s17 + $0x40] sm:$0xf] }
  0xdb   : > { %2782 = vrot.lane.b32.xlu1 %v6693_v37, %s8785_s19  ;;  %v2136_v19 = vsel %vm8817_vm2, %v2134_v35, %v2135_v7  ;;  %v1072_v55 = vsel %vm8863_vm5, %v1067_v46, %v9571_v45  ;;  %v2127_v58 = vsel %vm8817_vm2, %v6580_v34, %v2126_v28  ;;  %v2128_v38 = vrot.slane %v2126_v28, 4  ;;  %7881 = vmatprep.mubr.msk.bf16.mxu1 %vm3644_vm8, %v9648_v26  ;;  %v9675_v45 = vpop.permute.xlu1 %3058  ;;  %v9682_v16 = vpop.permute.xlu0 %3056  ;;  %v8668_v25 = vld [vmem:[%s8824_s17 + $0x44] sm:$0xf]  ;;  %v8672_v28 = vld [vmem:[%s12090_s1 + $0x28] sm:$0xff]  }
  0xdc   : > { %v6757_v53 = vcombine.low %v2133_v42, %v2136_v19  ;;  %8025 = vmatprep.mubr.msk.bf16.mxu0 %vm3644_vm8, %v9648_v26  ;;  %v6692_v59 = vcombine.low %v1062_v20, %v1072_v55  ;;  %v9667_v61 = vrot.slane %v1113_v43, 5  ;;  %v1119_v62 = vrot.slane %v1117_v52, 4  ;;  %7882 = vmatmul.mubr.msk.bf16.gmra.mrb[4].mxu1 %vm3644_vm8, %v9635_v24 }
  0xdd   : > { %v1123_v63 = vshll.u32 %v9638_v49, 16  ;;  %v2130_v17 = vsel %vm8817_vm2, %v2128_v38, %v2129_v12  ;;  %v1127_v8 = vshrl.u32 %v9638_v49, 16  ;;  %v1133_v10 = vshll.u32 %v9651_v33, 16  ;;  %8152 = vmatpush3.bf16.msra.mxu0 %v8599_v60  ;;  %8294 = vmatpush3.bf16.msra.mxu1 %v8666_v15  ;;  %v8606_v38 = vld [vmem:[%s12090_s1 + $0x80] sm:$0xff]  }
  0xde   : > { %v1094_v11 = vshrl.u32 %v9656_v54, 16  ;;  %2780 = vrot.lane.b32.xlu0 %v6692_v59, %s8785_s19  ;;  %v6756_v1 = vcombine.low %v2127_v58, %v2130_v17  ;;  %v1120_v21 = vor.u32 %v1119_v62, %v9667_v61  ;;  %v1097_v6 = vshll.u32 %v9656_v54, 16  ;;  %8289 = vmatprep.subr.bf16.mxu1 %v8667_v13 }
  0xdf   : > { %3102 = vrot.lane.b32.xlu1 %v6757_v53, %s8784_s18  ;;  %v1125_v51 = vrot.slane %v1123_v63, 5  ;;  %v1129_v57 = vrot.slane %v1127_v8, 4  ;;  %v1135_v12 = vrot.slane %v1133_v10, 5  ;;  %v1103_v4 = vshll.u32 %v9671_v5, 16  ;;  %v9705_v34 = vpop.permute.xlu1 %2742  ;;  %v9713_v52 = vpop.permute.xlu0 %2740  ;;  %v9726_v63 = vld [vmem:[%s8824_s17 + $0x170] sm:$0xf]  ;;  %8153 = vmatprep.subr.bf16.mxu0 %v8606_v38 }
  0xe0   : > { %v1096_v9 = vrot.slane %v1094_v11, 4  ;;  %8026 = vmatmul.mubr.msk.bf16.gmra.mrb[8].mxu0 %vm3644_vm8, %v9635_v24  ;;  %v1121_v2 = vrot.slane %v1120_v21, 4  ;;  %v1099_v29 = vrot.slane %v1097_v6, 5  ;;  %v1107_v30 = vshrl.u32 %v9671_v5, 16  ;;  %v9735_v10 = vld [vmem:[%s8824_s17 + $0x174] sm:$0xf] }
  0xe1   : > { %v6603_v27 = vcombine.low %v8668_v25, %v8669_v36  ;;  %v1130_v60 = vor.u32 %v1129_v57, %v1125_v51  ;;  %v1105_v39 = vrot.slane %v1103_v4, 5  ;;  %v6602_v7 = vcombine.low %v8670_v48, %v8671_v22  ;;  %8295 = vmatpush3.bf16.msra.mxu1 %v8667_v13  ;;  %8154 = vmatpush3.bf16.msra.mxu0 %v8606_v38  ;;  %v8676_v38 = vld [vmem:[%s8824_s17 + $0x54] sm:$0xf] }
  0xe2   : > { %v2142_v37 = vrot.slane %v9621_v41, 5  ;;  %3100 = vrot.lane.b32.xlu0 %v6756_v1, %s8784_s18  ;;  %v1126_v20 = vsel %vm8863_vm5, %v1121_v2, %v1125_v51  ;;  %v1100_v42 = vor.u32 %v1099_v29, %v1096_v9  ;;  %v1109_v35 = vrot.slane %v1107_v30, 4  ;;  %8290 = vmatprep.subr.bf16.mxu1 %v8672_v28  ;;  %v9746_v51 = vld [vmem:[%s8824_s17 + $0x178] sm:$0x1]  ;;  %v9755_v9 = vld [vmem:[%s8824_s17 + $0x168] sm:$0xf] }
  0xe3   : > { %v3188_v46 = vsel %vm3164_vm6, %v6603_v27, %v9449_v3  ;;  %v1131_v41 = vrot.slane %v1130_v60, 4  ;;  %v3185_v15 = vsel %vm3164_vm6, %v6602_v7, %v9463_v18  ;;  %v2145_v43 = vrot.slane %v9638_v49, 5  ;;  %v9766_v29 = vld [vmem:[%s8824_s17 + $0x16c] sm:$0xf]  ;;  %v9772_v30 = vpop.permute.xlu0 %3060 }
  0xe4   : > { %v2144_v19 = vrot.slane %v2142_v37, 4  ;;  %v1101_v55 = vrot.slane %v1100_v42, 4  ;;  %v1110_v3 = vor.u32 %v1109_v35, %v1105_v39  ;;  %v2148_v53 = vrot.slane %v9651_v33, 5 }
  0xe5   : > { %v6581_v58 = vrot.slane %v9656_v54, 9  ;;  %v1136_v59 = vsel %vm8863_vm5, %v1131_v41, %v1135_v12  ;;  %v2147_v49 = vrot.slane %v2145_v43, 4  ;;  %v2139_v62 = vrot.slane %v9671_v5, 5  ;;  %8296 = vmatpush3.bf16.msra.mxu1 %v8672_v28 }
  0xe6   : > { %v2146_v18 = vsel %vm8817_vm2, %v2144_v19, %v2145_v43  ;;  %v6695_v33 = vcombine.low %v1126_v20, %v1136_v59  ;;  %v1106_v54 = vsel %vm8863_vm5, %v1101_v55, %v1105_v39  ;;  %v1111_v17 = vrot.slane %v1110_v3, 4  ;;  %v8674_v19 = vld [vmem:[%s8824_s17 + $0x5c] sm:$0xf] }
  0xe7   : > { %v9732_v8 = vsel %vm3357_vm7, %v3188_v46, %v9492_v44  ;;  %v2149_v11 = vsel %vm8817_vm2, %v2147_v49, %v2148_v53  ;;  %v2140_v5 = vsel %vm8817_vm2, %v6581_v58, %v2139_v62  ;;  %v2141_v1 = vrot.slane %v2139_v62, 4  ;;  %v8675_v58 = vld [vmem:[%s8824_s17 + $0x50] sm:$0xf] }
  0xe8   : > { %v9743_v21 = vsel %vm3357_vm7, %v3185_v15, %v9494_v47  ;;  %2786 = vrot.lane.b32.xlu1 %v6695_v33, %s8785_s19  ;;  %v1116_v44 = vsel %vm8863_vm5, %v1111_v17, %v9667_v61  ;;  %v6759_v6 = vcombine.low %v2146_v18, %v2149_v11  ;;  %v1157_v57 = vshll.u32 %v9726_v63, 16  ;;  %v9759_v47 = vpop.permute.xlu1 %3062  ;;  %v8673_v15 = vld [vmem:[%s8824_s17 + $0x58] sm:$0xf]  ;;  %v9793_v17 = vpop.permute.xlu0 %2744 }
  0xe9   : > { %v1161_v12 = vshrl.u32 %v9726_v63, 16  ;;  %7885 = vmatprep.mubr.msk.bf16.mxu1 %vm3644_vm8, %v9743_v21  ;;  %v6694_v4 = vcombine.low %v1106_v54, %v1116_v44  ;;  %v2143_v13 = vsel %vm8817_vm2, %v2141_v1, %v2142_v37  ;;  %v1167_v2 = vshll.u32 %v9735_v10, 16  ;;  %8029 = vmatprep.mubr.msk.bf16.mxu0 %vm3644_vm8, %v9743_v21 }
  0xea   : > { %v1171_v61 = vshrl.u32 %v9735_v10, 16  ;;  %7886 = vmatmul.mubr.msk.bf16.gmra.mrb[8].mxu1 %vm3644_vm8, %v9732_v8  ;;  %v6758_v25 = vcombine.low %v2140_v5, %v2143_v13  ;;  %v1159_v36 = vrot.slane %v1157_v57, 5  ;;  %v1177_v60 = vshll.u32 %v9746_v51, 16  ;;  %8030 = vmatmul.mubr.msk.bf16.gmra.mrb[12].mxu0 %vm3644_vm8, %v9732_v8 }
  0xeb   : > { %v1163_v27 = vrot.slane %v1161_v12, 4  ;;  %2784 = vrot.lane.b32.xlu0 %v6694_v4, %s8785_s19  ;;  %v1169_v39 = vrot.slane %v1167_v2, 5  ;;  %v1138_v22 = vshrl.u32 %v9755_v9, 16  ;;  %v1141_v7 = vshll.u32 %v9755_v9, 16 }
  0xec   : > { %v1173_v48 = vrot.slane %v1171_v61, 4  ;;  %3106 = vrot.lane.b32.xlu1 %v6759_v6, %s8784_s18  ;;  %v1179_v20 = vrot.slane %v1177_v60, 5  ;;  %v1147_v42 = vshll.u32 %v9766_v29, 16  ;;  %v1151_v35 = vshrl.u32 %v9766_v29, 16  ;;  %v9787_v18 = vpop.permute.xlu1 %2746 }
  0xed   : > { %v1164_v37 = vor.u32 %v1163_v27, %v1159_v36  ;;  %v1140_v28 = vrot.slane %v1138_v22, 4  ;;  %v1143_v41 = vrot.slane %v1141_v7, 5  ;;  %v6605_v43 = vcombine.low %v8673_v15, %v8674_v19 }
  0xee   : > { %v1174_v46 = vor.u32 %v1173_v48, %v1169_v39  ;;  %v1149_v3 = vrot.slane %v1147_v42, 5  ;;  %v1153_v53 = vrot.slane %v1151_v35, 4  ;;  %v6604_v59 = vcombine.low %v8675_v58, %v8676_v38  ;;  %v9833_v48 = vld [vmem:[%s8824_s17 + $0x17c] sm:$0xf] }
  0xef   : > { %v1165_v55 = vrot.slane %v1164_v37, 4  ;;  %3104 = vrot.lane.b32.xlu0 %v6758_v25, %s8784_s18  ;;  %v1144_v62 = vor.u32 %v1143_v41, %v1140_v28  ;;  %v3194_v33 = vsel %vm3164_vm6, %v6605_v43, %v9515_v23  ;;  %v2155_v54 = vrot.slane %v9726_v63, 5  ;;  %v9804_v63 = vld [vmem:[%s8824_s17 + $0x184] sm:$0xf]  ;;  %v9851_v41 = vld [vmem:[%s8824_s17 + $0x180] sm:$0xf] }
  0xf0   : > { %v1175_v49 = vrot.slane %v1174_v46, 4  ;;  %v1154_v5 = vor.u32 %v1153_v53, %v1149_v3  ;;  %v3191_v1 = vsel %vm3164_vm6, %v6604_v59, %v9524_v14  ;;  %v2158_v44 = vrot.slane %v9735_v10, 5  ;;  %v9835_v22 = vpop.permute.xlu1 %3066 }
  0xf1   : > { %v1170_v11 = vsel %vm8863_vm5, %v1165_v55, %v1169_v39  ;;  %v1145_v57 = vrot.slane %v1144_v62, 4  ;;  %v2157_v12 = vrot.slane %v2155_v54, 4  ;;  %v2161_v23 = vrot.slane %v9746_v51, 5  ;;  %v9817_v51 = vld [vmem:[%s8824_s17 + $0x188] sm:$0xf] }
  0xf2   : > { %v1180_v6 = vsel %vm8863_vm5, %v1175_v49, %v1179_v20  ;;  %v1155_v13 = vrot.slane %v1154_v5, 4  ;;  %v2160_v2 = vrot.slane %v2158_v44, 4  ;;  %v6582_v61 = vrot.slane %v9755_v9, 9 }
  0xf3   : > { %v6697_v4 = vcombine.low %v1170_v11, %v1180_v6  ;;  %v1150_v14 = vsel %vm8863_vm5, %v1145_v57, %v1149_v3  ;;  %v2159_v10 = vsel %vm8817_vm2, %v2157_v12, %v2158_v44  ;;  %v2152_v25 = vrot.slane %v9766_v29, 5  ;;  %v9829_v29 = vld [vmem:[%s8824_s17 + $0x18c] sm:$0x1]  ;;  %v8678_v44 = vld [vmem:[%s8824_s17 + $0x70] sm:$0xf] }
  0xf4   : > { %v9814_v27 = vsel %vm3357_vm7, %v3194_v33, %v9579_v50  ;;  %v1160_v60 = vsel %vm8863_vm5, %v1155_v13, %v1159_v36  ;;  %v2162_v9 = vsel %vm8817_vm2, %v2160_v2, %v2161_v23  ;;  %v9826_v39 = vsel %vm3357_vm7, %v3191_v1, %v9585_v56  ;;  %v9843_v56 = vpop.permute.xlu0 %3064  ;;  %v8677_v1 = vld [vmem:[%s8824_s17 + $0x6c] sm:$0xf]  ;;  %v9869_v57 = vpop.permute.xlu1 %2750  ;;  %v8680_v13 = vld [vmem:[%s8824_s17 + $0x68] sm:$0xf] }
  0xf5   : > { %2790 = vrot.lane.b32.xlu1 %v6697_v4, %s8785_s19  ;;  %v1201_v50 = vshll.u32 %v9804_v63, 16  ;;  %v6696_v7 = vcombine.low %v1150_v14, %v1160_v60  ;;  %v6761_v37 = vcombine.low %v2159_v10, %v2162_v9  ;;  %v2153_v36 = vsel %vm8817_vm2, %v6582_v61, %v2152_v25  ;;  %7889 = vmatprep.mubr.msk.bf16.mxu1 %vm3644_vm8, %v9826_v39  ;;  %v8679_v4 = vld [vmem:[%s8824_s17 + $0x64] sm:$0xf] }
  0xf6   : > { %v2154_v20 = vrot.slane %v2152_v25, 4  ;;  %8033 = vmatprep.mubr.msk.bf16.mxu0 %vm3644_vm8, %v9826_v39  ;;  %v1205_v35 = vshrl.u32 %v9804_v63, 16  ;;  %v1211_v46 = vshll.u32 %v9817_v51, 16  ;;  %v1215_v28 = vshrl.u32 %v9817_v51, 16  ;;  %7890 = vmatmul.mubr.msk.bf16.gmra.mrb[12].mxu1 %vm3644_vm8, %v9814_v27 }
  0xf7   : > { %v9845_v42 = vrot.slane %v1201_v50, 5  ;;  %8034 = vmatmul.mubr.msk.bf16.gmra.mrb[16].mxu0 %vm3644_vm8, %v9814_v27  ;;  %2788 = vrot.lane.b32.xlu0 %v6696_v7, %s8785_s19  ;;  %v1221_v19 = vshll.u32 %v9829_v29, 16  ;;  %v1182_v43 = vshrl.u32 %v9833_v48, 16  ;;  %v1185_v55 = vshll.u32 %v9833_v48, 16 }
  0xf8   : > { %v2156_v15 = vsel %vm8817_vm2, %v2154_v20, %v2155_v54  ;;  %v1207_v53 = vrot.slane %v1205_v35, 4  ;;  %v1213_v58 = vrot.slane %v1211_v46, 5  ;;  %v1217_v38 = vrot.slane %v1215_v28, 4  ;;  %v9875_v14 = vpop.permute.xlu0 %2748  ;;  %v9888_v28 = vld [vmem:[%s8824_s17 + $0x198] sm:$0xf] }
  0xf9   : > { %3110 = vrot.lane.b32.xlu1 %v6761_v37, %s8784_s18  ;;  %v6760_v3 = vcombine.low %v2153_v36, %v2156_v15  ;;  %v1223_v59 = vrot.slane %v1221_v19, 5  ;;  %v1184_v49 = vrot.slane %v1182_v43, 4  ;;  %v1187_v62 = vrot.slane %v1185_v55, 5 }
  0xfa   : > { %v1191_v33 = vshll.u32 %v9851_v41, 16  ;;  %v1208_v54 = vor.u32 %v1207_v53, %v9845_v42  ;;  %v1218_v11 = vor.u32 %v1217_v38, %v1213_v58  ;;  %v1195_v5 = vshrl.u32 %v9851_v41, 16  ;;  %v9903_v53 = vpop.permute.xlu1 %3070 }
  0xfb   : > { %v6607_v6 = vcombine.low %v8677_v1, %v8678_v44  ;;  %3108 = vrot.lane.b32.xlu0 %v6760_v3, %s8784_s18  ;;  %v1188_v12 = vor.u32 %v1187_v62, %v1184_v49  ;;  %v6606_v2 = vcombine.low %v8679_v4, %v8680_v13  ;;  %v2168_v61 = vrot.slane %v9804_v63, 5 }
  0xfc   : > { %v1193_v23 = vrot.slane %v1191_v33, 5  ;;  %v1209_v10 = vrot.slane %v1208_v54, 4  ;;  %v1219_v25 = vrot.slane %v1218_v11, 4  ;;  %v1197_v60 = vrot.slane %v1195_v5, 4  ;;  %v9920_v49 = vpop.permute.xlu0 %3068 }
  0xfd   : > { %v3200_v9 = vsel %vm3164_vm6, %v6607_v6, %v9610_v32  ;;  %v1189_v50 = vrot.slane %v1188_v12, 4  ;;  %v3197_v7 = vsel %vm3164_vm6, %v6606_v2, %v9625_v31  ;;  %v2170_v37 = vrot.slane %v2168_v61, 4  ;;  %v273_v6 = vld [vmem:[%s8824_s17 + $0x194] sm:$0xf] }
  0xfe   : > { %v2171_v36 = vrot.slane %v9817_v51, 5  ;;  %v1214_v20 = vsel %vm8863_vm5, %v1209_v10, %v1213_v58  ;;  %v1224_v63 = vsel %vm8863_vm5, %v1219_v25, %v1223_v59  ;;  %v1198_v35 = vor.u32 %v1197_v60, %v1193_v23  ;;  %v9918_v59 = vld [vmem:[%s8824_s17 + $0x190] sm:$0xf] }
  0xff   : > { %v2174_v46 = vrot.slane %v9829_v29, 5  ;;  %v6699_v32 = vcombine.low %v1214_v20, %v1224_v63  ;;  %v1194_v31 = vsel %vm8863_vm5, %v1189_v50, %v1193_v23  ;;  %v6583_v43 = vrot.slane %v9833_v48, 9  ;;  %v9901_v29 = vld [vmem:[%s8824_s17 + $0x19c] sm:$0xf]  ;;  %v9913_v48 = vld [vmem:[%s8824_s17 + $0x1a0] sm:$0x1] }
 0x100   : > { %v2172_v51 = vsel %vm8817_vm2, %v2170_v37, %v2171_v36  ;;  %v2173_v15 = vrot.slane %v2171_v36, 4  ;;  %v1199_v19 = vrot.slane %v1198_v35, 4  ;;  %v2165_v55 = vrot.slane %v9851_v41, 5  ;;  %v8681_v63 = vld [vmem:[%s8824_s17 + $0x80] sm:$0xf] }
 0x101   : > { %v9898_v3 = vsel %vm3357_vm7, %v3200_v9, %v9675_v45  ;;  %2794 = vrot.lane.b32.xlu1 %v6699_v32, %s8785_s19  ;;  %v9910_v38 = vsel %vm3357_vm7, %v3197_v7, %v9682_v16  ;;  %v1245_v41 = vshll.u32 %v9888_v28, 16  ;;  %v1249_v45 = vshrl.u32 %v9888_v28, 16  ;;  %v9948_v7 = vpop.permute.xlu1 %2754  ;;  %v8682_v35 = vld [vmem:[%s8824_s17 + $0x84] sm:$0xf]  ;;  %v9952_v32 = vpop.permute.xlu0 %2752 }
 0x102   : > { %v2175_v58 = vsel %vm8817_vm2, %v2173_v15, %v2174_v46  ;;  %v1204_v62 = vsel %vm8863_vm5, %v1199_v19, %v9845_v42  ;;  %v2166_v16 = vsel %vm8817_vm2, %v6583_v43, %v2165_v55  ;;  %v2167_v54 = vrot.slane %v2165_v55, 4  ;;  %7893 = vmatprep.mubr.msk.bf16.mxu1 %vm3644_vm8, %v9910_v38  ;;  %8037 = vmatprep.mubr.msk.bf16.mxu0 %vm3644_vm8, %v9910_v38  ;;  %v8683_v19 = vld [vmem:[%s8824_s17 + $0x78] sm:$0xf]  ;;  %v8684_v43 = vld [vmem:[%s8824_s17 + $0x7c] sm:$0xf] }
 0x103   : > { %v6763_v33 = vcombine.low %v2172_v51, %v2175_v58  ;;  %v6698_v11 = vcombine.low %v1194_v31, %v1204_v62  ;;  %v9931_v5 = vrot.slane %v1245_v41, 5  ;;  %v1251_v1 = vrot.slane %v1249_v45, 4  ;;  %7894 = vmatmul.mubr.msk.bf16.gmra.mrb[16].mxu1 %vm3644_vm8, %v9898_v3  ;;  %8038 = vmatmul.mubr.msk.bf16.gmra.mrb[20].mxu0 %vm3644_vm8, %v9898_v3  ;;  %v8613_v31 = vld [vmem:[%s12090_s1 + $0x88] sm:$0xff]  }
 0x104   : > { %v1255_v44 = vshll.u32 %v9901_v29, 16  ;;  %v2169_v42 = vsel %vm8817_vm2, %v2167_v54, %v2168_v61  ;;  %v1259_v12 = vshrl.u32 %v9901_v29, 16  ;;  %v1265_v23 = vshll.u32 %v9913_v48, 16  ;;  %8155 = vmatprep.subr.bf16.mxu0 %v8613_v31 }
 0x105   : > { %v1226_v4 = vshrl.u32 %v9918_v59, 16  ;;  %2792 = vrot.lane.b32.xlu0 %v6698_v11, %s8785_s19  ;;  %3114 = vrot.lane.b32.xlu1 %v6763_v33, %s8784_s18  ;;  %v6762_v13 = vcombine.low %v2166_v16, %v2169_v42  ;;  %v1252_v2 = vor.u32 %v1251_v1, %v9931_v5  ;;  %v1229_v25 = vshll.u32 %v9918_v59, 16 }
 0x106   : > { %v1257_v10 = vrot.slane %v1255_v44, 5  ;;  %v1261_v61 = vrot.slane %v1259_v12, 4  ;;  %v1267_v60 = vrot.slane %v1265_v23, 5  ;;  %v1235_v50 = vshll.u32 %v273_v6, 16  ;;  %8156 = vmatpush3.bf16.msra.mxu0 %v8613_v31 }
 0x107   : > { %v1228_v9 = vrot.slane %v1226_v4, 4  ;;  %v1253_v37 = vrot.slane %v1252_v2, 4  ;;  %v1231_v36 = vrot.slane %v1229_v25, 5  ;;  %v1239_v20 = vshrl.u32 %v273_v6, 16  ;;  %v9986_v25 = vld [vmem:[%s8824_s17 + $0x1b0] sm:$0xf] }
 0x108   : > { %v6609_v46 = vcombine.low %v8681_v63, %v8682_v35  ;;  %v1262_v51 = vor.u32 %v1261_v61, %v1257_v10  ;;  %v1237_v15 = vrot.slane %v1235_v50, 5  ;;  %v6608_v55 = vcombine.low %v8683_v19, %v8684_v43  ;;  %v9988_v61 = vpop.permute.xlu0 %3072  ;;  %v10008_v35 = vld [vmem:[%s8824_s17 + $0x1a4] sm:$0xf] }
 0x109   : > { %v2181_v58 = vrot.slane %v9888_v28, 5  ;;  %3112 = vrot.lane.b32.xlu0 %v6762_v13, %s8784_s18  ;;  %v1258_v41 = vsel %vm8863_vm5, %v1253_v37, %v1257_v10  ;;  %v1232_v45 = vor.u32 %v1231_v36, %v1228_v9  ;;  %v1241_v62 = vrot.slane %v1239_v20, 4  ;;  %v9975_v13 = vld [vmem:[%s8824_s17 + $0x1ac] sm:$0xf]  ;;  %v9999_v37 = vld [vmem:[%s8824_s17 + $0x1b4] sm:$0x1] }
 0x10a   : > { %v3206_v33 = vsel %vm3164_vm6, %v6609_v46, %v9705_v34  ;;  %v1263_v16 = vrot.slane %v1262_v51, 4  ;;  %v3203_v54 = vsel %vm3164_vm6, %v6608_v55, %v9713_v52  ;;  %v2184_v1 = vrot.slane %v9901_v29, 5  ;;  %v9977_v29 = vpop.permute.xlu1 %3074 }
 0x10b   : > { %v2183_v11 = vrot.slane %v2181_v58, 4  ;;  %v1233_v28 = vrot.slane %v1232_v45, 4  ;;  %v1242_v44 = vor.u32 %v1241_v62, %v1237_v15  ;;  %v2187_v42 = vrot.slane %v9913_v48, 5 }
 0x10c   : > { %v6584_v12 = vrot.slane %v9918_v59, 9  ;;  %v1268_v23 = vsel %vm8863_vm5, %v1263_v16, %v1267_v60  ;;  %v2186_v4 = vrot.slane %v2184_v1, 4  ;;  %v2178_v52 = vrot.slane %v273_v6, 5 }
 0x10d   : > { %v2185_v34 = vsel %vm8817_vm2, %v2183_v11, %v2184_v1  ;;  %v6701_v2 = vcombine.low %v1258_v41, %v1268_v23  ;;  %v1238_v48 = vsel %vm8863_vm5, %v1233_v28, %v1237_v15  ;;  %v1243_v10 = vrot.slane %v1242_v44, 4  ;;  %v10017_v15 = vld [vmem:[%s8824_s17 + $0x1a8] sm:$0xf]  ;;  %v10034_v28 = vpop.permute.xlu0 %2756  ;;  %v8685_v23 = vld [vmem:[%s8824_s17 + $0x94] sm:$0xf] }
 0x10e   : > { %v9983_v59 = vsel %vm3357_vm7, %v3206_v33, %v9759_v47  ;;  %v2188_v6 = vsel %vm8817_vm2, %v2186_v4, %v2187_v42  ;;  %v2179_v60 = vsel %vm8817_vm2, %v6584_v12, %v2178_v52  ;;  %v2180_v9 = vrot.slane %v2178_v52, 4  ;;  %v10029_v33 = vpop.permute.xlu1 %2758 }
 0x10f   : > { %v9996_v50 = vsel %vm3357_vm7, %v3203_v54, %v9772_v30  ;;  %2798 = vrot.lane.b32.xlu1 %v6701_v2, %s8785_s19  ;;  %v1248_v47 = vsel %vm8863_vm5, %v1243_v10, %v9931_v5  ;;  %v6765_v36 = vcombine.low %v2185_v34, %v2188_v6  ;;  %v1289_v20 = vshll.u32 %v9975_v13, 16  ;;  %v8686_v34 = vld [vmem:[%s8824_s17 + $0x98] sm:$0xf]  ;;  %v8687_v10 = vld [vmem:[%s8824_s17 + $0x8c] sm:$0xf] }
 0x110   : > { %v1293_v63 = vshrl.u32 %v9975_v13, 16  ;;  %7897 = vmatprep.mubr.msk.bf16.mxu1 %vm3644_vm8, %v9996_v50  ;;  %v6700_v30 = vcombine.low %v1238_v48, %v1248_v47  ;;  %v2182_v46 = vsel %vm8817_vm2, %v2180_v9, %v2181_v58  ;;  %v1299_v31 = vshll.u32 %v9986_v25, 16  ;;  %8041 = vmatprep.mubr.msk.bf16.mxu0 %vm3644_vm8, %v9996_v50  ;;  %v8688_v6 = vld [vmem:[%s8824_s17 + $0x90] sm:$0xf] }
 0x111   : > { %v1303_v51 = vshrl.u32 %v9986_v25, 16  ;;  %7898 = vmatmul.mubr.msk.bf16.gmra.mrb[20].mxu1 %vm3644_vm8, %v9983_v59  ;;  %v6764_v5 = vcombine.low %v2179_v60, %v2182_v46  ;;  %v1291_v19 = vrot.slane %v1289_v20, 5  ;;  %v1309_v55 = vshll.u32 %v9999_v37, 16  ;;  %8042 = vmatmul.mubr.msk.bf16.gmra.mrb[24].mxu0 %vm3644_vm8, %v9983_v59 }
 0x112   : > { %v1295_v43 = vrot.slane %v1293_v63, 4  ;;  %2796 = vrot.lane.b32.xlu0 %v6700_v30, %s8785_s19  ;;  %v1301_v58 = vrot.slane %v1299_v31, 5  ;;  %v1270_v45 = vshrl.u32 %v10008_v35, 16  ;;  %v1273_v62 = vshll.u32 %v10008_v35, 16 }
 0x113   : > { %v1305_v41 = vrot.slane %v1303_v51, 4  ;;  %3118 = vrot.lane.b32.xlu1 %v6765_v36, %s8784_s18  ;;  %v1311_v54 = vrot.slane %v1309_v55, 5  ;;  %v1279_v11 = vshll.u32 %v10017_v15, 16  ;;  %v1283_v1 = vshrl.u32 %v10017_v15, 16 }
 0x114   : > { %v1296_v16 = vor.u32 %v1295_v43, %v1291_v19  ;;  %v1272_v42 = vrot.slane %v1270_v45, 4  ;;  %v1275_v12 = vrot.slane %v1273_v62, 5  ;;  %v6611_v4 = vcombine.low %v8685_v23, %v8686_v34 }
 0x115   : > { %v1306_v44 = vor.u32 %v1305_v41, %v1301_v58  ;;  %v1281_v2 = vrot.slane %v1279_v11, 5  ;;  %v1285_v48 = vrot.slane %v1283_v1, 4  ;;  %v6610_v60 = vcombine.low %v8687_v10, %v8688_v6  ;;  %v10070_v11 = vld [vmem:[%s8824_s17 + $0x1c4] sm:$0xf] }
 0x116   : > { %v1297_v52 = vrot.slane %v1296_v16, 4  ;;  %3116 = vrot.lane.b32.xlu0 %v6764_v5, %s8784_s18  ;;  %v1276_v47 = vor.u32 %v1275_v12, %v1272_v42  ;;  %v3212_v36 = vsel %vm3164_vm6, %v6611_v4, %v9787_v18  ;;  %v2194_v20 = vrot.slane %v9975_v13, 5  ;;  %v10053_v18 = vld [vmem:[%s8824_s17 + $0x1c0] sm:$0xf]  ;;  %v10055_v13 = vpop.permute.xlu1 %3078  ;;  %v10086_v42 = vld [vmem:[%s8824_s17 + $0x1b8] sm:$0xf] }
 0x117   : > { %v1307_v9 = vrot.slane %v1306_v44, 4  ;;  %v1286_v30 = vor.u32 %v1285_v48, %v1281_v2  ;;  %v3209_v46 = vsel %vm3164_vm6, %v6610_v60, %v9793_v17  ;;  %v2197_v31 = vrot.slane %v9986_v25, 5  ;;  %v10058_v25 = vpop.permute.xlu0 %3076  ;;  %v10100_v48 = vld [vmem:[%s8824_s17 + $0x1bc] sm:$0xf] }
 0x118   : > { %v1302_v63 = vsel %vm8863_vm5, %v1297_v52, %v1301_v58  ;;  %v1277_v5 = vrot.slane %v1276_v47, 4  ;;  %v2196_v43 = vrot.slane %v2194_v20, 4  ;;  %v2200_v55 = vrot.slane %v9999_v37, 5 }
 0x119   : > { %v1312_v51 = vsel %vm8863_vm5, %v1307_v9, %v1311_v54  ;;  %v1287_v41 = vrot.slane %v1286_v30, 4  ;;  %v2199_v45 = vrot.slane %v2197_v31, 4  ;;  %v6585_v17 = vrot.slane %v10008_v35, 9 }
 0x11a   : > { %v6703_v58 = vcombine.low %v1302_v63, %v1312_v51  ;;  %v1282_v62 = vsel %vm8863_vm5, %v1277_v5, %v1281_v2  ;;  %v2198_v16 = vsel %vm8817_vm2, %v2196_v43, %v2197_v31  ;;  %v2191_v37 = vrot.slane %v10017_v15, 5  ;;  %v10082_v15 = vld [vmem:[%s8824_s17 + $0x1c8] sm:$0x1]  ;;  %v10112_v47 = vpop.permute.xlu1 %2762 }
 0x11b   : > { %v10067_v54 = vsel %vm3357_vm7, %v3212_v36, %v9835_v22  ;;  %v1292_v35 = vsel %vm8863_vm5, %v1287_v41, %v1291_v19  ;;  %v2201_v1 = vsel %vm8817_vm2, %v2199_v45, %v2200_v55  ;;  %v10079_v44 = vsel %vm3357_vm7, %v3209_v46, %v9843_v56  ;;  %v10115_v31 = vpop.permute.xlu0 %2760  ;;  %v8689_v45 = vld [vmem:[%s8824_s17 + $0xa8] sm:$0xf] }
 0x11c   : > { %2802 = vrot.lane.b32.xlu1 %v6703_v58, %s8785_s19  ;;  %v1333_v22 = vshll.u32 %v10053_v18, 16  ;;  %v6702_v12 = vcombine.low %v1282_v62, %v1292_v35  ;;  %v6767_v23 = vcombine.low %v2198_v16, %v2201_v1  ;;  %v2192_v34 = vsel %vm8817_vm2, %v6585_v17, %v2191_v37  ;;  %7901 = vmatprep.mubr.msk.bf16.mxu1 %vm3644_vm8, %v10079_v44  ;;  %v8690_v17 = vld [vmem:[%s8824_s17 + $0xac] sm:$0xf]  ;;  %v8691_v35 = vld [vmem:[%s8824_s17 + $0xa0] sm:$0xf] }
 0x11d   : > { %v2193_v19 = vrot.slane %v2191_v37, 4  ;;  %8045 = vmatprep.mubr.msk.bf16.mxu0 %vm3644_vm8, %v10079_v44  ;;  %v1337_v4 = vshrl.u32 %v10053_v18, 16  ;;  %v1343_v52 = vshll.u32 %v10070_v11, 16  ;;  %v1347_v2 = vshrl.u32 %v10070_v11, 16  ;;  %7902 = vmatmul.mubr.msk.bf16.gmra.mrb[24].mxu1 %vm3644_vm8, %v10067_v54  ;;  %v8692_v1 = vld [vmem:[%s8824_s17 + $0xa4] sm:$0xf] }
 0x11e   : > { %v10094_v56 = vrot.slane %v1333_v22, 5  ;;  %8046 = vmatmul.mubr.msk.bf16.gmra.mrb[28].mxu0 %vm3644_vm8, %v10067_v54  ;;  %2800 = vrot.lane.b32.xlu0 %v6702_v12, %s8785_s19  ;;  %v1353_v6 = vshll.u32 %v10082_v15, 16  ;;  %v1314_v60 = vshrl.u32 %v10086_v42, 16  ;;  %v1317_v9 = vshll.u32 %v10086_v42, 16 }
 0x11f   : > { %v2195_v10 = vsel %vm8817_vm2, %v2193_v19, %v2194_v20  ;;  %v1339_v63 = vrot.slane %v1337_v4, 4  ;;  %v1345_v30 = vrot.slane %v1343_v52, 5  ;;  %v1349_v46 = vrot.slane %v1347_v2, 4 }
 0x120   : > { %3122 = vrot.lane.b32.xlu1 %v6767_v23, %s8784_s18  ;;  %v6766_v36 = vcombine.low %v2192_v34, %v2195_v10  ;;  %v1355_v20 = vrot.slane %v1353_v6, 5  ;;  %v1316_v51 = vrot.slane %v1314_v60, 4  ;;  %v1319_v5 = vrot.slane %v1317_v9, 5  ;;  %v10131_v60 = vpop.permute.xlu1 %3082 }
 0x121   : > { %v1323_v43 = vshll.u32 %v10100_v48, 16  ;;  %v1340_v55 = vor.u32 %v1339_v63, %v10094_v56  ;;  %v1350_v58 = vor.u32 %v1349_v46, %v1345_v30  ;;  %v1327_v41 = vshrl.u32 %v10100_v48, 16  ;;  %v10139_v63 = vld [vmem:[%s8824_s17 + $0x1d4] sm:$0xf]  ;;  %v10141_v46 = vpop.permute.xlu0 %3080 }
 0x122   : > { %v6613_v62 = vcombine.low %v8689_v45, %v8690_v17  ;;  %3120 = vrot.lane.b32.xlu0 %v6766_v36, %s8784_s18  ;;  %v1320_v16 = vor.u32 %v1319_v5, %v1316_v51  ;;  %v6612_v22 = vcombine.low %v8691_v35, %v8692_v1  ;;  %v2207_v12 = vrot.slane %v10053_v18, 5  ;;  %v10164_v45 = vld [vmem:[%s8824_s17 + $0x1dc] sm:$0x1] }
 0x123   : > { %v1325_v37 = vrot.slane %v1323_v43, 5  ;;  %v1341_v23 = vrot.slane %v1340_v55, 4  ;;  %v1351_v34 = vrot.slane %v1350_v58, 4  ;;  %v1329_v19 = vrot.slane %v1327_v41, 4  ;;  %v10154_v55 = vld [vmem:[%s8824_s17 + $0x1d8] sm:$0xf] }
 0x124   : > { %v3218_v4 = vsel %vm3164_vm6, %v6613_v62, %v9869_v57  ;;  %v1321_v52 = vrot.slane %v1320_v16, 4  ;;  %v3215_v2 = vsel %vm3164_vm6, %v6612_v22, %v9875_v14  ;;  %v2209_v10 = vrot.slane %v2207_v12, 4 }
 0x125   : > { %v2210_v6 = vrot.slane %v10070_v11, 5  ;;  %v1346_v9 = vsel %vm8863_vm5, %v1341_v23, %v1345_v30  ;;  %v1356_v18 = vsel %vm8863_vm5, %v1351_v34, %v1355_v20  ;;  %v1330_v36 = vor.u32 %v1329_v19, %v1325_v37  ;;  %v288_v23 = vld [vmem:[%s8824_s17 + $0x1d0] sm:$0xf] }
 0x126   : > { %v2213_v57 = vrot.slane %v10082_v15, 5  ;;  %v6705_v14 = vcombine.low %v1346_v9, %v1356_v18  ;;  %v1326_v11 = vsel %vm8863_vm5, %v1321_v52, %v1325_v37  ;;  %v6586_v20 = vrot.slane %v10086_v42, 9 }
 0x127   : > { %v2211_v51 = vsel %vm8817_vm2, %v2209_v10, %v2210_v6  ;;  %v2212_v30 = vrot.slane %v2210_v6, 4  ;;  %v1331_v5 = vrot.slane %v1330_v36, 4  ;;  %v2204_v43 = vrot.slane %v10100_v48, 5 }
 0x128   : > { %v10151_v15 = vsel %vm3357_vm7, %v3218_v4, %v9903_v53  ;;  %2806 = vrot.lane.b32.xlu1 %v6705_v14, %s8785_s19  ;;  %v10161_v41 = vsel %vm3357_vm7, %v3215_v2, %v9920_v49  ;;  %v1377_v42 = vshll.u32 %v10139_v63, 16  ;;  %v1381_v48 = vshrl.u32 %v10139_v63, 16  ;;  %v10169_v53 = vld [vmem:[%s8824_s17 + $0x1cc] sm:$0xf]  ;;  %v10195_v2 = vpop.permute.xlu0 %2764 }
 0x129   : > { %12123 = vst [vmem:[#allocation2_spill] sm:$0xff] %v10151_v15  ;;  %v2214_v58 = vsel %vm8817_vm2, %v2212_v30, %v2213_v57  ;;  %v1336_v17 = vsel %vm8863_vm5, %v1331_v5, %v10094_v56  ;;  %v2205_v16 = vsel %vm8817_vm2, %v6586_v20, %v2204_v43  ;;  %v2206_v37 = vrot.slane %v2204_v43, 4  ;;  %7905 = vmatprep.mubr.msk.bf16.mxu1 %vm3644_vm8, %v10161_v41  ;;  %v10188_v56 = vpop.permute.xlu1 %2766  ;;  %v8693_v5 = vld [vmem:[%s8824_s17 + $0xbc] sm:$0xf]  ;;  %v8694_v20 = vld [vmem:[%s8824_s17 + $0xc0] sm:$0xf] }
 0x12a   : > { %v6769_v62 = vcombine.low %v2211_v51, %v2214_v58  ;;  %8049 = vmatprep.mubr.msk.bf16.mxu0 %vm3644_vm8, %v10161_v41  ;;  %v6704_v49 = vcombine.low %v1326_v11, %v1336_v17  ;;  %v10180_v35 = vrot.slane %v1377_v42, 5  ;;  %v1383_v1 = vrot.slane %v1381_v48, 4  ;;  %7906 = vmatmul.mubr.msk.bf16.gmra.mrb[28].mxu1 %vm3644_vm8, %v10151_v15  ;;  %v8695_v48 = vld [vmem:[%s8824_s17 + $0xb4] sm:$0xf]  ;;  %v8696_v17 = vld [vmem:[%s8824_s17 + $0xb8] sm:$0xf] }
 0x12b   : > { %v1387_v22 = vshll.u32 %v10154_v55, 16  ;;  %8050 = vmatmul.mubr.msk.bf16.gmra.mrb[32].mxu0 %vm3644_vm8, %v10151_v15  ;;  %v2208_v34 = vsel %vm8817_vm2, %v2206_v37, %v2207_v12  ;;  %v1391_v19 = vshrl.u32 %v10154_v55, 16  ;;  %v1397_v4 = vshll.u32 %v10164_v45, 16 }
 0x12c   : > { %v1358_v52 = vshrl.u32 %v10169_v53, 16  ;;  %2804 = vrot.lane.b32.xlu0 %v6704_v49, %s8785_s19  ;;  %3126 = vrot.lane.b32.xlu1 %v6769_v62, %s8784_s18  ;;  %v6768_v10 = vcombine.low %v2205_v16, %v2208_v34  ;;  %v1384_v6 = vor.u32 %v1383_v1, %v10180_v35  ;;  %v1361_v9 = vshll.u32 %v10169_v53, 16 }
 0x12d   : > { %v1389_v12 = vrot.slane %v1387_v22, 5  ;;  %v1393_v18 = vrot.slane %v1391_v19, 4  ;;  %v1399_v36 = vrot.slane %v1397_v4, 5  ;;  %v1367_v14 = vshll.u32 %v288_v23, 16  ;;  %v10211_v34 = vpop.permute.xlu1 %3086 }
 0x12e   : > { %v1360_v57 = vrot.slane %v1358_v52, 4  ;;  %v1385_v11 = vrot.slane %v1384_v6, 4  ;;  %v1363_v51 = vrot.slane %v1361_v9, 5  ;;  %v1371_v30 = vshrl.u32 %v288_v23, 16 }
 0x12f   : > { %v6615_v43 = vcombine.low %v8693_v5, %v8694_v20  ;;  %v1394_v58 = vor.u32 %v1393_v18, %v1389_v12  ;;  %v1369_v42 = vrot.slane %v1367_v14, 5  ;;  %v6614_v62 = vcombine.low %v8695_v48, %v8696_v17  ;;  %v10254_v17 = vld [vmem:[%s8824_s17 + $0x1e0] sm:$0xf] }
 0x130   : > { %v2220_v16 = vrot.slane %v10139_v63, 5  ;;  %3124 = vrot.lane.b32.xlu0 %v6768_v10, %s8784_s18  ;;  %v1390_v37 = vsel %vm8863_vm5, %v1385_v11, %v1389_v12  ;;  %v1364_v49 = vor.u32 %v1363_v51, %v1360_v57  ;;  %v1373_v1 = vrot.slane %v1371_v30, 4  ;;  %v10216_v10 = vpop.permute.xlu0 %3084  ;;  %v10225_v11 = vld [vmem:[%s8824_s17 + $0x1e8] sm:$0xf] }
 0x131   : > { %v3224_v22 = vsel %vm3164_vm6, %v6615_v43, %v9948_v7  ;;  %v1395_v19 = vrot.slane %v1394_v58, 4  ;;  %v3221_v4 = vsel %vm3164_vm6, %v6614_v62, %v9952_v32  ;;  %v2223_v63 = vrot.slane %v10154_v55, 5  ;;  %v10245_v43 = vld [vmem:[%s8824_s17 + $0x1f0] sm:$0x1] }
 0x132   : > { %v2222_v52 = vrot.slane %v2220_v16, 4  ;;  %v1365_v6 = vrot.slane %v1364_v49, 4  ;;  %v1374_v12 = vor.u32 %v1373_v1, %v1369_v42  ;;  %v2226_v9 = vrot.slane %v10164_v45, 5  ;;  %v293_v1 = vld [vmem:[%s8824_s17 + $0x1e4] sm:$0xf] }
 0x133   : > { %v6587_v18 = vrot.slane %v10169_v53, 9  ;;  %v1400_v7 = vsel %vm8863_vm5, %v1395_v19, %v1399_v36  ;;  %v2225_v32 = vrot.slane %v2223_v63, 4  ;;  %v2217_v14 = vrot.slane %v288_v23, 5  ;;  %v10234_v53 = vld [vmem:[%s8824_s17 + $0x1ec] sm:$0xf] }
 0x134   : > { %v2224_v57 = vsel %vm8817_vm2, %v2222_v52, %v2223_v63  ;;  %v6707_v55 = vcombine.low %v1390_v37, %v1400_v7  ;;  %v1370_v51 = vsel %vm8863_vm5, %v1365_v6, %v1369_v42  ;;  %v1375_v30 = vrot.slane %v1374_v12, 4 }
 0x135   : > { %v10231_v45 = vsel %vm3357_vm7, %v3224_v22, %v9977_v29  ;;  %v2227_v36 = vsel %vm8817_vm2, %v2225_v32, %v2226_v9  ;;  %v2218_v23 = vsel %vm8817_vm2, %v6587_v18, %v2217_v14  ;;  %v2219_v5 = vrot.slane %v2217_v14, 4  ;;  %v10269_v22 = vpop.permute.xlu0 %2768 }
 0x136   : > { %12124 = vst [vmem:[#allocation3_spill] sm:$0xff] %v10231_v45  ;;  %v10242_v20 = vsel %vm3357_vm7, %v3221_v4, %v9988_v61  ;;  %2810 = vrot.lane.b32.xlu1 %v6707_v55, %s8785_s19  ;;  %v1380_v29 = vsel %vm8863_vm5, %v1375_v30, %v10180_v35  ;;  %v6771_v58 = vcombine.low %v2224_v57, %v2227_v36  ;;  %v1421_v42 = vshll.u32 %v10225_v11, 16  ;;  %v10258_v61 = vpop.permute.xlu1 %2770  ;;  %v8697_v30 = vld [vmem:[%s8824_s17 + $0xd0] sm:$0xf]  ;;  %v8698_v36 = vld [vmem:[%s8824_s17 + $0xd4] sm:$0xf] }
 0x137   : > { %12125 = vst [vmem:[#allocation4_spill] sm:$0xff] %v10242_v20  ;;  %v1425_v48 = vshrl.u32 %v10225_v11, 16  ;;  %7909 = vmatprep.mubr.msk.bf16.mxu1 %vm3644_vm8, %v10242_v20  ;;  %v6706_v62 = vcombine.low %v1370_v51, %v1380_v29  ;;  %v2221_v37 = vsel %vm8817_vm2, %v2219_v5, %v2220_v16  ;;  %v1431_v49 = vshll.u32 %v10234_v53, 16  ;;  %8053 = vmatprep.mubr.msk.bf16.mxu0 %vm3644_vm8, %v10242_v20 }
 0x138   : > { %v1435_v35 = vshrl.u32 %v10234_v53, 16  ;;  %7910 = vmatmul.mubr.msk.bf16.gmra.mrb[32].mxu1 %vm3644_vm8, %v10231_v45  ;;  %v6770_v19 = vcombine.low %v2218_v23, %v2221_v37  ;;  %v10271_v4 = vrot.slane %v1421_v42, 5  ;;  %v1441_v16 = vshll.u32 %v10245_v43, 16  ;;  %8054 = vmatmul.mubr.msk.bf16.gmra.mrb[36].mxu0 %vm3644_vm8, %v10231_v45  ;;  %v8699_v42 = vld [vmem:[%s8824_s17 + $0xc8] sm:$0xf] }
 0x139   : > { %v1427_v52 = vrot.slane %v1425_v48, 4  ;;  %2808 = vrot.lane.b32.xlu0 %v6706_v62, %s8785_s19  ;;  %v1433_v63 = vrot.slane %v1431_v49, 5  ;;  %v2239_v12 = vrot.slane %v10245_v43, 5  ;;  %v1402_v9 = vshrl.u32 %v10254_v17, 16  ;;  %v8700_v48 = vld [vmem:[%s8824_s17 + $0xcc] sm:$0xf] }
 0x13a   : > { %v1437_v6 = vrot.slane %v1435_v35, 4  ;;  %3130 = vrot.lane.b32.xlu1 %v6771_v58, %s8784_s18  ;;  %v1443_v7 = vrot.slane %v1441_v16, 5  ;;  %v1405_v57 = vshll.u32 %v10254_v17, 16  ;;  %v1411_v32 = vshll.u32 %v293_v1, 16  ;;  %v10286_v37 = vpop.permute.xlu1 %3090  ;;  %v10292_v16 = vpop.permute.xlu0 %3088 }
 0x13b   : > { %v1428_v18 = vor.u32 %v1427_v52, %v10271_v4  ;;  %v1404_v55 = vrot.slane %v1402_v9, 4  ;;  %v1415_v51 = vshrl.u32 %v293_v1, 16  ;;  %v6617_v23 = vcombine.low %v8697_v30, %v8698_v36 }
 0x13c   : > { %v1438_v14 = vor.u32 %v1437_v6, %v1433_v63  ;;  %v1407_v43 = vrot.slane %v1405_v57, 5  ;;  %v1413_v29 = vrot.slane %v1411_v32, 5  ;;  %v6616_v62 = vcombine.low %v8699_v42, %v8700_v48 }
 0x13d   : > { %v1429_v5 = vrot.slane %v1428_v18, 4  ;;  %3128 = vrot.lane.b32.xlu0 %v6770_v19, %s8784_s18  ;;  %v1417_v49 = vrot.slane %v1415_v51, 4  ;;  %v3230_v35 = vsel %vm3164_vm6, %v6617_v23, %v10029_v33  ;;  %v2233_v52 = vrot.slane %v10225_v11, 5 }
 0x13e   : > { %v1439_v58 = vrot.slane %v1438_v14, 4  ;;  %v1408_v9 = vor.u32 %v1407_v43, %v1404_v55  ;;  %v3227_v18 = vsel %vm3164_vm6, %v6616_v62, %v10034_v28  ;;  %v2236_v19 = vrot.slane %v10234_v53, 5  ;;  %v10338_v62 = vld [vmem:[%s8824_s17 + $0x1f4] sm:$0xf] }
 0x13f   : > { %v1434_v6 = vsel %vm8863_vm5, %v1429_v5, %v1433_v63  ;;  %v1418_v32 = vor.u32 %v1417_v49, %v1413_v29  ;;  %v2235_v14 = vrot.slane %v2233_v52, 4  ;;  %v6588_v33 = vrot.slane %v10254_v17, 9  ;;  %v10303_v63 = vld [vmem:[%s8824_s17 + $0x1fc] sm:$0xf]  ;;  %v10316_v17 = vld [vmem:[%s8824_s17 + $0x200] sm:$0xf] }
 0x140   : > { %v1444_v57 = vsel %vm8863_vm5, %v1439_v58, %v1443_v7  ;;  %v1409_v51 = vrot.slane %v1408_v9, 4  ;;  %v2238_v30 = vrot.slane %v2236_v19, 4  ;;  %v2230_v36 = vrot.slane %v293_v1, 5  ;;  %v10344_v58 = vpop.permute.xlu0 %2772  ;;  %v10351_v9 = vld [vmem:[%s8824_s17 + $0x1f8] sm:$0xf] }
 0x141   : > { %v6709_v11 = vcombine.low %v1434_v6, %v1444_v57  ;;  %v1419_v55 = vrot.slane %v1418_v32, 4  ;;  %v2237_v28 = vsel %vm8817_vm2, %v2235_v14, %v2236_v19  ;;  %v10309_v53 = vsel %vm3357_vm7, %v3230_v35, %v10055_v13  ;;  %v10326_v13 = vld [vmem:[%s8824_s17 + $0x204] sm:$0x1] }
 0x142   : > { %12126 = vst [vmem:[#allocation5_spill] sm:$0xff] %v10309_v53  ;;  %v10313_v7 = vsel %vm3357_vm7, %v3227_v18, %v10058_v25  ;;  %v1414_v1 = vsel %vm8863_vm5, %v1409_v51, %v1413_v29  ;;  %v2240_v23 = vsel %vm8817_vm2, %v2238_v30, %v2239_v12  ;;  %v2231_v5 = vsel %vm8817_vm2, %v6588_v33, %v2230_v36  ;;  %v10330_v25 = vpop.permute.xlu1 %2774 }
 0x143   : > { %12127 = vst [vmem:[#allocation6_spill] sm:$0xff] %v10313_v7  ;;  %2814 = vrot.lane.b32.xlu1 %v6709_v11, %s8785_s19  ;;  %v2232_v43 = vrot.slane %v2230_v36, 4  ;;  %7913 = vmatprep.mubr.msk.bf16.mxu1 %vm3644_vm8, %v10313_v7  ;;  %v1424_v42 = vsel %vm8863_vm5, %v1419_v55, %v10271_v4  ;;  %v6773_v29 = vcombine.low %v2237_v28, %v2240_v23  ;;  %v1465_v48 = vshll.u32 %v10303_v63, 16 }
 0x144   : > { %v1469_v12 = vshrl.u32 %v10303_v63, 16  ;;  %7914 = vmatmul.mubr.msk.bf16.gmra.mrb[36].mxu1 %vm3644_vm8, %v10309_v53  ;;  %8057 = vmatprep.mubr.msk.bf16.mxu0 %vm3644_vm8, %v10313_v7  ;;  %v6708_v49 = vcombine.low %v1414_v1, %v1424_v42  ;;  %v1475_v4 = vshll.u32 %v10316_v17, 16  ;;  %v1479_v6 = vshrl.u32 %v10316_v17, 16 }
 0x145   : > { %v2234_v35 = vsel %vm8817_vm2, %v2232_v43, %v2233_v52  ;;  %8058 = vmatmul.mubr.msk.bf16.gmra.mrb[40].mxu0 %vm3644_vm8, %v10309_v53  ;;  %v1467_v19 = vrot.slane %v1465_v48, 5  ;;  %v1485_v32 = vshll.u32 %v10326_v13, 16  ;;  %v1446_v33 = vshrl.u32 %v10338_v62, 16  ;;  %v8702_v43 = vld [vmem:[%s8824_s17 + $0xe8] sm:$0xf] }
 0x146   : > { %v6772_v18 = vcombine.low %v2231_v5, %v2234_v35  ;;  %v1471_v57 = vrot.slane %v1469_v12, 4  ;;  %2812 = vrot.lane.b32.xlu0 %v6708_v49, %s8785_s19  ;;  %v1477_v52 = vrot.slane %v1475_v4, 5  ;;  %v1481_v14 = vrot.slane %v1479_v6, 4  ;;  %v8701_v5 = vld [vmem:[%s8824_s17 + $0xe4] sm:$0xf] }
 0x147   : > { %3134 = vrot.lane.b32.xlu1 %v6773_v29, %s8784_s18  ;;  %v1449_v11 = vshll.u32 %v10338_v62, 16  ;;  %v1487_v30 = vrot.slane %v1485_v32, 5  ;;  %v1455_v36 = vshll.u32 %v10351_v9, 16  ;;  %v1459_v55 = vshrl.u32 %v10351_v9, 16  ;;  %v10364_v29 = vpop.permute.xlu1 %3094  ;;  %v8703_v35 = vld [vmem:[%s8824_s17 + $0xdc] sm:$0xf] }
 0x148   : > { %v1472_v51 = vor.u32 %v1471_v57, %v1467_v19  ;;  %v1482_v28 = vor.u32 %v1481_v14, %v1477_v52  ;;  %v1448_v1 = vrot.slane %v1446_v33, 4  ;;  %v6619_v42 = vcombine.low %v8701_v5, %v8702_v43  ;;  %v8704_v4 = vld [vmem:[%s8824_s17 + $0xe0] sm:$0xf]  ;;  %v10368_v57 = vpop.permute.xlu0 %3092 }
 0x149   : > { %v1451_v23 = vrot.slane %v1449_v11, 5  ;;  %v1457_v12 = vrot.slane %v1455_v36, 5  ;;  %v1461_v49 = vrot.slane %v1459_v55, 4  ;;  %v6618_v6 = vcombine.low %v8703_v35, %v8704_v4  ;;  %v10410_v35 = vld [vmem:[%s8824_s17 + $0x218] sm:$0x1] }
 0x14a   : > { %v1473_v48 = vrot.slane %v1472_v51, 4  ;;  %3132 = vrot.lane.b32.xlu0 %v6772_v18, %s8784_s18  ;;  %v1483_v32 = vrot.slane %v1482_v28, 4  ;;  %v3236_v33 = vsel %vm3164_vm6, %v6619_v42, %v10112_v47  ;;  %v2246_v11 = vrot.slane %v10303_v63, 5  ;;  %v10383_v47 = vld [vmem:[%s8824_s17 + $0x210] sm:$0xf] }
 0x14b   : > { %v1452_v14 = vor.u32 %v1451_v23, %v1448_v1  ;;  %v1462_v36 = vor.u32 %v1461_v49, %v1457_v12  ;;  %v3233_v55 = vsel %vm3164_vm6, %v6618_v6, %v10115_v31  ;;  %v2249_v5 = vrot.slane %v10316_v17, 5  ;;  %v10398_v49 = vpop.permute.xlu1 %2778  ;;  %v10414_v4 = vld [vmem:[%s8824_s17 + $0x208] sm:$0xf] }
 0x14c   : > { %v1478_v51 = vsel %vm8863_vm5, %v1473_v48, %v1477_v52  ;;  %v1488_v18 = vsel %vm8863_vm5, %v1483_v32, %v1487_v30  ;;  %v2248_v1 = vrot.slane %v2246_v11, 4  ;;  %v2252_v23 = vrot.slane %v10326_v13, 5  ;;  %v10396_v48 = vld [vmem:[%s8824_s17 + $0x214] sm:$0xf]  ;;  %v10416_v6 = vpop.permute.xlu0 %2776 }
 0x14d   : > { %v1453_v28 = vrot.slane %v1452_v14, 4  ;;  %v6711_v63 = vcombine.low %v1478_v51, %v1488_v18  ;;  %v1463_v52 = vrot.slane %v1462_v36, 4  ;;  %v2251_v43 = vrot.slane %v2249_v5, 4 }
 0x14e   : > { %v6589_v42 = vrot.slane %v10338_v62, 9  ;;  %v2250_v17 = vsel %vm8817_vm2, %v2248_v1, %v2249_v5  ;;  %v2243_v30 = vrot.slane %v10351_v9, 5  ;;  %v10393_v13 = vsel %vm3357_vm7, %v3236_v33, %v10131_v60  ;;  %v10430_v5 = vld [vmem:[%s8824_s17 + $0x20c] sm:$0xf] }
 0x14f   : > { %v1458_v31 = vsel %vm8863_vm5, %v1453_v28, %v1457_v12  ;;  %12128 = vst [vmem:[#allocation7_spill] sm:$0xff] %v10393_v13  ;;  %2818 = vrot.lane.b32.xlu1 %v6711_v63, %s8785_s19  ;;  %v1468_v62 = vsel %vm8863_vm5, %v1463_v52, %v1467_v19  ;;  %v2253_v12 = vsel %vm8817_vm2, %v2251_v43, %v2252_v23  ;;  %v1509_v60 = vshll.u32 %v10383_v47, 16 }
 0x150   : > { %v10407_v9 = vsel %vm3357_vm7, %v3233_v55, %v10141_v46  ;;  %v6710_v32 = vcombine.low %v1458_v31, %v1468_v62  ;;  %v6775_v14 = vcombine.low %v2250_v17, %v2253_v12  ;;  %v2244_v19 = vsel %vm8817_vm2, %v6589_v42, %v2243_v30  ;;  %v10444_v62 = vpop.permute.xlu1 %3098 }
 0x151   : > { %12129 = vst [vmem:[#allocation8_spill] sm:$0xff] %v10407_v9  ;;  %v2245_v33 = vrot.slane %v2243_v30, 4  ;;  %7917 = vmatprep.mubr.msk.bf16.mxu1 %vm3644_vm8, %v10407_v9  ;;  %8061 = vmatprep.mubr.msk.bf16.mxu0 %vm3644_vm8, %v10407_v9  ;;  %v10424_v46 = vrot.slane %v1509_v60, 5  ;;  %v1513_v51 = vshrl.u32 %v10383_v47, 16  ;;  %v1519_v36 = vshll.u32 %v10396_v48, 16 }
 0x152   : > { %v1523_v55 = vshrl.u32 %v10396_v48, 16  ;;  %7918 = vmatmul.mubr.msk.bf16.gmra.mrb[40].mxu1 %vm3644_vm8, %v10393_v13  ;;  %8062 = vmatmul.mubr.msk.bf16.gmra.mrb[44].mxu0 %vm3644_vm8, %v10393_v13  ;;  %v1529_v28 = vshll.u32 %v10410_v35, 16  ;;  %v1490_v1 = vshrl.u32 %v10414_v4, 16  ;;  %v1493_v23 = vshll.u32 %v10414_v4, 16 }
 0x153   : > { %2816 = vrot.lane.b32.xlu0 %v6710_v32, %s8785_s19  ;;  %v2247_v18 = vsel %vm8817_vm2, %v2245_v33, %v2246_v11  ;;  %3138 = vrot.lane.b32.xlu1 %v6775_v14, %s8784_s18  ;;  %v1515_v52 = vrot.slane %v1513_v51, 4  ;;  %v1521_v43 = vrot.slane %v1519_v36, 5  ;;  %v1499_v11 = vshll.u32 %v10430_v5, 16  ;;  %v8705_v33 = vld [vmem:[%s8824_s17 + $0xf8] sm:$0xf]  ;;  %v10450_v51 = vpop.permute.xlu0 %3096 }
 0x154   : > { %v6774_v63 = vcombine.low %v2244_v19, %v2247_v18  ;;  %v1525_v42 = vrot.slane %v1523_v55, 4  ;;  %v1531_v31 = vrot.slane %v1529_v28, 5  ;;  %v1492_v17 = vrot.slane %v1490_v1, 4  ;;  %v8706_v14 = vld [vmem:[%s8824_s17 + $0xfc] sm:$0xf] }
 0x155   : > { %v1495_v30 = vrot.slane %v1493_v23, 5  ;;  %v1516_v12 = vor.u32 %v1515_v52, %v10424_v46  ;;  %v1503_v32 = vshrl.u32 %v10430_v5, 16  ;;  %v6621_v19 = vcombine.low %v8705_v33, %v8706_v14  ;;  %v8707_v18 = vld [vmem:[%s8824_s17 + $0xf0] sm:$0xf]  ;;  %v8708_v28 = vld [vmem:[%s8824_s17 + $0xf4] sm:$0xf] }
 0x156   : > { %v1526_v60 = vor.u32 %v1525_v42, %v1521_v43  ;;  %v1501_v55 = vrot.slane %v1499_v11, 5  ;;  %v6620_v1 = vcombine.low %v8707_v18, %v8708_v28  ;;  %v2259_v23 = vrot.slane %v10383_v47, 5 }
 0x157   : > { %3136 = vrot.lane.b32.xlu0 %v6774_v63, %s8784_s18  ;;  %v1496_v36 = vor.u32 %v1495_v30, %v1492_v17  ;;  %v1517_v13 = vrot.slane %v1516_v12, 4  ;;  %v1505_v42 = vrot.slane %v1503_v32, 4  ;;  %v3242_v9 = vsel %vm3164_vm6, %v6621_v19, %v10188_v56  ;;  %v10467_v12 = vld [vmem:[%s8824_s17 + $0x224] sm:$0xf]  ;;  %v10473_v32 = vpop.permute.xlu1 %2782  ;;  %v10482_v19 = vld [vmem:[%s8824_s17 + $0x228] sm:$0xf] }
 0x158   : > { %v1527_v52 = vrot.slane %v1526_v60, 4  ;;  %v3239_v33 = vsel %vm3164_vm6, %v6620_v1, %v10195_v2  ;;  %v2261_v14 = vrot.slane %v2259_v23, 4  ;;  %v2262_v63 = vrot.slane %v10396_v48, 5 }
 0x159   : > { %v1497_v53 = vrot.slane %v1496_v36, 4  ;;  %v1522_v17 = vsel %vm8863_vm5, %v1517_v13, %v1521_v43  ;;  %v1506_v30 = vor.u32 %v1505_v42, %v1501_v55  ;;  %v2265_v11 = vrot.slane %v10410_v35, 5  ;;  %v10484_v36 = vpop.permute.xlu0 %2780 }
 0x15a   : > { %v1532_v47 = vsel %vm8863_vm5, %v1527_v52, %v1531_v31  ;;  %v2263_v48 = vsel %vm8817_vm2, %v2261_v14, %v2262_v63  ;;  %v2264_v60 = vrot.slane %v2262_v63, 4  ;;  %v6590_v43 = vrot.slane %v10414_v4, 9  ;;  %v10494_v4 = vld [vmem:[%s8824_s17 + $0x22c] sm:$0x1]  ;;  %v308_v63 = vld [vmem:[%s8824_s17 + $0x220] sm:$0xf] }
 0x15b   : > { %v6713_v56 = vcombine.low %v1522_v17, %v1532_v47  ;;  %v1502_v2 = vsel %vm8863_vm5, %v1497_v53, %v1501_v55  ;;  %v1507_v13 = vrot.slane %v1506_v30, 4  ;;  %v2256_v31 = vrot.slane %v10430_v5, 5 }
 0x15c   : > { %v10479_v35 = vsel %vm3357_vm7, %v3242_v9, %v10211_v34  ;;  %v2266_v53 = vsel %vm8817_vm2, %v2264_v60, %v2265_v11  ;;  %v10491_v55 = vsel %vm3357_vm7, %v3239_v33, %v10216_v10  ;;  %v1553_v5 = vshll.u32 %v10467_v12, 16  ;;  %v10499_v9 = vld [vmem:[%s8824_s17 + $0x21c] sm:$0xf] }
 0x15d   : > { %12130 = vst [vmem:[#allocation9_spill] sm:$0xff] %v10479_v35  ;;  %2822 = vrot.lane.b32.xlu1 %v6713_v56, %s8785_s19  ;;  %12131 = vst [vmem:[#allocation10_spill] sm:$0xff] %v10491_v55  ;;  %v1557_v34 = vshrl.u32 %v10467_v12, 16  ;;  %v1512_v18 = vsel %vm8863_vm5, %v1507_v13, %v10424_v46  ;;  %v6777_v28 = vcombine.low %v2263_v48, %v2266_v53  ;;  %v2258_v52 = vrot.slane %v2256_v31, 4  ;;  %v10529_v53 = vpop.permute.xlu0 %3100 }
 0x15e   : > { %v2257_v1 = vsel %vm8817_vm2, %v6590_v43, %v2256_v31  ;;  %7921 = vmatprep.mubr.msk.bf16.mxu1 %vm3644_vm8, %v10491_v55  ;;  %8065 = vmatprep.mubr.msk.bf16.mxu0 %vm3644_vm8, %v10491_v55  ;;  %v6712_v10 = vcombine.low %v1502_v2, %v1512_v18  ;;  %v10510_v42 = vrot.slane %v1553_v5, 5  ;;  %v1563_v14 = vshll.u32 %v10482_v19, 16 }
 0x15f   : > { %v1559_v33 = vrot.slane %v1557_v34, 4  ;;  %7922 = vmatmul.mubr.msk.bf16.gmra.mrb[44].mxu1 %vm3644_vm8, %v10479_v35  ;;  %8066 = vmatmul.mubr.msk.bf16.gmra.mrb[48].mxu0 %vm3644_vm8, %v10479_v35  ;;  %v2260_v46 = vsel %vm8817_vm2, %v2258_v52, %v2259_v23  ;;  %v1567_v17 = vshrl.u32 %v10482_v19, 16  ;;  %v1573_v47 = vshll.u32 %v10494_v4, 16  ;;  %v10527_v23 = vpop.permute.xlu1 %3102 }
 0x160   : > { %v1534_v30 = vshrl.u32 %v10499_v9, 16  ;;  %2820 = vrot.lane.b32.xlu0 %v6712_v10, %s8785_s19  ;;  %v6776_v11 = vcombine.low %v2257_v1, %v2260_v46  ;;  %v1565_v2 = vrot.slane %v1563_v14, 5  ;;  %v1537_v48 = vshll.u32 %v10499_v9, 16  ;;  %v8710_v1 = vld [vmem:[%s8824_s17 + $0x110] sm:$0xf] }
 0x161   : > { %3142 = vrot.lane.b32.xlu1 %v6777_v28, %s8784_s18  ;;  %v1560_v56 = vor.u32 %v1559_v33, %v10510_v42  ;;  %v1569_v60 = vrot.slane %v1567_v17, 4  ;;  %v1575_v13 = vrot.slane %v1573_v47, 5  ;;  %v1543_v31 = vshll.u32 %v308_v63, 16  ;;  %v8709_v28 = vld [vmem:[%s8824_s17 + $0x10c] sm:$0xf] }
 0x162   : > { %v1536_v43 = vrot.slane %v1534_v30, 4  ;;  %v1539_v34 = vrot.slane %v1537_v48, 5  ;;  %v1547_v18 = vshrl.u32 %v308_v63, 16  ;;  %v6623_v52 = vcombine.low %v8709_v28, %v8710_v1  ;;  %v8711_v14 = vld [vmem:[%s8824_s17 + $0x104] sm:$0xf] }
 0x163   : > { %v1561_v5 = vrot.slane %v1560_v56, 4  ;;  %v1570_v10 = vor.u32 %v1569_v60, %v1565_v2  ;;  %v1545_v33 = vrot.slane %v1543_v31, 5  ;;  %v8712_v46 = vld [vmem:[%s8824_s17 + $0x108] sm:$0xf]  ;;  %v2272_v55 = vrot.slane %v10467_v12, 5 }
 0x164   : > { %v6622_v35 = vcombine.low %v8711_v14, %v8712_v46  ;;  %3140 = vrot.lane.b32.xlu0 %v6776_v11, %s8784_s18  ;;  %v1540_v47 = vor.u32 %v1539_v34, %v1536_v43  ;;  %v1549_v30 = vrot.slane %v1547_v18, 4  ;;  %v3248_v56 = vsel %vm3164_vm6, %v6623_v52, %v10258_v61  ;;  %v10546_v43 = vpop.permute.xlu1 %2786  ;;  %v10553_v34 = vld [vmem:[%s8824_s17 + $0x238] sm:$0xf] }
 0x165   : > { %v1566_v17 = vsel %vm8863_vm5, %v1561_v5, %v1565_v2  ;;  %v1571_v48 = vrot.slane %v1570_v10, 4  ;;  %v2274_v31 = vrot.slane %v2272_v55, 4  ;;  %v2275_v28 = vrot.slane %v10482_v19, 5  ;;  %v10555_v19 = vpop.permute.xlu0 %2784 }
 0x166   : > { %v3245_v60 = vsel %vm3164_vm6, %v6622_v35, %v10269_v22  ;;  %v1541_v12 = vrot.slane %v1540_v47, 4  ;;  %v1550_v1 = vor.u32 %v1549_v30, %v1545_v33  ;;  %v2278_v11 = vrot.slane %v10494_v4, 5 }
 0x167   : > { %v6591_v2 = vrot.slane %v10499_v9, 9  ;;  %v1576_v61 = vsel %vm8863_vm5, %v1571_v48, %v1575_v13  ;;  %v2276_v5 = vsel %vm8817_vm2, %v2274_v31, %v2275_v28  ;;  %v2277_v22 = vrot.slane %v2275_v28, 4  ;;  %v10564_v13 = vld [vmem:[%s8824_s17 + $0x23c] sm:$0xf]  ;;  %v10593_v28 = vld [vmem:[%s8824_s17 + $0x234] sm:$0xf] }
 0x168   : > { %v2269_v35 = vrot.slane %v308_v63, 5  ;;  %v6715_v18 = vcombine.low %v1566_v17, %v1576_v61  ;;  %v1546_v4 = vsel %vm8863_vm5, %v1541_v12, %v1545_v33  ;;  %v1551_v9 = vrot.slane %v1550_v1, 4  ;;  %v10575_v33 = vld [vmem:[%s8824_s17 + $0x240] sm:$0x1] }
 0x169   : > { %v10561_v52 = vsel %vm3357_vm7, %v3248_v56, %v10286_v37  ;;  %v2279_v10 = vsel %vm8817_vm2, %v2277_v22, %v2278_v11  ;;  %v10572_v46 = vsel %vm3357_vm7, %v3245_v60, %v10292_v16  ;;  %v1597_v47 = vshll.u32 %v10553_v34, 16  ;;  %v10584_v56 = vld [vmem:[%s8824_s17 + $0x230] sm:$0xf] }
 0x16a   : > { %12132 = vst [vmem:[#allocation11_spill] sm:$0xff] %v10561_v52  ;;  %v2270_v63 = vsel %vm8817_vm2, %v6591_v2, %v2269_v35  ;;  %v2271_v14 = vrot.slane %v2269_v35, 4  ;;  %12133 = vst [vmem:[#allocation12_spill] sm:$0xff] %v10572_v46  ;;  %2826 = vrot.lane.b32.xlu1 %v6715_v18, %s8785_s19  ;;  %v1556_v37 = vsel %vm8863_vm5, %v1551_v9, %v10510_v42  ;;  %v1601_v30 = vshrl.u32 %v10553_v34, 16  ;;  %v10607_v35 = vpop.permute.xlu0 %3104 }
 0x16b   : > { %v6779_v17 = vcombine.low %v2276_v5, %v2279_v10  ;;  %7925 = vmatprep.mubr.msk.bf16.mxu1 %vm3644_vm8, %v10572_v46  ;;  %v6714_v16 = vcombine.low %v1546_v4, %v1556_v37  ;;  %v1607_v60 = vshll.u32 %v10564_v13, 16  ;;  %v1611_v31 = vshrl.u32 %v10564_v13, 16  ;;  %8069 = vmatprep.mubr.msk.bf16.mxu0 %vm3644_vm8, %v10572_v46  ;;  %v8716_v46 = vld [vmem:[%s8824_s17 + $0x11c] sm:$0xf] }
 0x16c   : > { %v2273_v48 = vsel %vm8817_vm2, %v2271_v14, %v2272_v55  ;;  %7926 = vmatmul.mubr.msk.bf16.gmra.mrb[48].mxu1 %vm3644_vm8, %v10561_v52  ;;  %v1599_v12 = vrot.slane %v1597_v47, 5  ;;  %v1603_v1 = vrot.slane %v1601_v30, 4  ;;  %v1617_v11 = vshll.u32 %v10575_v33, 16  ;;  %8070 = vmatmul.mubr.msk.bf16.gmra.mrb[52].mxu0 %vm3644_vm8, %v10561_v52  ;;  %v10602_v55 = vpop.permute.xlu1 %3106  ;;  %v8713_v47 = vld [vmem:[%s8824_s17 + $0x120] sm:$0xf] }
 0x16d   : > { %v6778_v42 = vcombine.low %v2270_v63, %v2273_v48  ;;  %2824 = vrot.lane.b32.xlu0 %v6714_v16, %s8785_s19  ;;  %v1609_v2 = vrot.slane %v1607_v60, 5  ;;  %v1613_v61 = vrot.slane %v1611_v31, 4  ;;  %v1578_v5 = vshrl.u32 %v10584_v56, 16  ;;  %v8714_v30 = vld [vmem:[%s8824_s17 + $0x124] sm:$0xf] }
 0x16e   : > { %v1581_v22 = vshll.u32 %v10584_v56, 16  ;;  %3146 = vrot.lane.b32.xlu1 %v6779_v17, %s8784_s18  ;;  %v1604_v18 = vor.u32 %v1603_v1, %v1599_v12  ;;  %v1619_v4 = vrot.slane %v1617_v11, 5  ;;  %v1587_v9 = vshll.u32 %v10593_v28, 16  ;;  %v8715_v52 = vld [vmem:[%s8824_s17 + $0x118] sm:$0xf] }
 0x16f   : > { %v1591_v10 = vshrl.u32 %v10593_v28, 16  ;;  %v1614_v63 = vor.u32 %v1613_v61, %v1609_v2  ;;  %v1580_v14 = vrot.slane %v1578_v5, 4  ;;  %v6625_v16 = vcombine.low %v8713_v47, %v8714_v30  ;;  %v10646_v47 = vld [vmem:[%s8824_s17 + $0x250] sm:$0xf] }
 0x170   : > { %v1583_v37 = vrot.slane %v1581_v22, 5  ;;  %v1605_v48 = vrot.slane %v1604_v18, 4  ;;  %v1589_v60 = vrot.slane %v1587_v9, 5  ;;  %v6624_v7 = vcombine.low %v8715_v52, %v8716_v46  ;;  %v10625_v52 = vpop.permute.xlu1 %2790 }
 0x171   : > { %v1593_v31 = vrot.slane %v1591_v10, 4  ;;  %3144 = vrot.lane.b32.xlu0 %v6778_v42, %s8784_s18  ;;  %v1615_v17 = vrot.slane %v1614_v63, 4  ;;  %v3254_v11 = vsel %vm3164_vm6, %v6625_v16, %v10330_v25  ;;  %v2285_v61 = vrot.slane %v10553_v34, 5  ;;  %v10631_v34 = vld [vmem:[%s8824_s17 + $0x24c] sm:$0xf] }
 0x172   : > { %v1584_v1 = vor.u32 %v1583_v37, %v1580_v14  ;;  %v1610_v5 = vsel %vm8863_vm5, %v1605_v48, %v1609_v2  ;;  %v3251_v18 = vsel %vm3164_vm6, %v6624_v7, %v10344_v58  ;;  %v2288_v9 = vrot.slane %v10564_v13, 5  ;;  %v10633_v2 = vpop.permute.xlu0 %2788  ;;  %v10662_v48 = vld [vmem:[%s8824_s17 + $0x244] sm:$0xf] }
 0x173   : > { %v1594_v22 = vor.u32 %v1593_v31, %v1589_v60  ;;  %v1620_v46 = vsel %vm8863_vm5, %v1615_v17, %v1619_v4  ;;  %v2287_v10 = vrot.slane %v2285_v61, 4  ;;  %v2291_v25 = vrot.slane %v10575_v33, 5 }
 0x174   : > { %v1585_v42 = vrot.slane %v1584_v1, 4  ;;  %v6717_v63 = vcombine.low %v1610_v5, %v1620_v46  ;;  %v2290_v58 = vrot.slane %v2288_v9, 4  ;;  %v6592_v13 = vrot.slane %v10584_v56, 9 }
 0x175   : > { %v1595_v7 = vrot.slane %v1594_v22, 4  ;;  %v2289_v4 = vsel %vm8817_vm2, %v2287_v10, %v2288_v9  ;;  %v2282_v37 = vrot.slane %v10593_v28, 5  ;;  %v10643_v33 = vsel %vm3357_vm7, %v3254_v11, %v10364_v29  ;;  %v10658_v28 = vld [vmem:[%s8824_s17 + $0x254] sm:$0x1]  ;;  %v10676_v22 = vld [vmem:[%s8824_s17 + $0x248] sm:$0xf] }
 0x176   : > { %v1590_v14 = vsel %vm8863_vm5, %v1585_v42, %v1589_v60  ;;  %12134 = vst [vmem:[#allocation13_spill] sm:$0xff] %v10643_v33  ;;  %2830 = vrot.lane.b32.xlu1 %v6717_v63, %s8785_s19  ;;  %v2292_v56 = vsel %vm8817_vm2, %v2290_v58, %v2291_v25  ;;  %v10655_v16 = vsel %vm3357_vm7, %v3251_v18, %v10368_v57  ;;  %v1641_v29 = vshll.u32 %v10631_v34, 16  ;;  %v10682_v18 = vpop.permute.xlu1 %3110  ;;  %v10690_v25 = vpop.permute.xlu0 %3108 }
 0x177   : > { %v1600_v30 = vsel %vm8863_vm5, %v1595_v7, %v1599_v12  ;;  %12135 = vst [vmem:[#allocation14_spill] sm:$0xff] %v10655_v16  ;;  %v6781_v31 = vcombine.low %v2289_v4, %v2292_v56  ;;  %v2283_v17 = vsel %vm8817_vm2, %v6592_v13, %v2282_v37  ;;  %v2284_v12 = vrot.slane %v2282_v37, 4  ;;  %7929 = vmatprep.mubr.msk.bf16.mxu1 %vm3644_vm8, %v10655_v16 }
 0x178   : > { %v6716_v60 = vcombine.low %v1590_v14, %v1600_v30  ;;  %8073 = vmatprep.mubr.msk.bf16.mxu0 %vm3644_vm8, %v10655_v16  ;;  %v10670_v57 = vrot.slane %v1641_v29, 5  ;;  %v1645_v1 = vshrl.u32 %v10631_v34, 16  ;;  %v1651_v11 = vshll.u32 %v10646_v47, 16  ;;  %7930 = vmatmul.mubr.msk.bf16.gmra.mrb[52].mxu1 %vm3644_vm8, %v10643_v33 }
 0x179   : > { %v1655_v5 = vshrl.u32 %v10646_v47, 16  ;;  %8074 = vmatmul.mubr.msk.bf16.gmra.mrb[56].mxu0 %vm3644_vm8, %v10643_v33  ;;  %v2286_v9 = vsel %vm8817_vm2, %v2284_v12, %v2285_v61  ;;  %v1661_v46 = vshll.u32 %v10658_v28, 16  ;;  %v1622_v42 = vshrl.u32 %v10662_v48, 16  ;;  %v8718_v12 = vld [vmem:[%s8824_s17 + $0x138] sm:$0xf] }
 0x17a   : > { %2828 = vrot.lane.b32.xlu0 %v6716_v60, %s8785_s19  ;;  %v1625_v10 = vshll.u32 %v10662_v48, 16  ;;  %3150 = vrot.lane.b32.xlu1 %v6781_v31, %s8784_s18  ;;  %v6780_v63 = vcombine.low %v2283_v17, %v2286_v9  ;;  %v1647_v7 = vrot.slane %v1645_v1, 4  ;;  %v1653_v58 = vrot.slane %v1651_v11, 5  ;;  %v8717_v60 = vld [vmem:[%s8824_s17 + $0x134] sm:$0xf] }
 0x17b   : > { %v1657_v13 = vrot.slane %v1655_v5, 4  ;;  %v1663_v14 = vrot.slane %v1661_v46, 5  ;;  %v1624_v61 = vrot.slane %v1622_v42, 4  ;;  %v1631_v37 = vshll.u32 %v10676_v22, 16  ;;  %v8719_v1 = vld [vmem:[%s8824_s17 + $0x12c] sm:$0xf] }
 0x17c   : > { %v1627_v4 = vrot.slane %v1625_v10, 5  ;;  %v1648_v30 = vor.u32 %v1647_v7, %v10670_v57  ;;  %v1635_v29 = vshrl.u32 %v10676_v22, 16  ;;  %v6627_v33 = vcombine.low %v8717_v60, %v8718_v12  ;;  %v8720_v11 = vld [vmem:[%s8824_s17 + $0x130] sm:$0xf] }
 0x17d   : > { %v1658_v56 = vor.u32 %v1657_v13, %v1653_v58  ;;  %v1633_v17 = vrot.slane %v1631_v37, 5  ;;  %v6626_v5 = vcombine.low %v8719_v1, %v8720_v11  ;;  %v2298_v9 = vrot.slane %v10631_v34, 5  ;;  %v10704_v13 = vpop.permute.xlu1 %2794  ;;  %v10709_v37 = vpop.permute.xlu0 %2792  ;;  %v10740_v1 = vld [vmem:[%s8824_s17 + $0x268] sm:$0x1] }
 0x17e   : > { %3148 = vrot.lane.b32.xlu0 %v6780_v63, %s8784_s18  ;;  %v1628_v31 = vor.u32 %v1627_v4, %v1624_v61  ;;  %v1649_v46 = vrot.slane %v1648_v30, 4  ;;  %v1637_v10 = vrot.slane %v1635_v29, 4  ;;  %v3260_v7 = vsel %vm3164_vm6, %v6627_v33, %v10398_v49 }
 0x17f   : > { %v1659_v42 = vrot.slane %v1658_v56, 4  ;;  %v3257_v63 = vsel %vm3164_vm6, %v6626_v5, %v10416_v6  ;;  %v2300_v61 = vrot.slane %v2298_v9, 4  ;;  %v2301_v4 = vrot.slane %v10646_v47, 5  ;;  %v10717_v56 = vld [vmem:[%s8824_s17 + $0x260] sm:$0xf] }
 0x180   : > { %v1629_v16 = vrot.slane %v1628_v31, 4  ;;  %v1654_v34 = vsel %vm8863_vm5, %v1649_v46, %v1653_v58  ;;  %v1638_v49 = vor.u32 %v1637_v10, %v1633_v17  ;;  %v2304_v33 = vrot.slane %v10658_v28, 5  ;;  %v10730_v28 = vld [vmem:[%s8824_s17 + $0x264] sm:$0xf] }
 0x181   : > { %v1664_v30 = vsel %vm8863_vm5, %v1659_v42, %v1663_v14  ;;  %v2302_v47 = vsel %vm8817_vm2, %v2300_v61, %v2301_v4  ;;  %v2303_v60 = vrot.slane %v2301_v4, 4  ;;  %v6593_v58 = vrot.slane %v10662_v48, 9 }
 0x182   : > { %v6719_v6 = vcombine.low %v1654_v34, %v1664_v30  ;;  %v1634_v29 = vsel %vm8863_vm5, %v1629_v16, %v1633_v17  ;;  %v1639_v12 = vrot.slane %v1638_v49, 4  ;;  %v2295_v14 = vrot.slane %v10676_v22, 5  ;;  %v10768_v30 = vpop.permute.xlu0 %3112 }
 0x183   : > { %v10727_v31 = vsel %vm3357_vm7, %v3260_v7, %v10444_v62  ;;  %v2305_v16 = vsel %vm8817_vm2, %v2303_v60, %v2304_v33  ;;  %v10737_v17 = vsel %vm3357_vm7, %v3257_v63, %v10450_v51  ;;  %v1685_v11 = vshll.u32 %v10717_v56, 16  ;;  %v10745_v62 = vld [vmem:[%s8824_s17 + $0x258] sm:$0xf]  ;;  %v10756_v51 = vpop.permute.xlu1 %3114 }
 0x184   : > { %12136 = vst [vmem:[#allocation15_spill] sm:$0xff] %v10727_v31  ;;  %2834 = vrot.lane.b32.xlu1 %v6719_v6, %s8785_s19  ;;  %12137 = vst [vmem:[#allocation16_spill] sm:$0xff] %v10737_v17  ;;  %v1689_v5 = vshrl.u32 %v10717_v56, 16  ;;  %v1644_v46 = vsel %vm8863_vm5, %v1639_v12, %v10670_v57  ;;  %v6783_v42 = vcombine.low %v2302_v47, %v2305_v16  ;;  %v2297_v7 = vrot.slane %v2295_v14, 4  ;;  %v10762_v57 = vld [vmem:[%s8824_s17 + $0x25c] sm:$0xf] }
 0x185   : > { %v2296_v10 = vsel %vm8817_vm2, %v6593_v58, %v2295_v14  ;;  %7933 = vmatprep.mubr.msk.bf16.mxu1 %vm3644_vm8, %v10737_v17  ;;  %8077 = vmatprep.mubr.msk.bf16.mxu0 %vm3644_vm8, %v10737_v17  ;;  %v6718_v63 = vcombine.low %v1634_v29, %v1644_v46  ;;  %v10758_v61 = vrot.slane %v1685_v11, 5  ;;  %v1695_v34 = vshll.u32 %v10730_v28, 16 }
 0x186   : > { %v1691_v4 = vrot.slane %v1689_v5, 4  ;;  %7934 = vmatmul.mubr.msk.bf16.gmra.mrb[56].mxu1 %vm3644_vm8, %v10727_v31  ;;  %8078 = vmatmul.mubr.msk.bf16.gmra.mrb[60].mxu0 %vm3644_vm8, %v10727_v31  ;;  %v2299_v49 = vsel %vm8817_vm2, %v2297_v7, %v2298_v9  ;;  %v1699_v33 = vshrl.u32 %v10730_v28, 16  ;;  %v1705_v6 = vshll.u32 %v10740_v1, 16  ;;  %v8721_v7 = vld [vmem:[%s8824_s17 + $0x148] sm:$0xf] }
 0x187   : > { %v1666_v29 = vshrl.u32 %v10745_v62, 16  ;;  %8157 = vmatprep.mubr.msk.bf16.mxu0 %vm3644_vm8, %v9648_v26  ;;  %2832 = vrot.lane.b32.xlu0 %v6718_v63, %s8785_s19  ;;  %v6782_v47 = vcombine.low %v2296_v10, %v2299_v49  ;;  %v1697_v9 = vrot.slane %v1695_v34, 5  ;;  %v1669_v12 = vshll.u32 %v10745_v62, 16  ;;  %v8722_v63 = vld [vmem:[%s8824_s17 + $0x14c] sm:$0xf]  ;;  %v10788_v45 = vpop.permute.xlu1 %2798 }
 0x188   : > { %3154 = vrot.lane.b32.xlu1 %v6783_v42, %s8784_s18  ;;  %v1692_v60 = vor.u32 %v1691_v4, %v10758_v61  ;;  %v1701_v58 = vrot.slane %v1699_v33, 4  ;;  %v1707_v14 = vrot.slane %v1705_v6, 5  ;;  %v1675_v11 = vshll.u32 %v10762_v57, 16  ;;  %v8723_v31 = vld [vmem:[%s8824_s17 + $0x140] sm:$0xf] }
 0x189   : > { %v1668_v16 = vrot.slane %v1666_v29, 4  ;;  %v1671_v46 = vrot.slane %v1669_v12, 5  ;;  %v1679_v26 = vshrl.u32 %v10762_v57, 16  ;;  %v6629_v42 = vcombine.low %v8721_v7, %v8722_v63  ;;  %v8724_v4 = vld [vmem:[%s8824_s17 + $0x144] sm:$0xf]  ;;  %v10795_v12 = vpop.permute.xlu0 %2796 }
 0x18a   : > { %v1693_v5 = vrot.slane %v1692_v60, 4  ;;  %v1702_v10 = vor.u32 %v1701_v58, %v1697_v9  ;;  %v1677_v49 = vrot.slane %v1675_v11, 5  ;;  %v6628_v17 = vcombine.low %v8723_v31, %v8724_v4 }
 0x18b   : > { %v2311_v34 = vrot.slane %v10717_v56, 5  ;;  %3152 = vrot.lane.b32.xlu0 %v6782_v47, %s8784_s18  ;;  %v1672_v6 = vor.u32 %v1671_v46, %v1668_v16  ;;  %v1681_v29 = vrot.slane %v1679_v26, 4  ;;  %v3266_v60 = vsel %vm3164_vm6, %v6629_v42, %v10473_v32  ;;  %v10810_v46 = vld [vmem:[%s8824_s17 + $0x274] sm:$0xf]  ;;  %v10821_v42 = vld [vmem:[%s8824_s17 + $0x278] sm:$0xf] }
 0x18c   : > { %v1698_v33 = vsel %vm8863_vm5, %v1693_v5, %v1697_v9  ;;  %v1703_v58 = vrot.slane %v1702_v10, 4  ;;  %v3263_v31 = vsel %vm3164_vm6, %v6628_v17, %v10484_v36  ;;  %v2314_v7 = vrot.slane %v10730_v28, 5 }
 0x18d   : > { %v2313_v11 = vrot.slane %v2311_v34, 4  ;;  %v1673_v47 = vrot.slane %v1672_v6, 4  ;;  %v1682_v63 = vor.u32 %v1681_v29, %v1677_v49  ;;  %v2317_v9 = vrot.slane %v10740_v1, 5 }
 0x18e   : > { %v6594_v16 = vrot.slane %v10745_v62, 9  ;;  %8158 = vmatmul.mubr.msk.bf16.vlgmr.msra.gmra.mrb[0].mxu0 %vm3644_vm8, %v9635_v24  ;;  %v1708_v32 = vsel %vm8863_vm5, %v1703_v58, %v1707_v14  ;;  %v2316_v17 = vrot.slane %v2314_v7, 4  ;;  %v2308_v5 = vrot.slane %v10762_v57, 5 }
 0x18f   : > { %v2315_v36 = vsel %vm8817_vm2, %v2313_v11, %v2314_v7  ;;  %8161 = vmatprep.mubr.msk.bf16.mxu0 %vm3644_vm8, %v9743_v21  ;;  %v6721_v1 = vcombine.low %v1698_v33, %v1708_v32  ;;  %v1678_v24 = vsel %vm8863_vm5, %v1673_v47, %v1677_v49  ;;  %v1683_v26 = vrot.slane %v1682_v63, 4  ;;  %v10832_v49 = vld [vmem:[%s8824_s17 + $0x27c] sm:$0x1]  ;;  %v10834_v33 = vpop.permute.xlu1 %3118  ;;  %v10843_v11 = vld [vmem:[%s8824_s17 + $0x26c] sm:$0xf] }
 0x190   : > { %v10818_v14 = vsel %vm3357_vm7, %v3266_v60, %v10527_v23  ;;  %v2318_v10 = vsel %vm8817_vm2, %v2316_v17, %v2317_v9  ;;  %v2309_v4 = vsel %vm8817_vm2, %v6594_v16, %v2308_v5  ;;  %v2310_v6 = vrot.slane %v2308_v5, 4  ;;  %v10854_v63 = vld [vmem:[%s8824_s17 + $0x270] sm:$0xf] }
 0x191   : > { %12138 = vst [vmem:[#allocation17_spill] sm:$0xff] %v10818_v14  ;;  %v10829_v21 = vsel %vm3357_vm7, %v3263_v31, %v10529_v53  ;;  %2838 = vrot.lane.b32.xlu1 %v6721_v1, %s8785_s19  ;;  %v1688_v23 = vsel %vm8863_vm5, %v1683_v26, %v10758_v61  ;;  %v6785_v29 = vcombine.low %v2315_v36, %v2318_v10  ;;  %v1729_v60 = vshll.u32 %v10810_v46, 16  ;;  %v10847_v53 = vpop.permute.xlu0 %3116 }
 0x192   : > { %12139 = vst [vmem:[#allocation18_spill] sm:$0xff] %v10829_v21  ;;  %v1733_v58 = vshrl.u32 %v10810_v46, 16  ;;  %7937 = vmatprep.mubr.msk.bf16.mxu1 %vm3644_vm8, %v10829_v21  ;;  %v6720_v31 = vcombine.low %v1678_v24, %v1688_v23  ;;  %v2312_v7 = vsel %vm8817_vm2, %v2310_v6, %v2311_v34  ;;  %v1739_v47 = vshll.u32 %v10821_v42, 16 }
 0x193   : > { %v1743_v61 = vshrl.u32 %v10821_v42, 16  ;;  %7938 = vmatmul.mubr.msk.bf16.gmra.mrb[60].mxu1 %vm3644_vm8, %v10818_v14  ;;  %v6784_v9 = vcombine.low %v2309_v4, %v2312_v7  ;;  %v10858_v16 = vrot.slane %v1729_v60, 5  ;;  %v1749_v36 = vshll.u32 %v10832_v49, 16  ;;  %v8728_v14 = vld [vmem:[%s8824_s17 + $0x158] sm:$0xf] }
 0x194   : > { %v1735_v32 = vrot.slane %v1733_v58, 4  ;;  %2836 = vrot.lane.b32.xlu0 %v6720_v31, %s8785_s19  ;;  %v1741_v34 = vrot.slane %v1739_v47, 5  ;;  %v1710_v5 = vshrl.u32 %v10843_v11, 16  ;;  %v1713_v1 = vshll.u32 %v10843_v11, 16  ;;  %v8725_v58 = vld [vmem:[%s8824_s17 + $0x15c] sm:$0xf] }
 0x195   : > { %v1745_v17 = vrot.slane %v1743_v61, 4  ;;  %3158 = vrot.lane.b32.xlu1 %v6785_v29, %s8784_s18  ;;  %v1751_v26 = vrot.slane %v1749_v36, 5  ;;  %v1719_v10 = vshll.u32 %v10854_v63, 16  ;;  %v1723_v4 = vshrl.u32 %v10854_v63, 16  ;;  %v8726_v31 = vld [vmem:[%s8824_s17 + $0x160] sm:$0xf]  ;;  %v10874_v29 = vpop.permute.xlu1 %2802  ;;  %v10878_v20 = vpop.permute.xlu0 %2800 }
 0x196   : > { %v1736_v24 = vor.u32 %v1735_v32, %v10858_v16  ;;  %8162 = vmatmul.mubr.msk.bf16.gmra.mrb[4].mxu0 %vm3644_vm8, %v9732_v8  ;;  %v1712_v23 = vrot.slane %v1710_v5, 4  ;;  %v1715_v60 = vrot.slane %v1713_v1, 5  ;;  %v6631_v7 = vcombine.low %v8725_v58, %v8726_v31  ;;  %v8727_v36 = vld [vmem:[%s8824_s17 + $0x154] sm:$0xf] }
 0x197   : > { %v1746_v6 = vor.u32 %v1745_v17, %v1741_v34  ;;  %8165 = vmatprep.mubr.msk.bf16.mxu0 %vm3644_vm8, %v9826_v39  ;;  %v1721_v61 = vrot.slane %v1719_v10, 5  ;;  %v1725_v32 = vrot.slane %v1723_v4, 4  ;;  %v6630_v21 = vcombine.low %v8727_v36, %v8728_v14 }
 0x198   : > { %v1737_v47 = vrot.slane %v1736_v24, 4  ;;  %3156 = vrot.lane.b32.xlu0 %v6784_v9, %s8784_s18  ;;  %v1716_v17 = vor.u32 %v1715_v60, %v1712_v23  ;;  %v3272_v5 = vsel %vm3164_vm6, %v6631_v7, %v10546_v43  ;;  %v2324_v39 = vrot.slane %v10810_v46, 5  ;;  %v10893_v43 = vld [vmem:[%s8824_s17 + $0x288] sm:$0xf]  ;;  %v10906_v7 = vld [vmem:[%s8824_s17 + $0x28c] sm:$0xf] }
 0x199   : > { %v1747_v8 = vrot.slane %v1746_v6, 4  ;;  %v1726_v24 = vor.u32 %v1725_v32, %v1721_v61  ;;  %v3269_v10 = vsel %vm3164_vm6, %v6630_v21, %v10555_v19  ;;  %v2327_v14 = vrot.slane %v10821_v42, 5 }
 0x19a   : > { %v1742_v1 = vsel %vm8863_vm5, %v1737_v47, %v1741_v34  ;;  %v1717_v4 = vrot.slane %v1716_v17, 4  ;;  %v2326_v6 = vrot.slane %v2324_v39, 4  ;;  %v2330_v23 = vrot.slane %v10832_v49, 5  ;;  %v10908_v47 = vpop.permute.xlu1 %3122  ;;  %v10925_v17 = vld [vmem:[%s8824_s17 + $0x280] sm:$0xf] }
 0x19b   : > { %v1752_v9 = vsel %vm8863_vm5, %v1747_v8, %v1751_v26  ;;  %v1727_v34 = vrot.slane %v1726_v24, 4  ;;  %v2329_v58 = vrot.slane %v2327_v14, 4  ;;  %v6595_v31 = vrot.slane %v10843_v11, 9 }
 0x19c   : > { %v6723_v60 = vcombine.low %v1742_v1, %v1752_v9  ;;  %v1722_v19 = vsel %vm8863_vm5, %v1717_v4, %v1721_v61  ;;  %v2328_v21 = vsel %vm8817_vm2, %v2326_v6, %v2327_v14  ;;  %v2321_v26 = vrot.slane %v10854_v63, 5  ;;  %v10943_v4 = vld [vmem:[%s8824_s17 + $0x284] sm:$0xf] }
 0x19d   : > { %v10903_v49 = vsel %vm3357_vm7, %v3272_v5, %v10602_v55  ;;  %v1732_v32 = vsel %vm8863_vm5, %v1727_v34, %v10858_v16  ;;  %v2331_v61 = vsel %vm8817_vm2, %v2329_v58, %v2330_v23  ;;  %v10918_v36 = vsel %vm3357_vm7, %v3269_v10, %v10607_v35  ;;  %v10921_v55 = vld [vmem:[%s8824_s17 + $0x290] sm:$0x1]  ;;  %v10929_v5 = vpop.permute.xlu0 %3120 }
 0x19e   : > { %12140 = vst [vmem:[#allocation19_spill] sm:$0xff] %v10903_v49  ;;  %2842 = vrot.lane.b32.xlu1 %v6723_v60, %s8785_s19  ;;  %12141 = vst [vmem:[#allocation20_spill] sm:$0xff] %v10918_v36  ;;  %v3518_v8 = vshll.u32 %v10893_v43, 16  ;;  %8166 = vmatmul.mubr.msk.bf16.gmra.mrb[8].mxu0 %vm3644_vm8, %v9814_v27  ;;  %v6722_v16 = vcombine.low %v1722_v19, %v1732_v32  ;;  %v6787_v1 = vcombine.low %v2328_v21, %v2331_v61  ;;  %v10955_v61 = vpop.permute.xlu1 %2806 }
 0x19f   : > { %v2322_v24 = vsel %vm8817_vm2, %v6595_v31, %v2321_v26  ;;  %v2323_v14 = vrot.slane %v2321_v26, 4  ;;  %7941 = vmatprep.mubr.msk.bf16.mxu1 %vm3644_vm8, %v10918_v36  ;;  %8169 = vmatprep.mubr.msk.bf16.mxu0 %vm3644_vm8, %v9910_v38  ;;  %v3522_v10 = vshrl.u32 %v10893_v43, 16  ;;  %v3528_v27 = vshll.u32 %v10906_v7, 16  ;;  %12142 = vst [vmem:[#allocation21_spill] sm:$0xff] %v10955_v61 }
 0x1a0   : > { %v10937_v35 = vrot.slane %v3518_v8, 5  ;;  %v3532_v9 = vshrl.u32 %v10906_v7, 16  ;;  %7942 = vmatmul.mubr.msk.bf16.gmra.mrb[64].mxu1 %vm3644_vm8, %v10903_v49  ;;  %2840 = vrot.lane.b32.xlu0 %v6722_v16, %s8785_s19  ;;  %v3538_v38 = vshll.u32 %v10921_v55, 16  ;;  %v3499_v23 = vshrl.u32 %v10925_v17, 16  ;;  %v8732_v49 = vld [vmem:[%s8824_s17 + $0x16c] sm:$0xf] }
 0x1a1   : > { %v2325_v6 = vsel %vm8817_vm2, %v2323_v14, %v2324_v39  ;;  %v3502_v60 = vshll.u32 %v10925_v17, 16  ;;  %v3524_v58 = vrot.slane %v3522_v10, 4  ;;  %v3530_v31 = vrot.slane %v3528_v27, 5  ;;  %v8730_v10 = vld [vmem:[%s8824_s17 + $0x174] sm:$0xf] }
 0x1a2   : > { %3162 = vrot.lane.b32.xlu1 %v6787_v1, %s8784_s18  ;;  %v6786_v34 = vcombine.low %v2322_v24, %v2325_v6  ;;  %v3534_v19 = vrot.slane %v3532_v9, 4  ;;  %v3540_v21 = vrot.slane %v3538_v38, 5  ;;  %v3501_v26 = vrot.slane %v3499_v23, 4  ;;  %v10957_v8 = vpop.f32.mrb[0].mxu1  ;;  %v8729_v24 = vld [vmem:[%s8824_s17 + $0x170] sm:$0xf]  ;;  %v10963_v9 = vpop.permute.xlu0 %2804 }
 0x1a3   : > { %v3504_v32 = vrot.slane %v3502_v60, 5  ;;  %v3508_v39 = vshll.u32 %v10943_v4, 16  ;;  %12143 = vst [vmem:[#allocation22_spill] sm:$0xff] %v10957_v8  ;;  %v3525_v16 = vor.u32 %v3524_v58, %v10937_v35  ;;  %v3512_v1 = vshrl.u32 %v10943_v4, 16  ;;  %v10965_v6 = vpop.f32.mrb[1].mxu1 }
 0x1a4   : > { %v3535_v14 = vor.u32 %v3534_v19, %v3530_v31  ;;  %v6633_v27 = vcombine.low %v8729_v24, %v8730_v10  ;;  %3160 = vrot.lane.b32.xlu0 %v6786_v34, %s8784_s18  ;;  %v8731_v60 = vld [vmem:[%s8824_s17 + $0x168] sm:$0xf]  ;;  %v3552_v8 = vrot.slane %v10893_v43, 5  ;;  %v10971_v58 = vpop.f32.mrb[2].mxu1 }
 0x1a5   : > { %v3505_v38 = vor.u32 %v3504_v32, %v3501_v26  ;;  %v3510_v23 = vrot.slane %v3508_v39, 5  ;;  %v6632_v36 = vcombine.low %v8731_v60, %v8732_v49  ;;  %v3526_v19 = vrot.slane %v3525_v16, 4  ;;  %v10977_v10 = vpop.f32.mrb[3].mxu1  ;;  %v8734_v60 = vld [vmem:[%s8824_s17 + $0x180] sm:$0xf] }
 0x1a6   : > { %v3536_v61 = vrot.slane %v3535_v14, 4  ;;  %v3514_v15 = vrot.slane %v3512_v1, 4  ;;  %v3278_v24 = vsel %vm3164_vm6, %v6633_v27, %v10625_v52  ;;  %8170 = vmatmul.mubr.msk.bf16.gmra.mrb[12].mxu0 %vm3644_vm8, %v9898_v3  ;;  %v3554_v49 = vrot.slane %v3552_v8, 4 }
 0x1a7   : > { %v3506_v34 = vrot.slane %v3505_v38, 4  ;;  %v3275_v26 = vsel %vm3164_vm6, %v6632_v36, %v10633_v2  ;;  %v3555_v32 = vrot.slane %v10906_v7, 5  ;;  %8173 = vmatprep.mubr.msk.bf16.mxu0 %vm3644_vm8, %v9996_v50  ;;  %v3531_v39 = vsel %vm8863_vm5, %v3526_v19, %v3530_v31  ;;  %v10993_v50 = vpop.permute.xlu1 %3126 }
 0x1a8   : > { %v3541_v52 = vsel %vm8863_vm5, %v3536_v61, %v3540_v21  ;;  %v3515_v3 = vor.u32 %v3514_v15, %v3510_v23  ;;  %v3558_v16 = vrot.slane %v10921_v55, 5  ;;  %v6788_v31 = vrot.slane %v10925_v17, 9  ;;  %v11001_v55 = vpop.permute.xlu0 %3124 }
 0x1a9   : > { %v6792_v14 = vcombine.low %v3531_v39, %v3541_v52  ;;  %v3511_v2 = vsel %vm8863_vm5, %v3506_v34, %v3510_v23  ;;  %v3556_v36 = vsel %vm8817_vm2, %v3554_v49, %v3555_v32  ;;  %v3557_v1 = vrot.slane %v3555_v32, 4  ;;  %v8733_v23 = vld [vmem:[%s8824_s17 + $0x17c] sm:$0xf] }
 0x1aa   : > { %v3516_v27 = vrot.slane %v3515_v3, 4  ;;  %v3549_v21 = vrot.slane %v10943_v4, 5  ;;  %v10999_v15 = vsel %vm3357_vm7, %v3278_v24, %v10682_v18  ;;  %v11008_v38 = vsel %vm3357_vm7, %v3275_v26, %v10690_v25  ;;  %v8735_v25 = vld [vmem:[%s8824_s17 + $0x184] sm:$0xf]  ;;  %v8736_v26 = vld [vmem:[%s8824_s17 + $0x188] sm:$0xf] }
 0x1ab   : > { %3574 = vrot.lane.b32.xlu1 %v6792_v14, %s8785_s19  ;;  %v3559_v61 = vsel %vm8817_vm2, %v3557_v1, %v3558_v16  ;;  %v6634_v19 = vcombine.low %v8733_v23, %v8734_v60  ;;  %7945 = vmatprep.mubr.msk.bf16.mxu1 %vm3644_vm8, %v11008_v38  ;;  %v6635_v39 = vcombine.low %v8735_v25, %v8736_v26  ;;  %v8737_v16 = vld [vmem:[%s8824_s17 + $0x190] sm:$0xf]  ;;  %v8738_v14 = vld [vmem:[%s8824_s17 + $0x194] sm:$0xf] }
 0x1ac   : > { %v3521_v18 = vsel %vm8863_vm5, %v3516_v27, %v10937_v35  ;;  %v6794_v24 = vcombine.low %v3556_v36, %v3559_v61  ;;  %v3550_v34 = vsel %vm8817_vm2, %v6788_v31, %v3549_v21  ;;  %v3551_v49 = vrot.slane %v3549_v21, 4  ;;  %7946 = vmatmul.mubr.msk.bf16.gmra.mrb[68].mxu1 %vm3644_vm8, %v10999_v15  ;;  %v11037_v36 = vpop.permute.xlu1 %2810  ;;  %v11052_v27 = vld [vmem:[%s8824_s17 + $0x294] sm:$0xf]  ;;  %v8739_v21 = vld [vmem:[%s8824_s17 + $0x198] sm:$0xf] }
 0x1ad   : > { %v6791_v32 = vcombine.low %v3511_v2, %v3521_v18  ;;  %v3281_v52 = vsel %vm3164_vm6, %v6634_v19, %v10709_v37  ;;  %v6636_v2 = vcombine.low %v8737_v16, %v8738_v14  ;;  %12145 = vst [vmem:[#allocation24_spill] sm:$0xff] %v11052_v27  ;;  %v8740_v61 = vld [vmem:[%s8824_s17 + $0x19c] sm:$0xf]  ;;  %v8741_v19 = vld [vmem:[%s8824_s17 + $0x1ac] sm:$0xf] }
 0x1ae   : > { %v3553_v35 = vsel %vm8817_vm2, %v3551_v49, %v3552_v8  ;;  %v11029_v3 = vsel %vm3357_vm7, %v3281_v52, %v10768_v30  ;;  %8174 = vmatmul.mubr.msk.bf16.gmra.mrb[16].mxu0 %vm3644_vm8, %v9983_v59  ;;  %v11043_v30 = vpop.permute.xlu0 %2808  ;;  %v3284_v59 = vsel %vm3164_vm6, %v6635_v39, %v10704_v13  ;;  %v8742_v18 = vld [vmem:[%s8824_s17 + $0x1b0] sm:$0xf]  ;;  %v8744_v49 = vld [vmem:[%s8824_s17 + $0x1a8] sm:$0xf]  ;;  %v4907_v39 = vshll.u32 %v11052_v27, 16 }
 0x1af   : > { %3572 = vrot.lane.b32.xlu0 %v6791_v32, %s8785_s19  ;;  %3584 = vrot.lane.b32.xlu1 %v6794_v24, %s8784_s18  ;;  %v6793_v37 = vcombine.low %v3550_v34, %v3553_v35  ;;  %v11045_v8 = vpop.f32.mrb[4].mxu1  ;;  %v11056_v31 = vsel %vm3357_vm7, %v3284_v59, %v10756_v51  ;;  %v3287_v23 = vsel %vm3164_vm6, %v6636_v2, %v10795_v12  ;;  %v8743_v51 = vld [vmem:[%s8824_s17 + $0x1a4] sm:$0xf]  ;;  %v4904_v12 = vshrl.u32 %v11052_v27, 16  ;;  %v11104_v14 = vld [vmem:[%s8824_s17 + $0x298] sm:$0xf] }
 0x1b0   : > { %7949 = vmatprep.mubr.msk.bf16.mxu1 %vm3644_vm8, %v11029_v3  ;;  %8177 = vmatprep.mubr.msk.bf16.mxu0 %vm3644_vm8, %v10079_v44  ;;  %v11049_v1 = vpop.f32.mrb[5].mxu1  ;;  %v6637_v44 = vcombine.low %v8739_v21, %v8740_v61  ;;  %v11067_v13 = vsel %vm3357_vm7, %v3287_v23, %v10847_v53  ;;  %v6639_v24 = vcombine.low %v8741_v19, %v8742_v18  ;;  %v11078_v25 = vpop.permute.xlu1 %3130  ;;  %v11118_v59 = vld [vmem:[%s8824_s17 + $0x2a0] sm:$0xf]  ;;  %v11121_v21 = vld [vmem:[%s8824_s17 + $0x2a4] sm:$0x1] }
 0x1b1   : > { %12144 = vst [vmem:[#allocation23_spill] sm:$0xff] %v11049_v1  ;;  %v11062_v60 = vpop.f32.mrb[6].mxu1  ;;  %v6638_v32 = vcombine.low %v8743_v51, %v8744_v49  ;;  %v4906_v2 = vrot.slane %v4904_v12, 4  ;;  %12149 = vst [vmem:[#allocation28_spill] sm:$0xff] %v11118_v59  ;;  %v8746_v23 = vld [vmem:[%s8824_s17 + $0x1bc] sm:$0xf] }
 0x1b2   : > { %12146 = vst [vmem:[#allocation25_spill] sm:$0xff] %v11062_v60  ;;  %v11071_v34 = vpop.f32.mrb[7].mxu1  ;;  %v3290_v53 = vsel %vm3164_vm6, %v6637_v44, %v10788_v45  ;;  %v11086_v26 = vpop.permute.xlu0 %3128  ;;  %v3296_v45 = vsel %vm3164_vm6, %v6639_v24, %v10874_v29  ;;  %v8745_v44 = vld [vmem:[%s8824_s17 + $0x1b8] sm:$0xf]  ;;  %v4909_v24 = vrot.slane %v4907_v39, 5  ;;  %v4913_v49 = vshll.u32 %v11104_v14, 16 }
 0x1b3   : > { %3582 = vrot.lane.b32.xlu0 %v6793_v37, %s8784_s18  ;;  %12147 = vst [vmem:[#allocation26_spill] sm:$0xff] %v11071_v34  ;;  %v11091_v52 = vsel %vm3357_vm7, %v3290_v53, %v10834_v33  ;;  %v11107_v33 = vld [vmem:[%s8824_s17 + $0x29c] sm:$0xf]  ;;  %v6640_v19 = vcombine.low %v8745_v44, %v8746_v23  ;;  %v4937_v44 = vshrl.u32 %v11118_v59, 16  ;;  %v4943_v23 = vshll.u32 %v11121_v21, 16 }
 0x1b4   : > { %7950 = vmatmul.mubr.msk.bf16.gmra.mrb[72].mxu1 %vm3644_vm8, %v11056_v31  ;;  %12148 = vst [vmem:[#allocation27_spill] sm:$0xff] %v11107_v33  ;;  %v4923_v12 = vshll.u32 %v11107_v33, 16  ;;  %v4927_v53 = vshrl.u32 %v11107_v33, 16  ;;  %v4915_v18 = vrot.slane %v4913_v49, 5  ;;  %v11148_v16 = vsel %vm3357_vm7, %v3296_v45, %v10908_v47 }
 0x1b5   : > { %7953 = vmatprep.mubr.msk.bf16.mxu1 %vm3644_vm8, %v11067_v13  ;;  %v11131_v51 = vpop.permute.xlu1 %2814  ;;  %v4939_v60 = vrot.slane %v4937_v44, 4  ;;  %v4945_v47 = vrot.slane %v4943_v23, 5  ;;  %v6935_v45 = vrot.slane %v11052_v27, 9  ;;  %v3299_v23 = vsel %vm3164_vm6, %v6640_v19, %v10963_v9  ;;  %v8747_v19 = vld [vmem:[%s8824_s17 + $0x1c0] sm:$0xf] }
 0x1b6   : > { %8178 = vmatmul.mubr.msk.bf16.gmra.mrb[20].mxu0 %vm3644_vm8, %v10067_v54  ;;  %v3293_v54 = vsel %vm3164_vm6, %v6638_v32, %v10878_v20  ;;  %v4917_v32 = vshrl.u32 %v11104_v14, 16  ;;  %v4929_v29 = vrot.slane %v4927_v53, 4 }
 0x1b7   : > { %8181 = vmatprep.mubr.msk.bf16.mxu0 %vm3644_vm8, %v10161_v41  ;;  %v11125_v61 = vsel %vm3357_vm7, %v3293_v54, %v10929_v5  ;;  %v4910_v5 = vor.u32 %v4909_v24, %v4906_v2  ;;  %v4933_v54 = vshll.u32 %v11118_v59, 16  ;;  %v4925_v41 = vrot.slane %v4923_v12, 5  ;;  %v12151_v2 = vld [vmem:[#allocation2_spill] sm:$0xff] }
 0x1b8   : > { %v11137_v37 = vpop.permute.xlu0 %2812  ;;  %v4919_v20 = vrot.slane %v4917_v32, 4 }
 0x1b9   : > { %v4911_v35 = vrot.slane %v4910_v5, 4  ;;  %v4935_v34 = vrot.slane %v4933_v54, 5  ;;  %v4930_v12 = vor.u32 %v4929_v29, %v4925_v41  ;;  %v4954_v5 = vrot.slane %v11104_v14, 5  ;;  %v11167_v44 = vpop.permute.xlu1 %3134 }
 0x1ba   : > { %v4920_v32 = vor.u32 %v4919_v20, %v4915_v18  ;;  %v4957_v54 = vrot.slane %v11107_v33, 5  ;;  %v4960_v20 = vrot.slane %v11118_v59, 5  ;;  %v4963_v29 = vrot.slane %v11121_v21, 5 }
 0x1bb   : > { %v4940_v1 = vor.u32 %v4939_v60, %v4935_v34  ;;  %v4956_v60 = vrot.slane %v4954_v5, 4  ;;  %v11175_v33 = vsel %vm3357_vm7, %v3299_v23, %v11001_v55 }
 0x1bc   : > { %7954 = vmatmul.mubr.msk.bf16.gmra.mrb[76].mxu1 %vm3644_vm8, %v11091_v52  ;;  %v3133_v27 = vpop.permute.xlu0 %3132 }
 0x1bd   : > { %v11144_v39 = vpop.f32.mrb[8].mxu1  ;;  %7957 = vmatprep.mubr.msk.bf16.mxu1 %vm3644_vm8, %v11125_v61  ;;  %v4958_v55 = vsel %vm8817_vm2, %v4956_v60, %v4957_v54 }
 0x1be   : > { %12150 = vst [vmem:[#allocation29_spill] sm:$0xff] %v11144_v39  ;;  %8182 = vmatmul.mubr.msk.bf16.gmra.mrb[24].mxu0 %vm3644_vm8, %v12151_v2  ;;  %v11154_v24 = vpop.f32.mrb[9].mxu1  ;;  %v12153_v39 = vld [vmem:[#allocation4_spill] sm:$0xff]  ;;  %v4916_v2 = vsel %vm8863_vm5, %v4911_v35, %v4915_v18  ;;  %v4941_v35 = vrot.slane %v4940_v1, 4  ;;  %v4959_v18 = vrot.slane %v4957_v54, 4  ;;  %v4955_v1 = vsel %vm8817_vm2, %v6935_v45, %v4954_v5  ;;  %v12155_v5 = vld [vmem:[#allocation6_spill] sm:$0xff] }
 0x1bf   : > { %12152 = vst [vmem:[#allocation2_spill] sm:$0xff] %v11154_v24  ;;  %8185 = vmatprep.mubr.msk.bf16.mxu0 %vm3644_vm8, %v12153_v39  ;;  %v11158_v49 = vpop.f32.mrb[10].mxu1  ;;  %v4921_v39 = vrot.slane %v4920_v32, 4  ;;  %v4931_v24 = vrot.slane %v4930_v12, 4  ;;  %v4962_v12 = vrot.slane %v4960_v20, 4  ;;  %v6940_v0 = vcombine.low %v4955_v1, %v4958_v55 }
 0x1c0   : > { %v11161_v53 = vpop.f32.mrb[11].mxu1  ;;  %v4946_v9 = vsel %vm8863_vm5, %v4941_v35, %v4945_v47  ;;  %v8750_v47 = vld [vmem:[%s8824_s17 + $0x1d0] sm:$0xf]  ;;  %v8752_v1 = vld [vmem:[%s8824_s17 + $0x1d8] sm:$0xf] }
 0x1c1   : > { %v4926_v32 = vsel %vm8863_vm5, %v4921_v39, %v4925_v41  ;;  %v4936_v21 = vsel %vm8863_vm5, %v4931_v24, %v4935_v34  ;;  %v8748_v41 = vld [vmem:[%s8824_s17 + $0x1c4] sm:$0xf]  ;;  %v4961_v34 = vsel %vm8817_vm2, %v4959_v18, %v4960_v20  ;;  %v4964_v40 = vsel %vm8817_vm2, %v4962_v12, %v4963_v29  ;;  %v8749_v24 = vld [vmem:[%s8824_s17 + $0x1cc] sm:$0xf]  ;;  %v11203_v54 = vpop.permute.xlu1 %2818  ;;  %v12156_v35 = vld [vmem:[#allocation21_spill] sm:$0xff] }
 0x1c2   : > { %v6938_v59 = vcombine.low %v4916_v2, %v4926_v32  ;;  %v6641_v39 = vcombine.low %v8747_v19, %v8748_v41  ;;  %v6939_v23 = vcombine.low %v4936_v21, %v4946_v9  ;;  %v6642_v45 = vcombine.low %v8749_v24, %v8750_v47  ;;  %v12154_v2 = vld [vmem:[#allocation3_spill] sm:$0xff] }
 0x1c3   : > { %v6941_v29 = vcombine.low %v4961_v34, %v4964_v40  ;;  %v8754_v41 = vld [vmem:[%s8824_s17 + $0x1e4] sm:$0xf]  ;;  %v12157_v34 = vld [vmem:[#allocation5_spill] sm:$0xff]  ;;  %v12158_v40 = vld [vmem:[#allocation8_spill] sm:$0xff] }
 0x1c4   : > { %7958 = vmatmul.mubr.msk.bf16.gmra.mrb[80].mxu1 %vm3644_vm8, %v11148_v16  ;;  %4977 = vrot.lane.b32.xlu0 %v6938_v59, %s8785_s19  ;;  %v3302_v60 = vsel %vm3164_vm6, %v6641_v39, %v12156_v35  ;;  %v3305_v32 = vsel %vm3164_vm6, %v6642_v45, %v11043_v30  ;;  %v8756_v35 = vld [vmem:[%s8824_s17 + $0x1ec] sm:$0xf] }
 0x1c5   : > { %7961 = vmatprep.mubr.msk.bf16.mxu1 %vm3644_vm8, %v11175_v33  ;;  %v2817_v20 = vpop.permute.xlu0 %2816  ;;  %4979 = vrot.lane.b32.xlu1 %v6939_v23, %s8785_s19  ;;  %v11211_v18 = vsel %vm3357_vm7, %v3302_v60, %v10993_v50  ;;  %v11219_v59 = vsel %vm3357_vm7, %v3305_v32, %v11086_v26  ;;  %v8751_v50 = vld [vmem:[%s8824_s17 + $0x1d4] sm:$0xf]  ;;  %v3139_v55 = vpop.permute.xlu1 %3138  ;;  %v8753_v26 = vld [vmem:[%s8824_s17 + $0x1e0] sm:$0xf]  ;;  %s7143_s19 = sshll.u32 %s12241_s13, 9 }
 0x1c6   : > { %8186 = vmatmul.mubr.msk.bf16.gmra.mrb[28].mxu0 %vm3644_vm8, %v12154_v2  ;;  %v6643_v30 = vcombine.low %v8751_v50, %v8752_v1  ;;  %v6644_v39 = vcombine.low %v8753_v26, %v8754_v41  ;;  %s11614_s27 = scalar_lea.vmem %s12092_s3, %s7143_s19 }
 0x1c7   : > { %8189 = vmatprep.mubr.msk.bf16.mxu0 %vm3644_vm8, %v12155_v5 }
 0x1c8   : > { %4987 = vrot.lane.b32.xlu0 %v6940_v0, %s8784_s18  ;;  %v3308_v24 = vsel %vm3164_vm6, %v6643_v30, %v11037_v36  ;;  %v3311_v45 = vsel %vm3164_vm6, %v6644_v39, %v11137_v37  ;;  %v8757_v36 = vld [vmem:[%s8824_s17 + $0x1f4] sm:$0xf]  ;;  %v12159_v37 = vld [vmem:[#allocation7_spill] sm:$0xff] }
 0x1c9   : > { %v11215_v21 = vpop.f32.mrb[12].mxu1  ;;  %4989 = vrot.lane.b32.xlu1 %v6941_v29, %s8784_s18  ;;  %v3137_v23 = vpop.permute.xlu0 %3136  ;;  %v11245_v47 = vsel %vm3357_vm7, %v3308_v24, %v11078_v25  ;;  %v11250_v2 = vsel %vm3357_vm7, %v3311_v45, %v3133_v27  ;;  %v8755_v29 = vld [vmem:[%s8824_s17 + $0x1e8] sm:$0xf]  ;;  %v8758_v25 = vld [vmem:[%s8824_s17 + $0x1f8] sm:$0xf] }
 0x1ca   : > { %v11221_v12 = vpop.f32.mrb[13].mxu1  ;;  %v6645_v60 = vcombine.low %v8755_v29, %v8756_v35  ;;  %v6646_v32 = vcombine.low %v8757_v36, %v8758_v25  ;;  %v12160_v27 = vld [vmem:[#allocation10_spill] sm:$0xff]  ;;  %v12164_v36 = vld [vmem:[#allocation9_spill] sm:$0xff]  ;;  %v12165_v25 = vld [vmem:[#allocation12_spill] sm:$0xff] }
 0x1cb   : > { %v11224_v9 = vpop.f32.mrb[14].mxu1  ;;  %v8759_v29 = vld [vmem:[%s8824_s17 + $0x1fc] sm:$0xf] }
 0x1cc   : > { %7962 = vmatmul.mubr.msk.bf16.gmra.mrb[84].mxu1 %vm3644_vm8, %v11211_v18  ;;  %v11231_v19 = vpop.f32.mrb[15].mxu1  ;;  %v3314_v30 = vsel %vm3164_vm6, %v6645_v60, %v11131_v51  ;;  %v8760_v51 = vld [vmem:[%s8824_s17 + $0x200] sm:$0xf]  ;;  %v8762_v60 = vld [vmem:[%s8824_s17 + $0x20c] sm:$0xf] }
 0x1cd   : > { %7965 = vmatprep.mubr.msk.bf16.mxu1 %vm3644_vm8, %v11219_v59  ;;  %v11274_v39 = vsel %vm3357_vm7, %v3314_v30, %v11167_v44  ;;  %v6647_v35 = vcombine.low %v8759_v29, %v8760_v51  ;;  %v8761_v44 = vld [vmem:[%s8824_s17 + $0x208] sm:$0xf]  ;;  %v8763_v51 = vld [vmem:[%s8824_s17 + $0x210] sm:$0xf] }
 0x1ce   : > { %8190 = vmatmul.mubr.msk.bf16.gmra.mrb[32].mxu0 %vm3644_vm8, %v12157_v34  ;;  %v3317_v34 = vsel %vm3164_vm6, %v6646_v32, %v2817_v20  ;;  %v6648_v20 = vcombine.low %v8761_v44, %v8762_v60  ;;  %v8764_v44 = vld [vmem:[%s8824_s17 + $0x214] sm:$0xf] }
 0x1cf   : > { %8193 = vmatprep.mubr.msk.bf16.mxu0 %vm3644_vm8, %v12158_v40  ;;  %v2823_v5 = vpop.permute.xlu1 %2822  ;;  %v11280_v45 = vsel %vm3357_vm7, %v3317_v34, %v3137_v23  ;;  %v6649_v60 = vcombine.low %v8763_v51, %v8764_v44 }
 0x1d1   : > { %v3326_v51 = vsel %vm3164_vm6, %v6649_v60, %v2823_v5  ;;  %v8769_v5 = vld [vmem:[%s8824_s17 + $0x230] sm:$0xf] }
 0x1d2   : > { %v2821_v0 = vpop.permute.xlu0 %2820 }
 0x1d3   : > { %v3143_v26 = vpop.permute.xlu1 %3142  ;;  %v3323_v30 = vsel %vm3164_vm6, %v6648_v20, %v2821_v0 }
 0x1d4   : > { %7966 = vmatmul.mubr.msk.bf16.gmra.mrb[88].mxu1 %vm3644_vm8, %v11245_v47  ;;  %v11325_v44 = vsel %vm3357_vm7, %v3326_v51, %v3143_v26  ;;  %v8770_v26 = vld [vmem:[%s8824_s17 + $0x234] sm:$0xf] }
 0x1d5   : > { %7969 = vmatprep.mubr.msk.bf16.mxu1 %vm3644_vm8, %v11250_v2  ;;  %v6652_v60 = vcombine.low %v8769_v5, %v8770_v26 }
 0x1d6   : > { %8194 = vmatmul.mubr.msk.bf16.gmra.mrb[36].mxu0 %vm3644_vm8, %v12159_v37  ;;  %v11264_v50 = vpop.f32.mrb[16].mxu1  ;;  %v3141_v40 = vpop.permute.xlu0 %3140  ;;  %v3320_v37 = vsel %vm3164_vm6, %v6647_v35, %v11203_v54  ;;  %v8765_v54 = vld [vmem:[%s8824_s17 + $0x21c] sm:$0xf]  ;;  %v12168_v35 = vld [vmem:[#allocation11_spill] sm:$0xff] }
 0x1d7   : > { %8197 = vmatprep.mubr.msk.bf16.mxu0 %vm3644_vm8, %v12160_v27  ;;  %v11266_v1 = vpop.f32.mrb[17].mxu1  ;;  %v11297_v27 = vsel %vm3357_vm7, %v3320_v37, %v3139_v55  ;;  %v11301_v34 = vsel %vm3357_vm7, %v3323_v30, %v3141_v40  ;;  %v8766_v55 = vld [vmem:[%s8824_s17 + $0x220] sm:$0xf]  ;;  %v12170_v37 = vld [vmem:[#allocation14_spill] sm:$0xff] }
 0x1d8   : > { %12161 = vst [vmem:[#allocation4_spill] sm:$0xff] %v11266_v1  ;;  %v11270_v41 = vpop.f32.mrb[18].mxu1  ;;  %v6650_v0 = vcombine.low %v8765_v54, %v8766_v55 }
 0x1d9   : > { %12162 = vst [vmem:[#allocation3_spill] sm:$0xff] %v11270_v41  ;;  %v11277_v24 = vpop.f32.mrb[19].mxu1  ;;  %v12181_v41 = vld [vmem:[#allocation17_spill] sm:$0xff] }
 0x1da   : > { %12163 = vst [vmem:[#allocation6_spill] sm:$0xff] %v11277_v24 }
 0x1dc   : > { %7970 = vmatmul.mubr.msk.bf16.gmra.mrb[92].mxu1 %vm3644_vm8, %v11274_v39  ;;  %v2827_v23 = vpop.permute.xlu1 %2826 }
 0x1dd   : > { %7973 = vmatprep.mubr.msk.bf16.mxu1 %vm3644_vm8, %v11280_v45 }
 0x1de   : > { %8198 = vmatmul.mubr.msk.bf16.gmra.mrb[40].mxu0 %vm3644_vm8, %v12164_v36 }
 0x1df   : > { %8201 = vmatprep.mubr.msk.bf16.mxu0 %vm3644_vm8, %v12165_v25  ;;  %v2825_v32 = vpop.permute.xlu0 %2824 }
 0x1e0   : > { %v3147_v36 = vpop.permute.xlu1 %3146  ;;  %v3329_v54 = vsel %vm3164_vm6, %v6650_v0, %v2825_v32  ;;  %v12172_v32 = vld [vmem:[#allocation13_spill] sm:$0xff]  ;;  %v12173_v0 = vld [vmem:[#allocation16_spill] sm:$0xff] }
 0x1e3   : > { %v3145_v40 = vpop.permute.xlu0 %3144 }
 0x1e4   : > { %v11303_v29 = vpop.f32.mrb[20].mxu1  ;;  %7974 = vmatmul.mubr.msk.bf16.gmra.mrb[96].mxu1 %vm3644_vm8, %v11297_v27  ;;  %v11329_v55 = vsel %vm3357_vm7, %v3329_v54, %v3145_v40 }
 0x1e5   : > { %12166 = vst [vmem:[#allocation21_spill] sm:$0xff] %v11303_v29  ;;  %v11309_v25 = vpop.f32.mrb[21].mxu1  ;;  %7977 = vmatprep.mubr.msk.bf16.mxu1 %vm3644_vm8, %v11301_v34  ;;  %v8768_v29 = vld [vmem:[%s8824_s17 + $0x228] sm:$0xf] }
 0x1e6   : > { %12167 = vst [vmem:[#allocation5_spill] sm:$0xff] %v11309_v25  ;;  %8202 = vmatmul.mubr.msk.bf16.gmra.mrb[44].mxu0 %vm3644_vm8, %v12168_v35  ;;  %v11317_v20 = vpop.f32.mrb[22].mxu1 }
 0x1e7   : > { %12169 = vst [vmem:[#allocation8_spill] sm:$0xff] %v11317_v20  ;;  %8205 = vmatprep.mubr.msk.bf16.mxu0 %vm3644_vm8, %v12170_v37  ;;  %v11321_v30 = vpop.f32.mrb[23].mxu1  ;;  %v8767_v20 = vld [vmem:[%s8824_s17 + $0x224] sm:$0xf] }
 0x1e8   : > { %12171 = vst [vmem:[#allocation7_spill] sm:$0xff] %v11321_v30  ;;  %v2831_v25 = vpop.permute.xlu1 %2830  ;;  %v6651_v37 = vcombine.low %v8767_v20, %v8768_v29 }
 0x1ea   : > { %v3332_v51 = vsel %vm3164_vm6, %v6651_v37, %v2827_v23  ;;  %v8771_v23 = vld [vmem:[%s8824_s17 + $0x238] sm:$0xf]  ;;  %v8772_v37 = vld [vmem:[%s8824_s17 + $0x23c] sm:$0xf] }
 0x1eb   : > { %v11347_v29 = vsel %vm3357_vm7, %v3332_v51, %v3147_v36  ;;  %v6653_v36 = vcombine.low %v8771_v23, %v8772_v37  ;;  %v8773_v23 = vld [vmem:[%s8824_s17 + $0x24c] sm:$0xf]  ;;  %v8774_v37 = vld [vmem:[%s8824_s17 + $0x250] sm:$0xf] }
 0x1ec   : > { %v2829_v35 = vpop.permute.xlu0 %2828  ;;  %7978 = vmatmul.mubr.msk.bf16.gmra.mrb[100].mxu1 %vm3644_vm8, %v11325_v44  ;;  %v3151_v54 = vpop.permute.xlu1 %3150 }
 0x1ed   : > { %7981 = vmatprep.mubr.msk.bf16.mxu1 %vm3644_vm8, %v11329_v55  ;;  %v3335_v20 = vsel %vm3164_vm6, %v6652_v60, %v2829_v35  ;;  %v12178_v35 = vld [vmem:[#allocation15_spill] sm:$0xff] }
 0x1ee   : > { %8206 = vmatmul.mubr.msk.bf16.gmra.mrb[48].mxu0 %vm3644_vm8, %v12172_v32 }
 0x1ef   : > { %8209 = vmatprep.mubr.msk.bf16.mxu0 %vm3644_vm8, %v12173_v0  ;;  %v12179_v0 = vld [vmem:[#allocation18_spill] sm:$0xff] }
 0x1f0   : > { %v3149_v40 = vpop.permute.xlu0 %3148  ;;  %v11344_v30 = vpop.f32.mrb[24].mxu1 }
 0x1f1   : > { %12174 = vst [vmem:[#allocation10_spill] sm:$0xff] %v11344_v30  ;;  %v11350_v24 = vpop.f32.mrb[25].mxu1  ;;  %v11353_v5 = vsel %vm3357_vm7, %v3335_v20, %v3149_v40  ;;  %v3338_v40 = vsel %vm3164_vm6, %v6653_v36, %v2831_v25  ;;  %v12183_v36 = vld [vmem:[#allocation20_spill] sm:$0xff] }
 0x1f2   : > { %12175 = vst [vmem:[#allocation9_spill] sm:$0xff] %v11350_v24  ;;  %v11355_v26 = vpop.f32.mrb[26].mxu1  ;;  %v11371_v51 = vsel %vm3357_vm7, %v3338_v40, %v3151_v54 }
 0x1f3   : > { %12176 = vst [vmem:[#allocation12_spill] sm:$0xff] %v11355_v26  ;;  %v11357_v32 = vpop.f32.mrb[27].mxu1 }
 0x1f4   : > { %12177 = vst [vmem:[#allocation11_spill] sm:$0xff] %v11357_v32  ;;  %7982 = vmatmul.mubr.msk.bf16.gmra.mrb[104].mxu1 %vm3644_vm8, %v11347_v29  ;;  %v6655_v32 = vcombine.low %v8773_v23, %v8774_v37 }
 0x1f5   : > { %7985 = vmatprep.mubr.msk.bf16.mxu1 %vm3644_vm8, %v11353_v5 }
 0x1f6   : > { %8210 = vmatmul.mubr.msk.bf16.gmra.mrb[52].mxu0 %vm3644_vm8, %v12178_v35  ;;  %v2835_v60 = vpop.permute.xlu1 %2834  ;;  %v12180_v35 = vcombine.low %v10662_v48, %v10676_v22 }
 0x1f7   : > { %8213 = vmatprep.mubr.msk.bf16.mxu0 %vm3644_vm8, %v12179_v0  ;;  %v3344_v22 = vsel %vm3164_vm6, %v6655_v32, %v2835_v60  ;;  %v12188_v32 = vcombine.low %v10717_v56, %v10730_v28 }
 0x1f9   : > { %v2833_v20 = vpop.permute.xlu0 %2832 }
 0x1fa   : > { %v3155_v26 = vpop.permute.xlu1 %3154  ;;  %v3341_v24 = vsel %vm3164_vm6, %v12180_v35, %v2833_v20 }
 0x1fb   : > { %v11400_v23 = vsel %vm3357_vm7, %v3344_v22, %v3155_v26  ;;  %v12189_v26 = vcombine.low %v10745_v62, %v10762_v57 }
 0x1fc   : > { %7986 = vmatmul.mubr.msk.bf16.gmra.mrb[108].mxu1 %vm3644_vm8, %v11371_v51 }
 0x1fd   : > { %v3153_v30 = vpop.permute.xlu0 %3152  ;;  %v11383_v25 = vpop.f32.mrb[28].mxu1 }
 0x1fe   : > { %8214 = vmatmul.mubr.msk.bf16.gmra.mrb[56].mxu0 %vm3644_vm8, %v12181_v41  ;;  %12182 = vst [vmem:[#allocation14_spill] sm:$0xff] %v11383_v25  ;;  %v11386_v54 = vsel %vm3357_vm7, %v3341_v24, %v3153_v30  ;;  %v11390_v40 = vpop.f32.mrb[29].mxu1  ;;  %v12187_v24 = vld [vmem:[#allocation19_spill] sm:$0xff] }
 0x1ff   : > { %8217 = vmatprep.mubr.msk.bf16.mxu0 %vm3644_vm8, %v12183_v36  ;;  %12184 = vst [vmem:[#allocation13_spill] sm:$0xff] %v11390_v40  ;;  %7989 = vmatprep.mubr.msk.bf16.mxu1 %vm3644_vm8, %v11386_v54  ;;  %v11394_v48 = vpop.f32.mrb[30].mxu1 }
 0x200   : > { %12185 = vst [vmem:[#allocation16_spill] sm:$0xff] %v11394_v48  ;;  %v11397_v20 = vpop.f32.mrb[31].mxu1 }
 0x201   : > { %12186 = vst [vmem:[#allocation15_spill] sm:$0xff] %v11397_v20 }
 0x203   : > { %v2839_v37 = vpop.permute.xlu1 %2838 }
 0x204   : > { %7990 = vmatmul.mubr.msk.bf16.gmra.mrb[112].mxu1 %vm3644_vm8, %v11400_v23  ;;  %v3350_v60 = vsel %vm3164_vm6, %v12188_v32, %v2839_v37  ;;  %v12190_v37 = vcombine.low %v10810_v46, %v10821_v42 }
 0x206   : > { %8218 = vmatmul.mubr.msk.bf16.gmra.mrb[60].mxu0 %vm3644_vm8, %v12187_v24  ;;  %v2837_v30 = vpop.permute.xlu0 %2836 }
 0x207   : > { %8221 = vmatprep.mubr.msk.bf16.mxu0 %vm3644_vm8, %v11008_v38  ;;  %v3159_v35 = vpop.permute.xlu1 %3158  ;;  %v3347_v22 = vsel %vm3164_vm6, %v12189_v26, %v2837_v30 }
 0x208   : > { %v11417_v20 = vsel %vm3357_vm7, %v3350_v60, %v3159_v35  ;;  %v12191_v35 = vcombine.low %v10843_v11, %v10854_v63 }
 0x20a   : > { %v3157_v48 = vpop.permute.xlu0 %3156 }
 0x20b   : > { %v11419_v40 = vpop.f32.mrb[32].mxu1  ;;  %v11422_v25 = vsel %vm3357_vm7, %v3347_v22, %v3157_v48 }
 0x20c   : > { %v11424_v1 = vpop.f32.mrb[33].mxu1  ;;  %7993 = vmatprep.mubr.msk.bf16.mxu1 %vm3644_vm8, %v11422_v25 }
 0x20d   : > { %v11428_v56 = vpop.f32.mrb[34].mxu1  ;;  %7994 = vmatmul.mubr.msk.bf16.gmra.mrb[116].mxu1 %vm3644_vm8, %v11417_v20 }
 0x20e   : > { %8222 = vmatmul.mubr.msk.bf16.gmra.mrb[64].mxu0 %vm3644_vm8, %v10999_v15  ;;  %v11434_v28 = vpop.f32.mrb[35].mxu1 }
 0x20f   : > { %8225 = vmatprep.mubr.msk.bf16.mxu0 %vm3644_vm8, %v11029_v3 }
 0x210   : > { %v2843_v62 = vpop.permute.xlu1 %2842 }
 0x211   : > { %v3356_v30 = vsel %vm3164_vm6, %v12190_v37, %v2843_v62  ;;  %v12195_v37 = vcombine.low %v10893_v43, %v10906_v7 }
 0x212   : > { %v2841_v57 = vpop.permute.xlu0 %2840 }
 0x213   : > { %v3353_v32 = vsel %vm3164_vm6, %v12191_v35, %v2841_v57  ;;  %v12196_v35 = vcombine.low %v10925_v17, %v10943_v4 }
 0x214   : > { %v3163_v48 = vpop.permute.xlu1 %3162 }
 0x215   : > { %v11449_v60 = vsel %vm3357_vm7, %v3356_v30, %v3163_v48 }
 0x216   : > { %8226 = vmatmul.mubr.msk.bf16.gmra.mrb[68].mxu0 %vm3644_vm8, %v11056_v31  ;;  %v3161_v26 = vpop.permute.xlu0 %3160 }
 0x217   : > { %8229 = vmatprep.mubr.msk.bf16.mxu0 %vm3644_vm8, %v11067_v13  ;;  %v11453_v22 = vpop.f32.mrb[36].mxu1  ;;  %v11456_v46 = vsel %vm3357_vm7, %v3353_v32, %v3161_v26 }
 0x218   : > { %v11458_v42 = vpop.f32.mrb[37].mxu1  ;;  %7997 = vmatprep.mubr.msk.bf16.mxu1 %vm3644_vm8, %v11456_v46 }
 0x219   : > { %12192 = vst [vmem:[#allocation18_spill] sm:$0xff] %v11458_v42  ;;  %v11462_v11 = vpop.f32.mrb[38].mxu1  ;;  %7998 = vmatmul.mubr.msk.bf16.gmra.mrb[120].mxu1 %vm3644_vm8, %v11449_v60 }
 0x21a   : > { %12193 = vst [vmem:[#allocation17_spill] sm:$0xff] %v11462_v11  ;;  %v11466_v63 = vpop.f32.mrb[39].mxu1 }
 0x21b   : > { %12194 = vst [vmem:[#allocation20_spill] sm:$0xff] %v11466_v63 }
 0x21d   : > { %v3575_v62 = vpop.permute.xlu1 %3574 }
 0x21e   : > { %8230 = vmatmul.mubr.msk.bf16.gmra.mrb[72].mxu0 %vm3644_vm8, %v11091_v52  ;;  %v3591_v30 = vsel %vm3164_vm6, %v12195_v37, %v3575_v62 }
 0x21f   : > { %8233 = vmatprep.mubr.msk.bf16.mxu0 %vm3644_vm8, %v11125_v61 }
 0x221   : > { %v3573_v57 = vpop.permute.xlu0 %3572  ;;  %v3585_v48 = vpop.permute.xlu1 %3584 }
 0x222   : > { %v3588_v32 = vsel %vm3164_vm6, %v12196_v35, %v3573_v57  ;;  %v11481_v26 = vsel %vm3357_vm7, %v3591_v30, %v3585_v48  ;;  %v11596_v35 = vld [vmem:[%s12091_s2] ss:$0 sm:$0xff] }
 0x225   : > { %v3583_v63 = vpop.permute.xlu0 %3582  ;;  %v11483_v11 = vpop.f32.mrb[40].mxu1 }
 0x226   : > { %v11486_v42 = vsel %vm3357_vm7, %v3588_v32, %v3583_v63  ;;  %8234 = vmatmul.mubr.msk.bf16.gmra.mrb[76].mxu0 %vm3644_vm8, %v11148_v16  ;;  %v11490_v43 = vpop.f32.mrb[41].mxu1 }
 0x227   : > { %8001 = vmatprep.mubr.msk.bf16.mxu1 %vm3644_vm8, %v11486_v42  ;;  %8237 = vmatprep.mubr.msk.bf16.mxu0 %vm3644_vm8, %v11175_v33  ;;  %v11496_v7 = vpop.f32.mrb[42].mxu1 }
 0x228   : > { %8002 = vmatmul.mubr.msk.bf16.gmra.mrb[124].mxu1 %vm3644_vm8, %v11481_v26  ;;  %v11500_v17 = vpop.f32.mrb[43].mxu1 }
 0x229   : > { %8081 = vmatprep.mubr.msk.bf16.mxu1 %vm3644_vm8, %v12179_v0 }
 0x22e   : > { %8238 = vmatmul.mubr.msk.bf16.gmra.mrb[80].mxu0 %vm3644_vm8, %v11211_v18 }
 0x22f   : > { %8241 = vmatprep.mubr.msk.bf16.mxu0 %vm3644_vm8, %v11219_v59 }
 0x230   : > { %8082 = vmatmul.mubr.msk.bf16.vlgmr.msra.gmra.mrb[64].mxu1 %vm3644_vm8, %v12181_v41 }
 0x231   : > { %8085 = vmatprep.mubr.msk.bf16.mxu1 %vm3644_vm8, %v12183_v36 }
 0x232   : > { %v11512_v4 = vpop.f32.mrb[44].mxu1 }
 0x233   : > { %v11514_v63 = vpop.f32.mrb[45].mxu1 }
 0x234   : > { %v11516_v62 = vpop.f32.mrb[46].mxu1 }
 0x235   : > { %v11518_v57 = vpop.f32.mrb[47].mxu1 }
 0x236   : > { %8242 = vmatmul.mubr.msk.bf16.gmra.mrb[84].mxu0 %vm3644_vm8, %v11245_v47 }
 0x237   : > { %8245 = vmatprep.mubr.msk.bf16.mxu0 %vm3644_vm8, %v11250_v2 }
 0x238   : > { %8086 = vmatmul.mubr.msk.bf16.gmra.mrb[68].mxu1 %vm3644_vm8, %v12187_v24 }
 0x239   : > { %8089 = vmatprep.mubr.msk.bf16.mxu1 %vm3644_vm8, %v11008_v38 }
 0x23e   : > { %8246 = vmatmul.mubr.msk.bf16.gmra.mrb[88].mxu0 %vm3644_vm8, %v11274_v39 }
 0x23f   : > { %8249 = vmatprep.mubr.msk.bf16.mxu0 %vm3644_vm8, %v11280_v45  ;;  %v11532_v41 = vpop.f32.mrb[48].mxu1 }
 0x240   : > { %8090 = vmatmul.mubr.msk.bf16.gmra.mrb[72].mxu1 %vm3644_vm8, %v10999_v15  ;;  %v11536_v0 = vpop.f32.mrb[49].mxu1 }
 0x241   : > { %8093 = vmatprep.mubr.msk.bf16.mxu1 %vm3644_vm8, %v11029_v3  ;;  %v11540_v36 = vpop.f32.mrb[50].mxu1 }
 0x242   : > { %v11542_v24 = vpop.f32.mrb[51].mxu1 }
 0x246   : > { %8250 = vmatmul.mubr.msk.bf16.gmra.mrb[92].mxu0 %vm3644_vm8, %v11297_v27 }
 0x247   : > { %8253 = vmatprep.mubr.msk.bf16.mxu0 %vm3644_vm8, %v11301_v34 }
 0x248   : > { %8094 = vmatmul.mubr.msk.bf16.gmra.mrb[76].mxu1 %vm3644_vm8, %v11056_v31 }
 0x249   : > { %8097 = vmatprep.mubr.msk.bf16.mxu1 %vm3644_vm8, %v11067_v13 }
 0x24b   : > { %v11552_v15 = vpop.f32.mrb[52].mxu1 }
 0x24c   : > { %v11554_v38 = vpop.f32.mrb[53].mxu1 }
 0x24d   : > { %v11556_v3 = vpop.f32.mrb[54].mxu1 }
 0x24e   : > { %8254 = vmatmul.mubr.msk.bf16.gmra.mrb[96].mxu0 %vm3644_vm8, %v11325_v44  ;;  %v11560_v48 = vpop.f32.mrb[55].mxu1 }
 0x24f   : > { %12197 = vst [vmem:[#allocation19_spill] sm:$0xff] %v11560_v48  ;;  %8257 = vmatprep.mubr.msk.bf16.mxu0 %vm3644_vm8, %v11329_v55 }
 0x250   : > { %8098 = vmatmul.mubr.msk.bf16.gmra.mrb[80].mxu1 %vm3644_vm8, %v11091_v52 }
 0x251   : > { %8101 = vmatprep.mubr.msk.bf16.mxu1 %vm3644_vm8, %v11125_v61 }
 0x256   : > { %8258 = vmatmul.mubr.msk.bf16.gmra.mrb[100].mxu0 %vm3644_vm8, %v11347_v29 }
 0x257   : > { %8261 = vmatprep.mubr.msk.bf16.mxu0 %vm3644_vm8, %v11353_v5 }
 0x258   : > { %8102 = vmatmul.mubr.msk.bf16.gmra.mrb[84].mxu1 %vm3644_vm8, %v11148_v16 }
 0x259   : > { %8105 = vmatprep.mubr.msk.bf16.mxu1 %vm3644_vm8, %v11175_v33  ;;  %v11576_v31 = vpop.f32.mrb[56].mxu1  ;;  %v12202_v33 = vld [vmem:[#allocation22_spill] sm:$0xff] }
 0x25a   : > { %12198 = vst [vmem:[#allocation30_spill] sm:$0xff] %v11576_v31  ;;  %v11578_v13 = vpop.f32.mrb[57].mxu1 }
 0x25b   : > { %12199 = vst [vmem:[#allocation31_spill] sm:$0xff] %v11578_v13  ;;  %v11580_v52 = vpop.f32.mrb[58].mxu1 }
 0x25c   : > { %12200 = vst [vmem:[#allocation32_spill] sm:$0xff] %v11580_v52  ;;  %v11582_v61 = vpop.f32.mrb[59].mxu1 }
 0x25d   : > { %12201 = vst [vmem:[#allocation33_spill] sm:$0xff] %v11582_v61 }
 0x25e   : > { %8262 = vmatmul.mubr.msk.bf16.gmra.mrb[104].mxu0 %vm3644_vm8, %v11371_v51 }
 0x25f   : > { %8265 = vmatprep.mubr.msk.bf16.mxu0 %vm3644_vm8, %v11386_v54 }
 0x260   : > { %8106 = vmatmul.mubr.msk.bf16.gmra.mrb[88].mxu1 %vm3644_vm8, %v11211_v18 }
 0x261   : > { %8109 = vmatprep.mubr.msk.bf16.mxu1 %vm3644_vm8, %v11219_v59  ;;  %v8159_v16 = vpop.f32.mrb[0].mxu0 }
 0x262   : > { %v8297_v37 = vadd.f32 %v8159_v16, %v12202_v33  ;;  %v5087_v30 = vpop.f32.mrb[1].mxu0 }
 0x263   : > { %v8298_v32 = vadd.f32 %v5087_v30, %v10965_v6  ;;  %v8160_v61 = vpop.f32.mrb[2].mxu0 }
 0x264   : > { %v8299_v52 = vadd.f32 %v8160_v61, %v10971_v58  ;;  %v5090_v13 = vpop.f32.mrb[3].mxu0  ;;  %v5735_v59 = vadd.f32 %v8297_v37, %v11596_v35 }
 0x265   : > { %v8300_v18 = vadd.f32 %v5090_v13, %v10977_v10  ;;  %v5733_v6 = vadd.f32 %v8298_v32, %v11596_v35 }
 0x266   : > { %v11602_v31 = vpop.f32.mrb[60].mxu1  ;;  %v5736_v16 = vadd.f32 %v8299_v52, %v11596_v35  ;;  %8266 = vmatmul.mubr.msk.bf16.gmra.mrb[108].mxu0 %vm3644_vm8, %v11400_v23 }
 0x267   : > { %12203 = vst [vmem:[#allocation22_spill] sm:$0xff] %v11602_v31  ;;  %v11608_v33 = vpop.f32.mrb[61].mxu1  ;;  %v5734_v58 = vadd.f32 %v8300_v18, %v11596_v35  ;;  %8269 = vmatprep.mubr.msk.bf16.mxu0 %vm3644_vm8, %v11422_v25  ;;  %v12206_v18 = vld [vmem:[#allocation23_spill] sm:$0xff] }
 0x268   : > { %12204 = vst [vmem:[#allocation34_spill] sm:$0xff] %v11608_v33  ;;  %8110 = vmatmul.mubr.msk.bf16.gmra.mrb[92].mxu1 %vm3644_vm8, %v11245_v47  ;;  %v11621_v10 = vpop.f32.mrb[62].mxu1  ;;  %v7280_v13 = vpack.c.bf16 %v5736_v16, %v5735_v59  ;;  %v12207_v47 = vld [vmem:[#allocation25_spill] sm:$0xff]  ;;  %v12208_v59 = vld [vmem:[#allocation26_spill] sm:$0xff] }
 0x269   : > { %12205 = vst [vmem:[#allocation35_spill] sm:$0xff] %v11621_v10  ;;  %8113 = vmatprep.mubr.msk.bf16.mxu1 %vm3644_vm8, %v11250_v2  ;;  %v11625_v52 = vpop.f32.mrb[63].mxu1  ;;  %v7275_v61 = vpack.c.bf16 %v5734_v58, %v5733_v6  ;;  %v8163_v37 = vpop.f32.mrb[4].mxu0 }
 0x26a   : > { %7592 = vst [vmem:[%s11614_s27 + $0x8] sm:$0xff] %v7280_v13   ;;  %v8301_v30 = vadd.f32 %v8163_v37, %v11045_v8  ;;  %v5103_v32 = vpop.f32.mrb[5].mxu0 }
 0x26b   : > { %7276 = vst [vmem:[%s11614_s27] sm:$0xff] %v7275_v61   ;;  %v8302_v33 = vadd.f32 %v5103_v32, %v12206_v18  ;;  %v8164_v31 = vpop.f32.mrb[6].mxu0  ;;  %v4978_v18 = vpop.permute.xlu0 %4977 }
 0x26c   : > { %v8303_v48 = vadd.f32 %v8164_v31, %v12207_v47  ;;  %v5106_v10 = vpop.f32.mrb[7].mxu0  ;;  %v5739_v2 = vadd.f32 %v8301_v30, %v11596_v35 }
 0x26d   : > { %v8304_v16 = vadd.f32 %v5106_v10, %v12208_v59  ;;  %v5737_v8 = vadd.f32 %v8302_v33, %v11596_v35  ;;  %v12210_v33 = vld [vmem:[#allocation2_spill] sm:$0xff] }
 0x26e   : > { %v5740_v6 = vadd.f32 %v8303_v48, %v11596_v35  ;;  %8270 = vmatmul.mubr.msk.bf16.gmra.mrb[112].mxu0 %vm3644_vm8, %v11417_v20  ;;  %v12209_v48 = vld [vmem:[#allocation29_spill] sm:$0xff] }
 0x26f   : > { %v5738_v58 = vadd.f32 %v8304_v16, %v11596_v35  ;;  %8273 = vmatprep.mubr.msk.bf16.mxu0 %vm3644_vm8, %v11456_v46  ;;  %v12211_v16 = vld [vmem:[#allocation24_spill] sm:$0xff] }
 0x270   : > { %8114 = vmatmul.mubr.msk.bf16.gmra.mrb[96].mxu1 %vm3644_vm8, %v11274_v39  ;;  %v7290_v31 = vpack.c.bf16 %v5740_v6, %v5739_v2 }
 0x271   : > { %8117 = vmatprep.mubr.msk.bf16.mxu1 %vm3644_vm8, %v11280_v45  ;;  %v7285_v10 = vpack.c.bf16 %v5738_v58, %v5737_v8  ;;  %v8167_v13 = vpop.f32.mrb[8].mxu0  ;;  %v6936_v45 = vcombine.low %v12211_v16, %v11104_v14 }
 0x272   : > { %7594 = vst [vmem:[%s11614_s27 + $0x18] sm:$0xff] %v7290_v31   ;;  %v8305_v61 = vadd.f32 %v8167_v13, %v12209_v48  ;;  %v5119_v37 = vpop.f32.mrb[9].mxu0 }
 0x273   : > { %7593 = vst [vmem:[%s11614_s27 + $0x10] sm:$0xff] %v7285_v10   ;;  %v8306_v30 = vadd.f32 %v5119_v37, %v12210_v33  ;;  %v8168_v32 = vpop.f32.mrb[10].mxu0  ;;  %v4993_v31 = vsel %vm3164_vm6, %v6936_v45, %v4978_v18  ;;  %v4988_v10 = vpop.permute.xlu0 %4987 }
 0x274   : > { %v8307_v47 = vadd.f32 %v8168_v32, %v11158_v49  ;;  %v5122_v59 = vpop.f32.mrb[11].mxu0  ;;  %v5743_v2 = vadd.f32 %v8305_v61, %v11596_v35  ;;  %v4980_v33 = vpop.permute.xlu1 %4979 }
 0x275   : > { %v8308_v39 = vadd.f32 %v5122_v59, %v11161_v53  ;;  %v5741_v8 = vadd.f32 %v8306_v30, %v11596_v35 }
 0x276   : > { %v5744_v6 = vadd.f32 %v8307_v47, %v11596_v35  ;;  %8274 = vmatmul.mubr.msk.bf16.gmra.mrb[116].mxu0 %vm3644_vm8, %v11449_v60  ;;  %v12212_v47 = vld [vmem:[#allocation28_spill] sm:$0xff] }
 0x277   : > { %v5742_v58 = vadd.f32 %v8308_v39, %v11596_v35  ;;  %8277 = vmatprep.mubr.msk.bf16.mxu0 %vm3644_vm8, %v11486_v42 }
 0x278   : > { %8118 = vmatmul.mubr.msk.bf16.gmra.mrb[100].mxu1 %vm3644_vm8, %v11297_v27  ;;  %v7300_v49 = vpack.c.bf16 %v5744_v6, %v5743_v2  ;;  %v4990_v2 = vpop.permute.xlu1 %4989 }
 0x279   : > { %8121 = vmatprep.mubr.msk.bf16.mxu1 %vm3644_vm8, %v11301_v34  ;;  %v7295_v14 = vpack.c.bf16 %v5742_v58, %v5741_v8  ;;  %v8171_v53 = vpop.f32.mrb[12].mxu0  ;;  %v4998_v34 = vsel %vm3357_vm7, %v4993_v31, %v4988_v10  ;;  %v12214_v8 = vld [vmem:[#allocation4_spill] sm:$0xff]  ;;  %v12216_v31 = vld [vmem:[#allocation6_spill] sm:$0xff] }
 0x27a   : > { %7596 = vst [vmem:[%s11614_s27 + $0x28] sm:$0xff] %v7300_v49   ;;  %v8309_v13 = vadd.f32 %v8171_v53, %v11215_v21  ;;  %v5135_v48 = vpop.f32.mrb[13].mxu0  ;;  %v12213_v21 = vld [vmem:[#allocation27_spill] sm:$0xff] }
 0x27b   : > { %7595 = vst [vmem:[%s11614_s27 + $0x20] sm:$0xff] %v7295_v14   ;;  %v8310_v61 = vadd.f32 %v5135_v48, %v11221_v12  ;;  %v8172_v42 = vpop.f32.mrb[14].mxu0  ;;  %v6937_v59 = vcombine.low %v12213_v21, %v12212_v47  ;;  %v12215_v14 = vld [vmem:[#allocation3_spill] sm:$0xff]  ;;  %v12219_v21 = vld [vmem:[#allocation8_spill] sm:$0xff] }
 0x27c   : > { %v8311_v37 = vadd.f32 %v8172_v42, %v11224_v9  ;;  %v5138_v27 = vpop.f32.mrb[15].mxu0  ;;  %v5747_v32 = vadd.f32 %v8309_v13, %v11596_v35 }
 0x27d   : > { %v8312_v30 = vadd.f32 %v5138_v27, %v11231_v19  ;;  %v5745_v12 = vadd.f32 %v8310_v61, %v11596_v35  ;;  %v4996_v45 = vsel %vm3164_vm6, %v6937_v59, %v4980_v33  ;;  %v12217_v33 = vld [vmem:[#allocation21_spill] sm:$0xff] }
 0x27e   : > { %v5748_v18 = vadd.f32 %v8311_v37, %v11596_v35  ;;  %8278 = vmatmul.mubr.msk.bf16.gmra.mrb[120].mxu0 %vm3644_vm8, %v11481_v26 }
 0x27f   : > { %v5746_v9 = vadd.f32 %v8312_v30, %v11596_v35  ;;  %8281 = vmatprep.mubr.msk.bf16.mxu0 %vm3644_vm8, %v4998_v34 }
 0x280   : > { %8122 = vmatmul.mubr.msk.bf16.gmra.mrb[104].mxu1 %vm3644_vm8, %v11325_v44  ;;  %v7310_v19 = vpack.c.bf16 %v5748_v18, %v5747_v32  ;;  %v12218_v32 = vld [vmem:[#allocation5_spill] sm:$0xff] }
 0x281   : > { %8125 = vmatprep.mubr.msk.bf16.mxu1 %vm3644_vm8, %v11329_v55  ;;  %v7305_v39 = vpack.c.bf16 %v5746_v9, %v5745_v12  ;;  %v8175_v16 = vpop.f32.mrb[16].mxu0  ;;  %v5000_v55 = vsel %vm3357_vm7, %v4996_v45, %v4990_v2 }
 0x282   : > { %7598 = vst [vmem:[%s11614_s27 + $0x38] sm:$0xff] %v7310_v19   ;;  %v8313_v26 = vadd.f32 %v8175_v16, %v11264_v50  ;;  %v5151_v6 = vpop.f32.mrb[17].mxu0 }
 0x283   : > { %7597 = vst [vmem:[%s11614_s27 + $0x30] sm:$0xff] %v7305_v39   ;;  %v8314_v58 = vadd.f32 %v5151_v6, %v12214_v8  ;;  %v8176_v49 = vpop.f32.mrb[18].mxu0  ;;  %v12221_v6 = vld [vmem:[#allocation10_spill] sm:$0xff] }
 0x284   : > { %v8315_v44 = vadd.f32 %v8176_v49, %v12215_v14  ;;  %v5154_v53 = vpop.f32.mrb[19].mxu0  ;;  %v5751_v13 = vadd.f32 %v8313_v26, %v11596_v35  ;;  %v12222_v49 = vld [vmem:[#allocation9_spill] sm:$0xff] }
 0x285   : > { %v8316_v10 = vadd.f32 %v5154_v53, %v12216_v31  ;;  %v5749_v50 = vadd.f32 %v8314_v58, %v11596_v35  ;;  %v12223_v53 = vld [vmem:[#allocation12_spill] sm:$0xff] }
 0x286   : > { %v5752_v48 = vadd.f32 %v8315_v44, %v11596_v35  ;;  %8282 = vmatmul.mubr.msk.bf16.gmra.mrb[124].mxu0 %vm3644_vm8, %v5000_v55 }
 0x287   : > { %v5750_v61 = vadd.f32 %v8316_v10, %v11596_v35 }
 0x288   : > { %8126 = vmatmul.mubr.msk.bf16.gmra.mrb[108].mxu1 %vm3644_vm8, %v11347_v29  ;;  %v7320_v42 = vpack.c.bf16 %v5752_v48, %v5751_v13  ;;  %v12220_v29 = vld [vmem:[#allocation7_spill] sm:$0xff] }
 0x289   : > { %8129 = vmatprep.mubr.msk.bf16.mxu1 %vm3644_vm8, %v11353_v5  ;;  %v7315_v37 = vpack.c.bf16 %v5750_v61, %v5749_v50  ;;  %v8179_v27 = vpop.f32.mrb[20].mxu0 }
 0x28a   : > { %7600 = vst [vmem:[%s11614_s27 + $0x48] sm:$0xff] %v7320_v42   ;;  %v8317_v34 = vadd.f32 %v8179_v27, %v12217_v33  ;;  %v5167_v30 = vpop.f32.mrb[21].mxu0  ;;  %v12225_v27 = vld [vmem:[#allocation14_spill] sm:$0xff] }
 0x28b   : > { %7599 = vst [vmem:[%s11614_s27 + $0x40] sm:$0xff] %v7315_v37   ;;  %v8318_v18 = vadd.f32 %v5167_v30, %v12218_v32  ;;  %v8180_v47 = vpop.f32.mrb[22].mxu0  ;;  %v12226_v30 = vld [vmem:[#allocation13_spill] sm:$0xff] }
 0x28c   : > { %v8319_v59 = vadd.f32 %v8180_v47, %v12219_v21  ;;  %v5170_v12 = vpop.f32.mrb[23].mxu0  ;;  %v5755_v19 = vadd.f32 %v8317_v34, %v11596_v35  ;;  %v12227_v47 = vld [vmem:[#allocation16_spill] sm:$0xff] }
 0x28d   : > { %v8320_v9 = vadd.f32 %v5170_v12, %v12220_v29  ;;  %v5753_v39 = vadd.f32 %v8318_v18, %v11596_v35 }
 0x28e   : > { %v5756_v5 = vadd.f32 %v8319_v59, %v11596_v35 }
 0x28f   : > { %v5754_v16 = vadd.f32 %v8320_v9, %v11596_v35 }
 0x290   : > { %8130 = vmatmul.mubr.msk.bf16.gmra.mrb[112].mxu1 %vm3644_vm8, %v11371_v51  ;;  %v7330_v45 = vpack.c.bf16 %v5756_v5, %v5755_v19  ;;  %v12224_v51 = vld [vmem:[#allocation11_spill] sm:$0xff] }
 0x291   : > { %8133 = vmatprep.mubr.msk.bf16.mxu1 %vm3644_vm8, %v11386_v54  ;;  %v7325_v26 = vpack.c.bf16 %v5754_v16, %v5753_v39  ;;  %v8183_v2 = vpop.f32.mrb[24].mxu0 }
 0x292   : > { %7602 = vst [vmem:[%s11614_s27 + $0x58] sm:$0xff] %v7330_v45   ;;  %v8321_v8 = vadd.f32 %v8183_v2, %v12221_v6  ;;  %v5183_v58 = vpop.f32.mrb[25].mxu0 }
 0x293   : > { %7601 = vst [vmem:[%s11614_s27 + $0x50] sm:$0xff] %v7325_v26   ;;  %v8322_v14 = vadd.f32 %v5183_v58, %v12222_v49  ;;  %v8184_v44 = vpop.f32.mrb[26].mxu0 }
 0x294   : > { %v8323_v55 = vadd.f32 %v8184_v44, %v12223_v53  ;;  %v5186_v31 = vpop.f32.mrb[27].mxu0  ;;  %v5759_v13 = vadd.f32 %v8321_v8, %v11596_v35 }
 0x295   : > { %v8324_v10 = vadd.f32 %v5186_v31, %v12224_v51  ;;  %v5757_v48 = vadd.f32 %v8322_v14, %v11596_v35 }
 0x296   : > { %v5760_v54 = vadd.f32 %v8323_v55, %v11596_v35 }
 0x297   : > { %v5758_v50 = vadd.f32 %v8324_v10, %v11596_v35  ;;  %v12230_v10 = vld [vmem:[#allocation17_spill] sm:$0xff] }
 0x298   : > { %8134 = vmatmul.mubr.msk.bf16.gmra.mrb[116].mxu1 %vm3644_vm8, %v11400_v23  ;;  %v7340_v61 = vpack.c.bf16 %v5760_v54, %v5759_v13  ;;  %v12228_v23 = vld [vmem:[#allocation15_spill] sm:$0xff] }
 0x299   : > { %8137 = vmatprep.mubr.msk.bf16.mxu1 %vm3644_vm8, %v11422_v25  ;;  %v7335_v42 = vpack.c.bf16 %v5758_v50, %v5757_v48  ;;  %v8187_v37 = vpop.f32.mrb[28].mxu0  ;;  %v12231_v48 = vld [vmem:[#allocation20_spill] sm:$0xff] }
 0x29a   : > { %7604 = vst [vmem:[%s11614_s27 + $0x68] sm:$0xff] %v7340_v61   ;;  %v8325_v33 = vadd.f32 %v8187_v37, %v12225_v27  ;;  %v5199_v34 = vpop.f32.mrb[29].mxu0 }
 0x29b   : > { %7603 = vst [vmem:[%s11614_s27 + $0x60] sm:$0xff] %v7335_v42   ;;  %v8326_v32 = vadd.f32 %v5199_v34, %v12226_v30  ;;  %v8188_v18 = vpop.f32.mrb[30].mxu0 }
 0x29c   : > { %v8327_v21 = vadd.f32 %v8188_v18, %v12227_v47  ;;  %v5202_v59 = vpop.f32.mrb[31].mxu0  ;;  %v5763_v29 = vadd.f32 %v8325_v33, %v11596_v35 }
 0x29d   : > { %v8328_v12 = vadd.f32 %v5202_v59, %v12228_v23  ;;  %v5761_v9 = vadd.f32 %v8326_v32, %v11596_v35 }
 0x29e   : > { %v5764_v25 = vadd.f32 %v8327_v21, %v11596_v35 }
 0x29f   : > { %v5762_v19 = vadd.f32 %v8328_v12, %v11596_v35 }
 0x2a0   : > { %8138 = vmatmul.mubr.msk.bf16.gmra.mrb[120].mxu1 %vm3644_vm8, %v11417_v20  ;;  %v7350_v5 = vpack.c.bf16 %v5764_v25, %v5763_v29 }
 0x2a1   : > { %8141 = vmatprep.mubr.msk.bf16.mxu1 %vm3644_vm8, %v11456_v46  ;;  %v7345_v39 = vpack.c.bf16 %v5762_v19, %v5761_v9  ;;  %v8191_v16 = vpop.f32.mrb[32].mxu0 }
 0x2a2   : > { %7606 = vst [vmem:[%s11614_s27 + $0x78] sm:$0xff] %v7350_v5   ;;  %v8329_v45 = vadd.f32 %v8191_v16, %v11419_v40  ;;  %v5215_v26 = vpop.f32.mrb[33].mxu0 }
 0x2a3   : > { %7605 = vst [vmem:[%s11614_s27 + $0x70] sm:$0xff] %v7345_v39   ;;  %v8330_v2 = vadd.f32 %v5215_v26, %v11424_v1  ;;  %v8192_v6 = vpop.f32.mrb[34].mxu0 }
 0x2a4   : > { %v8331_v8 = vadd.f32 %v8192_v6, %v11428_v56  ;;  %v5218_v58 = vpop.f32.mrb[35].mxu0  ;;  %v5767_v49 = vadd.f32 %v8329_v45, %v11596_v35 }
 0x2a5   : > { %v8332_v20 = vadd.f32 %v5218_v58, %v11434_v28  ;;  %v5765_v14 = vadd.f32 %v8330_v2, %v11596_v35  ;;  %v12229_v28 = vld [vmem:[#allocation18_spill] sm:$0xff] }
 0x2a6   : > { %v5768_v46 = vadd.f32 %v8331_v8, %v11596_v35 }
 0x2a7   : > { %v5766_v40 = vadd.f32 %v8332_v20, %v11596_v35 }
 0x2a8   : > { %8142 = vmatmul.mubr.msk.bf16.gmra.mrb[124].mxu1 %vm3644_vm8, %v11449_v60  ;;  %v7360_v44 = vpack.c.bf16 %v5768_v46, %v5767_v49 }
 0x2a9   : > { %v7355_v1 = vpack.c.bf16 %v5766_v40, %v5765_v14  ;;  %v8195_v53 = vpop.f32.mrb[36].mxu0 }
 0x2aa   : > { %7608 = vst [vmem:[%s11614_s27 + $0x88] sm:$0xff] %v7360_v44   ;;  %v8333_v56 = vadd.f32 %v8195_v53, %v11453_v22  ;;  %v5231_v55 = vpop.f32.mrb[37].mxu0 }
 0x2ab   : > { %7607 = vst [vmem:[%s11614_s27 + $0x80] sm:$0xff] %v7355_v1   ;;  %v8334_v31 = vadd.f32 %v5231_v55, %v12229_v28  ;;  %v8196_v51 = vpop.f32.mrb[38].mxu0 }
 0x2ac   : > { %v8335_v13 = vadd.f32 %v8196_v51, %v12230_v10  ;;  %v5234_v54 = vpop.f32.mrb[39].mxu0  ;;  %v5771_v60 = vadd.f32 %v8333_v56, %v11596_v35 }
 0x2ad   : > { %v8336_v50 = vadd.f32 %v5234_v54, %v12231_v48  ;;  %v5769_v42 = vadd.f32 %v8334_v31, %v11596_v35 }
 0x2ae   : > { %v5772_v61 = vadd.f32 %v8335_v13, %v11596_v35  ;;  %v12232_v13 = vld [vmem:[#allocation19_spill] sm:$0xff] }
 0x2af   : > { %v5770_v37 = vadd.f32 %v8336_v50, %v11596_v35 }
 0x2b0   : > { %v7370_v22 = vpack.c.bf16 %v5772_v61, %v5771_v60 }
 0x2b1   : > { %v7365_v27 = vpack.c.bf16 %v5770_v37, %v5769_v42  ;;  %v8199_v33 = vpop.f32.mrb[40].mxu0 }
 0x2b2   : > { %7610 = vst [vmem:[%s11614_s27 + $0x98] sm:$0xff] %v7370_v22   ;;  %v8337_v34 = vadd.f32 %v8199_v33, %v11483_v11  ;;  %v5247_v30 = vpop.f32.mrb[41].mxu0  ;;  %v12233_v22 = vld [vmem:[#allocation30_spill] sm:$0xff] }
 0x2b3   : > { %7609 = vst [vmem:[%s11614_s27 + $0x90] sm:$0xff] %v7365_v27   ;;  %v8338_v32 = vadd.f32 %v5247_v30, %v11490_v43  ;;  %v8200_v18 = vpop.f32.mrb[42].mxu0  ;;  %v12235_v30 = vld [vmem:[#allocation32_spill] sm:$0xff] }
 0x2b4   : > { %v8339_v47 = vadd.f32 %v8200_v18, %v11496_v7  ;;  %v5250_v21 = vpop.f32.mrb[43].mxu0  ;;  %v5775_v23 = vadd.f32 %v8337_v34, %v11596_v35 }
 0x2b5   : > { %v8340_v59 = vadd.f32 %v5250_v21, %v11500_v17  ;;  %v5773_v29 = vadd.f32 %v8338_v32, %v11596_v35 }
 0x2b6   : > { %v5776_v12 = vadd.f32 %v8339_v47, %v11596_v35  ;;  %v12236_v47 = vld [vmem:[#allocation33_spill] sm:$0xff] }
 0x2b7   : > { %v5774_v25 = vadd.f32 %v8340_v59, %v11596_v35 }
 0x2b8   : > { %v7380_v11 = vpack.c.bf16 %v5776_v12, %v5775_v23 }
 0x2b9   : > { %v7375_v9 = vpack.c.bf16 %v5774_v25, %v5773_v29  ;;  %v8203_v19 = vpop.f32.mrb[44].mxu0 }
 0x2ba   : > { %7612 = vst [vmem:[%s11614_s27 + $0xa8] sm:$0xff] %v7380_v11   ;;  %v8341_v43 = vadd.f32 %v8203_v19, %v11512_v4  ;;  %v5263_v5 = vpop.f32.mrb[45].mxu0  ;;  %v12237_v19 = vld [vmem:[#allocation22_spill] sm:$0xff] }
 0x2bb   : > { %7611 = vst [vmem:[%s11614_s27 + $0xa0] sm:$0xff] %v7375_v9   ;;  %v8342_v7 = vadd.f32 %v5263_v5, %v11514_v63  ;;  %v8204_v17 = vpop.f32.mrb[46].mxu0 }
 0x2bc   : > { %v8343_v39 = vadd.f32 %v8204_v17, %v11516_v62  ;;  %v5266_v16 = vpop.f32.mrb[47].mxu0  ;;  %v5779_v26 = vadd.f32 %v8341_v43, %v11596_v35 }
 0x2bd   : > { %v8344_v45 = vadd.f32 %v5266_v16, %v11518_v57  ;;  %v5777_v6 = vadd.f32 %v8342_v7, %v11596_v35  ;;  %v12238_v7 = vld [vmem:[#allocation34_spill] sm:$0xff]  ;;  %v12239_v16 = vld [vmem:[#allocation35_spill] sm:$0xff] }
 0x2be   : > { %v5780_v2 = vadd.f32 %v8343_v39, %v11596_v35 }
 0x2bf   : > { %v5778_v8 = vadd.f32 %v8344_v45, %v11596_v35 }
 0x2c0   : > { %v7390_v4 = vpack.c.bf16 %v5780_v2, %v5779_v26 }
 0x2c1   : > { %v7385_v58 = vpack.c.bf16 %v5778_v8, %v5777_v6  ;;  %v8207_v20 = vpop.f32.mrb[48].mxu0 }
 0x2c2   : > { %7614 = vst [vmem:[%s11614_s27 + $0xb8] sm:$0xff] %v7390_v4   ;;  %v8345_v63 = vadd.f32 %v8207_v20, %v11532_v41  ;;  %v5279_v49 = vpop.f32.mrb[49].mxu0 }
 0x2c3   : > { %7613 = vst [vmem:[%s11614_s27 + $0xb0] sm:$0xff] %v7385_v58   ;;  %v8346_v62 = vadd.f32 %v5279_v49, %v11536_v0  ;;  %v8208_v57 = vpop.f32.mrb[50].mxu0 }
 0x2c4   : > { %v8347_v46 = vadd.f32 %v8208_v57, %v11540_v36  ;;  %v5282_v14 = vpop.f32.mrb[51].mxu0  ;;  %v5783_v44 = vadd.f32 %v8345_v63, %v11596_v35 }
 0x2c5   : > { %v8348_v40 = vadd.f32 %v5282_v14, %v11542_v24  ;;  %v5781_v53 = vadd.f32 %v8346_v62, %v11596_v35 }
 0x2c6   : > { %v5784_v1 = vadd.f32 %v8347_v46, %v11596_v35 }
 0x2c7   : > { %v5782_v56 = vadd.f32 %v8348_v40, %v11596_v35 }
 0x2c8   : > { %v7400_v41 = vpack.c.bf16 %v5784_v1, %v5783_v44 }
 0x2c9   : > { %v7395_v55 = vpack.c.bf16 %v5782_v56, %v5781_v53  ;;  %v8211_v28 = vpop.f32.mrb[52].mxu0 }
 0x2ca   : > { %7616 = vst [vmem:[%s11614_s27 + $0xc8] sm:$0xff] %v7400_v41   ;;  %v8349_v0 = vadd.f32 %v8211_v28, %v11552_v15  ;;  %v5295_v31 = vpop.f32.mrb[53].mxu0 }
 0x2cb   : > { %7615 = vst [vmem:[%s11614_s27 + $0xc0] sm:$0xff] %v7395_v55   ;;  %v8350_v36 = vadd.f32 %v5295_v31, %v11554_v38  ;;  %v8212_v24 = vpop.f32.mrb[54].mxu0 }
 0x2cc   : > { %v8351_v51 = vadd.f32 %v8212_v24, %v11556_v3  ;;  %v5298_v10 = vpop.f32.mrb[55].mxu0  ;;  %v5787_v48 = vadd.f32 %v8349_v0, %v11596_v35  ;;  %v12234_v3 = vld [vmem:[#allocation31_spill] sm:$0xff] }
 0x2cd   : > { %v8352_v54 = vadd.f32 %v5298_v10, %v12232_v13  ;;  %v5785_v60 = vadd.f32 %v8350_v36, %v11596_v35 }
 0x2ce   : > { %v5788_v50 = vadd.f32 %v8351_v51, %v11596_v35 }
 0x2cf   : > { %v5786_v61 = vadd.f32 %v8352_v54, %v11596_v35 }
 0x2d0   : > { %v7410_v15 = vpack.c.bf16 %v5788_v50, %v5787_v48 }
 0x2d1   : > { %v7405_v42 = vpack.c.bf16 %v5786_v61, %v5785_v60  ;;  %v8215_v37 = vpop.f32.mrb[56].mxu0 }
 0x2d2   : > { %7618 = vst [vmem:[%s11614_s27 + $0xd8] sm:$0xff] %v7410_v15   ;;  %v8353_v38 = vadd.f32 %v8215_v37, %v12233_v22  ;;  %v5311_v27 = vpop.f32.mrb[57].mxu0 }
 0x2d3   : > { %7617 = vst [vmem:[%s11614_s27 + $0xd0] sm:$0xff] %v7405_v42   ;;  %v8354_v33 = vadd.f32 %v5311_v27, %v12234_v3  ;;  %v8216_v34 = vpop.f32.mrb[58].mxu0 }
 0x2d4   : > { %v8355_v32 = vadd.f32 %v8216_v34, %v12235_v30  ;;  %v5314_v18 = vpop.f32.mrb[59].mxu0  ;;  %v5791_v59 = vadd.f32 %v8353_v38, %v11596_v35 }
 0x2d5   : > { %v8356_v21 = vadd.f32 %v5314_v18, %v12236_v47  ;;  %v5789_v12 = vadd.f32 %v8354_v33, %v11596_v35 }
 0x2d6   : > { %v5792_v23 = vadd.f32 %v8355_v32, %v11596_v35 }
 0x2d7   : > { %v5790_v29 = vadd.f32 %v8356_v21, %v11596_v35 }
 0x2d8   : > { %v7420_v25 = vpack.c.bf16 %v5792_v23, %v5791_v59 }
 0x2d9   : > { %v7415_v11 = vpack.c.bf16 %v5790_v29, %v5789_v12  ;;  %v8219_v9 = vpop.f32.mrb[60].mxu0 }
 0x2da   : > { %7620 = vst [vmem:[%s11614_s27 + $0xe8] sm:$0xff] %v7420_v25   ;;  %v8357_v43 = vadd.f32 %v8219_v9, %v12237_v19  ;;  %v5327_v5 = vpop.f32.mrb[61].mxu0 }
 0x2db   : > { %7619 = vst [vmem:[%s11614_s27 + $0xe0] sm:$0xff] %v7415_v11   ;;  %v8358_v17 = vadd.f32 %v5327_v5, %v12238_v7  ;;  %v8220_v39 = vpop.f32.mrb[62].mxu0 }
 0x2dc   : > { %v8359_v45 = vadd.f32 %v8220_v39, %v12239_v16  ;;  %v5330_v26 = vpop.f32.mrb[63].mxu0  ;;  %v5795_v6 = vadd.f32 %v8357_v43, %v11596_v35 }
 0x2dd   : > { %v8360_v2 = vadd.f32 %v5330_v26, %v11625_v52  ;;  %v5793_v4 = vadd.f32 %v8358_v17, %v11596_v35 }
 0x2de   : > { %v5796_v8 = vadd.f32 %v8359_v45, %v11596_v35 }
 0x2df   : > { %v5794_v58 = vadd.f32 %v8360_v2, %v11596_v35 }
 0x2e0   : > { %v7430_v20 = vpack.c.bf16 %v5796_v8, %v5795_v6 }
 0x2e1   : > { %v7425_v63 = vpack.c.bf16 %v5794_v58, %v5793_v4  ;;  %v8223_v49 = vpop.f32.mrb[64].mxu0 }
 0x2e2   : > { %7622 = vst [vmem:[%s11614_s27 + $0xf8] sm:$0xff] %v7430_v20   ;;  %v5343_v62 = vpop.f32.mrb[65].mxu0 }
 0x2e3   : > { %7621 = vst [vmem:[%s11614_s27 + $0xf0] sm:$0xff] %v7425_v63   ;;  %v8224_v57 = vpop.f32.mrb[66].mxu0 }
 0x2e4   : > { %v5346_v46 = vpop.f32.mrb[67].mxu0 }
 0x2e9   : > { %v8227_v14 = vpop.f32.mrb[68].mxu0 }
 0x2ea   : > { %v5359_v40 = vpop.f32.mrb[69].mxu0 }
 0x2eb   : > { %v8228_v44 = vpop.f32.mrb[70].mxu0 }
 0x2ec   : > { %v5362_v52 = vpop.f32.mrb[71].mxu0 }
 0x2f1   : > { %v8231_v1 = vpop.f32.mrb[72].mxu0 }
 0x2f2   : > { %v5375_v53 = vpop.f32.mrb[73].mxu0 }
 0x2f3   : > { %v8232_v56 = vpop.f32.mrb[74].mxu0 }
 0x2f4   : > { %v5378_v41 = vpop.f32.mrb[75].mxu0 }
 0x2f9   : > { %v11829_v55 = vpop.f32.mrb[76].mxu0 }
 0x2fa   : > { %v11831_v28 = vpop.f32.mrb[77].mxu0 }
 0x2fb   : > { %v11833_v0 = vpop.f32.mrb[78].mxu0 }
 0x2fc   : > { %v11835_v31 = vpop.f32.mrb[79].mxu0 }
 0x301   : > { %v11837_v36 = vpop.f32.mrb[80].mxu0 }
 0x302   : > { %v11839_v24 = vpop.f32.mrb[81].mxu0 }
 0x303   : > { %v8083_v51 = vpop.f32.mrb[64].mxu1  ;;  %v11841_v10 = vpop.f32.mrb[82].mxu0 }
 0x304   : > { %v8361_v13 = vadd.f32 %v8223_v49, %v8083_v51  ;;  %v4648_v54 = vpop.f32.mrb[65].mxu1  ;;  %v11843_v48 = vpop.f32.mrb[83].mxu0 }
 0x305   : > { %v8362_v50 = vadd.f32 %v5343_v62, %v4648_v54  ;;  %v8084_v60 = vpop.f32.mrb[66].mxu1 }
 0x306   : > { %v8363_v61 = vadd.f32 %v8224_v57, %v8084_v60  ;;  %v4651_v15 = vpop.f32.mrb[67].mxu1  ;;  %v5799_v37 = vadd.f32 %v8361_v13, %v11596_v35 }
 0x307   : > { %v8364_v42 = vadd.f32 %v5346_v46, %v4651_v15  ;;  %v5797_v38 = vadd.f32 %v8362_v50, %v11596_v35 }
 0x308   : > { %v5800_v22 = vadd.f32 %v8363_v61, %v11596_v35 }
 0x309   : > { %v5798_v27 = vadd.f32 %v8364_v42, %v11596_v35  ;;  %v11849_v3 = vpop.f32.mrb[84].mxu0 }
 0x30a   : > { %v7440_v33 = vpack.c.bf16 %v5800_v22, %v5799_v37  ;;  %v11851_v34 = vpop.f32.mrb[85].mxu0 }
 0x30b   : > { %v7435_v30 = vpack.c.bf16 %v5798_v27, %v5797_v38  ;;  %v8087_v32 = vpop.f32.mrb[68].mxu1  ;;  %v11853_v18 = vpop.f32.mrb[86].mxu0 }
 0x30c   : > { %7624 = vst [vmem:[%s11614_s27 + $0x108] sm:$0xff] %v7440_v33   ;;  %v8365_v47 = vadd.f32 %v8227_v14, %v8087_v32  ;;  %v4664_v21 = vpop.f32.mrb[69].mxu1  ;;  %v11856_v59 = vpop.f32.mrb[87].mxu0 }
 0x30d   : > { %7623 = vst [vmem:[%s11614_s27 + $0x100] sm:$0xff] %v7435_v30   ;;  %v8366_v23 = vadd.f32 %v5359_v40, %v4664_v21  ;;  %v8088_v12 = vpop.f32.mrb[70].mxu1 }
 0x30e   : > { %v8367_v29 = vadd.f32 %v8228_v44, %v8088_v12  ;;  %v4667_v25 = vpop.f32.mrb[71].mxu1  ;;  %v5803_v9 = vadd.f32 %v8365_v47, %v11596_v35 }
 0x30f   : > { %v8368_v11 = vadd.f32 %v5362_v52, %v4667_v25  ;;  %v5801_v43 = vadd.f32 %v8366_v23, %v11596_v35 }
 0x310   : > { %v5804_v19 = vadd.f32 %v8367_v29, %v11596_v35 }
 0x311   : > { %v5802_v5 = vadd.f32 %v8368_v11, %v11596_v35  ;;  %v11863_v7 = vpop.f32.mrb[88].mxu0 }
 0x312   : > { %v7450_v17 = vpack.c.bf16 %v5804_v19, %v5803_v9  ;;  %v11865_v39 = vpop.f32.mrb[89].mxu0 }
 0x313   : > { %v7445_v16 = vpack.c.bf16 %v5802_v5, %v5801_v43  ;;  %v8091_v45 = vpop.f32.mrb[72].mxu1  ;;  %v11867_v26 = vpop.f32.mrb[90].mxu0 }
 0x314   : > { %7626 = vst [vmem:[%s11614_s27 + $0x118] sm:$0xff] %v7450_v17   ;;  %v8369_v2 = vadd.f32 %v8231_v1, %v8091_v45  ;;  %v4680_v6 = vpop.f32.mrb[73].mxu1  ;;  %v11870_v8 = vpop.f32.mrb[91].mxu0 }
 0x315   : > { %7625 = vst [vmem:[%s11614_s27 + $0x110] sm:$0xff] %v7445_v16   ;;  %v8370_v4 = vadd.f32 %v5375_v53, %v4680_v6  ;;  %v8092_v58 = vpop.f32.mrb[74].mxu1 }
 0x316   : > { %v8371_v20 = vadd.f32 %v8232_v56, %v8092_v58  ;;  %v4683_v63 = vpop.f32.mrb[75].mxu1  ;;  %v5807_v62 = vadd.f32 %v8369_v2, %v11596_v35 }
 0x317   : > { %v8372_v49 = vadd.f32 %v5378_v41, %v4683_v63  ;;  %v5805_v46 = vadd.f32 %v8370_v4, %v11596_v35 }
 0x318   : > { %v5808_v57 = vadd.f32 %v8371_v20, %v11596_v35 }
 0x319   : > { %v5806_v14 = vadd.f32 %v8372_v49, %v11596_v35  ;;  %v11877_v40 = vpop.f32.mrb[92].mxu0 }
 0x31a   : > { %v7460_v44 = vpack.c.bf16 %v5808_v57, %v5807_v62  ;;  %v11879_v52 = vpop.f32.mrb[93].mxu0 }
 0x31b   : > { %v7455_v1 = vpack.c.bf16 %v5806_v14, %v5805_v46  ;;  %v8095_v53 = vpop.f32.mrb[76].mxu1  ;;  %v11881_v51 = vpop.f32.mrb[94].mxu0 }
 0x31c   : > { %7628 = vst [vmem:[%s11614_s27 + $0x128] sm:$0xff] %v7460_v44   ;;  %v8373_v56 = vadd.f32 %v11829_v55, %v8095_v53  ;;  %v4696_v41 = vpop.f32.mrb[77].mxu1  ;;  %v11885_v13 = vpop.f32.mrb[95].mxu0 }
 0x31d   : > { %7627 = vst [vmem:[%s11614_s27 + $0x120] sm:$0xff] %v7455_v1   ;;  %v8374_v54 = vadd.f32 %v11831_v28, %v4696_v41  ;;  %v8096_v50 = vpop.f32.mrb[78].mxu1 }
 0x31e   : > { %v8375_v60 = vadd.f32 %v11833_v0, %v8096_v50  ;;  %v4699_v61 = vpop.f32.mrb[79].mxu1  ;;  %v5811_v42 = vadd.f32 %v8373_v56, %v11596_v35 }
 0x31f   : > { %v8376_v15 = vadd.f32 %v11835_v31, %v4699_v61  ;;  %v5809_v55 = vadd.f32 %v8374_v54, %v11596_v35 }
 0x320   : > { %v5812_v37 = vadd.f32 %v8375_v60, %v11596_v35 }
 0x321   : > { %v5810_v22 = vadd.f32 %v8376_v15, %v11596_v35  ;;  %v11895_v38 = vpop.f32.mrb[96].mxu0 }
 0x322   : > { %v7470_v27 = vpack.c.bf16 %v5812_v37, %v5811_v42  ;;  %v11897_v33 = vpop.f32.mrb[97].mxu0 }
 0x323   : > { %v7465_v28 = vpack.c.bf16 %v5810_v22, %v5809_v55  ;;  %v8099_v30 = vpop.f32.mrb[80].mxu1  ;;  %v11899_v0 = vpop.f32.mrb[98].mxu0 }
 0x324   : > { %7630 = vst [vmem:[%s11614_s27 + $0x138] sm:$0xff] %v7470_v27   ;;  %v8377_v31 = vadd.f32 %v11837_v36, %v8099_v30  ;;  %v4712_v32 = vpop.f32.mrb[81].mxu1  ;;  %v11903_v47 = vpop.f32.mrb[99].mxu0 }
 0x325   : > { %7629 = vst [vmem:[%s11614_s27 + $0x130] sm:$0xff] %v7465_v28   ;;  %v8378_v21 = vadd.f32 %v11839_v24, %v4712_v32  ;;  %v8100_v23 = vpop.f32.mrb[82].mxu1 }
 0x326   : > { %v8379_v12 = vadd.f32 %v11841_v10, %v8100_v23  ;;  %v4715_v29 = vpop.f32.mrb[83].mxu1  ;;  %v5815_v11 = vadd.f32 %v8377_v31, %v11596_v35 }
 0x327   : > { %v8380_v25 = vadd.f32 %v11843_v48, %v4715_v29  ;;  %v5813_v36 = vadd.f32 %v8378_v21, %v11596_v35 }
 0x328   : > { %v5816_v9 = vadd.f32 %v8379_v12, %v11596_v35 }
 0x329   : > { %v5814_v19 = vadd.f32 %v8380_v25, %v11596_v35  ;;  %v11913_v43 = vpop.f32.mrb[100].mxu0 }
 0x32a   : > { %v7480_v5 = vpack.c.bf16 %v5816_v9, %v5815_v11  ;;  %v11915_v17 = vpop.f32.mrb[101].mxu0 }
 0x32b   : > { %v7475_v24 = vpack.c.bf16 %v5814_v19, %v5813_v36  ;;  %v8103_v16 = vpop.f32.mrb[84].mxu1  ;;  %v11917_v10 = vpop.f32.mrb[102].mxu0 }
 0x32c   : > { %7632 = vst [vmem:[%s11614_s27 + $0x148] sm:$0xff] %v7480_v5   ;;  %v8381_v48 = vadd.f32 %v11849_v3, %v8103_v16  ;;  %v4728_v45 = vpop.f32.mrb[85].mxu1  ;;  %v11921_v2 = vpop.f32.mrb[103].mxu0 }
 0x32d   : > { %7631 = vst [vmem:[%s11614_s27 + $0x140] sm:$0xff] %v7475_v24   ;;  %v8382_v6 = vadd.f32 %v11851_v34, %v4728_v45  ;;  %v8104_v4 = vpop.f32.mrb[86].mxu1 }
 0x32e   : > { %v8383_v58 = vadd.f32 %v11853_v18, %v8104_v4  ;;  %v4731_v20 = vpop.f32.mrb[87].mxu1  ;;  %v5819_v49 = vadd.f32 %v8381_v48, %v11596_v35 }
 0x32f   : > { %v8384_v63 = vadd.f32 %v11856_v59, %v4731_v20  ;;  %v5817_v3 = vadd.f32 %v8382_v6, %v11596_v35 }
 0x330   : > { %v5820_v62 = vadd.f32 %v8383_v58, %v11596_v35 }
 0x331   : > { %v5818_v57 = vadd.f32 %v8384_v63, %v11596_v35  ;;  %v11931_v46 = vpop.f32.mrb[104].mxu0 }
 0x332   : > { %v7490_v14 = vpack.c.bf16 %v5820_v62, %v5819_v49  ;;  %v11933_v44 = vpop.f32.mrb[105].mxu0 }
 0x333   : > { %v7485_v34 = vpack.c.bf16 %v5818_v57, %v5817_v3  ;;  %v8107_v1 = vpop.f32.mrb[88].mxu1  ;;  %v11935_v18 = vpop.f32.mrb[106].mxu0 }
 0x334   : > { %7634 = vst [vmem:[%s11614_s27 + $0x158] sm:$0xff] %v7490_v14   ;;  %v8385_v59 = vadd.f32 %v11863_v7, %v8107_v1  ;;  %v4744_v53 = vpop.f32.mrb[89].mxu1  ;;  %v11939_v56 = vpop.f32.mrb[107].mxu0 }
 0x335   : > { %7633 = vst [vmem:[%s11614_s27 + $0x150] sm:$0xff] %v7485_v34   ;;  %v8386_v41 = vadd.f32 %v11865_v39, %v4744_v53  ;;  %v8108_v54 = vpop.f32.mrb[90].mxu1 }
 0x336   : > { %v8387_v50 = vadd.f32 %v11867_v26, %v8108_v54  ;;  %v4747_v60 = vpop.f32.mrb[91].mxu1  ;;  %v5823_v15 = vadd.f32 %v8385_v59, %v11596_v35 }
 0x337   : > { %v8388_v61 = vadd.f32 %v11870_v8, %v4747_v60  ;;  %v5821_v7 = vadd.f32 %v8386_v41, %v11596_v35 }
 0x338   : > { %v5824_v42 = vadd.f32 %v8387_v50, %v11596_v35 }
 0x339   : > { %v5822_v37 = vadd.f32 %v8388_v61, %v11596_v35  ;;  %v11949_v55 = vpop.f32.mrb[108].mxu0 }
 0x33a   : > { %v7500_v22 = vpack.c.bf16 %v5824_v42, %v5823_v15  ;;  %v11951_v27 = vpop.f32.mrb[109].mxu0 }
 0x33b   : > { %v7495_v39 = vpack.c.bf16 %v5822_v37, %v5821_v7  ;;  %v8111_v28 = vpop.f32.mrb[92].mxu1  ;;  %v11953_v26 = vpop.f32.mrb[110].mxu0 }
 0x33c   : > { %7636 = vst [vmem:[%s11614_s27 + $0x168] sm:$0xff] %v7500_v22   ;;  %v8389_v8 = vadd.f32 %v11877_v40, %v8111_v28  ;;  %v4760_v30 = vpop.f32.mrb[93].mxu1  ;;  %v11957_v31 = vpop.f32.mrb[111].mxu0 }
 0x33d   : > { %7635 = vst [vmem:[%s11614_s27 + $0x160] sm:$0xff] %v7495_v39   ;;  %v8390_v32 = vadd.f32 %v11879_v52, %v4760_v30  ;;  %v8112_v21 = vpop.f32.mrb[94].mxu1 }
 0x33e   : > { %v8391_v23 = vadd.f32 %v11881_v51, %v8112_v21  ;;  %v4763_v12 = vpop.f32.mrb[95].mxu1  ;;  %v5827_v25 = vadd.f32 %v8389_v8, %v11596_v35 }
 0x33f   : > { %v8392_v29 = vadd.f32 %v11885_v13, %v4763_v12  ;;  %v5825_v40 = vadd.f32 %v8390_v32, %v11596_v35  ;;  %v12020_v12 = vld [vmem:[%s12091_s2] ss:$0 sm:$0xff] }
 0x340   : > { %v5828_v11 = vadd.f32 %v8391_v23, %v11596_v35 }
 0x341   : > { %v5826_v9 = vadd.f32 %v8392_v29, %v11596_v35  ;;  %v11967_v36 = vpop.f32.mrb[112].mxu0 }
 0x342   : > { %v7510_v19 = vpack.c.bf16 %v5828_v11, %v5827_v25  ;;  %v11969_v5 = vpop.f32.mrb[113].mxu0 }
 0x343   : > { %v7505_v52 = vpack.c.bf16 %v5826_v9, %v5825_v40  ;;  %v8115_v24 = vpop.f32.mrb[96].mxu1  ;;  %v11971_v51 = vpop.f32.mrb[114].mxu0 }
 0x344   : > { %7638 = vst [vmem:[%s11614_s27 + $0x178] sm:$0xff] %v7510_v19   ;;  %v8393_v13 = vadd.f32 %v11895_v38, %v8115_v24  ;;  %v4776_v16 = vpop.f32.mrb[97].mxu1  ;;  %v11975_v48 = vpop.f32.mrb[115].mxu0 }
 0x345   : > { %7637 = vst [vmem:[%s11614_s27 + $0x170] sm:$0xff] %v7505_v52   ;;  %v8394_v45 = vadd.f32 %v11897_v33, %v4776_v16  ;;  %v8116_v6 = vpop.f32.mrb[98].mxu1 }
 0x346   : > { %v8395_v4 = vadd.f32 %v11899_v0, %v8116_v6  ;;  %v4779_v58 = vpop.f32.mrb[99].mxu1  ;;  %v5831_v63 = vadd.f32 %v8393_v13, %v11596_v35 }
 0x347   : > { %v8396_v20 = vadd.f32 %v11903_v47, %v4779_v58  ;;  %v5829_v38 = vadd.f32 %v8394_v45, %v11596_v35 }
 0x348   : > { %v5832_v49 = vadd.f32 %v8395_v4, %v11596_v35 }
 0x349   : > { %v5830_v62 = vadd.f32 %v8396_v20, %v11596_v35  ;;  %v11985_v3 = vpop.f32.mrb[116].mxu0 }
 0x34a   : > { %v7520_v57 = vpack.c.bf16 %v5832_v49, %v5831_v63  ;;  %v11987_v14 = vpop.f32.mrb[117].mxu0 }
 0x34b   : > { %v7515_v33 = vpack.c.bf16 %v5830_v62, %v5829_v38  ;;  %v8119_v34 = vpop.f32.mrb[100].mxu1  ;;  %v11989_v0 = vpop.f32.mrb[118].mxu0 }
 0x34c   : > { %7640 = vst [vmem:[%s11614_s27 + $0x188] sm:$0xff] %v7520_v57   ;;  %v8397_v47 = vadd.f32 %v11913_v43, %v8119_v34  ;;  %v4792_v1 = vpop.f32.mrb[101].mxu1  ;;  %v11993_v59 = vpop.f32.mrb[119].mxu0 }
 0x34d   : > { %7639 = vst [vmem:[%s11614_s27 + $0x180] sm:$0xff] %v7515_v33   ;;  %v8398_v53 = vadd.f32 %v11915_v17, %v4792_v1  ;;  %v8120_v41 = vpop.f32.mrb[102].mxu1 }
 0x34e   : > { %v8399_v54 = vadd.f32 %v11917_v10, %v8120_v41  ;;  %v4795_v50 = vpop.f32.mrb[103].mxu1  ;;  %v5835_v61 = vadd.f32 %v8397_v47, %v11596_v35 }
 0x34f   : > { %v8400_v60 = vadd.f32 %v11921_v2, %v4795_v50  ;;  %v5833_v43 = vadd.f32 %v8398_v53, %v11596_v35 }
 0x350   : > { %v5836_v15 = vadd.f32 %v8399_v54, %v11596_v35 }
 0x351   : > { %v5834_v42 = vadd.f32 %v8400_v60, %v11596_v35  ;;  %v12003_v7 = vpop.f32.mrb[120].mxu0 }
 0x352   : > { %v7530_v37 = vpack.c.bf16 %v5836_v15, %v5835_v61  ;;  %v12005_v22 = vpop.f32.mrb[121].mxu0 }
 0x353   : > { %v7525_v17 = vpack.c.bf16 %v5834_v42, %v5833_v43  ;;  %v8123_v39 = vpop.f32.mrb[104].mxu1  ;;  %v12007_v10 = vpop.f32.mrb[122].mxu0 }
 0x354   : > { %7642 = vst [vmem:[%s11614_s27 + $0x198] sm:$0xff] %v7530_v37   ;;  %v8401_v2 = vadd.f32 %v11931_v46, %v8123_v39  ;;  %v4808_v28 = vpop.f32.mrb[105].mxu1  ;;  %v12011_v8 = vpop.f32.mrb[123].mxu0 }
 0x355   : > { %7641 = vst [vmem:[%s11614_s27 + $0x190] sm:$0xff] %v7525_v17   ;;  %v8402_v30 = vadd.f32 %v11933_v44, %v4808_v28  ;;  %v8124_v35 = vpop.f32.mrb[106].mxu1 }
 0x356   : > { %v8403_v32 = vadd.f32 %v11935_v18, %v8124_v35  ;;  %v4811_v21 = vpop.f32.mrb[107].mxu1  ;;  %v5839_v46 = vadd.f32 %v12020_v12, %v8401_v2 }
 0x357   : > { %v8404_v23 = vadd.f32 %v11939_v56, %v4811_v21  ;;  %v5837_v25 = vadd.f32 %v12020_v12, %v8402_v30 }
 0x358   : > { %v5840_v29 = vadd.f32 %v12020_v12, %v8403_v32 }
 0x359   : > { %v5838_v44 = vadd.f32 %v12020_v12, %v8404_v23  ;;  %v12026_v11 = vpop.f32.mrb[124].mxu0 }
 0x35a   : > { %v7540_v18 = vpack.c.bf16 %v5840_v29, %v5839_v46  ;;  %v12028_v40 = vpop.f32.mrb[125].mxu0 }
 0x35b   : > { %v7535_v56 = vpack.c.bf16 %v5838_v44, %v5837_v25  ;;  %v8127_v9 = vpop.f32.mrb[108].mxu1  ;;  %v12030_v19 = vpop.f32.mrb[126].mxu0 }
 0x35c   : > { %7644 = vst [vmem:[%s11614_s27 + $0x1a8] sm:$0xff] %v7540_v18   ;;  %v8405_v52 = vadd.f32 %v11949_v55, %v8127_v9  ;;  %v4824_v24 = vpop.f32.mrb[109].mxu1  ;;  %v12034_v13 = vpop.f32.mrb[127].mxu0 }
 0x35d   : > { %7643 = vst [vmem:[%s11614_s27 + $0x1a0] sm:$0xff] %v7535_v56   ;;  %v8406_v16 = vadd.f32 %v11951_v27, %v4824_v24  ;;  %v8128_v45 = vpop.f32.mrb[110].mxu1 }
 0x35e   : > { %v8407_v6 = vadd.f32 %v11953_v26, %v8128_v45  ;;  %v4827_v4 = vpop.f32.mrb[111].mxu1  ;;  %v5843_v20 = vadd.f32 %v12020_v12, %v8405_v52 }
 0x35f   : > { %v8408_v58 = vadd.f32 %v11957_v31, %v4827_v4  ;;  %v5841_v55 = vadd.f32 %v12020_v12, %v8406_v16 }
 0x360   : > { %v5844_v63 = vadd.f32 %v12020_v12, %v8407_v6 }
 0x361   : > { %v5842_v49 = vadd.f32 %v12020_v12, %v8408_v58 }
 0x362   : > { %v7550_v38 = vpack.c.bf16 %v5844_v63, %v5843_v20 }
 0x363   : > { %v7545_v62 = vpack.c.bf16 %v5842_v49, %v5841_v55  ;;  %v8131_v57 = vpop.f32.mrb[112].mxu1 }
 0x364   : > { %7646 = vst [vmem:[%s11614_s27 + $0x1b8] sm:$0xff] %v7550_v38   ;;  %v8409_v27 = vadd.f32 %v11967_v36, %v8131_v57  ;;  %v4840_v33 = vpop.f32.mrb[113].mxu1 }
 0x365   : > { %7645 = vst [vmem:[%s11614_s27 + $0x1b0] sm:$0xff] %v7545_v62   ;;  %v8410_v26 = vadd.f32 %v11969_v5, %v4840_v33  ;;  %v8132_v31 = vpop.f32.mrb[114].mxu1 }
 0x366   : > { %v8411_v34 = vadd.f32 %v11971_v51, %v8132_v31  ;;  %v4843_v47 = vpop.f32.mrb[115].mxu1  ;;  %v5847_v53 = vadd.f32 %v12020_v12, %v8409_v27 }
 0x367   : > { %v8412_v1 = vadd.f32 %v11975_v48, %v4843_v47  ;;  %v5845_v54 = vadd.f32 %v12020_v12, %v8410_v26 }
 0x368   : > { %v5848_v41 = vadd.f32 %v12020_v12, %v8411_v34 }
 0x369   : > { %v5846_v50 = vadd.f32 %v12020_v12, %v8412_v1 }
 0x36a   : > { %v7560_v36 = vpack.c.bf16 %v5848_v41, %v5847_v53 }
 0x36b   : > { %v7555_v60 = vpack.c.bf16 %v5846_v50, %v5845_v54  ;;  %v8135_v61 = vpop.f32.mrb[116].mxu1 }
 0x36c   : > { %7648 = vst [vmem:[%s11614_s27 + $0x1c8] sm:$0xff] %v7560_v36   ;;  %v8413_v5 = vadd.f32 %v11985_v3, %v8135_v61  ;;  %v4856_v15 = vpop.f32.mrb[117].mxu1 }
 0x36d   : > { %7647 = vst [vmem:[%s11614_s27 + $0x1c0] sm:$0xff] %v7555_v60   ;;  %v8414_v51 = vadd.f32 %v11987_v14, %v4856_v15  ;;  %v8136_v48 = vpop.f32.mrb[118].mxu1 }
 0x36e   : > { %v8415_v43 = vadd.f32 %v11989_v0, %v8136_v48  ;;  %v4859_v42 = vpop.f32.mrb[119].mxu1  ;;  %v5851_v17 = vadd.f32 %v12020_v12, %v8413_v5 }
 0x36f   : > { %v8416_v37 = vadd.f32 %v11993_v59, %v4859_v42  ;;  %v5849_v2 = vadd.f32 %v12020_v12, %v8414_v51 }
 0x370   : > { %v5852_v39 = vadd.f32 %v12020_v12, %v8415_v43 }
 0x371   : > { %v5850_v28 = vadd.f32 %v12020_v12, %v8416_v37 }
 0x372   : > { %v7570_v3 = vpack.c.bf16 %v5852_v39, %v5851_v17 }
 0x373   : > { %v7565_v30 = vpack.c.bf16 %v5850_v28, %v5849_v2  ;;  %v8139_v35 = vpop.f32.mrb[120].mxu1 }
 0x374   : > { %7650 = vst [vmem:[%s11614_s27 + $0x1d8] sm:$0xff] %v7570_v3   ;;  %v8417_v14 = vadd.f32 %v12003_v7, %v8139_v35  ;;  %v4872_v32 = vpop.f32.mrb[121].mxu1 }
 0x375   : > { %7649 = vst [vmem:[%s11614_s27 + $0x1d0] sm:$0xff] %v7565_v30   ;;  %v8418_v0 = vadd.f32 %v12005_v22, %v4872_v32  ;;  %v8140_v59 = vpop.f32.mrb[122].mxu1 }
 0x376   : > { %v8419_v21 = vadd.f32 %v12007_v10, %v8140_v59  ;;  %v4875_v23 = vpop.f32.mrb[123].mxu1  ;;  %v5855_v29 = vadd.f32 %v12020_v12, %v8417_v14 }
 0x377   : > { %v8420_v46 = vadd.f32 %v12011_v8, %v4875_v23  ;;  %v5853_v44 = vadd.f32 %v12020_v12, %v8418_v0 }
 0x378   : > { %v5856_v25 = vadd.f32 %v12020_v12, %v8419_v21 }
 0x379   : > { %v5854_v18 = vadd.f32 %v12020_v12, %v8420_v46 }
 0x37a   : > { %v7580_v7 = vpack.c.bf16 %v5856_v25, %v5855_v29 }
 0x37b   : > { %v7575_v56 = vpack.c.bf16 %v5854_v18, %v5853_v44  ;;  %v8143_v9 = vpop.f32.mrb[124].mxu1 }
 0x37c   : > { %7652 = vst [vmem:[%s11614_s27 + $0x1e8] sm:$0xff] %v7580_v7   ;;  %v8421_v22 = vadd.f32 %v12026_v11, %v8143_v9  ;;  %v4888_v10 = vpop.f32.mrb[125].mxu1 }
 0x37d   : > { %7651 = vst [vmem:[%s11614_s27 + $0x1e0] sm:$0xff] %v7575_v56   ;;  %v8422_v8 = vadd.f32 %v12028_v40, %v4888_v10  ;;  %v8144_v52 = vpop.f32.mrb[126].mxu1 }
 0x37e   : > { %v8423_v24 = vadd.f32 %v12030_v19, %v8144_v52  ;;  %v4891_v16 = vpop.f32.mrb[127].mxu1  ;;  %v5859_v6 = vadd.f32 %v12020_v12, %v8421_v22 }
 0x37f   : > { %v8424_v45 = vadd.f32 %v12034_v13, %v4891_v16  ;;  %v5857_v58 = vadd.f32 %v12020_v12, %v8422_v8 }
 0x380   : > { %v5860_v4 = vadd.f32 %v12020_v12, %v8423_v24 }
 0x381   : > { %v5858_v20 = vadd.f32 %v12020_v12, %v8424_v45 }
 0x382   : > { %v7590_v63 = vpack.c.bf16 %v5860_v4, %v5859_v6 }
 0x383   : > { %v7585_v11 = vpack.c.bf16 %v5858_v20, %v5857_v58 }
 0x384   : > { %7654 = vst [vmem:[%s11614_s27 + $0x1f8] sm:$0xff] %v7590_v63  }
 0x385   : > { %7653 = vst [vmem:[%s11614_s27 + $0x1f0] sm:$0xff] %v7585_v11  }
 0x386 PF: > { %s13_s12 = sadd.s32 1, %s8782_s12  }
 0x387   : > { %p10_p4 = scmp.ge.s32.totalorder %s13_s12, 4  }
 0x389   :  { %12 = sbr.rel (!%p10_p4) target bundleno = 1 (0x1), region = 62 }

</bundles_post_ra>
